<compile_context>
chip_gen: v7x
topology: tpu7x:2x2x1
jax: 0.10.0
libtpu: 0.0.40
codegen_flags: <defaults>
</compile_context>

<pallas_src>
import jax
import jax.numpy as jnp
from jax import lax
from jax.experimental import pallas as pl
from jax.experimental.pallas import tpu as pltpu


def _basic_block_kernel(x_ref, w1_ref, b1_ref, w2_ref, b2_ref,
                        out_ref, xpad_ref, midpad_ref):
    """Fused conv3x3 -> +bias -> ReLU -> conv3x3 -> +bias -> +identity -> ReLU.

    Ref shapes (one grid step == one batch element):
      x_ref     : (1, H, W, C)        unpadded input (residual source)
      w1_ref    : (3, C, 3*P)  bf16   conv1 weights, BN1 scale folded,
                                      layout [ky, cin, kx*P + p]
      b1_ref    : (1, P)       f32    folded BN1 bias
      w2_ref    : (3, P, 3*P)  bf16   conv2 weights, BN2 scale folded
      b2_ref    : (1, P)       f32    folded BN2 bias
      out_ref   : (1, H, W, P) f32
      xpad_ref  : (H+2, Wpad, C) f32  VMEM scratch: zero-padded input
      midpad_ref: (H+2, Wpad, P) f32  VMEM scratch: zero-padded relu(bn1(conv1))
    """
    H = out_ref.shape[1]
    W = out_ref.shape[2]
    P = out_ref.shape[3]
    C = x_ref.shape[3]
    Wpad = xpad_ref.shape[1]

    def zero_halo(pad_ref, cdim):
        # 1-px halo ring + right padding columns; interior is fully overwritten
        # every step, so this is all that must be (re)initialized.
        zrow = jnp.zeros((1, Wpad, cdim), jnp.float32)
        zcol = jnp.zeros((H + 2, 1, cdim), jnp.float32)
        zrgt = jnp.zeros((H + 2, Wpad - (W + 1), cdim), jnp.float32)
        pad_ref[0:1, :, :] = zrow
        pad_ref[H + 1:H + 2, :, :] = zrow
        pad_ref[:, 0:1, :] = zcol
        pad_ref[:, W + 1:Wpad, :] = zrgt

    def conv3x3(src_ref, w_ref, cin, cout):
        # Wide-N schedule: per ky, one MXU dot with M=H*Wpad, K=cin, N=3*cout,
        # then accumulate the kx-shifted slices of the result.
        acc = None
        for ky in range(3):
            rows = (src_ref[ky:ky + H, :, :]
                    .reshape(H * Wpad, cin)          # free view: Wpad % 8 == 0
                    .astype(jnp.bfloat16))
            z = jnp.dot(rows, w_ref[ky],             # (H*Wpad, 3*cout) f32 acc
                        preferred_element_type=jnp.float32)
            z = z.reshape(H, Wpad, 3 * cout)
            for kx in range(3):
                part = z[:, kx:kx + W, kx * cout:(kx + 1) * cout]
                acc = part if acc is None else acc + part
        return acc                                    # (H, W, cout) f32

    # ---- stage zero-padded input (pad done in-kernel, not in the wrapper) ----
    zero_halo(xpad_ref, C)
    xpad_ref[1:H + 1, 1:W + 1, :] = x_ref[0]

    # ---------------- conv1 (BN1 scale folded) + bias + ReLU ----------------
    y = jnp.maximum(conv3x3(xpad_ref, w1_ref, C, P) + b1_ref[...], 0.0)

    zero_halo(midpad_ref, P)
    midpad_ref[1:H + 1, 1:W + 1, :] = y

    # -------- conv2 (BN2 scale folded) + bias + residual + ReLU -------------
    acc2 = conv3x3(midpad_ref, w2_ref, P, P)
    z = jnp.maximum(acc2 + b2_ref[...] + x_ref[0], 0.0)   # identity == x
    out_ref[...] = z.reshape(1, H, W, P)


def basic_block_pallas_nhwc(x_nhwc, w1, g1, be1, m1, v1, w2, g2, be2, m2, v2,
                            eps=1e-5):
    """BasicBlock forward on NHWC input (channels on the 128-lane axis)."""
    N, H, W, C = x_nhwc.shape
    P = w1.shape[0]
    assert P == C, "identity residual requires inplanes == planes"
    Wpad = ((W + 2 + 7) // 8) * 8   # pad scratch width to a sublane multiple

    # Fold BN (eval mode) into per-output-channel scale / bias; fold the scale
    # into the conv weights (kernel only adds bias).
    s1 = g1.astype(jnp.float32) / jnp.sqrt(v1.astype(jnp.float32) + eps)
    s2 = g2.astype(jnp.float32) / jnp.sqrt(v2.astype(jnp.float32) + eps)
    b1 = (be1.astype(jnp.float32) - m1.astype(jnp.float32) * s1).reshape(1, P)
    b2 = (be2.astype(jnp.float32) - m2.astype(jnp.float32) * s2).reshape(1, P)

    def pack_w(w, s):
        # OIHW (P, Cin, 3, 3), scale folded -> (ky, Cin, kx*P + p), bf16.
        w = w.astype(jnp.float32) * s[:, None, None, None]
        cin = w.shape[1]
        w = jnp.transpose(w, (2, 1, 3, 0))            # (ky, cin, kx, P)
        return w.reshape(3, cin, 3 * P).astype(jnp.bfloat16)

    w1p = pack_w(w1, s1)
    w2p = pack_w(w2, s2)

    return pl.pallas_call(
        _basic_block_kernel,
        out_shape=jax.ShapeDtypeStruct((N, H, W, P), jnp.float32),
        grid_spec=pltpu.PrefetchScalarGridSpec(
            num_scalar_prefetch=0,
            grid=(N,),
            in_specs=[
                pl.BlockSpec((1, H, W, C), lambda n: (n, 0, 0, 0)),
                pl.BlockSpec((3, C, 3 * P), lambda n: (0, 0, 0)),
                pl.BlockSpec((1, P), lambda n: (0, 0)),
                pl.BlockSpec((3, P, 3 * P), lambda n: (0, 0, 0)),
                pl.BlockSpec((1, P), lambda n: (0, 0)),
            ],
            out_specs=pl.BlockSpec((1, H, W, P), lambda n: (n, 0, 0, 0)),
            scratch_shapes=[
                pltpu.VMEM((H + 2, Wpad, C), jnp.float32),
                pltpu.VMEM((H + 2, Wpad, P), jnp.float32),
            ],
        ),
        compiler_params=pltpu.CompilerParams(
            dimension_semantics=("parallel",),
            vmem_limit_bytes=32 * 1024 * 1024),
    )(x_nhwc.astype(jnp.float32), w1p, b1, w2p, b2)


def basic_block_pallas(x_nchw, w1, g1, be1, m1, v1, w2, g2, be2, m2, v2,
                       eps=1e-5):
    """PyTorch-layout compatibility wrapper: (N, C, H, W) in / out.

    In a full network the NCHW<->NHWC conversions would be hoisted to the
    network boundary; they are kept here only for parity with the module API.
    """
    x_nhwc = jnp.transpose(x_nchw, (0, 2, 3, 1)).astype(jnp.float32)
    out_nhwc = basic_block_pallas_nhwc(x_nhwc, w1, g1, be1, m1, v1,
                                       w2, g2, be2, m2, v2, eps)
    return jnp.transpose(out_nhwc, (0, 3, 1, 2))


def basic_block_ref(x, w1, g1, be1, m1, v1, w2, g2, be2, m2, v2, eps=1e-5):
    """Pure-JAX reference (mirrors the PyTorch forward in eval mode)."""
    dn = ('NCHW', 'OIHW', 'NCHW')

    def bn(y, g, b, m, v):
        return ((y - m[None, :, None, None])
                / jnp.sqrt(v + eps)[None, :, None, None]
                * g[None, :, None, None] + b[None, :, None, None])

    out = lax.conv_general_dilated(x, w1, (1, 1), ((1, 1), (1, 1)),
                                   dimension_numbers=dn)
    out = jnp.maximum(bn(out, g1, be1, m1, v1), 0.0)
    out = lax.conv_general_dilated(out, w2, (1, 1), ((1, 1), (1, 1)),
                                   dimension_numbers=dn)
    out = bn(out, g2, be2, m2, v2)
    out = out + x
    return jnp.maximum(out, 0.0)


if __name__ == "__main__":
    # Shapes consistent with a real BasicBlock (inplanes == planes, stride=1,
    # downsample=None).  C = P = 128 keeps the channel axis exactly one vreg
    # wide so every activation load/store is lane-dense; N=2 gives two parallel
    # grid steps (both v7x TensorCores get work).
    N, C, H, W = 2, 128, 16, 16
    P = C

    key = jax.random.PRNGKey(0)
    keys = jax.random.split(key, 12)

    x = jax.random.normal(keys[0], (N, C, H, W), jnp.float32)

    # Deterministic synthetic parameters (shapes from the module __init__).
    w1 = jax.random.normal(keys[1], (P, C, 3, 3), jnp.float32) * 0.03
    w2 = jax.random.normal(keys[2], (P, P, 3, 3), jnp.float32) * 0.03
    g1 = 1.0 + 0.1 * jax.random.normal(keys[3], (P,), jnp.float32)
    be1 = 0.1 * jax.random.normal(keys[4], (P,), jnp.float32)
    m1 = 0.1 * jax.random.normal(keys[5], (P,), jnp.float32)
    v1 = jax.random.uniform(keys[6], (P,), jnp.float32, 0.5, 1.5)
    g2 = 1.0 + 0.1 * jax.random.normal(keys[7], (P,), jnp.float32)
    be2 = 0.1 * jax.random.normal(keys[8], (P,), jnp.float32)
    m2 = 0.1 * jax.random.normal(keys[9], (P,), jnp.float32)
    v2 = jax.random.uniform(keys[10], (P,), jnp.float32, 0.5, 1.5)

    out = basic_block_pallas(x, w1, g1, be1, m1, v1, w2, g2, be2, m2, v2)
    out = jax.block_until_ready(out)

    ref = basic_block_ref(x, w1, g1, be1, m1, v1, w2, g2, be2, m2, v2)
    assert out.shape == (N, P, H, W)
    max_err = float(jnp.max(jnp.abs(out - ref)))
    # bf16 MXU operands (f32 accumulate) intentionally relax numerics vs the
    # pure-f32 PyTorch module; tolerance widened accordingly.
    assert jnp.allclose(out, ref, atol=5e-2, rtol=5e-2), max_err

    print("KERNEL_OK")
</pallas_src>

<mosaic_0001>
module attributes {stable_mosaic.version = 11 : i64} {
  func.func @_basic_block_kernel(%arg0: i32, %arg1: memref<1x16x16x128xf32, #tpu.memory_space<vmem>>, %arg2: memref<3x128x384xbf16, #tpu.memory_space<vmem>>, %arg3: memref<1x128xf32, #tpu.memory_space<vmem>>, %arg4: memref<3x128x384xbf16, #tpu.memory_space<vmem>>, %arg5: memref<1x128xf32, #tpu.memory_space<vmem>>, %arg6: memref<1x16x16x128xf32, #tpu.memory_space<vmem>>, %arg7: memref<18x24x128xf32, #tpu.memory_space<vmem>>, %arg8: memref<18x24x128xf32, #tpu.memory_space<vmem>>) attributes {dimension_semantics = [#tpu.dimension_semantics<parallel>], iteration_bounds = array<i64: 2>, scalar_prefetch = 0 : i64, scratch_operands = 2 : i64, tpu.core_type = #tpu.core_type<tc>, window_params = [{transform_indices = @transform_0, window_bounds = array<i64: 1, 16, 16, 128>}, {pipeline_mode = #tpu.pipeline_mode<synchronous>, transform_indices = @transform_1, window_bounds = array<i64: 3, 128, 384>}, {pipeline_mode = #tpu.pipeline_mode<synchronous>, transform_indices = @transform_2, window_bounds = array<i64: 1, 128>}, {pipeline_mode = #tpu.pipeline_mode<synchronous>, transform_indices = @transform_3, window_bounds = array<i64: 3, 128, 384>}, {pipeline_mode = #tpu.pipeline_mode<synchronous>, transform_indices = @transform_4, window_bounds = array<i64: 1, 128>}, {transform_indices = @transform_5, window_bounds = array<i64: 1, 16, 16, 128>}]} {
    %cst = arith.constant 0.000000e+00 : f32
    %0 = vector.broadcast %cst : f32 to vector<1x24x128xf32>
    %cst_0 = arith.constant 0.000000e+00 : f32
    %1 = vector.broadcast %cst_0 : f32 to vector<18x1x128xf32>
    %cst_1 = arith.constant 0.000000e+00 : f32
    %2 = vector.broadcast %cst_1 : f32 to vector<18x7x128xf32>
    %c0 = arith.constant 0 : index
    %c0_2 = arith.constant 0 : index
    %c0_3 = arith.constant 0 : index
    %3 = vector.load %arg7[%c0, %c0_2, %c0_3] : memref<18x24x128xf32, #tpu.memory_space<vmem>>, vector<1x24x128xf32>
    tpu.vector_store %arg7[%c0, %c0_2, %c0_3], %0 {strides = array<i32>} : memref<18x24x128xf32, #tpu.memory_space<vmem>>, vector<1x24x128xf32>,
    %c17 = arith.constant 17 : index
    %c0_4 = arith.constant 0 : index
    %c0_5 = arith.constant 0 : index
    %4 = vector.load %arg7[%c17, %c0_4, %c0_5] : memref<18x24x128xf32, #tpu.memory_space<vmem>>, vector<1x24x128xf32>
    tpu.vector_store %arg7[%c17, %c0_4, %c0_5], %0 {strides = array<i32>} : memref<18x24x128xf32, #tpu.memory_space<vmem>>, vector<1x24x128xf32>,
    %c0_6 = arith.constant 0 : index
    %c0_7 = arith.constant 0 : index
    %c0_8 = arith.constant 0 : index
    %5 = vector.load %arg7[%c0_6, %c0_7, %c0_8] : memref<18x24x128xf32, #tpu.memory_space<vmem>>, vector<18x1x128xf32>
    tpu.vector_store %arg7[%c0_6, %c0_7, %c0_8], %1 {strides = array<i32>} : memref<18x24x128xf32, #tpu.memory_space<vmem>>, vector<18x1x128xf32>,
    %c0_9 = arith.constant 0 : index
    %c17_10 = arith.constant 17 : index
    %c0_11 = arith.constant 0 : index
    %6 = vector.load %arg7[%c0_9, %c17_10, %c0_11] : memref<18x24x128xf32, #tpu.memory_space<vmem>>, vector<18x7x128xf32>
    tpu.vector_store %arg7[%c0_9, %c17_10, %c0_11], %2 {strides = array<i32>} : memref<18x24x128xf32, #tpu.memory_space<vmem>>, vector<18x7x128xf32>,
    %c0_12 = arith.constant 0 : index
    %c0_13 = arith.constant 0 : index
    %c0_14 = arith.constant 0 : index
    %c0_15 = arith.constant 0 : index
    %7 = vector.load %arg1[%c0_12, %c0_13, %c0_14, %c0_15] : memref<1x16x16x128xf32, #tpu.memory_space<vmem>>, vector<1x16x16x128xf32>
    %8 = vector.shape_cast %7 : vector<1x16x16x128xf32> to vector<16x16x128xf32>
    %c1 = arith.constant 1 : index
    %c1_16 = arith.constant 1 : index
    %c0_17 = arith.constant 0 : index
    %9 = vector.load %arg7[%c1, %c1_16, %c0_17] : memref<18x24x128xf32, #tpu.memory_space<vmem>>, vector<16x16x128xf32>
    tpu.vector_store %arg7[%c1, %c1_16, %c0_17], %8 {strides = array<i32>} : memref<18x24x128xf32, #tpu.memory_space<vmem>>, vector<16x16x128xf32>,
    %c0_18 = arith.constant 0 : index
    %c0_19 = arith.constant 0 : index
    %c0_20 = arith.constant 0 : index
    %10 = vector.load %arg7[%c0_18, %c0_19, %c0_20] : memref<18x24x128xf32, #tpu.memory_space<vmem>>, vector<16x24x128xf32>
    %11 = vector.shape_cast %10 : vector<16x24x128xf32> to vector<384x128xf32>
    %12 = arith.truncf %11 : vector<384x128xf32> to vector<384x128xbf16>
    %c0_21 = arith.constant 0 : index
    %c0_22 = arith.constant 0 : index
    %c0_23 = arith.constant 0 : index
    %13 = vector.load %arg2[%c0_21, %c0_22, %c0_23] : memref<3x128x384xbf16, #tpu.memory_space<vmem>>, vector<1x128x384xbf16>
    %14 = vector.shape_cast %13 : vector<1x128x384xbf16> to vector<128x384xbf16>
    %cst_24 = arith.constant dense<0.000000e+00> : vector<384x384xf32>
    %15 = tpu.matmul %12, %14, %cst_24 {dimension_numbers = #tpu.dot_dimension_numbers<[1], [0], [0], [1], [0, 0, 1, 1], [], []>} : vector<384x128xbf16>, vector<128x384xbf16>, vector<384x384xf32> -> vector<384x384xf32>
    %16 = vector.shape_cast %15 : vector<384x384xf32> to vector<16x24x384xf32>
    %17 = vector.extract_strided_slice %16 {offsets = [0, 0, 0], sizes = [16, 16, 128], strides = [1, 1, 1]} : vector<16x24x384xf32> to vector<16x16x128xf32>
    %18 = vector.extract_strided_slice %16 {offsets = [0, 1, 128], sizes = [16, 16, 128], strides = [1, 1, 1]} : vector<16x24x384xf32> to vector<16x16x128xf32>
    %19 = arith.addf %17, %18 : vector<16x16x128xf32>
    %20 = vector.extract_strided_slice %16 {offsets = [0, 2, 256], sizes = [16, 16, 128], strides = [1, 1, 1]} : vector<16x24x384xf32> to vector<16x16x128xf32>
    %21 = arith.addf %19, %20 : vector<16x16x128xf32>
    %c1_25 = arith.constant 1 : index
    %c0_26 = arith.constant 0 : index
    %c0_27 = arith.constant 0 : index
    %22 = vector.load %arg7[%c1_25, %c0_26, %c0_27] : memref<18x24x128xf32, #tpu.memory_space<vmem>>, vector<16x24x128xf32>
    %23 = vector.shape_cast %22 : vector<16x24x128xf32> to vector<384x128xf32>
    %24 = arith.truncf %23 : vector<384x128xf32> to vector<384x128xbf16>
    %c1_28 = arith.constant 1 : index
    %c0_29 = arith.constant 0 : index
    %c0_30 = arith.constant 0 : index
    %25 = vector.load %arg2[%c1_28, %c0_29, %c0_30] : memref<3x128x384xbf16, #tpu.memory_space<vmem>>, vector<1x128x384xbf16>
    %26 = vector.shape_cast %25 : vector<1x128x384xbf16> to vector<128x384xbf16>
    %cst_31 = arith.constant dense<0.000000e+00> : vector<384x384xf32>
    %27 = tpu.matmul %24, %26, %cst_31 {dimension_numbers = #tpu.dot_dimension_numbers<[1], [0], [0], [1], [0, 0, 1, 1], [], []>} : vector<384x128xbf16>, vector<128x384xbf16>, vector<384x384xf32> -> vector<384x384xf32>
    %28 = vector.shape_cast %27 : vector<384x384xf32> to vector<16x24x384xf32>
    %29 = vector.extract_strided_slice %28 {offsets = [0, 0, 0], sizes = [16, 16, 128], strides = [1, 1, 1]} : vector<16x24x384xf32> to vector<16x16x128xf32>
    %30 = arith.addf %21, %29 : vector<16x16x128xf32>
    %31 = vector.extract_strided_slice %28 {offsets = [0, 1, 128], sizes = [16, 16, 128], strides = [1, 1, 1]} : vector<16x24x384xf32> to vector<16x16x128xf32>
    %32 = arith.addf %30, %31 : vector<16x16x128xf32>
    %33 = vector.extract_strided_slice %28 {offsets = [0, 2, 256], sizes = [16, 16, 128], strides = [1, 1, 1]} : vector<16x24x384xf32> to vector<16x16x128xf32>
    %34 = arith.addf %32, %33 : vector<16x16x128xf32>
    %c2 = arith.constant 2 : index
    %c0_32 = arith.constant 0 : index
    %c0_33 = arith.constant 0 : index
    %35 = vector.load %arg7[%c2, %c0_32, %c0_33] : memref<18x24x128xf32, #tpu.memory_space<vmem>>, vector<16x24x128xf32>
    %36 = vector.shape_cast %35 : vector<16x24x128xf32> to vector<384x128xf32>
    %37 = arith.truncf %36 : vector<384x128xf32> to vector<384x128xbf16>
    %c2_34 = arith.constant 2 : index
    %c0_35 = arith.constant 0 : index
    %c0_36 = arith.constant 0 : index
    %38 = vector.load %arg2[%c2_34, %c0_35, %c0_36] : memref<3x128x384xbf16, #tpu.memory_space<vmem>>, vector<1x128x384xbf16>
    %39 = vector.shape_cast %38 : vector<1x128x384xbf16> to vector<128x384xbf16>
    %cst_37 = arith.constant dense<0.000000e+00> : vector<384x384xf32>
    %40 = tpu.matmul %37, %39, %cst_37 {dimension_numbers = #tpu.dot_dimension_numbers<[1], [0], [0], [1], [0, 0, 1, 1], [], []>} : vector<384x128xbf16>, vector<128x384xbf16>, vector<384x384xf32> -> vector<384x384xf32>
    %41 = vector.shape_cast %40 : vector<384x384xf32> to vector<16x24x384xf32>
    %42 = vector.extract_strided_slice %41 {offsets = [0, 0, 0], sizes = [16, 16, 128], strides = [1, 1, 1]} : vector<16x24x384xf32> to vector<16x16x128xf32>
    %43 = arith.addf %34, %42 : vector<16x16x128xf32>
    %44 = vector.extract_strided_slice %41 {offsets = [0, 1, 128], sizes = [16, 16, 128], strides = [1, 1, 1]} : vector<16x24x384xf32> to vector<16x16x128xf32>
    %45 = arith.addf %43, %44 : vector<16x16x128xf32>
    %46 = vector.extract_strided_slice %41 {offsets = [0, 2, 256], sizes = [16, 16, 128], strides = [1, 1, 1]} : vector<16x24x384xf32> to vector<16x16x128xf32>
    %47 = arith.addf %45, %46 : vector<16x16x128xf32>
    %c0_38 = arith.constant 0 : index
    %c0_39 = arith.constant 0 : index
    %48 = vector.load %arg3[%c0_38, %c0_39] : memref<1x128xf32, #tpu.memory_space<vmem>>, vector<1x128xf32>
    %49 = vector.shape_cast %48 : vector<1x128xf32> to vector<1x1x128xf32>
    %50 = vector.broadcast %49 : vector<1x1x128xf32> to vector<16x16x128xf32>
    %51 = arith.addf %47, %50 : vector<16x16x128xf32>
    %cst_40 = arith.constant 0.000000e+00 : f32
    %52 = vector.broadcast %cst_40 : f32 to vector<16x16x128xf32>
    %53 = arith.maximumf %51, %52 : vector<16x16x128xf32>
    %cst_41 = arith.constant 0.000000e+00 : f32
    %54 = vector.broadcast %cst_41 : f32 to vector<1x24x128xf32>
    %cst_42 = arith.constant 0.000000e+00 : f32
    %55 = vector.broadcast %cst_42 : f32 to vector<18x1x128xf32>
    %cst_43 = arith.constant 0.000000e+00 : f32
    %56 = vector.broadcast %cst_43 : f32 to vector<18x7x128xf32>
    %c0_44 = arith.constant 0 : index
    %c0_45 = arith.constant 0 : index
    %c0_46 = arith.constant 0 : index
    %57 = vector.load %arg8[%c0_44, %c0_45, %c0_46] : memref<18x24x128xf32, #tpu.memory_space<vmem>>, vector<1x24x128xf32>
    tpu.vector_store %arg8[%c0_44, %c0_45, %c0_46], %54 {strides = array<i32>} : memref<18x24x128xf32, #tpu.memory_space<vmem>>, vector<1x24x128xf32>,
    %c17_47 = arith.constant 17 : index
    %c0_48 = arith.constant 0 : index
    %c0_49 = arith.constant 0 : index
    %58 = vector.load %arg8[%c17_47, %c0_48, %c0_49] : memref<18x24x128xf32, #tpu.memory_space<vmem>>, vector<1x24x128xf32>
    tpu.vector_store %arg8[%c17_47, %c0_48, %c0_49], %54 {strides = array<i32>} : memref<18x24x128xf32, #tpu.memory_space<vmem>>, vector<1x24x128xf32>,
    %c0_50 = arith.constant 0 : index
    %c0_51 = arith.constant 0 : index
    %c0_52 = arith.constant 0 : index
    %59 = vector.load %arg8[%c0_50, %c0_51, %c0_52] : memref<18x24x128xf32, #tpu.memory_space<vmem>>, vector<18x1x128xf32>
    tpu.vector_store %arg8[%c0_50, %c0_51, %c0_52], %55 {strides = array<i32>} : memref<18x24x128xf32, #tpu.memory_space<vmem>>, vector<18x1x128xf32>,
    %c0_53 = arith.constant 0 : index
    %c17_54 = arith.constant 17 : index
    %c0_55 = arith.constant 0 : index
    %60 = vector.load %arg8[%c0_53, %c17_54, %c0_55] : memref<18x24x128xf32, #tpu.memory_space<vmem>>, vector<18x7x128xf32>
    tpu.vector_store %arg8[%c0_53, %c17_54, %c0_55], %56 {strides = array<i32>} : memref<18x24x128xf32, #tpu.memory_space<vmem>>, vector<18x7x128xf32>,
    %c1_56 = arith.constant 1 : index
    %c1_57 = arith.constant 1 : index
    %c0_58 = arith.constant 0 : index
    %61 = vector.load %arg8[%c1_56, %c1_57, %c0_58] : memref<18x24x128xf32, #tpu.memory_space<vmem>>, vector<16x16x128xf32>
    tpu.vector_store %arg8[%c1_56, %c1_57, %c0_58], %53 {strides = array<i32>} : memref<18x24x128xf32, #tpu.memory_space<vmem>>, vector<16x16x128xf32>,
    %c0_59 = arith.constant 0 : index
    %c0_60 = arith.constant 0 : index
    %c0_61 = arith.constant 0 : index
    %62 = vector.load %arg8[%c0_59, %c0_60, %c0_61] : memref<18x24x128xf32, #tpu.memory_space<vmem>>, vector<16x24x128xf32>
    %63 = vector.shape_cast %62 : vector<16x24x128xf32> to vector<384x128xf32>
    %64 = arith.truncf %63 : vector<384x128xf32> to vector<384x128xbf16>
    %c0_62 = arith.constant 0 : index
    %c0_63 = arith.constant 0 : index
    %c0_64 = arith.constant 0 : index
    %65 = vector.load %arg4[%c0_62, %c0_63, %c0_64] : memref<3x128x384xbf16, #tpu.memory_space<vmem>>, vector<1x128x384xbf16>
    %66 = vector.shape_cast %65 : vector<1x128x384xbf16> to vector<128x384xbf16>
    %cst_65 = arith.constant dense<0.000000e+00> : vector<384x384xf32>
    %67 = tpu.matmul %64, %66, %cst_65 {dimension_numbers = #tpu.dot_dimension_numbers<[1], [0], [0], [1], [0, 0, 1, 1], [], []>} : vector<384x128xbf16>, vector<128x384xbf16>, vector<384x384xf32> -> vector<384x384xf32>
    %68 = vector.shape_cast %67 : vector<384x384xf32> to vector<16x24x384xf32>
    %69 = vector.extract_strided_slice %68 {offsets = [0, 0, 0], sizes = [16, 16, 128], strides = [1, 1, 1]} : vector<16x24x384xf32> to vector<16x16x128xf32>
    %70 = vector.extract_strided_slice %68 {offsets = [0, 1, 128], sizes = [16, 16, 128], strides = [1, 1, 1]} : vector<16x24x384xf32> to vector<16x16x128xf32>
    %71 = arith.addf %69, %70 : vector<16x16x128xf32>
    %72 = vector.extract_strided_slice %68 {offsets = [0, 2, 256], sizes = [16, 16, 128], strides = [1, 1, 1]} : vector<16x24x384xf32> to vector<16x16x128xf32>
    %73 = arith.addf %71, %72 : vector<16x16x128xf32>
    %c1_66 = arith.constant 1 : index
    %c0_67 = arith.constant 0 : index
    %c0_68 = arith.constant 0 : index
    %74 = vector.load %arg8[%c1_66, %c0_67, %c0_68] : memref<18x24x128xf32, #tpu.memory_space<vmem>>, vector<16x24x128xf32>
    %75 = vector.shape_cast %74 : vector<16x24x128xf32> to vector<384x128xf32>
    %76 = arith.truncf %75 : vector<384x128xf32> to vector<384x128xbf16>
    %c1_69 = arith.constant 1 : index
    %c0_70 = arith.constant 0 : index
    %c0_71 = arith.constant 0 : index
    %77 = vector.load %arg4[%c1_69, %c0_70, %c0_71] : memref<3x128x384xbf16, #tpu.memory_space<vmem>>, vector<1x128x384xbf16>
    %78 = vector.shape_cast %77 : vector<1x128x384xbf16> to vector<128x384xbf16>
    %cst_72 = arith.constant dense<0.000000e+00> : vector<384x384xf32>
    %79 = tpu.matmul %76, %78, %cst_72 {dimension_numbers = #tpu.dot_dimension_numbers<[1], [0], [0], [1], [0, 0, 1, 1], [], []>} : vector<384x128xbf16>, vector<128x384xbf16>, vector<384x384xf32> -> vector<384x384xf32>
    %80 = vector.shape_cast %79 : vector<384x384xf32> to vector<16x24x384xf32>
    %81 = vector.extract_strided_slice %80 {offsets = [0, 0, 0], sizes = [16, 16, 128], strides = [1, 1, 1]} : vector<16x24x384xf32> to vector<16x16x128xf32>
    %82 = arith.addf %73, %81 : vector<16x16x128xf32>
    %83 = vector.extract_strided_slice %80 {offsets = [0, 1, 128], sizes = [16, 16, 128], strides = [1, 1, 1]} : vector<16x24x384xf32> to vector<16x16x128xf32>
    %84 = arith.addf %82, %83 : vector<16x16x128xf32>
    %85 = vector.extract_strided_slice %80 {offsets = [0, 2, 256], sizes = [16, 16, 128], strides = [1, 1, 1]} : vector<16x24x384xf32> to vector<16x16x128xf32>
    %86 = arith.addf %84, %85 : vector<16x16x128xf32>
    %c2_73 = arith.constant 2 : index
    %c0_74 = arith.constant 0 : index
    %c0_75 = arith.constant 0 : index
    %87 = vector.load %arg8[%c2_73, %c0_74, %c0_75] : memref<18x24x128xf32, #tpu.memory_space<vmem>>, vector<16x24x128xf32>
    %88 = vector.shape_cast %87 : vector<16x24x128xf32> to vector<384x128xf32>
    %89 = arith.truncf %88 : vector<384x128xf32> to vector<384x128xbf16>
    %c2_76 = arith.constant 2 : index
    %c0_77 = arith.constant 0 : index
    %c0_78 = arith.constant 0 : index
    %90 = vector.load %arg4[%c2_76, %c0_77, %c0_78] : memref<3x128x384xbf16, #tpu.memory_space<vmem>>, vector<1x128x384xbf16>
    %91 = vector.shape_cast %90 : vector<1x128x384xbf16> to vector<128x384xbf16>
    %cst_79 = arith.constant dense<0.000000e+00> : vector<384x384xf32>
    %92 = tpu.matmul %89, %91, %cst_79 {dimension_numbers = #tpu.dot_dimension_numbers<[1], [0], [0], [1], [0, 0, 1, 1], [], []>} : vector<384x128xbf16>, vector<128x384xbf16>, vector<384x384xf32> -> vector<384x384xf32>
    %93 = vector.shape_cast %92 : vector<384x384xf32> to vector<16x24x384xf32>
    %94 = vector.extract_strided_slice %93 {offsets = [0, 0, 0], sizes = [16, 16, 128], strides = [1, 1, 1]} : vector<16x24x384xf32> to vector<16x16x128xf32>
    %95 = arith.addf %86, %94 : vector<16x16x128xf32>
    %96 = vector.extract_strided_slice %93 {offsets = [0, 1, 128], sizes = [16, 16, 128], strides = [1, 1, 1]} : vector<16x24x384xf32> to vector<16x16x128xf32>
    %97 = arith.addf %95, %96 : vector<16x16x128xf32>
    %98 = vector.extract_strided_slice %93 {offsets = [0, 2, 256], sizes = [16, 16, 128], strides = [1, 1, 1]} : vector<16x24x384xf32> to vector<16x16x128xf32>
    %99 = arith.addf %97, %98 : vector<16x16x128xf32>
    %c0_80 = arith.constant 0 : index
    %c0_81 = arith.constant 0 : index
    %100 = vector.load %arg5[%c0_80, %c0_81] : memref<1x128xf32, #tpu.memory_space<vmem>>, vector<1x128xf32>
    %101 = vector.shape_cast %100 : vector<1x128xf32> to vector<1x1x128xf32>
    %102 = vector.broadcast %101 : vector<1x1x128xf32> to vector<16x16x128xf32>
    %103 = arith.addf %99, %102 : vector<16x16x128xf32>
    %c0_82 = arith.constant 0 : index
    %c0_83 = arith.constant 0 : index
    %c0_84 = arith.constant 0 : index
    %c0_85 = arith.constant 0 : index
    %104 = vector.load %arg1[%c0_82, %c0_83, %c0_84, %c0_85] : memref<1x16x16x128xf32, #tpu.memory_space<vmem>>, vector<1x16x16x128xf32>
    %105 = vector.shape_cast %104 : vector<1x16x16x128xf32> to vector<16x16x128xf32>
    %106 = arith.addf %103, %105 : vector<16x16x128xf32>
    %cst_86 = arith.constant 0.000000e+00 : f32
    %107 = vector.broadcast %cst_86 : f32 to vector<16x16x128xf32>
    %108 = arith.maximumf %106, %107 : vector<16x16x128xf32>
    %109 = vector.shape_cast %108 : vector<16x16x128xf32> to vector<1x16x16x128xf32>
    %c0_87 = arith.constant 0 : index
    %c0_88 = arith.constant 0 : index
    %c0_89 = arith.constant 0 : index
    %c0_90 = arith.constant 0 : index
    %110 = vector.load %arg6[%c0_87, %c0_88, %c0_89, %c0_90] : memref<1x16x16x128xf32, #tpu.memory_space<vmem>>, vector<1x16x16x128xf32>
    tpu.vector_store %arg6[%c0_87, %c0_88, %c0_89, %c0_90], %109 {strides = array<i32>} : memref<1x16x16x128xf32, #tpu.memory_space<vmem>>, vector<1x16x16x128xf32>,
    return
  }
  func.func @transform_0(%arg0: i32) -> (i32, i32, i32, i32) {
    %c0_i32 = arith.constant 0 : i32
    %c0_i32_0 = arith.constant 0 : i32
    %c0_i32_1 = arith.constant 0 : i32
    %c0_i32_2 = arith.constant 0 : i32
    return %arg0, %c0_i32, %c0_i32_0, %c0_i32_1 : i32, i32, i32, i32
  }
  func.func @transform_1(%arg0: i32) -> (i32, i32, i32) {
    %c0_i32 = arith.constant 0 : i32
    %c0_i32_0 = arith.constant 0 : i32
    %c0_i32_1 = arith.constant 0 : i32
    %c0_i32_2 = arith.constant 0 : i32
    return %c0_i32, %c0_i32_0, %c0_i32_1 : i32, i32, i32
  }
  func.func @transform_2(%arg0: i32) -> (i32, i32) {
    %c0_i32 = arith.constant 0 : i32
    %c0_i32_0 = arith.constant 0 : i32
    %c0_i32_1 = arith.constant 0 : i32
    return %c0_i32, %c0_i32_0 : i32, i32
  }
  func.func @transform_3(%arg0: i32) -> (i32, i32, i32) {
    %c0_i32 = arith.constant 0 : i32
    %c0_i32_0 = arith.constant 0 : i32
    %c0_i32_1 = arith.constant 0 : i32
    %c0_i32_2 = arith.constant 0 : i32
    return %c0_i32, %c0_i32_0, %c0_i32_1 : i32, i32, i32
  }
  func.func @transform_4(%arg0: i32) -> (i32, i32) {
    %c0_i32 = arith.constant 0 : i32
    %c0_i32_0 = arith.constant 0 : i32
    %c0_i32_1 = arith.constant 0 : i32
    return %c0_i32, %c0_i32_0 : i32, i32
  }
  func.func @transform_5(%arg0: i32) -> (i32, i32, i32, i32) {
    %c0_i32 = arith.constant 0 : i32
    %c0_i32_0 = arith.constant 0 : i32
    %c0_i32_1 = arith.constant 0 : i32
    %c0_i32_2 = arith.constant 0 : i32
    return %arg0, %c0_i32, %c0_i32_0, %c0_i32_1 : i32, i32, i32, i32
  }
}

</mosaic_0001>

<bundles_post_ra>
// kernel: tpu_custom_call.1
= control target key start
LH: loop header
LB: loop body
LE: loop exit
PB: predicated region body
PF: predicated region fallthrough
CT: control target
= control target key end

     0   :  { %10 = vsyncpa [#allocation5], 0  ;;  %s11116_s0 = inlined_call_operand.hbm [shape: f32[2,16,16,128], index: 0, kind: input, shape index: {}]   ;;  %s11117_s1 = inlined_call_operand.hbm [shape: bf16[3,128,384], index: 1, kind: input, shape index: {}]   ;;  %s11118_s2 = inlined_call_operand.vmem [shape: f32[1,128], index: 2, kind: input, shape index: {}]   ;;  %s11119_s3 = inlined_call_operand.hbm [shape: bf16[3,128,384], index: 3, kind: input, shape index: {}]   ;;  %s11120_s4 = inlined_call_operand.vmem [shape: f32[1,128], index: 4, kind: input, shape index: {}]   ;;  %s11121_s5 = inlined_call_operand.hbm [shape: f32[2,16,16,128], index: 5, kind: output, shape index: {}]  }
   0x1   :  { %12 = vsyncpa [#allocation5 + $0x1], 0 }
   0x2   :  { %13 = vsyncpa [#allocation8], 0 }
   0x3   :  { %14 = vsyncpa [#allocation6], 0 }
   0x4   :  { %16 = vsyncpa [#allocation6 + $0x1], 0  ;;  %s8744_s18 = smov 0   ;;  %s8746_s19 = smov 0  }
   0x5   :  { %s8748_s20 = smov 0   ;;  %s8750_s21 = smov 0  }
   0x6 LB: > { %s8765_s22 = sadd.s32 4294967295, %s8700_s21   ;;  %s7525_s23 = sadd.s32 4294967294, %s8700_s21   ;;  %s8700_s21 = sphi %s8750_s21, %s11196_s21   ;;  %s8696_s20 = sphi %s8748_s20, %s11195_s20   ;;  %s8692_s19 = sphi %s8746_s19, %s11194_s19   ;;  %s8688_s18 = sphi %s8744_s18, %s11193_s18  }
   0x7   : > { %p42_p0 = scmp.ne.s32.totalorder %s8692_s19, %s8688_s18  ;;  %p11122_p1 = scmp.eq.s32.totalorder %s8765_s22, 0 }
   0x8   : > { %p156_p3 = scmp.eq.s32.totalorder %s7525_s23, 1  ;;  %p7526_p5 = scmp.ge.s32.totalorder %s8700_s21, 1 }
   0x9   : > { %p8774_p4 = por %p11122_p1, %p42_p0  ;;  %p163_p7 = scmp.lt.s32.totalorder %s8700_s21, 3 }
   0xa   : > { %p8779_p6 = por %p156_p3, %p42_p0  ;;  %s8702_s27 = smov [#allocation7]  }
   0xb   : > { %s11138_s24 = scalar_select %p8774_p4, 1, 0 }
   0xc   : > { %s11139_s25 = scalar_select %p8779_p6, 1, 0 }
   0xd   : > { %p8784_p8 = pnand %p7526_p5, %p163_p7  ;;  %s175_s28 = sshll.u32 %s8702_s27, 4  ;;  %s8788_s28 = int_to_ptr.vmem [resolvable:$true] %s175_s28 }
   0xe   : > { %s8703_s30 = smov [#allocation9]   ;;  %s8544_s9 = scalar_lea.hbm %s11117_s1, 9216 }
   0xf   : > { %p8279_p9 = pneg %p8784_p8  ;;  %s191_s6 = sshll.u32 %s8703_s30, 4  ;;  %s8799_s6 = int_to_ptr.vmem [resolvable:$true] %s191_s6 }
  0x10   : > { %p8545_p12 = scmp.ne.s32.totalorder %s11117_s1, %s8544_s9  ;;  %p8551_p5 = scmp.lt.u32.totalorder %s8544_s9, %s11117_s1 }
  0x11   : > { %p8795_p11 = pnand %p8279_p9, %p11122_p1 }
  0x13   : > { %p8546_p13 = pneg %p8795_p11 }
  0x15   : > { %p8547_p0 = pnand %p8546_p13, %p8545_p12 }
  0x17   : > { %p8548_p3 = pneg %p8547_p0 }
  0x19   : > { %p8553_p7 = pnand %p8551_p5, %p8548_p3 }
  0x1b   : > { %8556 = shalt.err (!%p8553_p7)
}
  0x1c   : > { %s8557_s14 = scalar_lea.vmem %s8788_s28, 9216  ;;  %p8565_p2 = scmp.lt.s32.totalorder %s8788_s28, %s8788_s28 }
  0x1d   : > { %p8558_p9 = scmp.ne.s32.totalorder %s8788_s28, %s8557_s14  ;;  %p8566_p12 = scmp.lt.s32.totalorder %s8557_s14, %s8557_s14 }
  0x1f   : > { %p8560_p10 = pnand %p8558_p9, %p8546_p13  ;;  %p8567_p0 = por %p8566_p12, %p8565_p2 }
  0x21   : > { %p8561_p1 = pneg %p8560_p10 }
  0x23   : > { %p8568_p6 = pnand %p8567_p0, %p8561_p1 }
  0x25   : > { %8571 = shalt.err (!%p8568_p6)
}
  0x26   : > { %s8704_s15 = smov 192   ;;  %s8705_s16 = smov 12  }
  0x27   : > { %8282 = dma.hbm_to_vmem [thread:$0]  (!%p8795_p11), %s11117_s1, 9216, %s8788_s28, [#allocation8], %s8704_s15, %s8704_s15, %s8705_s16  }
  0x28   : > { %s8572_s7 = scalar_lea.hbm %s11119_s3, 9216 }
  0x29   : > { %p8573_p2 = scmp.ne.s32.totalorder %s11119_s3, %s8572_s7  ;;  %p8579_p10 = scmp.lt.u32.totalorder %s8572_s7, %s11119_s3 }
  0x2b   : > { %p8575_p1 = pnand %p8573_p2, %p8546_p13 }
  0x2d   : > { %p8576_p6 = pneg %p8575_p1 }
  0x2f   : > { %p8581_p3 = pnand %p8579_p10, %p8576_p6 }
  0x31   : > { %8584 = shalt.err (!%p8581_p3)
}
  0x32   : > { %s8585_s28 = scalar_lea.vmem %s8799_s6, 9216  ;;  %p8593_p12 = scmp.lt.s32.totalorder %s8799_s6, %s8799_s6 }
  0x33   : > { %p8586_p5 = scmp.ne.s32.totalorder %s8799_s6, %s8585_s28  ;;  %p8594_p0 = scmp.lt.s32.totalorder %s8585_s28, %s8585_s28 }
  0x35   : > { %p8588_p7 = pnand %p8586_p5, %p8546_p13  ;;  %p8595_p2 = por %p8594_p0, %p8593_p12 }
  0x37   : > { %p8589_p9 = pneg %p8588_p7 }
  0x39   : > { %p8596_p1 = pnand %p8595_p2, %p8589_p9 }
  0x3b   : > { %8599 = shalt.err (!%p8596_p1)
}
  0x3c   : > { %8285 = dma.hbm_to_vmem [thread:$0]  (!%p8795_p11), %s11119_s3, 9216, %s8799_s6, [#allocation8], %s8704_s15, %s8704_s15, %s8705_s16  }
  0x3d   : > { %s8854_s14 = sadd.s32 1, %s8700_s21   ;;  %s29_s29 = sadd.s32 1, %s8696_s20 }
  0x3e   : > { %s26_s17 = ssub.s32 %s8700_s21, %s8854_s14  ;;  %p36_p13 = scmp.ne.s32.totalorder %s8696_s20, %s8692_s19 }
  0x3f   : > { %p27_p6 = scmp.eq.s32.totalorder %s26_s17, 0  ;;  %p37_p10 = scmp.eq.s32.totalorder %s8700_s21, 0 }
  0x40   : > { %p11142_p3 = scmp.eq.s32.totalorder %s8765_s22, 1  ;;  %p8296_p7 = scmp.lt.s32.totalorder %s8700_s21, 2 }
  0x41   : > { %s8870_s27 = scalar_select %p27_p6, %s8696_s20, %s29_s29  }
  0x42   : > { %p8864_p5 = por %p11142_p3, %p36_p13  ;;  %p38_p9 = por %p37_p10, %p36_p13 }
  0x43   : > { %s208_s30 = sand.u32 1, %s8696_s20   ;;  %s7689_s6 = sshll.u32 %s8700_s21, 12 }
  0x44   : > { %s11143_s23 = scalar_select %p8864_p5, 1, 0 }
  0x45   : > { %s7530_s7 = sshll.u32 %s208_s30, 8  ;;  %s8877_s8 = scalar_lea.hbm %s11116_s0, %s7689_s6 }
  0x46   : > { %s212_s9 = scalar_lea.vmem [#allocation4], %s7530_s7  ;;  %p8881_p11 = pnand %p8296_p7, %p38_p9 }
  0x47   : > { %s219_s10 = sshll.u32 %s212_s9, 4  ;;  %s8885_s28 = scalar_lea.sflag [#allocation5], %s208_s30  ;;  %s8879_s10 = int_to_ptr.vmem [resolvable:$true] %s219_s10 }
  0x48   : > { %s8600_s12 = scalar_lea.hbm %s8877_s8, 4096  ;;  %p8602_p0 = pneg %p8881_p11 }
  0x49   : > { %p8601_p12 = scmp.ne.s32.totalorder %s8877_s8, %s8600_s12  ;;  %s8605_s17 = scalar_lea.hbm %s11116_s0, 8192 }
  0x4a   : > { %p8606_p13 = scmp.lt.u32.totalorder %s8877_s8, %s11116_s0  ;;  %p8607_p6 = scmp.lt.u32.totalorder %s8605_s17, %s8600_s12 }
  0x4b   : > { %p8603_p2 = pnand %p8602_p0, %p8601_p12  ;;  %p8609_p3 = scmp.lt.u32.totalorder %s8600_s12, %s8877_s8 }
  0x4c   : > { %p8608_p10 = por %p8607_p6, %p8606_p13 }
  0x4d   : > { %p8604_p1 = pneg %p8603_p2 }
  0x4e   : > { %p8610_p7 = por %p8609_p3, %p8608_p10 }
  0x50   : > { %p8611_p9 = pnand %p8610_p7, %p8604_p1 }
  0x52   : > { %8614 = shalt.err (!%p8611_p9)
}
  0x53   : > { %s8615_s30 = scalar_lea.vmem %s8879_s10, 4096  ;;  %s8706_s15 = smov [#allocation4]  }
  0x54   : > { %p8616_p12 = scmp.ne.s32.totalorder %s8879_s10, %s8615_s30  ;;  %s8620_s16 = sshll.u32 %s8706_s15, 4  ;;  %s8621_s16 = int_to_ptr.vmem [resolvable:$false] %s8620_s16 }
  0x55   : > { %s8622_s9 = scalar_lea.vmem %s8621_s16, 8192  ;;  %p8623_p4 = scmp.lt.s32.totalorder %s8879_s10, %s8621_s16 }
  0x56   : > { %p8618_p2 = pnand %p8616_p12, %p8602_p0  ;;  %p8624_p13 = scmp.lt.s32.totalorder %s8622_s9, %s8615_s30 }
  0x58   : > { %p8619_p5 = pneg %p8618_p2  ;;  %p8625_p6 = por %p8624_p13, %p8623_p4 }
  0x5a   : > { %p8626_p10 = pnand %p8625_p6, %p8619_p5 }
  0x5c   : > { %8629 = shalt.err (!%p8626_p10)
}
  0x5d   : > { %s8707_s12 = smov 128   ;;  %s8708_s13 = smov 8  }
  0x5e   : > { %8289 = dma.hbm_to_vmem [thread:$0]  (!%p8881_p11), %s8877_s8, 4096, %s8879_s10, %s8885_s28, %s8707_s12, %s8707_s12, %s8708_s13  }
  0x5f   : > { %231 = sbr.rel (%p8784_p8) target bundleno = 1390 (0x56e), region = 40 }
  0x66   : > { %s8916_s29 = sand.u32 1, %s8692_s19   ;;  %p11145_p4 = scmp.ne.s32.totalorder %s11138_s24, 0 }
  0x67   : > { %s7534_s17 = sshll.u32 %s8916_s29, 8  ;;  %s234_s7 = scalar_lea.sflag [#allocation5], %s8916_s29 }
  0x68   : > { %s8922_s6 = scalar_lea.vmem [#allocation4], %s7534_s17 }
  0x69   : > { %8675 = dma.done.wait (%p11145_p4), %s234_s7, 4096  }
  0x6a   : > { %8677 = vsyncadd (%p11145_p4), %s234_s7, 4294963200  ;;  %p11146_p5 = scmp.eq.s32.totalorder %s8765_s22, 0 }
  0x6c   : > { %8679 = dma.done.wait (%p11146_p5), [#allocation8], 18432   ;;  %p11147_p8 = pmov %p11146_p5 }
  0x6d   : > { %v11125_v0 = vmov 0   ;;  %v8710_v1 = vmov 0.0   ;;  %v8342_v2 = vld [vmem:[#allocation7 + $0x4] ss:$12 sps:$4 sm:$0xff]   ;;  %v8344_v3 = vld [vmem:[#allocation7 + $0x8] ss:$12 sps:$4 sm:$0xff]  }
  0x6e   : > { %8681 = vsyncadd (%p11147_p8), [#allocation8], 4294948864  ;;  %645 = vmatprep.mubr.bf16.mxu0 %v11125_v0  ;;  %273 = vst [vmem:[#allocation2] sm:$0xff] %v8710_v1  ;;  %613 = vmatprep.subr.bf16.mxu0 %v8342_v2  ;;  %v8345_v4 = vld [vmem:[#allocation7] ss:$12 sps:$4 sm:$0xff]   ;;  %v318_v27 = vld [vmem:[%s8922_s6 + $0x10] sm:$0xff] }
  0x6f   : > { %274 = vst [vmem:[#allocation2 + $0x8] sm:$0xff] %v8710_v1  ;;  %275 = vst [vmem:[#allocation2 + $0x10] sm:$0xff] %v8710_v1  ;;  %7883 = vmatprep.subr.bf16.mxu1 %v8344_v3  ;;  %v8346_v5 = vld [vmem:[#allocation7 + $0x1c] ss:$12 sps:$4 sm:$0xff]   ;;  %614 = vmatpush1.bf16.msra.mxu0 %v8345_v4  ;;  %v8348_v6 = vld [vmem:[#allocation7 + $0x20] ss:$12 sps:$4 sm:$0xff]  }
  0x70   : > { %277 = vst [vmem:[#allocation2 + $0x198] sm:$0xff] %v8710_v1  ;;  %279 = vst [vmem:[#allocation2 + $0x1a8] sm:$0xff] %v8710_v1  ;;  %7884 = vmatpush3.bf16.msra.mxu1 %v8344_v3  ;;  %v8349_v7 = vld [vmem:[#allocation7 + $0x18] ss:$12 sps:$4 sm:$0xff]   ;;  %615 = vmatprep.subr.bf16.mxu0 %v8346_v5  ;;  %v8350_v8 = vld [vmem:[#allocation7 + $0x34] ss:$12 sps:$4 sm:$0xff]  }
  0x71   : > { %281 = vst [vmem:[#allocation2 + $0x18] sm:$0x1] %v8710_v1  ;;  %282 = vst [vmem:[#allocation2 + $0x30] sm:$0x1] %v8710_v1  ;;  %7885 = vmatprep.subr.bf16.mxu1 %v8348_v6  ;;  %v8352_v9 = vld [vmem:[#allocation7 + $0x38] ss:$12 sps:$4 sm:$0xff]  }
  0x72   : > { %283 = vst [vmem:[#allocation2 + $0x48] sm:$0x1] %v8710_v1  ;;  %284 = vst [vmem:[#allocation2 + $0x60] sm:$0x1] %v8710_v1  ;;  %v8353_v10 = vld [vmem:[#allocation7 + $0x30] ss:$12 sps:$4 sm:$0xff]  }
  0x73   : > { %285 = vst [vmem:[#allocation2 + $0x78] sm:$0x1] %v8710_v1  ;;  %286 = vst [vmem:[#allocation2 + $0x90] sm:$0x1] %v8710_v1  ;;  %616 = vmatpush1.bf16.msra.mxu0 %v8349_v7  ;;  %v8354_v11 = vld [vmem:[#allocation7 + $0x4c] ss:$12 sps:$4 sm:$0xff]  }
  0x74   : > { %287 = vst [vmem:[#allocation2 + $0xa8] sm:$0x1] %v8710_v1  ;;  %288 = vst [vmem:[#allocation2 + $0xc0] sm:$0x1] %v8710_v1  ;;  %7886 = vmatpush3.bf16.msra.mxu1 %v8348_v6  ;;  %617 = vmatprep.subr.bf16.mxu0 %v8350_v8  ;;  %v8356_v12 = vld [vmem:[#allocation7 + $0x50] ss:$12 sps:$4 sm:$0xff]  }
  0x75   : > { %289 = vst [vmem:[#allocation2 + $0xd8] sm:$0x1] %v8710_v1  ;;  %290 = vst [vmem:[#allocation2 + $0xf0] sm:$0x1] %v8710_v1  ;;  %7887 = vmatprep.subr.bf16.mxu1 %v8352_v9  ;;  %v8357_v13 = vld [vmem:[#allocation7 + $0x48] ss:$12 sps:$4 sm:$0xff]  }
  0x76   : > { %291 = vst [vmem:[#allocation2 + $0x108] sm:$0x1] %v8710_v1  ;;  %292 = vst [vmem:[#allocation2 + $0x120] sm:$0x1] %v8710_v1  ;;  %v8358_v14 = vld [vmem:[#allocation7 + $0x64] ss:$12 sps:$4 sm:$0xff]  }
  0x77   : > { %293 = vst [vmem:[#allocation2 + $0x138] sm:$0x1] %v8710_v1  ;;  %294 = vst [vmem:[#allocation2 + $0x150] sm:$0x1] %v8710_v1  ;;  %618 = vmatpush1.bf16.msra.mxu0 %v8353_v10  ;;  %v8360_v15 = vld [vmem:[#allocation7 + $0x68] ss:$12 sps:$4 sm:$0xff]  }
  0x78   : > { %295 = vst [vmem:[#allocation2 + $0x168] sm:$0x1] %v8710_v1  ;;  %296 = vst [vmem:[#allocation2 + $0x180] sm:$0x1] %v8710_v1  ;;  %7888 = vmatpush3.bf16.msra.mxu1 %v8352_v9  ;;  %619 = vmatprep.subr.bf16.mxu0 %v8354_v11  ;;  %v8361_v16 = vld [vmem:[#allocation7 + $0x60] ss:$12 sps:$4 sm:$0xff]  }
  0x79   : > { %299 = vst [vmem:[#allocation2 + $0x29] sm:$0x7f] %v8710_v1  ;;  %300 = vst [vmem:[#allocation2 + $0x41] sm:$0x7f] %v8710_v1  ;;  %7889 = vmatprep.subr.bf16.mxu1 %v8356_v12  ;;  %v8362_v17 = vld [vmem:[#allocation7 + $0x7c] ss:$12 sps:$4 sm:$0xff]  }
  0x7a   : > { %301 = vst [vmem:[#allocation2 + $0x59] sm:$0x7f] %v8710_v1  ;;  %302 = vst [vmem:[#allocation2 + $0x71] sm:$0x7f] %v8710_v1  ;;  %v8364_v18 = vld [vmem:[#allocation7 + $0x80] ss:$12 sps:$4 sm:$0xff]  }
  0x7b   : > { %303 = vst [vmem:[#allocation2 + $0x89] sm:$0x7f] %v8710_v1  ;;  %304 = vst [vmem:[#allocation2 + $0xa1] sm:$0x7f] %v8710_v1  ;;  %620 = vmatpush1.bf16.msra.mxu0 %v8357_v13  ;;  %v316_v21 = vld [vmem:[%s8922_s6] sm:$0xff]  ;;  %v317_v26 = vld [vmem:[%s8922_s6 + $0x8] sm:$0xff] }
  0x7c   : > { %305 = vst [vmem:[#allocation2 + $0xb9] sm:$0x7f] %v8710_v1  ;;  %306 = vst [vmem:[#allocation2 + $0xd1] sm:$0x7f] %v8710_v1  ;;  %7890 = vmatpush3.bf16.msra.mxu1 %v8356_v12  ;;  %621 = vmatprep.subr.bf16.mxu0 %v8358_v14  ;;  %v8365_v22 = vld [vmem:[#allocation7 + $0x78] ss:$12 sps:$4 sm:$0xff]  }
  0x7d   : > { %307 = vst [vmem:[#allocation2 + $0xe9] sm:$0x7f] %v8710_v1  ;;  %308 = vst [vmem:[#allocation2 + $0x101] sm:$0x7f] %v8710_v1  ;;  %7891 = vmatprep.subr.bf16.mxu1 %v8360_v15  ;;  %v8366_v23 = vld [vmem:[#allocation7 + $0x94] ss:$12 sps:$4 sm:$0xff]  }
  0x7e   : > { %309 = vst [vmem:[#allocation2 + $0x119] sm:$0x7f] %v8710_v1  ;;  %310 = vst [vmem:[#allocation2 + $0x131] sm:$0x7f] %v8710_v1  ;;  %v8368_v24 = vld [vmem:[#allocation7 + $0x98] ss:$12 sps:$4 sm:$0xff]  }
  0x7f   : > { %311 = vst [vmem:[#allocation2 + $0x149] sm:$0x7f] %v8710_v1  ;;  %312 = vst [vmem:[#allocation2 + $0x161] sm:$0x7f] %v8710_v1  ;;  %622 = vmatpush1.bf16.msra.mxu0 %v8361_v16  ;;  %v8369_v25 = vld [vmem:[#allocation7 + $0x90] ss:$12 sps:$4 sm:$0xff]  }
  0x80   : > { %313 = vst [vmem:[#allocation2 + $0x179] sm:$0x7f] %v8710_v1  ;;  %314 = vst [vmem:[#allocation2 + $0x191] sm:$0x7f] %v8710_v1  ;;  %7892 = vmatpush3.bf16.msra.mxu1 %v8360_v15  ;;  %623 = vmatprep.subr.bf16.mxu0 %v8362_v17  ;;  %v319_v28 = vld [vmem:[%s8922_s6 + $0x18] sm:$0xff]  ;;  %v320_v31 = vld [vmem:[%s8922_s6 + $0x20] sm:$0xff] }
  0x81   : > { %3815 = vst [vmem:[#allocation3] sm:$0xff] %v8710_v1  ;;  %3817 = vst [vmem:[#allocation3 + $0x10] sm:$0xff] %v8710_v1  ;;  %7893 = vmatprep.subr.bf16.mxu1 %v8364_v18  ;;  %v8370_v29 = vld [vmem:[#allocation7 + $0xac] ss:$12 sps:$4 sm:$0xff]   ;;  %v8372_v30 = vld [vmem:[#allocation7 + $0xb0] ss:$12 sps:$4 sm:$0xff]  }
  0x82   : > { %3819 = vst [vmem:[#allocation3 + $0x198] sm:$0xff] %v8710_v1  ;;  %3821 = vst [vmem:[#allocation3 + $0x1a8] sm:$0xff] %v8710_v1  ;;  %v321_v32 = vld [vmem:[%s8922_s6 + $0x28] sm:$0xff]  ;;  %v322_v33 = vld [vmem:[%s8922_s6 + $0x30] sm:$0xff]  ;;  %vm1143_vm0 = vcmask 1046528   ;;  %vm1336_vm1 = vcmask 1045504  }
  0x83   : > { %3823 = vst [vmem:[#allocation3 + $0x18] sm:$0x1] %v8710_v1  ;;  %3824 = vst [vmem:[#allocation3 + $0x30] sm:$0x1] %v8710_v1  ;;  %624 = vmatpush1.bf16.msra.mxu0 %v8365_v22  ;;  %v323_v34 = vld [vmem:[%s8922_s6 + $0x38] sm:$0xff]  ;;  %v324_v35 = vld [vmem:[%s8922_s6 + $0x40] sm:$0xff] }
  0x84   : > { %3825 = vst [vmem:[#allocation3 + $0x48] sm:$0x1] %v8710_v1  ;;  %3826 = vst [vmem:[#allocation3 + $0x60] sm:$0x1] %v8710_v1  ;;  %7894 = vmatpush3.bf16.msra.mxu1 %v8364_v18  ;;  %625 = vmatprep.subr.bf16.mxu0 %v8366_v23  ;;  %v8373_v36 = vld [vmem:[#allocation7 + $0xa8] ss:$12 sps:$4 sm:$0xff]  }
  0x85   : > { %3827 = vst [vmem:[#allocation3 + $0x78] sm:$0x1] %v8710_v1  ;;  %3828 = vst [vmem:[#allocation3 + $0x90] sm:$0x1] %v8710_v1  ;;  %7895 = vmatprep.subr.bf16.mxu1 %v8368_v24  ;;  %v8374_v38 = vld [vmem:[#allocation7 + $0xc8] ss:$12 sps:$4 sm:$0xff]  }
  0x86   : > { %3829 = vst [vmem:[#allocation3 + $0xa8] sm:$0x1] %v8710_v1  ;;  %3830 = vst [vmem:[#allocation3 + $0xc0] sm:$0x1] %v8710_v1  ;;  %v8377_v40 = vld [vmem:[#allocation7 + $0xc4] ss:$12 sps:$4 sm:$0xff]  }
  0x87   : > { %3831 = vst [vmem:[#allocation3 + $0xd8] sm:$0x1] %v8710_v1  ;;  %3832 = vst [vmem:[#allocation3 + $0xf0] sm:$0x1] %v8710_v1  ;;  %626 = vmatpush1.bf16.msra.mxu0 %v8369_v25  ;;  %v325_v41 = vld [vmem:[%s8922_s6 + $0x48] sm:$0xff]  ;;  %v326_v42 = vld [vmem:[%s8922_s6 + $0x50] sm:$0xff] }
  0x88   : > { %3833 = vst [vmem:[#allocation3 + $0x108] sm:$0x1] %v8710_v1  ;;  %3834 = vst [vmem:[#allocation3 + $0x120] sm:$0x1] %v8710_v1  ;;  %7896 = vmatpush3.bf16.msra.mxu1 %v8368_v24  ;;  %627 = vmatprep.subr.bf16.mxu0 %v8370_v29  ;;  %v327_v43 = vld [vmem:[%s8922_s6 + $0x58] sm:$0xff]  ;;  %v328_v63 = vld [vmem:[%s8922_s6 + $0x60] sm:$0xff] }
  0x89   : > { %3835 = vst [vmem:[#allocation3 + $0x138] sm:$0x1] %v8710_v1  ;;  %3836 = vst [vmem:[#allocation3 + $0x150] sm:$0x1] %v8710_v1  ;;  %7897 = vmatprep.subr.bf16.mxu1 %v8372_v30  ;;  %v8375_v52 = vld [vmem:[#allocation7 + $0xc0] ss:$12 sps:$4 sm:$0xff]  }
  0x8a   : > { %3837 = vst [vmem:[#allocation3 + $0x168] sm:$0x1] %v8710_v1  ;;  %3838 = vst [vmem:[#allocation3 + $0x180] sm:$0x1] %v8710_v1  ;;  %v8380_v60 = vld [vmem:[#allocation7 + $0xdc] ss:$12 sps:$4 sm:$0xff]  }
  0x8b   : > { %3841 = vst [vmem:[#allocation3 + $0x29] sm:$0x7f] %v8710_v1  ;;  %3842 = vst [vmem:[#allocation3 + $0x41] sm:$0x7f] %v8710_v1  ;;  %628 = vmatpush1.bf16.msra.mxu0 %v8373_v36  ;;  %v8381_v61 = vld [vmem:[#allocation7 + $0xe0] ss:$12 sps:$4 sm:$0xff]  }
  0x8c   : > { %3843 = vst [vmem:[#allocation3 + $0x59] sm:$0x7f] %v8710_v1  ;;  %3844 = vst [vmem:[#allocation3 + $0x71] sm:$0x7f] %v8710_v1  ;;  %7898 = vmatpush3.bf16.msra.mxu1 %v8372_v30  ;;  %7947 = vmatprep.subr.bf16.mxu0 %v8374_v38  ;;  %v330_v2 = vld [vmem:[%s8922_s6 + $0x70] sm:$0xff]  ;;  %v331_v4 = vld [vmem:[%s8922_s6 + $0x78] sm:$0xff] }
  0x8d   : > { %3845 = vst [vmem:[#allocation3 + $0x89] sm:$0x7f] %v8710_v1  ;;  %3846 = vst [vmem:[#allocation3 + $0xa1] sm:$0x7f] %v8710_v1  ;;  %1714 = vmatprep.subr.bf16.mxu1 %v8377_v40  ;;  %v8378_v3 = vld [vmem:[#allocation7 + $0xd8] ss:$12 sps:$4 sm:$0xff]  }
  0x8e   : > { %3847 = vst [vmem:[#allocation3 + $0xb9] sm:$0x7f] %v8710_v1  ;;  %3848 = vst [vmem:[#allocation3 + $0xd1] sm:$0x7f] %v8710_v1  ;;  %v8384_v5 = vld [vmem:[#allocation7 + $0xf4] ss:$12 sps:$4 sm:$0xff]  }
  0x8f   : > { %3849 = vst [vmem:[#allocation3 + $0xe9] sm:$0x7f] %v8710_v1  ;;  %3850 = vst [vmem:[#allocation3 + $0x101] sm:$0x7f] %v8710_v1  ;;  %v332_v6 = vld [vmem:[%s8922_s6 + $0x80] sm:$0xff]  ;;  %v333_v13 = vld [vmem:[%s8922_s6 + $0x88] sm:$0xff] }
  0x90   : > { %3851 = vst [vmem:[#allocation3 + $0x119] sm:$0x7f] %v8710_v1  ;;  %3852 = vst [vmem:[#allocation3 + $0x131] sm:$0x7f] %v8710_v1  ;;  %v8382_v8 = vld [vmem:[#allocation7 + $0xf0] ss:$12 sps:$4 sm:$0xff]  }
  0x91   : > { %3853 = vst [vmem:[#allocation3 + $0x149] sm:$0x7f] %v8710_v1  ;;  %3854 = vst [vmem:[#allocation3 + $0x161] sm:$0x7f] %v8710_v1  ;;  %v8388_v9 = vld [vmem:[#allocation7 + $0xf8] ss:$12 sps:$4 sm:$0xff]  }
  0x92   : > { %3855 = vst [vmem:[#allocation3 + $0x179] sm:$0x7f] %v8710_v1  ;;  %3856 = vst [vmem:[#allocation3 + $0x191] sm:$0x7f] %v8710_v1  ;;  %v334_v14 = vld [vmem:[%s8922_s6 + $0x90] sm:$0xff]  ;;  %v335_v15 = vld [vmem:[%s8922_s6 + $0x98] sm:$0xff] }
  0x93   : > { %280 = vst [vmem:[#allocation2] sm:$0x1] %v8710_v1  ;;  %297 = vst [vmem:[#allocation2 + $0x198] sm:$0x1] %v8710_v1  ;;  %v8387_v17 = vld [vmem:[#allocation7 + $0x10c] ss:$12 sps:$4 sm:$0xff]  }
  0x94   : > { %298 = vst [vmem:[#allocation2 + $0x11] sm:$0x7f] %v8710_v1  ;;  %315 = vst [vmem:[#allocation2 + $0x1a9] sm:$0x7f] %v8710_v1  ;;  %v8385_v18 = vld [vmem:[#allocation7 + $0x108] ss:$12 sps:$4 sm:$0xff]  }
  0x95   : > { %3822 = vst [vmem:[#allocation3] sm:$0x1] %v8710_v1  ;;  %3839 = vst [vmem:[#allocation3 + $0x198] sm:$0x1] %v8710_v1  ;;  %v8391_v22 = vld [vmem:[#allocation7 + $0x124] ss:$12 sps:$4 sm:$0xff]  }
  0x96   : > { %3840 = vst [vmem:[#allocation3 + $0x11] sm:$0x7f] %v8710_v1  ;;  %3857 = vst [vmem:[#allocation3 + $0x1a9] sm:$0x7f] %v8710_v1  ;;  %v339_v23 = vld [vmem:[%s8922_s6 + $0xb8] sm:$0xff]  ;;  %v340_v24 = vld [vmem:[%s8922_s6 + $0xc0] sm:$0xff] }
  0x97   : > { %349 = vst [vmem:[#allocation2 + $0x19] sm:$0xff] %v316_v21  ;;  %350 = vst [vmem:[#allocation2 + $0x21] sm:$0xff] %v317_v26  ;;  %v338_v21 = vld [vmem:[%s8922_s6 + $0xb0] sm:$0xff]  ;;  %v8389_v30 = vld [vmem:[#allocation7 + $0x120] ss:$12 sps:$4 sm:$0xff]   ;;  %s10875_s30 = scalar_lea.vmem [#allocation10], %s7534_s17 }
  0x98   : > { %351 = vst [vmem:[#allocation2 + $0x31] sm:$0xff] %v318_v27  ;;  %352 = vst [vmem:[#allocation2 + $0x39] sm:$0xff] %v319_v28  ;;  %v8395_v26 = vld [vmem:[#allocation7 + $0x110] ss:$12 sps:$4 sm:$0xff]   ;;  %s7690_s15 = sshll.u32 %s8765_s22, 12  ;;  %s7433_s16 = sshll.u32 %s10875_s30, 4  ;;  %s11070_s16 = int_to_ptr.vmem [resolvable:$true] %s7433_s16 }
  0x99   : > { %353 = vst [vmem:[#allocation2 + $0x49] sm:$0xff] %v320_v31  ;;  %354 = vst [vmem:[#allocation2 + $0x51] sm:$0xff] %v321_v32  ;;  %v8394_v32 = vld [vmem:[#allocation7 + $0x13c] ss:$12 sps:$4 sm:$0xff]   ;;  %s11068_s13 = scalar_lea.hbm %s11121_s5, %s7690_s15  ;;  %s7420_s17 = scalar_lea.sflag [#allocation6], %s8916_s29 }
  0x9a   : > { %v381_v19 = vld [vmem:[#allocation2] sm:$0xff]  ;;  %355 = vst [vmem:[#allocation2 + $0x61] sm:$0xff] %v322_v33  ;;  %356 = vst [vmem:[#allocation2 + $0x69] sm:$0xff] %v323_v34  ;;  %v341_v33 = vld [vmem:[%s8922_s6 + $0xc8] sm:$0xff]  ;;  %s8630_s7 = scalar_lea.vmem %s11070_s16, 4096  ;;  %p11190_p0 = scmp.ne.s32.totalorder %s11143_s23, 0 }
  0x9b   : > { %v9015_v20 = vpack.c.bf16 %v8710_v1, %v381_v19  ;;  %v383_v37 = vld [vmem:[#allocation2 + $0x10] sm:$0xff]  ;;  %357 = vst [vmem:[#allocation2 + $0x79] sm:$0xff] %v324_v35  ;;  %358 = vst [vmem:[#allocation2 + $0x81] sm:$0xff] %v325_v41  ;;  %v329_v1 = vld [vmem:[%s8922_s6 + $0x68] sm:$0xff]  ;;  %p8631_p11 = scmp.ne.s32.totalorder %s11070_s16, %s8630_s7  ;;  %s8711_s22 = smov [#allocation10]  }
  0x9c   : > { %359 = vst [vmem:[#allocation2 + $0x91] sm:$0xff] %v326_v42  ;;  %360 = vst [vmem:[#allocation2 + $0x99] sm:$0xff] %v327_v43  ;;  %v336_v19 = vld [vmem:[%s8922_s6 + $0xa0] sm:$0xff]  ;;  %v342_v34 = vld [vmem:[%s8922_s6 + $0xd0] sm:$0xff] }
  0x9d   : > { %7899 = vmatprep.mubr.bf16.mxu1 %v9015_v20  ;;  %646 = vmatmul.mubr.bf16.vlgmr.msra.gmra.mrb[0].mxu0 %v9015_v20  ;;  %361 = vst [vmem:[#allocation2 + $0xa9] sm:$0xff] %v328_v63  ;;  %362 = vst [vmem:[#allocation2 + $0xb1] sm:$0xff] %v329_v1  ;;  %v337_v20 = vld [vmem:[%s8922_s6 + $0xa8] sm:$0xff]  ;;  %v343_v35 = vld [vmem:[%s8922_s6 + $0xd8] sm:$0xff]  ;;  %p8632_p1 = pnand %p8631_p11, %p11190_p0 }
  0x9e   : > { %v384_v39 = vld [vmem:[#allocation2 + $0x18] sm:$0xff]  ;;  %v385_v44 = vld [vmem:[#allocation2 + $0x20] sm:$0xff]  ;;  %v386_v45 = vld [vmem:[#allocation2 + $0x28] sm:$0xff]  ;;  %7948 = vmatpush3.bf16.msra.mxu0 %v8374_v38  ;;  %363 = vst [vmem:[#allocation2 + $0xc1] sm:$0xff] %v330_v2  ;;  %655 = vmatprep.mubr.bf16.mxu0 %v11125_v0 }
  0x9f   : > { %v387_v46 = vld [vmem:[#allocation2 + $0x30] sm:$0xff]  ;;  %v430_v47 = vpack.c.bf16 %v384_v39, %v383_v37  ;;  %v388_v48 = vld [vmem:[#allocation2 + $0x38] sm:$0xff]  ;;  %v389_v49 = vld [vmem:[#allocation2 + $0x40] sm:$0xff]  ;;  %v9030_v50 = vpack.c.bf16 %v385_v44, %v384_v39  ;;  %v9038_v56 = vpack.c.bf16 %v386_v45, %v385_v44  ;;  %364 = vst [vmem:[#allocation2 + $0xc9] sm:$0xff] %v331_v4  ;;  %7949 = vmatprep.subr.bf16.mxu0 %v8381_v61  ;;  %p8633_p3 = pneg %p8632_p1 }
  0xa0   : > { %v9032_v51 = vpack.c.bf16 %v387_v46, %v386_v45  ;;  %v390_v53 = vld [vmem:[#allocation2 + $0x48] sm:$0xff]  ;;  %v9034_v54 = vld [vmem:[#allocation2 + $0x50] sm:$0xff]  ;;  %v9036_v55 = vpack.c.bf16 %v389_v49, %v388_v48  ;;  %v392_v57 = vld [vmem:[#allocation2 + $0x58] sm:$0xff]  ;;  %v9056_v7 = vpack.c.bf16 %v388_v48, %v387_v46  ;;  %365 = vst [vmem:[#allocation2 + $0xd9] sm:$0xff] %v332_v6 }
  0xa1   : > { %v9040_v58 = vld [vmem:[#allocation2 + $0x60] sm:$0xff]  ;;  %v9043_v59 = vpack.c.bf16 %v9034_v54, %v390_v53  ;;  %7900 = vmatmul.mubr.bf16.vlgmr.msra.gmra.mrb[0].mxu1 %v430_v47  ;;  %v9058_v10 = vpack.c.bf16 %v390_v53, %v389_v49  ;;  %v394_v11 = vld [vmem:[#allocation2 + $0x68] sm:$0xff]  ;;  %v395_v12 = vld [vmem:[#allocation2 + $0x70] sm:$0xff]  ;;  %366 = vst [vmem:[#allocation2 + $0xe1] sm:$0xff] %v333_v13  ;;  %v9074_v25 = vpack.c.bf16 %v392_v57, %v9034_v54 }
  0xa2   : > { %v9046_v62 = vpack.c.bf16 %v9040_v58, %v392_v57  ;;  %1715 = vmatpush1.bf16.msra.mxu1 %v8375_v52  ;;  %7903 = vmatprep.mubr.bf16.mxu1 %v9038_v56  ;;  %v9063_v16 = vpack.c.bf16 %v395_v12, %v394_v11  ;;  %367 = vst [vmem:[#allocation2 + $0xf1] sm:$0xff] %v334_v14  ;;  %368 = vst [vmem:[#allocation2 + $0xf9] sm:$0xff] %v335_v15  ;;  %v396_v28 = vld [vmem:[#allocation2 + $0x78] sm:$0xff]  ;;  %v397_v29 = vld [vmem:[#allocation2 + $0x80] sm:$0xff] }
  0xa3   : > { %1716 = vmatprep.subr.bf16.mxu1 %v8380_v60  ;;  %7950 = vmatpush3.bf16.msra.mxu0 %v8381_v61  ;;  %369 = vst [vmem:[#allocation2 + $0x109] sm:$0xff] %v336_v19  ;;  %370 = vst [vmem:[#allocation2 + $0x111] sm:$0xff] %v337_v20  ;;  %v9077_v27 = vpack.c.bf16 %v394_v11, %v9040_v58  ;;  %v9079_v31 = vpack.c.bf16 %v397_v29, %v396_v28  ;;  %v398_v36 = vld [vmem:[#allocation2 + $0x88] sm:$0xff]  ;;  %v8392_v37 = vld [vmem:[#allocation7 + $0x138] ss:$12 sps:$4 sm:$0xff]  }
  0xa4   : > { %7951 = vmatprep.subr.bf16.mxu0 %v8388_v9  ;;  %371 = vst [vmem:[#allocation2 + $0x121] sm:$0xff] %v338_v21  ;;  %372 = vst [vmem:[#allocation2 + $0x129] sm:$0xff] %v339_v23  ;;  %v8398_v38 = vld [vmem:[#allocation7 + $0x154] ss:$12 sps:$4 sm:$0xff]   ;;  %v9088_v39 = vpack.c.bf16 %v396_v28, %v395_v12  ;;  %v8396_v41 = vld [vmem:[#allocation7 + $0x150] ss:$12 sps:$4 sm:$0xff]   ;;  %v9091_v43 = vpack.c.bf16 %v398_v36, %v397_v29 }
  0xa5   : > { %656 = vmatmul.mubr.bf16.gmra.mrb[4].mxu0 %v430_v47  ;;  %373 = vst [vmem:[#allocation2 + $0x139] sm:$0xff] %v340_v24  ;;  %374 = vst [vmem:[#allocation2 + $0x141] sm:$0xff] %v341_v33  ;;  %v399_v40 = vld [vmem:[#allocation2 + $0x90] sm:$0xff]  ;;  %v344_v42 = vld [vmem:[%s8922_s6 + $0xe0] sm:$0xff] }
  0xa6   : > { %1717 = vmatpush1.bf16.msra.mxu1 %v8378_v3  ;;  %664 = vmatprep.mubr.bf16.mxu0 %v11125_v0  ;;  %375 = vst [vmem:[#allocation2 + $0x151] sm:$0xff] %v342_v34  ;;  %376 = vst [vmem:[#allocation2 + $0x159] sm:$0xff] %v343_v35  ;;  %v345_v44 = vld [vmem:[%s8922_s6 + $0xe8] sm:$0xff]  ;;  %v9094_v46 = vpack.c.bf16 %v399_v40, %v398_v36  ;;  %v400_v48 = vld [vmem:[#allocation2 + $0x98] sm:$0xff] }
  0xa7   : > { %1718 = vmatprep.subr.bf16.mxu1 %v8384_v5  ;;  %7952 = vmatpush3.bf16.msra.mxu0 %v8388_v9  ;;  %377 = vst [vmem:[#allocation2 + $0x169] sm:$0xff] %v344_v42  ;;  %378 = vst [vmem:[#allocation2 + $0x171] sm:$0xff] %v345_v44  ;;  %v8402_v45 = vld [vmem:[#allocation7 + $0x128] ss:$12 sps:$4 sm:$0xff]   ;;  %v8401_v47 = vld [vmem:[#allocation7 + $0x16c] ss:$12 sps:$4 sm:$0xff]   ;;  %v9102_v57 = vpack.c.bf16 %v400_v48, %v399_v40 }
  0xa8   : > { %7953 = vmatprep.subr.bf16.mxu0 %v8395_v26  ;;  %v401_v49 = vld [vmem:[#allocation2 + $0xa0] sm:$0xff]  ;;  %v402_v52 = vld [vmem:[#allocation2 + $0xa8] sm:$0xff]  ;;  %v403_v63 = vld [vmem:[#allocation2 + $0xb0] sm:$0xff] }
  0xa9   : > { %7904 = vmatmul.mubr.bf16.gmra.mrb[4].mxu1 %v9056_v7  ;;  %v8404_v53 = vld [vmem:[#allocation7 + $0x140] ss:$12 sps:$4 sm:$0xff]   ;;  %v8399_v54 = vld [vmem:[#allocation7 + $0x168] ss:$12 sps:$4 sm:$0xff]   ;;  %v9104_v58 = vpack.c.bf16 %v402_v52, %v401_v49  ;;  %v8406_v60 = vld [vmem:[#allocation7 + $0x158] ss:$12 sps:$4 sm:$0xff]   ;;  %v9106_v61 = vpack.c.bf16 %v401_v49, %v400_v48  ;;  %v9117_v6 = vpack.c.bf16 %v403_v63, %v402_v52 }
  0xaa   : > { %7907 = vmatprep.mubr.bf16.mxu1 %v9058_v10  ;;  %1719 = vmatpush1.bf16.msra.mxu1 %v8382_v8  ;;  %v404_v1 = vld [vmem:[#allocation2 + $0xb8] sm:$0xff]  ;;  %v405_v2 = vld [vmem:[#allocation2 + $0xc0] sm:$0xff]  ;;  %v406_v3 = vld [vmem:[#allocation2 + $0xc8] sm:$0xff] }
  0xab   : > { %1720 = vmatprep.subr.bf16.mxu1 %v8387_v17  ;;  %7954 = vmatpush3.bf16.msra.mxu0 %v8395_v26  ;;  %v9113_v4 = vpack.c.bf16 %v404_v1, %v403_v63  ;;  %v9115_v5 = vpack.c.bf16 %v406_v3, %v405_v2  ;;  %v408_v8 = vld [vmem:[#allocation2 + $0xd8] sm:$0xff]  ;;  %v409_v9 = vld [vmem:[#allocation2 + $0xe0] sm:$0xff]  ;;  %v9127_v14 = vpack.c.bf16 %v405_v2, %v404_v1  ;;  %v411_v15 = vld [vmem:[#allocation2 + $0xf0] sm:$0xff] }
  0xac   : > { %7955 = vmatprep.subr.bf16.mxu0 %v8402_v45  ;;  %v8408_v11 = vld [vmem:[#allocation7 + $0x170] ss:$12 sps:$4 sm:$0xff]   ;;  %v9131_v19 = vld [vmem:[#allocation2 + $0x108] sm:$0xff]  ;;  %v9170_v33 = vld [vmem:[#allocation2 + $0x140] sm:$0xff] }
  0xad   : > { %665 = vmatmul.mubr.bf16.gmra.mrb[8].mxu0 %v9038_v56  ;;  %v9100_v56 = vld [vmem:[#allocation7 + $0x188] ss:$12 sps:$4 sm:$0xff]   ;;  %v412_v17 = vld [vmem:[#allocation2 + $0xf8] sm:$0xff]  ;;  %v8412_v34 = vld [vmem:[#allocation7 + $0x184] ss:$12 sps:$4 sm:$0xff]  }
  0xae   : > { %1721 = vmatpush1.bf16.msra.mxu1 %v8385_v18  ;;  %673 = vmatprep.mubr.bf16.mxu0 %v11125_v0  ;;  %v413_v18 = vld [vmem:[#allocation2 + $0x100] sm:$0xff]  ;;  %v9135_v20 = vpack.c.bf16 %v412_v17, %v411_v15  ;;  %v9142_v23 = vld [vmem:[#allocation2 + $0x110] sm:$0xff]  ;;  %v9144_v24 = vld [vmem:[#allocation2 + $0x118] sm:$0xff] }
  0xaf   : > { %1722 = vmatprep.subr.bf16.mxu1 %v8391_v22  ;;  %7956 = vmatpush3.bf16.msra.mxu0 %v8402_v45  ;;  %v9138_v21 = vpack.c.bf16 %v9131_v19, %v413_v18  ;;  %v9150_v26 = vld [vmem:[#allocation2 + $0x128] sm:$0xff]  ;;  %v9158_v28 = vpack.c.bf16 %v9144_v24, %v9142_v23  ;;  %v9192_v40 = vld [vmem:[#allocation2 + $0x158] sm:$0xff]  ;;  %v9196_v42 = vld [vmem:[#allocation2 + $0x160] sm:$0xff] }
  0xb0   : > { %7957 = vmatprep.subr.bf16.mxu0 %v8404_v53  ;;  %v9174_v35 = vld [vmem:[#allocation2 + $0x148] sm:$0xff]  ;;  %v9214_v48 = vld [vmem:[#allocation2 + $0x178] sm:$0xff] }
  0xb1   : > { %7908 = vmatmul.mubr.bf16.gmra.mrb[8].mxu1 %v9074_v25  ;;  %v8405_v52 = vld [vmem:[#allocation7 + $0x1a0] ss:$12 sps:$4 sm:$0xff]   ;;  %v8434_v63 = vld [vmem:[#allocation7 + $0x230] ss:$12 sps:$4 sm:$0xff]  }
  0xb2   : > { %7911 = vmatprep.mubr.bf16.mxu1 %v9077_v27  ;;  %1723 = vmatpush1.bf16.msra.mxu1 %v8389_v30  ;;  %v9164_v30 = vld [vmem:[#allocation2 + $0x130] sm:$0xff]  ;;  %v347_v1 = vld [vmem:[%s8922_s6 + $0xf8] sm:$0xff]  ;;  %v8410_v2 = vld [vmem:[#allocation7 + $0x180] ss:$12 sps:$4 sm:$0xff]  }
  0xb3   : > { %1724 = vmatprep.subr.bf16.mxu1 %v8394_v32  ;;  %7958 = vmatpush3.bf16.msra.mxu0 %v8404_v53  ;;  %v9166_v32 = vld [vmem:[#allocation2 + $0x138] sm:$0xff]  ;;  %380 = vst [vmem:[#allocation2 + $0x189] sm:$0xff] %v347_v1 }
  0xb4   : > { %7959 = vmatprep.subr.bf16.mxu0 %v8406_v60  ;;  %v8407_v53 = vld [vmem:[#allocation7 + $0x1b8] ss:$12 sps:$4 sm:$0xff]  }
  0xb5   : > { %674 = vmatmul.mubr.bf16.gmra.mrb[12].mxu0 %v9056_v7  ;;  %v407_v7 = vld [vmem:[#allocation2 + $0xd0] sm:$0xff] }
  0xb6   : > { %1725 = vmatpush1.bf16.msra.mxu1 %v8392_v37  ;;  %683 = vmatprep.mubr.bf16.mxu0 %v11125_v0  ;;  %v9123_v12 = vpack.c.bf16 %v408_v8, %v407_v7  ;;  %v9140_v22 = vpack.c.bf16 %v407_v7, %v406_v3  ;;  %v9180_v37 = vpack.c.bf16 %v9166_v32, %v9164_v30  ;;  %v8416_v3 = vld [vmem:[#allocation7 + $0x19c] ss:$12 sps:$4 sm:$0xff]  }
  0xb7   : > { %1726 = vmatprep.subr.bf16.mxu1 %v8398_v38  ;;  %7960 = vmatpush3.bf16.msra.mxu0 %v8406_v60  ;;  %v9184_v38 = vpack.c.bf16 %v9174_v35, %v9170_v33  ;;  %v346_v60 = vld [vmem:[%s8922_s6 + $0xf0] sm:$0xff] }
  0xb8   : > { %7961 = vmatprep.subr.bf16.mxu0 %v8408_v11  ;;  %379 = vst [vmem:[#allocation2 + $0x181] sm:$0xff] %v346_v60  ;;  %v8417_v7 = vld [vmem:[#allocation7 + $0x1b0] ss:$12 sps:$4 sm:$0xff]  }
  0xb9   : > { %7912 = vmatmul.mubr.bf16.gmra.mrb[12].mxu1 %v9088_v39 }
  0xba   : > { %7915 = vmatprep.mubr.bf16.mxu1 %v9091_v43  ;;  %1727 = vmatpush1.bf16.msra.mxu1 %v8396_v41  ;;  %v9194_v41 = vpack.c.bf16 %v413_v18, %v412_v17 }
  0xbb   : > { %1728 = vmatprep.subr.bf16.mxu1 %v8401_v47  ;;  %7962 = vmatpush3.bf16.msra.mxu0 %v8408_v11  ;;  %v9212_v47 = vld [vmem:[#allocation2 + $0x170] sm:$0xff] }
  0xbc   : > { %2846 = vmatprep.subr.bf16.mxu0 %v8412_v34  ;;  %v9218_v49 = vpack.c.bf16 %v9214_v48, %v9212_v47  ;;  %v8433_v11 = vld [vmem:[#allocation7 + $0x214] ss:$12 sps:$4 sm:$0xff]  }
  0xbd   : > { %684 = vmatmul.mubr.bf16.gmra.mrb[16].mxu0 %v9058_v10  ;;  %v410_v10 = vld [vmem:[#allocation2 + $0xe8] sm:$0xff] }
  0xbe   : > { %1729 = vmatpush1.bf16.msra.mxu1 %v8399_v54  ;;  %692 = vmatprep.mubr.bf16.mxu0 %v11125_v0  ;;  %v9125_v13 = vpack.c.bf16 %v410_v10, %v409_v9  ;;  %v9176_v36 = vpack.c.bf16 %v411_v15, %v410_v10  ;;  %v8409_v54 = vld [vmem:[#allocation7 + $0x1d0] ss:$12 sps:$4 sm:$0xff]   ;;  %v9289_v15 = vpack.c.bf16 %v9142_v23, %v9131_v19 }
  0xbf   : > { %8011 = vmatprep.subr.bf16.mxu1 %v9100_v56 }
  0xc1   : > { %7916 = vmatmul.mubr.bf16.gmra.mrb[16].mxu1 %v9102_v57 }
  0xc2   : > { %7919 = vmatprep.mubr.bf16.mxu1 %v9104_v58 }
  0xc5   : > { %693 = vmatmul.mubr.bf16.gmra.mrb[20].mxu0 %v9074_v25  ;;  %v9148_v25 = vld [vmem:[#allocation2 + $0x120] sm:$0xff] }
  0xc6   : > { %701 = vmatprep.mubr.bf16.mxu0 %v11125_v0  ;;  %v9162_v29 = vpack.c.bf16 %v9150_v26, %v9148_v25 }
  0xc9   : > { %7920 = vmatmul.mubr.bf16.gmra.mrb[20].mxu1 %v9113_v4 }
  0xca   : > { %7923 = vmatprep.mubr.bf16.mxu1 %v9115_v5 }
  0xcd   : > { %702 = vmatmul.mubr.bf16.gmra.mrb[24].mxu0 %v9077_v27  ;;  %v9154_v27 = vpack.c.bf16 %v409_v9, %v408_v8  ;;  %v8423_v8 = vld [vmem:[#allocation7 + $0x1cc] ss:$12 sps:$4 sm:$0xff]   ;;  %v8430_v9 = vld [vmem:[#allocation7 + $0x1fc] ss:$12 sps:$4 sm:$0xff]  }
  0xce   : > { %711 = vmatprep.mubr.bf16.mxu0 %v11125_v0 }
  0xd1   : > { %7924 = vmatmul.mubr.bf16.gmra.mrb[24].mxu1 %v9123_v12 }
  0xd2   : > { %7927 = vmatprep.mubr.bf16.mxu1 %v9125_v13 }
  0xd5   : > { %712 = vmatmul.mubr.bf16.gmra.mrb[28].mxu0 %v9088_v39  ;;  %v9188_v39 = vld [vmem:[#allocation2 + $0x150] sm:$0xff] }
  0xd6   : > { %720 = vmatprep.mubr.bf16.mxu0 %v11125_v0  ;;  %v9202_v44 = vpack.c.bf16 %v9192_v40, %v9188_v39 }
  0xd9   : > { %7928 = vmatmul.mubr.bf16.gmra.mrb[28].mxu1 %v9135_v20 }
  0xda   : > { %7931 = vmatprep.mubr.bf16.mxu1 %v9138_v21 }
  0xdd   : > { %721 = vmatmul.mubr.bf16.gmra.mrb[32].mxu0 %v9091_v43  ;;  %v9198_v43 = vld [vmem:[#allocation2 + $0x168] sm:$0xff] }
  0xde   : > { %729 = vmatprep.mubr.bf16.mxu0 %v11125_v0  ;;  %v9206_v45 = vpack.c.bf16 %v9198_v43, %v9196_v42 }
  0xe1   : > { %7932 = vmatmul.mubr.bf16.gmra.mrb[32].mxu1 %v9158_v28 }
  0xe2   : > { %7935 = vmatprep.mubr.bf16.mxu1 %v9162_v29 }
  0xe5   : > { %730 = vmatmul.mubr.bf16.gmra.mrb[36].mxu0 %v9102_v57  ;;  %v8420_v57 = vld [vmem:[#allocation7 + $0x200] ss:$12 sps:$4 sm:$0xff]  }
  0xe6   : > { %739 = vmatprep.mubr.bf16.mxu0 %v11125_v0 }
  0xe9   : > { %7936 = vmatmul.mubr.bf16.gmra.mrb[36].mxu1 %v9180_v37 }
  0xea   : > { %7939 = vmatprep.mubr.bf16.mxu1 %v9184_v38 }
  0xed   : > { %740 = vmatmul.mubr.bf16.gmra.mrb[40].mxu0 %v9104_v58  ;;  %v8427_v58 = vld [vmem:[#allocation7 + $0x218] ss:$12 sps:$4 sm:$0xff]  }
  0xee   : > { %748 = vmatprep.mubr.bf16.mxu0 %v11125_v0 }
  0xf1   : > { %7940 = vmatmul.mubr.bf16.gmra.mrb[40].mxu1 %v9202_v44 }
  0xf2   : > { %7943 = vmatprep.mubr.bf16.mxu1 %v9206_v45 }
  0xf5   : > { %749 = vmatmul.mubr.bf16.gmra.mrb[44].mxu0 %v9113_v4  ;;  %v8414_v4 = vld [vmem:[#allocation7 + $0x198] ss:$12 sps:$4 sm:$0xff]  }
  0xf6   : > { %757 = vmatprep.mubr.bf16.mxu0 %v11125_v0 }
  0xf9   : > { %7944 = vmatmul.mubr.bf16.gmra.mrb[44].mxu1 %v9218_v49 }
  0xfa   : > { %1746 = vmatprep.mubr.bf16.mxu1 %v11125_v0 }
  0xfd   : > { %758 = vmatmul.mubr.bf16.gmra.mrb[48].mxu0 %v9115_v5  ;;  %v8419_v5 = vld [vmem:[#allocation7 + $0x1b4] ss:$12 sps:$4 sm:$0xff]  }
  0xfe   : > { %767 = vmatprep.mubr.bf16.mxu0 %v11125_v0 }
 0x101   : > { %1747 = vmatmul.mubr.bf16.vlgmr.msra.gmra.mrb[48].mxu1 %v9030_v50 }
 0x102   : > { %8012 = vmatpush3.bf16.msra.mxu1 %v9100_v56  ;;  %1756 = vmatprep.mubr.bf16.mxu1 %v11125_v0  ;;  %v8413_v56 = vld [vmem:[#allocation7 + $0x1e8] ss:$12 sps:$4 sm:$0xff]  }
 0x103   : > { %8013 = vmatprep.subr.bf16.mxu1 %v8405_v52 }
 0x105   : > { %768 = vmatmul.mubr.bf16.gmra.mrb[52].mxu0 %v9123_v12 }
 0x106   : > { %8014 = vmatpush3.bf16.msra.mxu1 %v8405_v52  ;;  %776 = vmatprep.mubr.bf16.mxu0 %v11125_v0 }
 0x107   : > { %8015 = vmatprep.subr.bf16.mxu1 %v8407_v53 }
 0x109   : > { %1757 = vmatmul.mubr.bf16.gmra.mrb[52].mxu1 %v9032_v51 }
 0x10a   : > { %1765 = vmatprep.mubr.bf16.mxu1 %v11125_v0  ;;  %8016 = vmatpush3.bf16.msra.mxu1 %v8407_v53 }
 0x10b   : > { %8017 = vmatprep.subr.bf16.mxu1 %v8409_v54 }
 0x10d   : > { %777 = vmatmul.mubr.bf16.gmra.mrb[56].mxu0 %v9125_v13 }
 0x10e   : > { %8018 = vmatpush3.bf16.msra.mxu1 %v8409_v54  ;;  %785 = vmatprep.mubr.bf16.mxu0 %v11125_v0 }
 0x10f   : > { %8019 = vmatprep.subr.bf16.mxu1 %v8413_v56 }
 0x111   : > { %1766 = vmatmul.mubr.bf16.gmra.mrb[56].mxu1 %v9036_v55 }
 0x112   : > { %1774 = vmatprep.mubr.bf16.mxu1 %v11125_v0  ;;  %8020 = vmatpush3.bf16.msra.mxu1 %v8413_v56 }
 0x113   : > { %8021 = vmatprep.subr.bf16.mxu1 %v8420_v57 }
 0x115   : > { %786 = vmatmul.mubr.bf16.gmra.mrb[60].mxu0 %v9135_v20 }
 0x116   : > { %8022 = vmatpush3.bf16.msra.mxu1 %v8420_v57  ;;  %795 = vmatprep.mubr.bf16.mxu0 %v11125_v0 }
 0x117   : > { %8023 = vmatprep.subr.bf16.mxu1 %v8427_v58 }
 0x119   : > { %1775 = vmatmul.mubr.bf16.gmra.mrb[60].mxu1 %v9043_v59 }
 0x11a   : > { %1784 = vmatprep.mubr.bf16.mxu1 %v11125_v0  ;;  %8024 = vmatpush3.bf16.msra.mxu1 %v8427_v58 }
 0x11b   : > { %8025 = vmatprep.subr.bf16.mxu1 %v8434_v63 }
 0x11d   : > { %796 = vmatmul.mubr.bf16.gmra.mrb[64].mxu0 %v9138_v21 }
 0x11e   : > { %804 = vmatprep.mubr.bf16.mxu0 %v11125_v0  ;;  %8026 = vmatpush3.bf16.msra.mxu1 %v8434_v63 }
 0x121   : > { %1785 = vmatmul.mubr.bf16.gmra.mrb[64].mxu1 %v9046_v62 }
 0x122   : > { %1793 = vmatprep.mubr.bf16.mxu1 %v11125_v0 }
 0x125   : > { %805 = vmatmul.mubr.bf16.gmra.mrb[68].mxu0 %v9158_v28 }
 0x126   : > { %813 = vmatprep.mubr.bf16.mxu0 %v11125_v0 }
 0x129   : > { %1794 = vmatmul.mubr.bf16.gmra.mrb[68].mxu1 %v9063_v16 }
 0x12a   : > { %1802 = vmatprep.mubr.bf16.mxu1 %v11125_v0 }
 0x12d   : > { %814 = vmatmul.mubr.bf16.gmra.mrb[72].mxu0 %v9162_v29 }
 0x12e   : > { %823 = vmatprep.mubr.bf16.mxu0 %v11125_v0 }
 0x131   : > { %1803 = vmatmul.mubr.bf16.gmra.mrb[72].mxu1 %v9079_v31 }
 0x132   : > { %1812 = vmatprep.mubr.bf16.mxu1 %v11125_v0 }
 0x135   : > { %824 = vmatmul.mubr.bf16.gmra.mrb[76].mxu0 %v9180_v37 }
 0x136   : > { %832 = vmatprep.mubr.bf16.mxu0 %v11125_v0 }
 0x139   : > { %1813 = vmatmul.mubr.bf16.gmra.mrb[76].mxu1 %v9094_v46 }
 0x13a   : > { %1821 = vmatprep.mubr.bf16.mxu1 %v11125_v0 }
 0x13d   : > { %833 = vmatmul.mubr.bf16.gmra.mrb[80].mxu0 %v9184_v38  ;;  %v8437_v38 = vld [vmem:[#allocation7 + $0x22c] ss:$12 sps:$4 sm:$0xff]  }
 0x13e   : > { %841 = vmatprep.mubr.bf16.mxu0 %v11125_v0 }
 0x141   : > { %1822 = vmatmul.mubr.bf16.gmra.mrb[80].mxu1 %v9106_v61 }
 0x142   : > { %1830 = vmatprep.mubr.bf16.mxu1 %v11125_v0 }
 0x145   : > { %842 = vmatmul.mubr.bf16.gmra.mrb[84].mxu0 %v9202_v44 }
 0x146   : > { %851 = vmatprep.mubr.bf16.mxu0 %v11125_v0 }
 0x149   : > { %1831 = vmatmul.mubr.bf16.gmra.mrb[84].mxu1 %v9117_v6 }
 0x14a   : > { %1840 = vmatprep.mubr.bf16.mxu1 %v11125_v0 }
 0x14d   : > { %852 = vmatmul.mubr.bf16.gmra.mrb[88].mxu0 %v9206_v45  ;;  %v8435_v45 = vld [vmem:[#allocation7 + $0x228] ss:$12 sps:$4 sm:$0xff]  }
 0x14e   : > { %860 = vmatprep.mubr.bf16.mxu0 %v11125_v0 }
 0x151   : > { %1841 = vmatmul.mubr.bf16.gmra.mrb[88].mxu1 %v9127_v14 }
 0x152   : > { %1849 = vmatprep.mubr.bf16.mxu1 %v11125_v0 }
 0x155   : > { %861 = vmatmul.mubr.bf16.gmra.mrb[92].mxu0 %v9218_v49 }
 0x156   : > { %7963 = vmatprep.mubr.bf16.mxu0 %v9030_v50  ;;  %v8421_v50 = vld [vmem:[#allocation7 + $0x1c8] ss:$12 sps:$4 sm:$0xff]  }
 0x159   : > { %1850 = vmatmul.mubr.bf16.gmra.mrb[92].mxu1 %v9140_v22 }
 0x15a   : > { %1858 = vmatprep.mubr.bf16.mxu1 %v11125_v0 }
 0x15d   : > { %7964 = vmatmul.mubr.bf16.vlgmr.msra.gmra.mrb[96].mxu0 %v9032_v51  ;;  %v8426_v51 = vld [vmem:[#allocation7 + $0x1e4] ss:$12 sps:$4 sm:$0xff]  }
 0x15e   : > { %2847 = vmatpush1.bf16.msra.mxu0 %v8410_v2  ;;  %7967 = vmatprep.mubr.bf16.mxu0 %v9036_v55  ;;  %v8424_v55 = vld [vmem:[#allocation7 + $0x1e0] ss:$12 sps:$4 sm:$0xff]  }
 0x15f   : > { %2848 = vmatprep.subr.bf16.mxu0 %v8416_v3 }
 0x161   : > { %1859 = vmatmul.mubr.bf16.gmra.mrb[96].mxu1 %v9154_v27 }
 0x162   : > { %1868 = vmatprep.mubr.bf16.mxu1 %v11125_v0  ;;  %2849 = vmatpush1.bf16.msra.mxu0 %v8414_v4 }
 0x163   : > { %2850 = vmatprep.subr.bf16.mxu0 %v8419_v5 }
 0x165   : > { %7968 = vmatmul.mubr.bf16.gmra.mrb[100].mxu0 %v9043_v59  ;;  %v8428_v59 = vld [vmem:[#allocation7 + $0x1f8] ss:$12 sps:$4 sm:$0xff]  }
 0x166   : > { %7971 = vmatprep.mubr.bf16.mxu0 %v9046_v62  ;;  %2851 = vmatpush1.bf16.msra.mxu0 %v8417_v7 }
 0x167   : > { %2852 = vmatprep.subr.bf16.mxu0 %v8423_v8 }
 0x169   : > { %1869 = vmatmul.mubr.bf16.gmra.mrb[100].mxu1 %v9176_v36 }
 0x16a   : > { %1877 = vmatprep.mubr.bf16.mxu1 %v11125_v0  ;;  %2853 = vmatpush1.bf16.msra.mxu0 %v8421_v50 }
 0x16b   : > { %2854 = vmatprep.subr.bf16.mxu0 %v8426_v51 }
 0x16d   : > { %7972 = vmatmul.mubr.bf16.gmra.mrb[104].mxu0 %v9063_v16 }
 0x16e   : > { %7975 = vmatprep.mubr.bf16.mxu0 %v9079_v31  ;;  %2855 = vmatpush1.bf16.msra.mxu0 %v8424_v55  ;;  %v8431_v31 = vld [vmem:[#allocation7 + $0x210] ss:$12 sps:$4 sm:$0xff]  }
 0x16f   : > { %2856 = vmatprep.subr.bf16.mxu0 %v8430_v9 }
 0x170   : > { %v647_v10 = vpop.f32.mrb[0].mxu0 }
 0x171   : > { %1878 = vmatmul.mubr.bf16.gmra.mrb[104].mxu1 %v9194_v41  ;;  %v649_v12 = vpop.f32.mrb[1].mxu0 }
 0x172   : > { %1886 = vmatprep.mubr.bf16.mxu1 %v11125_v0  ;;  %v651_v20 = vpop.f32.mrb[2].mxu0  ;;  %2857 = vmatpush1.bf16.msra.mxu0 %v8428_v59  ;;  %v1144_v29 = vrot.slane %v649_v12, 1  ;;  %v9316_v12 = vpack.c.bf16 %v9164_v30, %v9150_v26 }
 0x173   : > { %v653_v21 = vpop.f32.mrb[3].mxu0  ;;  %2858 = vmatprep.subr.bf16.mxu0 %v8433_v11 }
 0x174   : > { %v7901_v62 = vpop.f32.mrb[0].mxu1  ;;  %v1145_v34 = vrot.slane %v653_v21, 1 }
 0x175   : > { %v904_v13 = vpop.f32.mrb[1].mxu1  ;;  %v1340_v17 = vrot.slane %v7901_v62, 2  ;;  %7976 = vmatmul.mubr.bf16.gmra.mrb[108].mxu0 %v9094_v46  ;;  %v9300_v46 = vpack.c.bf16 %v9148_v25, %v9144_v24 }
 0x176   : > { %v1337_v18 = vrot.slane %v904_v13, 2  ;;  %v7902_v16 = vpop.f32.mrb[2].mxu1  ;;  %v1146_v19 = vsel %vm1143_vm0, %v1144_v29, %v1145_v34  ;;  %7979 = vmatprep.mubr.bf16.mxu0 %v9106_v61  ;;  %2859 = vmatpush1.bf16.msra.mxu0 %v8431_v31 }
 0x177   : > { %v907_v28 = vpop.f32.mrb[3].mxu1  ;;  %v1256_v49 = vadd.f32 %v1146_v19, %v647_v10  ;;  %2860 = vmatprep.subr.bf16.mxu0 %v8437_v38  ;;  %v1342_v61 = vrot.slane %v7902_v16, 2 }
 0x178   : > { %v1338_v37 = vrot.slane %v907_v28, 2  ;;  %v657_v52 = vpop.f32.mrb[4].mxu0 }
 0x179   : > { %1887 = vmatmul.mubr.bf16.gmra.mrb[108].mxu1 %v9289_v15  ;;  %v658_v56 = vpop.f32.mrb[5].mxu0  ;;  %v9335_v52 = vpack.c.bf16 %v9170_v33, %v9166_v32 }
 0x17a   : > { %1896 = vmatprep.mubr.bf16.mxu1 %v11125_v0  ;;  %v1339_v23 = vsel %vm1336_vm1, %v1337_v18, %v1338_v37  ;;  %v1341_v44 = vsel %vm1336_vm1, %v1338_v37, %v1340_v17  ;;  %v1147_v60 = vrot.slane %v658_v56, 1  ;;  %v660_v1 = vpop.f32.mrb[6].mxu0  ;;  %2861 = vmatpush1.bf16.msra.mxu0 %v8435_v45 }
 0x17b   : > { %v9302_v58 = vadd.f32 %v1339_v23, %v1256_v49  ;;  %v662_v4 = vpop.f32.mrb[7].mxu0 }
 0x17c   : > { %v7905_v53 = vpop.f32.mrb[4].mxu1  ;;  %v1148_v7 = vsel %vm1143_vm0, %v1145_v34, %v1147_v60 }
 0x17d   : > { %v1347_v54 = vrot.slane %v7905_v53, 2  ;;  %v920_v57 = vpop.f32.mrb[5].mxu1  ;;  %7980 = vmatmul.mubr.bf16.gmra.mrb[112].mxu0 %v9117_v6  ;;  %v1257_v24 = vadd.f32 %v1148_v7, %v651_v20  ;;  %v1149_v6 = vrot.slane %v662_v4, 1 }
 0x17e   : > { %v1343_v63 = vrot.slane %v920_v57, 2  ;;  %v7906_v2 = vpop.f32.mrb[6].mxu1  ;;  %7983 = vmatprep.mubr.bf16.mxu0 %v9127_v14 }
 0x17f   : > { %v1348_v3 = vrot.slane %v7906_v2, 2  ;;  %v923_v5 = vpop.f32.mrb[7].mxu1  ;;  %v9312_v55 = vadd.f32 %v1341_v44, %v1257_v24 }
 0x180   : > { %v1345_v8 = vrot.slane %v923_v5, 2  ;;  %v1344_v50 = vsel %vm1336_vm1, %v1342_v61, %v1343_v63  ;;  %v666_v9 = vpop.f32.mrb[8].mxu0 }
 0x181   : > { %1897 = vmatmul.mubr.bf16.gmra.mrb[112].mxu1 %v9300_v46  ;;  %v1349_v25 = vsel %vm1336_vm1, %v1347_v54, %v1348_v3  ;;  %v668_v62 = vpop.f32.mrb[9].mxu0 }
 0x182   : > { %1905 = vmatprep.mubr.bf16.mxu1 %v11125_v0  ;;  %v1346_v51 = vsel %vm1336_vm1, %v1343_v63, %v1345_v8  ;;  %v1150_v13 = vrot.slane %v668_v62, 1  ;;  %v670_v18 = vpop.f32.mrb[10].mxu0 }
 0x183   : > { %v671_v14 = vpop.f32.mrb[11].mxu0 }
 0x184   : > { %v7909_v59 = vpop.f32.mrb[8].mxu1  ;;  %v1151_v28 = vsel %vm1143_vm0, %v1149_v6, %v1150_v13  ;;  %v1152_v31 = vrot.slane %v671_v14, 1 }
 0x185   : > { %v1353_v10 = vrot.slane %v7909_v59, 2  ;;  %v936_v11 = vpop.f32.mrb[9].mxu1  ;;  %7984 = vmatmul.mubr.bf16.gmra.mrb[116].mxu0 %v9140_v22  ;;  %v1258_v26 = vadd.f32 %v1151_v28, %v660_v1 }
 0x186   : > { %v1350_v17 = vrot.slane %v936_v11, 2  ;;  %v7910_v20 = vpop.f32.mrb[10].mxu1  ;;  %v1153_v37 = vsel %vm1143_vm0, %v1150_v13, %v1152_v31  ;;  %7987 = vmatprep.mubr.bf16.mxu0 %v9154_v27 }
 0x187   : > { %v1355_v16 = vrot.slane %v7910_v20, 2  ;;  %v939_v21 = vpop.f32.mrb[11].mxu1  ;;  %v9331_v19 = vadd.f32 %v1344_v50, %v1258_v26  ;;  %v1259_v23 = vadd.f32 %v1153_v37, %v666_v9 }
 0x188   : > { %v1352_v29 = vrot.slane %v939_v21, 2  ;;  %v1351_v34 = vsel %vm1336_vm1, %v1348_v3, %v1350_v17  ;;  %v675_v44 = vpop.f32.mrb[12].mxu0 }
 0x189   : > { %1906 = vmatmul.mubr.bf16.gmra.mrb[116].mxu1 %v9316_v12  ;;  %v9323_v30 = vsel %vm1336_vm1, %v1353_v10, %v1355_v16  ;;  %v677_v49 = vpop.f32.mrb[13].mxu0  ;;  %v9337_v53 = vadd.f32 %v1346_v51, %v1259_v23 }
 0x18a   : > { %1914 = vmatprep.mubr.bf16.mxu1 %v11125_v0  ;;  %v9329_v38 = vsel %vm1336_vm1, %v1352_v29, %v1353_v10  ;;  %v679_v57 = vpop.f32.mrb[14].mxu0  ;;  %v1154_v63 = vrot.slane %v677_v49, 1 }
 0x18b   : > { %v681_v61 = vpop.f32.mrb[15].mxu0 }
 0x18c   : > { %v7913_v45 = vpop.f32.mrb[12].mxu1  ;;  %v1155_v1 = vrot.slane %v681_v61, 1 }
 0x18d   : > { %v952_v22 = vpop.f32.mrb[13].mxu1  ;;  %v1360_v54 = vrot.slane %v7913_v45, 2  ;;  %7988 = vmatmul.mubr.bf16.gmra.mrb[120].mxu0 %v9176_v36  ;;  %v9352_v36 = vpack.c.bf16 %v9188_v39, %v9174_v35 }
 0x18e   : > { %v1357_v56 = vrot.slane %v952_v22, 2  ;;  %v7914_v27 = vpop.f32.mrb[14].mxu1  ;;  %v1156_v3 = vsel %vm1143_vm0, %v1154_v63, %v1155_v1  ;;  %7991 = vmatprep.mubr.bf16.mxu0 %v9194_v41 }
 0x18f   : > { %v955_v60 = vpop.f32.mrb[15].mxu1  ;;  %v1260_v4 = vadd.f32 %v1156_v3, %v675_v44  ;;  %v1362_v9 = vrot.slane %v7914_v27, 2 }
 0x190   : > { %v1358_v2 = vrot.slane %v955_v60, 2  ;;  %v685_v5 = vpop.f32.mrb[16].mxu0 }
 0x191   : > { %1915 = vmatmul.mubr.bf16.gmra.mrb[120].mxu1 %v9335_v52  ;;  %v686_v50 = vpop.f32.mrb[17].mxu0  ;;  %v9354_v51 = vadd.f32 %v1349_v25, %v1260_v4  ;;  %v1550_v4 = vpack.c.bf16 %v9212_v47, %v9198_v43  ;;  %v1526_v43 = vld [vmem:[#allocation2 + $0x180] sm:$0xff] }
 0x192   : > { %1924 = vmatprep.mubr.bf16.mxu1 %v11125_v0  ;;  %v9345_v32 = vsel %vm1336_vm1, %v1357_v56, %v1358_v2  ;;  %v9348_v33 = vsel %vm1336_vm1, %v1358_v2, %v1360_v54  ;;  %v1157_v41 = vrot.slane %v686_v50, 1  ;;  %v688_v10 = vpop.f32.mrb[18].mxu0 }
 0x193   : > { %v690_v6 = vpop.f32.mrb[19].mxu0 }
 0x194   : > { %v7917_v7 = vpop.f32.mrb[16].mxu1  ;;  %v1158_v17 = vsel %vm1143_vm0, %v1155_v1, %v1157_v41  ;;  %v1159_v26 = vrot.slane %v690_v6, 1 }
 0x195   : > { %v1367_v8 = vrot.slane %v7917_v7, 2  ;;  %v968_v24 = vpop.f32.mrb[17].mxu1  ;;  %7992 = vmatmul.mubr.bf16.gmra.mrb[124].mxu0 %v9289_v15  ;;  %v1261_v35 = vadd.f32 %v1158_v17, %v679_v57  ;;  %v1549_v15 = vpack.c.bf16 %v9196_v42, %v9192_v40 }
 0x196   : > { %v1363_v59 = vrot.slane %v968_v24, 2  ;;  %v7918_v62 = vpop.f32.mrb[18].mxu1  ;;  %7995 = vmatprep.mubr.bf16.mxu0 %v9300_v46 }
 0x197   : > { %v1368_v11 = vrot.slane %v7918_v62, 2  ;;  %v971_v13 = vpop.f32.mrb[19].mxu1  ;;  %v9370_v16 = vadd.f32 %v1351_v34, %v1261_v35 }
 0x198   : > { %v1365_v18 = vrot.slane %v971_v13, 2  ;;  %v9358_v20 = vsel %vm1336_vm1, %v1362_v9, %v1363_v59  ;;  %v694_v14 = vpop.f32.mrb[20].mxu0 }
 0x199   : > { %1925 = vmatmul.mubr.bf16.gmra.mrb[124].mxu1 %v9352_v36  ;;  %v9363_v39 = vsel %vm1336_vm1, %v1367_v8, %v1368_v11  ;;  %v696_v31 = vpop.f32.mrb[21].mxu0 }
 0x19a   : > { %1933 = vmatprep.mubr.bf16.mxu1 %v11125_v0  ;;  %v9368_v25 = vsel %vm1336_vm1, %v1363_v59, %v1365_v18  ;;  %v1160_v37 = vrot.slane %v696_v31, 1  ;;  %v698_v44 = vpop.f32.mrb[22].mxu0 }
 0x19b   : > { %v699_v46 = vpop.f32.mrb[23].mxu0 }
 0x19c   : > { %v7921_v21 = vpop.f32.mrb[20].mxu1  ;;  %v1161_v54 = vsel %vm1143_vm0, %v1159_v26, %v1160_v37  ;;  %v1162_v34 = vrot.slane %v699_v46, 1  ;;  %v1528_v46 = vld [vmem:[#allocation2 + $0x190] sm:$0xff] }
 0x19d   : > { %v1373_v28 = vrot.slane %v7921_v21, 2  ;;  %v984_v29 = vpop.f32.mrb[21].mxu1  ;;  %7996 = vmatmul.mubr.bf16.gmra.mrb[128].mxu0 %v9316_v12  ;;  %v1262_v27 = vadd.f32 %v1161_v54, %v688_v10  ;;  %v2613_v54 = vld [vmem:[#allocation2 + $0x30] sm:$0xff] }
 0x19e   : > { %v1370_v23 = vrot.slane %v984_v29, 2  ;;  %v7922_v45 = vpop.f32.mrb[22].mxu1  ;;  %v1163_v42 = vsel %vm1143_vm0, %v1160_v37, %v1162_v34  ;;  %7999 = vmatprep.mubr.bf16.mxu0 %v9335_v52  ;;  %v2614_v34 = vld [vmem:[#allocation2 + $0x38] sm:$0xff] }
 0x19f   : > { %v1375_v49 = vrot.slane %v7922_v45, 2  ;;  %v987_v22 = vpop.f32.mrb[23].mxu1  ;;  %v9389_v60 = vadd.f32 %v9329_v38, %v1262_v27  ;;  %v1263_v63 = vadd.f32 %v1163_v42, %v694_v14 }
 0x1a0   : > { %v1372_v56 = vrot.slane %v987_v22, 2  ;;  %v9376_v57 = vsel %vm1336_vm1, %v1368_v11, %v1370_v23  ;;  %v703_v1 = vpop.f32.mrb[24].mxu0 }
 0x1a1   : > { %1934 = vmatmul.mubr.bf16.gmra.mrb[128].mxu1 %v1549_v15  ;;  %v9380_v40 = vsel %vm1336_vm1, %v1373_v28, %v1375_v49  ;;  %v705_v12 = vpop.f32.mrb[25].mxu0  ;;  %v9394_v5 = vadd.f32 %v9323_v30, %v1263_v63 }
 0x1a2   : > { %1942 = vmatprep.mubr.bf16.mxu1 %v11125_v0  ;;  %v9386_v61 = vsel %vm1336_vm1, %v1372_v56, %v1373_v28  ;;  %v707_v52 = vpop.f32.mrb[26].mxu0  ;;  %v1164_v41 = vrot.slane %v705_v12, 1 }
 0x1a3   : > { %v709_v24 = vpop.f32.mrb[27].mxu0 }
 0x1a4   : > { %v7925_v2 = vpop.f32.mrb[24].mxu1  ;;  %v1165_v38 = vrot.slane %v709_v24, 1 }
 0x1a5   : > { %v1000_v3 = vpop.f32.mrb[25].mxu1  ;;  %v1380_v7 = vrot.slane %v7925_v2, 2  ;;  %8000 = vmatmul.mubr.bf16.gmra.mrb[132].mxu0 %v9352_v36  ;;  %v1551_v36 = vpack.c.bf16 %v1526_v43, %v9214_v48 }
 0x1a6   : > { %v1377_v8 = vrot.slane %v1000_v3, 2  ;;  %v7926_v50 = vpop.f32.mrb[26].mxu1  ;;  %v1166_v10 = vsel %vm1143_vm0, %v1164_v41, %v1165_v38  ;;  %8003 = vmatprep.mubr.bf16.mxu0 %v1549_v15 }
 0x1a7   : > { %v1003_v9 = vpop.f32.mrb[27].mxu1  ;;  %v1264_v62 = vadd.f32 %v1166_v10, %v703_v1  ;;  %v1382_v29 = vrot.slane %v7926_v50, 2  ;;  %v2661_v50 = vpack.c.bf16 %v2614_v34, %v2613_v54 }
 0x1a8   : > { %v1378_v59 = vrot.slane %v1003_v9, 2  ;;  %v713_v11 = vpop.f32.mrb[28].mxu0 }
 0x1a9   : > { %1943 = vmatmul.mubr.bf16.gmra.mrb[132].mxu1 %v1550_v4  ;;  %v714_v17 = vpop.f32.mrb[29].mxu0  ;;  %v9407_v35 = vadd.f32 %v9345_v32, %v1264_v62  ;;  %v9417_v32 = vld [vmem:[#allocation2 + $0x188] sm:$0xff] }
 0x1aa   : > { %1952 = vmatprep.mubr.bf16.mxu1 %v11125_v0  ;;  %v9400_v47 = vsel %vm1336_vm1, %v1377_v8, %v1378_v59  ;;  %v9403_v30 = vsel %vm1336_vm1, %v1378_v59, %v1380_v7  ;;  %v1167_v14 = vrot.slane %v714_v17, 1  ;;  %v716_v28 = vpop.f32.mrb[30].mxu0  ;;  %v1552_v12 = vpack.c.bf16 %v1528_v46, %v9417_v32 }
 0x1ab   : > { %v718_v26 = vpop.f32.mrb[31].mxu0 }
 0x1ac   : > { %v7929_v6 = vpop.f32.mrb[28].mxu1  ;;  %v1168_v23 = vsel %vm1143_vm0, %v1165_v38, %v1167_v14  ;;  %v1169_v3 = vrot.slane %v718_v26, 1 }
 0x1ad   : > { %v1387_v13 = vrot.slane %v7929_v6, 2  ;;  %v1016_v18 = vpop.f32.mrb[29].mxu1  ;;  %8004 = vmatmul.mubr.bf16.gmra.mrb[136].mxu0 %v1550_v4  ;;  %v1265_v45 = vadd.f32 %v1168_v23, %v707_v52  ;;  %v2615_v6 = vld [vmem:[#allocation2 + $0x40] sm:$0xff] }
 0x1ae   : > { %v1383_v21 = vrot.slane %v1016_v18, 2  ;;  %v7930_v31 = vpop.f32.mrb[30].mxu1  ;;  %8007 = vmatprep.mubr.bf16.mxu0 %v1551_v36  ;;  %v2617_v18 = vld [vmem:[#allocation2 + $0x50] sm:$0xff] }
 0x1af   : > { %v1388_v15 = vrot.slane %v7930_v31, 2  ;;  %v1019_v37 = vpop.f32.mrb[31].mxu1  ;;  %v9423_v56 = vadd.f32 %v9348_v33, %v1265_v45 }
 0x1b0   : > { %v1385_v44 = vrot.slane %v1019_v37, 2  ;;  %v9411_v49 = vsel %vm1336_vm1, %v1382_v29, %v1383_v21  ;;  %v722_v27 = vpop.f32.mrb[32].mxu0 }
 0x1b1   : > { %1953 = vmatmul.mubr.bf16.gmra.mrb[136].mxu1 %v1551_v36  ;;  %v9414_v48 = vsel %vm1336_vm1, %v1387_v13, %v1388_v15  ;;  %v724_v1 = vpop.f32.mrb[33].mxu0  ;;  %v2616_v13 = vld [vmem:[#allocation2 + $0x48] sm:$0xff]  ;;  %v2618_v36 = vld [vmem:[#allocation2 + $0x58] sm:$0xff] }
 0x1b2   : > { %1961 = vmatprep.mubr.bf16.mxu1 %v11125_v0  ;;  %v9420_v22 = vsel %vm1336_vm1, %v1383_v21, %v1385_v44  ;;  %v1170_v4 = vrot.slane %v724_v1, 1  ;;  %v726_v8 = vpop.f32.mrb[34].mxu0  ;;  %v2662_v26 = vpack.c.bf16 %v2616_v13, %v2615_v6  ;;  %v9444_v54 = vpack.c.bf16 %v2618_v36, %v2617_v18 }
 0x1b3   : > { %v727_v9 = vpop.f32.mrb[35].mxu0 }
 0x1b4   : > { %v7933_v42 = vpop.f32.mrb[32].mxu1  ;;  %v1171_v38 = vsel %vm1143_vm0, %v1169_v3, %v1170_v4  ;;  %v1172_v33 = vrot.slane %v727_v9, 1 }
 0x1b5   : > { %v1393_v63 = vrot.slane %v7933_v42, 2  ;;  %v1032_v2 = vpop.f32.mrb[33].mxu1  ;;  %8008 = vmatmul.mubr.bf16.gmra.mrb[140].mxu0 %v1552_v12  ;;  %v1266_v43 = vadd.f32 %v1171_v38, %v716_v28 }
 0x1b6   : > { %v1390_v7 = vrot.slane %v1032_v2, 2  ;;  %v7934_v52 = vpop.f32.mrb[34].mxu1  ;;  %v1173_v11 = vsel %vm1143_vm0, %v1170_v4, %v1172_v33  ;;  %2878 = vmatprep.mubr.bf16.mxu0 %v11125_v0  ;;  %v2620_v2 = vld [vmem:[#allocation2 + $0x68] sm:$0xff]  ;;  %v2621_v4 = vld [vmem:[#allocation2 + $0x70] sm:$0xff] }
 0x1b7   : > { %v1395_v24 = vrot.slane %v7934_v52, 2  ;;  %v1035_v41 = vpop.f32.mrb[35].mxu1  ;;  %v9439_v14 = vadd.f32 %v9358_v20, %v1266_v43  ;;  %v1267_v21 = vadd.f32 %v1173_v11, %v722_v27 }
 0x1b8   : > { %v1392_v59 = vrot.slane %v1035_v41, 2  ;;  %v9428_v10 = vsel %vm1336_vm1, %v1388_v15, %v1390_v7  ;;  %v731_v28 = vpop.f32.mrb[36].mxu0  ;;  %v2622_v7 = vld [vmem:[#allocation2 + $0x78] sm:$0xff] }
 0x1b9   : > { %1962 = vmatmul.mubr.bf16.gmra.mrb[140].mxu1 %v1552_v12  ;;  %v9431_v62 = vsel %vm1336_vm1, %v1393_v63, %v1395_v24  ;;  %v733_v29 = vpop.f32.mrb[37].mxu0  ;;  %v9442_v37 = vadd.f32 %v9368_v25, %v1267_v21  ;;  %v2619_v25 = vld [vmem:[#allocation2 + $0x60] sm:$0xff]  ;;  %v9460_v18 = vpack.c.bf16 %v2622_v7, %v2621_v4 }
 0x1ba   : > { %8027 = vmatprep.mubr.bf16.mxu1 %v2661_v50  ;;  %v9436_v17 = vsel %vm1336_vm1, %v1392_v59, %v1393_v63  ;;  %v735_v45 = vpop.f32.mrb[38].mxu0  ;;  %v1174_v63 = vrot.slane %v733_v29, 1  ;;  %v9455_v38 = vpack.c.bf16 %v2620_v2, %v2619_v25 }
 0x1bb   : > { %v737_v34 = vpop.f32.mrb[39].mxu0 }
 0x1bc   : > { %v7937_v31 = vpop.f32.mrb[36].mxu1  ;;  %v1175_v20 = vrot.slane %v737_v34, 1 }
 0x1bd   : > { %v1048_v15 = vpop.f32.mrb[37].mxu1  ;;  %v1400_v23 = vrot.slane %v7937_v31, 2  ;;  %2879 = vmatmul.mubr.bf16.vlgmr.msra.gmra.mrb[144].mxu0 %v2661_v50  ;;  %v8440_v31 = vld [vmem:[#allocation9 + $0x4] ss:$12 sps:$4 sm:$0xff]  }
 0x1be   : > { %v1397_v44 = vrot.slane %v1048_v15, 2  ;;  %v7938_v46 = vpop.f32.mrb[38].mxu1  ;;  %v1176_v27 = vsel %vm1143_vm0, %v1174_v63, %v1175_v20  ;;  %2888 = vmatprep.mubr.bf16.mxu0 %v11125_v0  ;;  %v2624_v63 = vld [vmem:[#allocation2 + $0x88] sm:$0xff]  ;;  %4123 = vmatprep.subr.bf16.mxu1 %v8440_v31 }
 0x1bf   : > { %v1051_v42 = vpop.f32.mrb[39].mxu1  ;;  %v1268_v8 = vadd.f32 %v1176_v27, %v731_v28  ;;  %v1402_v59 = vrot.slane %v7938_v46, 2 }
 0x1c0   : > { %v1398_v1 = vrot.slane %v1051_v42, 2  ;;  %v741_v52 = vpop.f32.mrb[40].mxu0 }
 0x1c1   : > { %8028 = vmatmul.mubr.bf16.vlgmr.msra.gmra.mrb[144].mxu1 %v2662_v26  ;;  %v742_v9 = vpop.f32.mrb[41].mxu0  ;;  %v9458_v33 = vadd.f32 %v9363_v39, %v1268_v8  ;;  %v2623_v39 = vld [vmem:[#allocation2 + $0x80] sm:$0xff] }
 0x1c2   : > { %8031 = vmatprep.mubr.bf16.mxu1 %v9444_v54  ;;  %v9450_v12 = vsel %vm1336_vm1, %v1397_v44, %v1398_v1  ;;  %v9453_v3 = vsel %vm1336_vm1, %v1398_v1, %v1400_v23  ;;  %v1177_v43 = vrot.slane %v742_v9, 1  ;;  %v744_v6 = vpop.f32.mrb[42].mxu0  ;;  %v8438_v23 = vld [vmem:[#allocation9] ss:$12 sps:$4 sm:$0xff]   ;;  %v8441_v44 = vld [vmem:[#allocation9 + $0x8] ss:$12 sps:$4 sm:$0xff]   ;;  %v9478_v7 = vpack.c.bf16 %v2624_v63, %v2623_v39 }
 0x1c3   : > { %v746_v21 = vpop.f32.mrb[43].mxu0  ;;  %v2626_v1 = vld [vmem:[#allocation2 + $0x98] sm:$0xff]  ;;  %8075 = vmatprep.subr.bf16.mxu0 %v8441_v44  ;;  %4124 = vmatpush1.bf16.msra.mxu1 %v8438_v23  ;;  %v2627_v39 = vld [vmem:[#allocation2 + $0xa0] sm:$0xff] }
 0x1c4   : > { %v7941_v50 = vpop.f32.mrb[40].mxu1  ;;  %v1178_v29 = vsel %vm1143_vm0, %v1175_v20, %v1177_v43  ;;  %v2625_v20 = vld [vmem:[#allocation2 + $0x90] sm:$0xff]  ;;  %8076 = vmatpush3.bf16.msra.mxu0 %v8441_v44  ;;  %v1179_v52 = vrot.slane %v746_v21, 1  ;;  %v8444_v23 = vld [vmem:[#allocation9 + $0x1c] ss:$12 sps:$4 sm:$0xff]  }
 0x1c5   : > { %v1407_v24 = vrot.slane %v7941_v50, 2  ;;  %v1064_v41 = vpop.f32.mrb[41].mxu1  ;;  %2889 = vmatmul.mubr.bf16.gmra.mrb[148].mxu0 %v2662_v26  ;;  %v1269_v46 = vadd.f32 %v1178_v29, %v735_v45  ;;  %v9480_v8 = vpack.c.bf16 %v2626_v1, %v2625_v20  ;;  %v2630_v20 = vld [vmem:[#allocation2 + $0xb8] sm:$0xff]  ;;  %4125 = vmatprep.subr.bf16.mxu1 %v8444_v23 }
 0x1c6   : > { %v1403_v11 = vrot.slane %v1064_v41, 2  ;;  %v7942_v13 = vpop.f32.mrb[42].mxu1  ;;  %2897 = vmatprep.mubr.bf16.mxu0 %v11125_v0  ;;  %v2634_v23 = vld [vmem:[#allocation2 + $0xd8] sm:$0xff] }
 0x1c7   : > { %v1408_v36 = vrot.slane %v7942_v13, 2  ;;  %v1067_v28 = vpop.f32.mrb[43].mxu1  ;;  %v9476_v25 = vadd.f32 %v9376_v57, %v1269_v46  ;;  %v2628_v46 = vld [vmem:[#allocation2 + $0xa8] sm:$0xff] }
 0x1c8   : > { %v1405_v15 = vrot.slane %v1067_v28, 2  ;;  %v9464_v34 = vsel %vm1336_vm1, %v1402_v59, %v1403_v11  ;;  %v750_v26 = vpop.f32.mrb[44].mxu0 }
 0x1c9   : > { %8032 = vmatmul.mubr.bf16.gmra.mrb[148].mxu1 %v9455_v38  ;;  %v9468_v42 = vsel %vm1336_vm1, %v1407_v24, %v1408_v36  ;;  %v752_v2 = vpop.f32.mrb[45].mxu0 }
 0x1ca   : > { %8035 = vmatprep.mubr.bf16.mxu1 %v9460_v18  ;;  %v9473_v27 = vsel %vm1336_vm1, %v1403_v11, %v1405_v15  ;;  %v1180_v24 = vrot.slane %v752_v2, 1  ;;  %v754_v41 = vpop.f32.mrb[46].mxu0  ;;  %v8442_v15 = vld [vmem:[#allocation9 + $0x18] ss:$12 sps:$4 sm:$0xff]  }
 0x1cb   : > { %v755_v43 = vpop.f32.mrb[47].mxu0  ;;  %4126 = vmatpush1.bf16.msra.mxu1 %v8442_v15  ;;  %v2632_v15 = vld [vmem:[#allocation2 + $0xc8] sm:$0xff] }
 0x1cc   : > { %v7945_v45 = vpop.f32.mrb[44].mxu1  ;;  %v1181_v13 = vsel %vm1143_vm0, %v1179_v52, %v1180_v24  ;;  %v1182_v28 = vrot.slane %v755_v43, 1 }
 0x1cd   : > { %v1080_v4 = vpop.f32.mrb[45].mxu1  ;;  %v1413_v50 = vrot.slane %v7945_v45, 2  ;;  %2898 = vmatmul.mubr.bf16.gmra.mrb[152].mxu0 %v9444_v54  ;;  %v1270_v29 = vadd.f32 %v1181_v13, %v744_v6  ;;  %v2629_v6 = vld [vmem:[#allocation2 + $0xb0] sm:$0xff] }
 0x1ce   : > { %v1410_v9 = vrot.slane %v1080_v4, 2  ;;  %v7946_v59 = vpop.f32.mrb[46].mxu1  ;;  %v1183_v44 = vsel %vm1143_vm0, %v1180_v24, %v1182_v28  ;;  %2906 = vmatprep.mubr.bf16.mxu0 %v11125_v0  ;;  %v9506_v43 = vpack.c.bf16 %v2630_v20, %v2629_v6 }
 0x1cf   : > { %v1415_v57 = vrot.slane %v7946_v59, 2  ;;  %v1083_v11 = vpop.f32.mrb[47].mxu1  ;;  %v9498_v1 = vadd.f32 %v9386_v61, %v1270_v29  ;;  %v2631_v29 = vld [vmem:[#allocation2 + $0xc0] sm:$0xff] }
 0x1d0   : > { %v1412_v31 = vrot.slane %v1083_v11, 2  ;;  %v9486_v21 = vsel %vm1336_vm1, %v1408_v36, %v1410_v9  ;;  %v1271_v36 = vadd.f32 %v1183_v44, %v750_v26  ;;  %v759_v45 = vpop.f32.mrb[48].mxu0  ;;  %v9501_v9 = vpack.c.bf16 %v2628_v46, %v2627_v39 }
 0x1d1   : > { %8036 = vmatmul.mubr.bf16.gmra.mrb[152].mxu1 %v9478_v7  ;;  %v9495_v54 = vsel %vm1336_vm1, %v1413_v50, %v1415_v57  ;;  %v761_v52 = vpop.f32.mrb[49].mxu0 }
 0x1d2   : > { %8039 = vmatprep.mubr.bf16.mxu1 %v9480_v8  ;;  %v9492_v63 = vsel %vm1336_vm1, %v1412_v31, %v1413_v50  ;;  %v9504_v41 = vadd.f32 %v9380_v40, %v1271_v36  ;;  %v763_v59 = vpop.f32.mrb[50].mxu0  ;;  %v1184_v13 = vrot.slane %v761_v52, 1  ;;  %v9517_v36 = vpack.c.bf16 %v2632_v15, %v2631_v29  ;;  %v8445_v29 = vld [vmem:[#allocation9 + $0x30] ss:$12 sps:$4 sm:$0xff]   ;;  %v8448_v15 = vld [vmem:[#allocation9 + $0x20] ss:$12 sps:$4 sm:$0xff]  }
 0x1d3   : > { %v765_v26 = vpop.f32.mrb[51].mxu0  ;;  %8077 = vmatprep.subr.bf16.mxu0 %v8448_v15 }
 0x1d4   : > { %v1748_v2 = vpop.f32.mrb[48].mxu1  ;;  %v1185_v28 = vrot.slane %v765_v26, 1  ;;  %8078 = vmatpush3.bf16.msra.mxu0 %v8448_v15 }
 0x1d5   : > { %v2196_v4 = vadd.f32 %v1748_v2, %v9302_v58  ;;  %v1750_v24 = vpop.f32.mrb[49].mxu1  ;;  %2907 = vmatmul.mubr.bf16.gmra.mrb[156].mxu0 %v9455_v38 }
 0x1d6   : > { %v2276_v50 = vrot.slane %v1750_v24, 1  ;;  %v1752_v57 = vpop.f32.mrb[50].mxu1  ;;  %v1186_v58 = vsel %vm1143_vm0, %v1184_v13, %v1185_v28  ;;  %2916 = vmatprep.mubr.bf16.mxu0 %v11125_v0  ;;  %v8447_v13 = vld [vmem:[#allocation9 + $0x34] ss:$12 sps:$4 sm:$0xff]  }
 0x1d7   : > { %v2197_v61 = vadd.f32 %v1752_v57, %v9312_v55  ;;  %v1754_v11 = vpop.f32.mrb[51].mxu1  ;;  %v2633_v55 = vld [vmem:[#allocation2 + $0xd0] sm:$0xff]  ;;  %v1272_v44 = vadd.f32 %v1186_v58, %v759_v45  ;;  %4127 = vmatprep.subr.bf16.mxu1 %v8447_v13 }
 0x1d8   : > { %v2277_v31 = vrot.slane %v1754_v11, 1  ;;  %v769_v46 = vpop.f32.mrb[52].mxu0  ;;  %v9522_v26 = vpack.c.bf16 %v2634_v23, %v2633_v55  ;;  %v2637_v55 = vld [vmem:[#allocation2 + $0xf0] sm:$0xff]  ;;  %v2638_v23 = vld [vmem:[#allocation2 + $0xf8] sm:$0xff]  ;;  %4128 = vmatpush1.bf16.msra.mxu1 %v8445_v29 }
 0x1d9   : > { %8040 = vmatmul.mubr.bf16.gmra.mrb[156].mxu1 %v9501_v9  ;;  %v770_v38 = vpop.f32.mrb[53].mxu0  ;;  %v9520_v2 = vadd.f32 %v9400_v47, %v1272_v44  ;;  %v2635_v47 = vld [vmem:[#allocation2 + $0xe0] sm:$0xff] }
 0x1da   : > { %v2278_v40 = vsel %vm1143_vm0, %v2276_v50, %v2277_v31  ;;  %8043 = vmatprep.mubr.bf16.mxu1 %v9506_v43  ;;  %v1187_v52 = vrot.slane %v770_v38, 1  ;;  %v772_v50 = vpop.f32.mrb[54].mxu0 }
 0x1db   : > { %v9515_v39 = vadd.f32 %v2278_v40, %v2196_v4  ;;  %v774_v45 = vpop.f32.mrb[55].mxu0 }
 0x1dc   : > { %v1758_v6 = vpop.f32.mrb[52].mxu1  ;;  %v1188_v58 = vsel %vm1143_vm0, %v1185_v28, %v1187_v52  ;;  %v9539_v52 = vpack.c.bf16 %v2638_v23, %v2637_v55 }
 0x1dd   : > { %v1759_v20 = vpop.f32.mrb[53].mxu1  ;;  %2917 = vmatmul.mubr.bf16.gmra.mrb[160].mxu0 %v9460_v18  ;;  %v1273_v44 = vadd.f32 %v1188_v58, %v763_v59 }
 0x1de   : > { %v2279_v24 = vrot.slane %v1759_v20, 1  ;;  %v1761_v57 = vpop.f32.mrb[54].mxu1  ;;  %2925 = vmatprep.mubr.bf16.mxu0 %v11125_v0 }
 0x1df   : > { %v2198_v11 = vadd.f32 %v1761_v57, %v9331_v19  ;;  %v1763_v4 = vpop.f32.mrb[55].mxu1  ;;  %v2636_v19 = vld [vmem:[#allocation2 + $0xe8] sm:$0xff]  ;;  %v9534_v28 = vadd.f32 %v9403_v30, %v1273_v44 }
 0x1e0   : > { %v2280_v40 = vsel %vm1143_vm0, %v2277_v31, %v2279_v24  ;;  %v778_v31 = vpop.f32.mrb[56].mxu0  ;;  %v9537_v20 = vpack.c.bf16 %v2636_v19, %v2635_v47  ;;  %v1189_v24 = vrot.slane %v774_v45, 1  ;;  %v8449_v19 = vld [vmem:[#allocation9 + $0x48] ss:$12 sps:$4 sm:$0xff]   ;;  %v8451_v45 = vld [vmem:[#allocation9 + $0x4c] ss:$12 sps:$4 sm:$0xff]  }
 0x1e1   : > { %8044 = vmatmul.mubr.bf16.gmra.mrb[160].mxu1 %v9517_v36  ;;  %v9531_v46 = vadd.f32 %v2280_v40, %v2197_v61  ;;  %v780_v6 = vpop.f32.mrb[57].mxu0  ;;  %v2281_v61 = vrot.slane %v1763_v4, 1  ;;  %4129 = vmatprep.subr.bf16.mxu1 %v8451_v45 }
 0x1e2   : > { %8047 = vmatprep.mubr.bf16.mxu1 %v9522_v26  ;;  %v1190_v57 = vrot.slane %v780_v6, 1  ;;  %v782_v30 = vpop.f32.mrb[58].mxu0  ;;  %v2639_v6 = vld [vmem:[#allocation2 + $0x100] sm:$0xff]  ;;  %4130 = vmatpush1.bf16.msra.mxu1 %v8449_v19 }
 0x1e3   : > { %v783_v13 = vpop.f32.mrb[59].mxu0 }
 0x1e4   : > { %v1767_v18 = vpop.f32.mrb[56].mxu1  ;;  %v1191_v0 = vsel %vm1143_vm0, %v1189_v24, %v1190_v57  ;;  %v1192_v15 = vrot.slane %v783_v13, 1  ;;  %v2641_v24 = vld [vmem:[#allocation2 + $0x110] sm:$0xff] }
 0x1e5   : > { %v2199_v59 = vadd.f32 %v1767_v18, %v9337_v53  ;;  %v1769_v38 = vpop.f32.mrb[57].mxu1  ;;  %2926 = vmatmul.mubr.bf16.gmra.mrb[164].mxu0 %v9478_v7  ;;  %v1274_v47 = vadd.f32 %v1191_v0, %v772_v50  ;;  %v11148_v18 = vmov 0  }
 0x1e6   : > { %v2282_v58 = vrot.slane %v1769_v38, 1  ;;  %v1771_v40 = vpop.f32.mrb[58].mxu1  ;;  %v1193_v55 = vsel %vm1143_vm0, %v1190_v57, %v1192_v15  ;;  %2934 = vmatprep.mubr.bf16.mxu0 %v11148_v18  ;;  %v2640_v38 = vld [vmem:[#allocation2 + $0x108] sm:$0xff] }
 0x1e7   : > { %v1772_v44 = vpop.f32.mrb[59].mxu1  ;;  %v9552_v7 = vadd.f32 %v9411_v49, %v1274_v47  ;;  %v1275_v0 = vadd.f32 %v1193_v55, %v778_v31  ;;  %v9557_v13 = vpack.c.bf16 %v2640_v38, %v2639_v6  ;;  %v2644_v6 = vld [vmem:[#allocation2 + $0x128] sm:$0xff]  ;;  %v2646_v38 = vld [vmem:[#allocation2 + $0x138] sm:$0xff] }
 0x1e8   : > { %v2283_v29 = vsel %vm1143_vm0, %v2281_v61, %v2282_v58  ;;  %v2284_v53 = vrot.slane %v1772_v44, 1  ;;  %v2642_v61 = vld [vmem:[#allocation2 + $0x118] sm:$0xff] }
 0x1e9   : > { %8048 = vmatmul.mubr.bf16.gmra.mrb[164].mxu1 %v9537_v20  ;;  %v9545_v4 = vadd.f32 %v2283_v29, %v2198_v11  ;;  %v787_v11 = vpop.f32.mrb[60].mxu0  ;;  %v9560_v44 = vadd.f32 %v9420_v22, %v1275_v0 }
 0x1ea   : > { %v2285_v23 = vsel %vm1143_vm0, %v2282_v58, %v2284_v53  ;;  %8051 = vmatprep.mubr.bf16.mxu1 %v9539_v52  ;;  %v789_v58 = vpop.f32.mrb[61].mxu0  ;;  %v9562_v53 = vpack.c.bf16 %v2642_v61, %v2641_v24 }
 0x1eb   : > { %v9554_v50 = vadd.f32 %v2285_v23, %v2199_v59  ;;  %11150 = vst [vmem:[#allocation15_spill] sm:$0xff] %v9560_v44  ;;  %v791_v15 = vpop.f32.mrb[62].mxu0  ;;  %v1194_v45 = vrot.slane %v789_v58, 1  ;;  %v2643_v23 = vld [vmem:[#allocation2 + $0x120] sm:$0xff] }
 0x1ec   : > { %v1776_v30 = vpop.f32.mrb[60].mxu1  ;;  %v793_v59 = vpop.f32.mrb[63].mxu0 }
 0x1ed   : > { %11149 = vst [vmem:[#allocation14_spill] sm:$0xff] %v9554_v50  ;;  %v2200_v57 = vadd.f32 %v1776_v30, %v9354_v51  ;;  %v1778_v40 = vpop.f32.mrb[61].mxu1  ;;  %v1195_v19 = vrot.slane %v793_v59, 1  ;;  %2935 = vmatmul.mubr.bf16.gmra.mrb[168].mxu0 %v9480_v8 }
 0x1ee   : > { %v2286_v29 = vrot.slane %v1778_v40, 1  ;;  %v1780_v49 = vpop.f32.mrb[62].mxu1  ;;  %2944 = vmatprep.mubr.bf16.mxu0 %v11148_v18  ;;  %v9573_v40 = vpack.c.bf16 %v2644_v6, %v2643_v23  ;;  %v8452_v23 = vld [vmem:[#allocation9 + $0x60] ss:$12 sps:$4 sm:$0xff]   ;;  %v8455_v6 = vld [vmem:[#allocation9 + $0x38] ss:$12 sps:$4 sm:$0xff]  }
 0x1ef   : > { %v2201_v31 = vadd.f32 %v1780_v49, %v9370_v16  ;;  %v1782_v47 = vpop.f32.mrb[63].mxu1  ;;  %v1196_v51 = vsel %vm1143_vm0, %v1194_v45, %v1195_v19  ;;  %v2645_v16 = vld [vmem:[#allocation2 + $0x130] sm:$0xff]  ;;  %8079 = vmatprep.subr.bf16.mxu0 %v8455_v6 }
 0x1f0   : > { %v2287_v55 = vrot.slane %v1782_v47, 1  ;;  %v1276_v24 = vadd.f32 %v1196_v51, %v787_v11  ;;  %v797_v0 = vpop.f32.mrb[64].mxu0  ;;  %v9578_v44 = vpack.c.bf16 %v2646_v38, %v2645_v16  ;;  %v8454_v51 = vld [vmem:[#allocation9 + $0x64] ss:$12 sps:$4 sm:$0xff]   ;;  %v2650_v38 = vld [vmem:[#allocation2 + $0x158] sm:$0xff]  ;;  %8080 = vmatpush3.bf16.msra.mxu0 %v8455_v6 }
 0x1f1   : > { %8052 = vmatmul.mubr.bf16.gmra.mrb[168].mxu1 %v9557_v13  ;;  %v798_v8 = vpop.f32.mrb[65].mxu0  ;;  %v2649_v16 = vld [vmem:[#allocation2 + $0x150] sm:$0xff]  ;;  %4131 = vmatprep.subr.bf16.mxu1 %v8454_v51 }
 0x1f2   : > { %v2288_v22 = vsel %vm1143_vm0, %v2286_v29, %v2287_v55  ;;  %8055 = vmatprep.mubr.bf16.mxu1 %v9562_v53  ;;  %v9576_v49 = vadd.f32 %v9414_v48, %v1276_v24  ;;  %v1197_v29 = vrot.slane %v798_v8, 1  ;;  %v800_v47 = vpop.f32.mrb[66].mxu0  ;;  %v2647_v48 = vld [vmem:[#allocation2 + $0x140] sm:$0xff]  ;;  %4132 = vmatpush1.bf16.msra.mxu1 %v8452_v23 }
 0x1f3   : > { %v9571_v61 = vadd.f32 %v2288_v22, %v2200_v57  ;;  %v802_v11 = vpop.f32.mrb[67].mxu0 }
 0x1f4   : > { %v1786_v30 = vpop.f32.mrb[64].mxu1  ;;  %11151 = vst [vmem:[#allocation16_spill] sm:$0xff] %v9576_v49  ;;  %v1198_v22 = vsel %vm1143_vm0, %v1195_v19, %v1197_v29  ;;  %v9595_v29 = vpack.c.bf16 %v2650_v38, %v2649_v16  ;;  %v2651_v16 = vld [vmem:[#allocation2 + $0x160] sm:$0xff]  ;;  %v2652_v38 = vld [vmem:[#allocation2 + $0x168] sm:$0xff] }
 0x1f5   : > { %v1787_v58 = vpop.f32.mrb[65].mxu1  ;;  %2945 = vmatmul.mubr.bf16.gmra.mrb[172].mxu0 %v9501_v9  ;;  %v1277_v24 = vadd.f32 %v1198_v22, %v791_v15 }
 0x1f6   : > { %v2289_v59 = vrot.slane %v1787_v58, 1  ;;  %v1789_v45 = vpop.f32.mrb[66].mxu1  ;;  %2953 = vmatprep.mubr.bf16.mxu0 %v11148_v18 }
 0x1f7   : > { %v2202_v50 = vadd.f32 %v1789_v45, %v9389_v60  ;;  %v1791_v57 = vpop.f32.mrb[67].mxu1  ;;  %v2648_v60 = vld [vmem:[#allocation2 + $0x148] sm:$0xff]  ;;  %v9590_v19 = vadd.f32 %v9428_v10, %v1277_v24 }
 0x1f8   : > { %v2290_v0 = vsel %vm1143_vm0, %v2287_v55, %v2289_v59  ;;  %v806_v55 = vpop.f32.mrb[68].mxu0  ;;  %v9593_v58 = vpack.c.bf16 %v2648_v60, %v2647_v48  ;;  %v1199_v59 = vrot.slane %v802_v11, 1  ;;  %v2291_v45 = vrot.slane %v1791_v57, 1 }
 0x1f9   : > { %8056 = vmatmul.mubr.bf16.gmra.mrb[172].mxu1 %v9573_v40  ;;  %v9585_v30 = vadd.f32 %v2290_v0, %v2201_v31  ;;  %11153 = vst [vmem:[#allocation18_spill] sm:$0xff] %v9590_v19  ;;  %v808_v31 = vpop.f32.mrb[69].mxu0 }
 0x1fa   : > { %8059 = vmatprep.mubr.bf16.mxu1 %v9578_v44  ;;  %v1200_v22 = vrot.slane %v808_v31, 1  ;;  %v810_v10 = vpop.f32.mrb[70].mxu0  ;;  %v2654_v31 = vld [vmem:[#allocation2 + $0x178] sm:$0xff] }
 0x1fb   : > { %11152 = vst [vmem:[#allocation17_spill] sm:$0xff] %v9585_v30  ;;  %v811_v51 = vpop.f32.mrb[71].mxu0  ;;  %v8458_v30 = vld [vmem:[#allocation9 + $0x7c] ss:$12 sps:$4 sm:$0xff]  }
 0x1fc   : > { %v1795_v9 = vpop.f32.mrb[68].mxu1  ;;  %v1201_v49 = vsel %vm1143_vm0, %v1199_v59, %v1200_v22  ;;  %v1202_v6 = vrot.slane %v811_v51, 1  ;;  %4133 = vmatprep.subr.bf16.mxu1 %v8458_v30 }
 0x1fd   : > { %v2203_v15 = vadd.f32 %v1795_v9, %v9394_v5  ;;  %v1797_v8 = vpop.f32.mrb[69].mxu1  ;;  %v8456_v9 = vld [vmem:[#allocation9 + $0x78] ss:$12 sps:$4 sm:$0xff]   ;;  %2954 = vmatmul.mubr.bf16.gmra.mrb[176].mxu0 %v9506_v43  ;;  %v1278_v11 = vadd.f32 %v1201_v49, %v800_v47 }
 0x1fe   : > { %v2292_v0 = vrot.slane %v1797_v8, 1  ;;  %v1799_v24 = vpop.f32.mrb[70].mxu1  ;;  %v1203_v48 = vsel %vm1143_vm0, %v1200_v22, %v1202_v6  ;;  %2962 = vmatprep.mubr.bf16.mxu0 %v11148_v18  ;;  %4134 = vmatpush1.bf16.msra.mxu1 %v8456_v9 }
 0x1ff   : > { %v1800_v19 = vpop.f32.mrb[71].mxu1  ;;  %v9608_v8 = vadd.f32 %v9436_v17, %v1278_v11  ;;  %v1279_v43 = vadd.f32 %v1203_v48, %v806_v55  ;;  %v2655_v11 = vld [vmem:[#allocation2 + $0x180] sm:$0xff]  ;;  %v2657_v48 = vld [vmem:[#allocation2 + $0x190] sm:$0xff] }
 0x200   : > { %v2293_v23 = vsel %vm1143_vm0, %v2291_v45, %v2292_v0  ;;  %v2294_v5 = vrot.slane %v1800_v19, 1  ;;  %v2653_v19 = vld [vmem:[#allocation2 + $0x170] sm:$0xff] }
 0x201   : > { %8060 = vmatmul.mubr.bf16.gmra.mrb[176].mxu1 %v9593_v58  ;;  %v9601_v57 = vadd.f32 %v2293_v23, %v2202_v50  ;;  %v815_v50 = vpop.f32.mrb[72].mxu0  ;;  %v9616_v10 = vadd.f32 %v9431_v62, %v1279_v43  ;;  %v9618_v23 = vpack.c.bf16 %v2654_v31, %v2653_v19  ;;  %v9630_v43 = vpack.c.bf16 %v9417_v32, %v2655_v11  ;;  %v8459_v32 = vld [vmem:[#allocation9 + $0x90] ss:$12 sps:$4 sm:$0xff]  }
 0x202   : > { %v2295_v60 = vsel %vm1143_vm0, %v2292_v0, %v2294_v5  ;;  %8063 = vmatprep.mubr.bf16.mxu1 %v9595_v29  ;;  %v817_v45 = vpop.f32.mrb[73].mxu0  ;;  %v9613_v0 = vpack.c.bf16 %v2652_v38, %v2651_v16  ;;  %v8462_v11 = vld [vmem:[#allocation9 + $0x50] ss:$12 sps:$4 sm:$0xff]  }
 0x203   : > { %v9610_v49 = vadd.f32 %v2295_v60, %v2203_v15  ;;  %v819_v51 = vpop.f32.mrb[74].mxu0  ;;  %v1204_v6 = vrot.slane %v817_v45, 1  ;;  %8081 = vmatprep.subr.bf16.mxu0 %v8462_v11 }
 0x204   : > { %v1804_v47 = vpop.f32.mrb[72].mxu1  ;;  %v821_v55 = vpop.f32.mrb[75].mxu0  ;;  %8082 = vmatpush3.bf16.msra.mxu0 %v8462_v11 }
 0x205   : > { %v2204_v59 = vadd.f32 %v1804_v47, %v9407_v35  ;;  %v1806_v22 = vpop.f32.mrb[73].mxu1  ;;  %v1205_v5 = vrot.slane %v821_v55, 1  ;;  %2963 = vmatmul.mubr.bf16.gmra.mrb[180].mxu0 %v9517_v36 }
 0x206   : > { %v2296_v24 = vrot.slane %v1806_v22, 1  ;;  %v1808_v17 = vpop.f32.mrb[74].mxu1  ;;  %2972 = vmatprep.mubr.bf16.mxu0 %v11148_v18 }
 0x207   : > { %v2205_v30 = vadd.f32 %v1808_v17, %v9423_v56  ;;  %v1810_v15 = vpop.f32.mrb[75].mxu1  ;;  %v1206_v35 = vsel %vm1143_vm0, %v1204_v6, %v1205_v5  ;;  %v2658_v56 = vld [vmem:[#allocation2 + $0x198] sm:$0xff]  ;;  %v8461_v6 = vld [vmem:[#allocation9 + $0x94] ss:$12 sps:$4 sm:$0xff]  }
 0x208   : > { %v2297_v9 = vrot.slane %v1810_v15, 1  ;;  %v1280_v60 = vadd.f32 %v1206_v35, %v815_v50  ;;  %v825_v38 = vpop.f32.mrb[76].mxu0  ;;  %v9635_v55 = vpack.c.bf16 %v2658_v56, %v2657_v48  ;;  %4135 = vmatprep.subr.bf16.mxu1 %v8461_v6 }
 0x209   : > { %8064 = vmatmul.mubr.bf16.gmra.mrb[180].mxu1 %v9613_v0  ;;  %v826_v31 = vpop.f32.mrb[77].mxu0 }
 0x20a   : > { %v2298_v62 = vsel %vm1143_vm0, %v2296_v24, %v2297_v9  ;;  %8067 = vmatprep.mubr.bf16.mxu1 %v9618_v23  ;;  %v9633_v47 = vadd.f32 %v9450_v12, %v1280_v60  ;;  %v1207_v45 = vrot.slane %v826_v31, 1  ;;  %v828_v24 = vpop.f32.mrb[78].mxu0  ;;  %4136 = vmatpush1.bf16.msra.mxu1 %v8459_v32 }
 0x20b   : > { %v9627_v16 = vadd.f32 %v2298_v62, %v2204_v59  ;;  %v830_v59 = vpop.f32.mrb[79].mxu0 }
 0x20c   : > { %v1814_v19 = vpop.f32.mrb[76].mxu1  ;;  %v1208_v35 = vsel %vm1143_vm0, %v1205_v5, %v1207_v45 }
 0x20d   : > { %v1815_v36 = vpop.f32.mrb[77].mxu1  ;;  %2973 = vmatmul.mubr.bf16.gmra.mrb[184].mxu0 %v9522_v26  ;;  %v1281_v12 = vadd.f32 %v1208_v35, %v819_v51  ;;  %v1209_v19 = vrot.slane %v830_v59, 1 }
 0x20e   : > { %v2299_v22 = vrot.slane %v1815_v36, 1  ;;  %v1817_v17 = vpop.f32.mrb[78].mxu1  ;;  %2981 = vmatprep.mubr.bf16.mxu0 %v11148_v18 }
 0x20f   : > { %v2206_v50 = vadd.f32 %v1817_v17, %v9439_v14  ;;  %v1819_v15 = vpop.f32.mrb[79].mxu1  ;;  %v2660_v14 = vld [vmem:[#allocation2 + $0x1a8] sm:$0xff]  ;;  %v9647_v48 = vadd.f32 %v9453_v3, %v1281_v12 }
 0x210   : > { %v2300_v62 = vsel %vm1143_vm0, %v2297_v9, %v2299_v22  ;;  %v834_v5 = vpop.f32.mrb[80].mxu0  ;;  %v2301_v31 = vrot.slane %v1819_v15, 1  ;;  %v8465_v15 = vld [vmem:[#allocation9 + $0xac] ss:$12 sps:$4 sm:$0xff]  }
 0x211   : > { %8068 = vmatmul.mubr.bf16.gmra.mrb[184].mxu1 %v9630_v43  ;;  %v9642_v60 = vadd.f32 %v2300_v62, %v2205_v30  ;;  %v836_v56 = vpop.f32.mrb[81].mxu0  ;;  %v8534_v30 = vld [vmem:[#allocation2 + $0x8] sm:$0xff]  ;;  %4137 = vmatprep.subr.bf16.mxu1 %v8465_v15 }
 0x212   : > { %8071 = vmatprep.mubr.bf16.mxu1 %v9635_v55  ;;  %v9650_v38 = vpack.c.bf16 %v2660_v14, %v8534_v30  ;;  %v1210_v36 = vrot.slane %v836_v56, 1  ;;  %v838_v22 = vpop.f32.mrb[82].mxu0 }
 0x213   : > { %v839_v17 = vpop.f32.mrb[83].mxu0 }
 0x214   : > { %v1823_v9 = vpop.f32.mrb[80].mxu1  ;;  %v1211_v35 = vsel %vm1143_vm0, %v1209_v19, %v1210_v36  ;;  %v1212_v32 = vrot.slane %v839_v17, 1 }
 0x215   : > { %v2207_v26 = vadd.f32 %v1823_v9, %v9442_v37  ;;  %v1825_v51 = vpop.f32.mrb[81].mxu1  ;;  %2982 = vmatmul.mubr.bf16.gmra.mrb[188].mxu0 %v9537_v20  ;;  %v1282_v37 = vadd.f32 %v1211_v35, %v828_v24 }
 0x216   : > { %v2302_v45 = vrot.slane %v1825_v51, 1  ;;  %v1827_v3 = vpop.f32.mrb[82].mxu1  ;;  %v1213_v59 = vsel %vm1143_vm0, %v1210_v36, %v1212_v32  ;;  %2990 = vmatprep.mubr.bf16.mxu0 %v11148_v18  ;;  %v8463_v51 = vld [vmem:[#allocation9 + $0xa8] ss:$12 sps:$4 sm:$0xff]  }
 0x217   : > { %v1828_v6 = vpop.f32.mrb[83].mxu1  ;;  %v9663_v9 = vadd.f32 %v9464_v34, %v1282_v37  ;;  %v1283_v56 = vadd.f32 %v1213_v59, %v834_v5  ;;  %4138 = vmatpush1.bf16.msra.mxu1 %v8463_v51  ;;  %v8467_v37 = vld [vmem:[#allocation9 + $0x80] ss:$12 sps:$4 sm:$0xff]  }
 0x218   : > { %v2303_v62 = vsel %vm1143_vm0, %v2301_v31, %v2302_v45  ;;  %v2304_v11 = vrot.slane %v1828_v6, 1  ;;  %v843_v19 = vpop.f32.mrb[84].mxu0 }
 0x219   : > { %8072 = vmatmul.mubr.bf16.gmra.mrb[188].mxu1 %v9650_v38  ;;  %v9656_v12 = vadd.f32 %v2303_v62, %v2206_v50  ;;  %v8466_v50 = vld [vmem:[#allocation9 + $0x68] ss:$12 sps:$4 sm:$0xff]   ;;  %v845_v36 = vpop.f32.mrb[85].mxu0  ;;  %v9669_v3 = vadd.f32 %v9473_v27, %v1283_v56  ;;  %v8468_v56 = vld [vmem:[#allocation9 + $0x98] ss:$12 sps:$4 sm:$0xff]  }
 0x21a   : > { %4155 = vmatprep.mubr.bf16.mxu1 %v11148_v18  ;;  %v2305_v14 = vsel %vm1143_vm0, %v2302_v45, %v2304_v11  ;;  %v3891_v45 = vld [vmem:[#allocation3] sm:$0xff]  ;;  %v847_v34 = vpop.f32.mrb[86].mxu0  ;;  %8083 = vmatprep.subr.bf16.mxu0 %v8466_v50  ;;  %v1214_v32 = vrot.slane %v845_v36, 1 }
 0x21b   : > { %v9665_v20 = vadd.f32 %v2305_v14, %v2207_v26  ;;  %v9671_v5 = vpack.c.bf16 %v8534_v30, %v3891_v45  ;;  %v849_v35 = vpop.f32.mrb[87].mxu0  ;;  %8084 = vmatpush3.bf16.msra.mxu0 %v8466_v50 }
 0x21c   : > { %v1832_v24 = vpop.f32.mrb[84].mxu1  ;;  %8085 = vmatprep.subr.bf16.mxu0 %v8467_v37 }
 0x21d   : > { %v2208_v31 = vadd.f32 %v1832_v24, %v9458_v33  ;;  %v1834_v22 = vpop.f32.mrb[85].mxu1  ;;  %v1215_v33 = vrot.slane %v849_v35, 1  ;;  %2991 = vmatmul.mubr.bf16.gmra.mrb[192].mxu0 %v9539_v52  ;;  %v8470_v35 = vld [vmem:[#allocation9 + $0xb0] ss:$12 sps:$4 sm:$0xff]  }
 0x21e   : > { %v2306_v17 = vrot.slane %v1834_v22, 1  ;;  %v1836_v6 = vpop.f32.mrb[86].mxu1  ;;  %3000 = vmatprep.mubr.bf16.mxu0 %v11148_v18 }
 0x21f   : > { %v2209_v26 = vadd.f32 %v1836_v6, %v9476_v25  ;;  %v1838_v62 = vpop.f32.mrb[87].mxu1  ;;  %v1216_v27 = vsel %vm1143_vm0, %v1214_v32, %v1215_v33  ;;  %8086 = vmatpush3.bf16.msra.mxu0 %v8467_v37 }
 0x220   : > { %v2307_v11 = vrot.slane %v1838_v62, 1  ;;  %v1284_v59 = vadd.f32 %v1216_v27, %v843_v19  ;;  %v853_v15 = vpop.f32.mrb[88].mxu0  ;;  %8087 = vmatprep.subr.bf16.mxu0 %v8468_v56 }
 0x221   : > { %4156 = vmatmul.mubr.bf16.vlgmr.msra.gmra.mrb[192].mxu1 %v9671_v5  ;;  %v854_v51 = vpop.f32.mrb[89].mxu0 }
 0x222   : > { %v2308_v30 = vsel %vm1143_vm0, %v2306_v17, %v2307_v11  ;;  %4165 = vmatprep.mubr.bf16.mxu1 %v11148_v18  ;;  %v9683_v24 = vadd.f32 %v9468_v42, %v1284_v59  ;;  %v1217_v50 = vrot.slane %v854_v51, 1  ;;  %v856_v22 = vpop.f32.mrb[90].mxu0 }
 0x223   : > { %v9680_v25 = vadd.f32 %v2308_v30, %v2208_v31  ;;  %v858_v17 = vpop.f32.mrb[91].mxu0  ;;  %8088 = vmatpush3.bf16.msra.mxu0 %v8468_v56 }
 0x224   : > { %v1842_v14 = vpop.f32.mrb[88].mxu1  ;;  %v1218_v31 = vsel %vm1143_vm0, %v1215_v33, %v1217_v50  ;;  %8089 = vmatprep.subr.bf16.mxu0 %v8470_v35  ;;  %v1219_v15 = vrot.slane %v858_v17, 1 }
 0x225   : > { %v1843_v52 = vpop.f32.mrb[89].mxu1  ;;  %3001 = vmatmul.mubr.bf16.gmra.mrb[196].mxu0 %v9557_v13  ;;  %v1285_v32 = vadd.f32 %v1218_v31, %v847_v34 }
 0x226   : > { %v2309_v36 = vrot.slane %v1843_v52, 1  ;;  %v1845_v45 = vpop.f32.mrb[90].mxu1  ;;  %3009 = vmatprep.mubr.bf16.mxu0 %v11148_v18 }
 0x227   : > { %v2210_v19 = vadd.f32 %v1845_v45, %v9498_v1  ;;  %v1847_v6 = vpop.f32.mrb[91].mxu1  ;;  %v9693_v37 = vadd.f32 %v9486_v21, %v1285_v32  ;;  %8090 = vmatpush3.bf16.msra.mxu0 %v8470_v35 }
 0x228   : > { %v2310_v62 = vsel %vm1143_vm0, %v2307_v11, %v2309_v36  ;;  %v862_v1 = vpop.f32.mrb[92].mxu0  ;;  %v2311_v11 = vrot.slane %v1847_v6, 1 }
 0x229   : > { %v9689_v42 = vadd.f32 %v2310_v62, %v2209_v26  ;;  %v864_v33 = vpop.f32.mrb[93].mxu0 }
 0x22a   : > { %v1220_v14 = vrot.slane %v864_v33, 1  ;;  %v866_v34 = vpop.f32.mrb[94].mxu0 }
 0x22b   : > { %v867_v56 = vpop.f32.mrb[95].mxu0 }
 0x22c   : > { %v1851_v27 = vpop.f32.mrb[92].mxu1  ;;  %v1221_v52 = vsel %vm1143_vm0, %v1219_v15, %v1220_v14  ;;  %v1222_v50 = vrot.slane %v867_v56, 1 }
 0x22d   : > { %v2211_v30 = vadd.f32 %v1851_v27, %v9504_v41  ;;  %v1853_v59 = vpop.f32.mrb[93].mxu1  ;;  %3010 = vmatmul.mubr.bf16.gmra.mrb[200].mxu0 %v9562_v53  ;;  %v1286_v45 = vadd.f32 %v1221_v52, %v856_v22  ;;  %v8469_v41 = vld [vmem:[#allocation9 + $0xc8] ss:$12 sps:$4 sm:$0xff]  }
 0x22e   : > { %v2312_v13 = vrot.slane %v1853_v59, 1  ;;  %v1855_v26 = vpop.f32.mrb[94].mxu1  ;;  %v1223_v17 = vsel %vm1143_vm0, %v1220_v14, %v1222_v50  ;;  %3018 = vmatprep.mubr.bf16.mxu0 %v11148_v18  ;;  %8139 = vmatprep.subr.bf16.mxu1 %v8469_v41 }
 0x22f   : > { %v1856_v51 = vpop.f32.mrb[95].mxu1  ;;  %v9705_v35 = vadd.f32 %v9492_v63, %v1286_v45  ;;  %v1287_v62 = vadd.f32 %v1223_v17, %v862_v1  ;;  %8140 = vmatpush3.bf16.msra.mxu1 %v8469_v41 }
 0x230   : > { %v2314_v21 = vrot.slane %v1856_v51, 1  ;;  %v2313_v36 = vsel %vm1143_vm0, %v2311_v11, %v2312_v13  ;;  %v7965_v33 = vpop.f32.mrb[96].mxu0 }
 0x231   : > { %v9699_v31 = vadd.f32 %v2313_v36, %v2210_v19  ;;  %v2005_v19 = vpop.f32.mrb[97].mxu0  ;;  %v9711_v59 = vadd.f32 %v9495_v54, %v1287_v62  ;;  %v2471_v34 = vrot.slane %v7965_v33, 2 }
 0x232   : > { %v2315_v6 = vsel %vm1143_vm0, %v2312_v13, %v2314_v21  ;;  %v7966_v14 = vpop.f32.mrb[98].mxu0 }
 0x233   : > { %v9707_v32 = vadd.f32 %v2315_v6, %v2211_v30  ;;  %v2008_v1 = vpop.f32.mrb[99].mxu0  ;;  %v2468_v30 = vrot.slane %v2005_v19, 2  ;;  %v2473_v41 = vrot.slane %v7966_v14, 2 }
 0x234   : > { %v1860_v27 = vpop.f32.mrb[96].mxu1  ;;  %v2469_v56 = vrot.slane %v2008_v1, 2 }
 0x235   : > { %v2212_v53 = vadd.f32 %v1860_v27, %v9520_v2  ;;  %v1862_v22 = vpop.f32.mrb[97].mxu1  ;;  %3019 = vmatmul.mubr.bf16.gmra.mrb[204].mxu0 %v9573_v40 }
 0x236   : > { %v2316_v15 = vrot.slane %v1862_v22, 1  ;;  %v1864_v11 = vpop.f32.mrb[98].mxu1  ;;  %3028 = vmatprep.mubr.bf16.mxu0 %v11148_v18  ;;  %v2470_v2 = vsel %vm1336_vm1, %v2468_v30, %v2469_v56  ;;  %v2472_v54 = vsel %vm1336_vm1, %v2469_v56, %v2471_v34  ;;  %v11154_v30 = vld [vmem:[#allocation14_spill] sm:$0xff] }
 0x237   : > { %v2213_v63 = vadd.f32 %v1864_v11, %v9534_v28  ;;  %v1866_v13 = vpop.f32.mrb[99].mxu1  ;;  %v9720_v52 = vadd.f32 %v2470_v2, %v9515_v39  ;;  %v9723_v28 = vadd.f32 %v2472_v54, %v9531_v46 }
 0x238   : > { %v2317_v26 = vrot.slane %v1866_v13, 1  ;;  %v7969_v36 = vpop.f32.mrb[100].mxu0 }
 0x239   : > { %v2021_v40 = vpop.f32.mrb[101].mxu0  ;;  %v2478_v33 = vrot.slane %v7969_v36, 2 }
 0x23a   : > { %v2318_v51 = vsel %vm1143_vm0, %v2316_v15, %v2317_v26  ;;  %v2474_v6 = vrot.slane %v2021_v40, 2  ;;  %v7970_v27 = vpop.f32.mrb[102].mxu0 }
 0x23b   : > { %v9725_v50 = vadd.f32 %v2318_v51, %v2212_v53  ;;  %v2479_v19 = vrot.slane %v7970_v27, 2  ;;  %v2024_v15 = vpop.f32.mrb[103].mxu0 }
 0x23c   : > { %v1870_v21 = vpop.f32.mrb[100].mxu1  ;;  %v2476_v11 = vrot.slane %v2024_v15, 2  ;;  %v2475_v46 = vsel %vm1336_vm1, %v2473_v41, %v2474_v6 }
 0x23d   : > { %v1871_v45 = vpop.f32.mrb[101].mxu1  ;;  %3029 = vmatmul.mubr.bf16.gmra.mrb[208].mxu0 %v9578_v44  ;;  %v9732_v13 = vadd.f32 %v2475_v46, %v9545_v4  ;;  %v2480_v14 = vsel %vm1336_vm1, %v2478_v33, %v2479_v19  ;;  %v11155_v44 = vld [vmem:[#allocation15_spill] sm:$0xff] }
 0x23e   : > { %v2319_v17 = vrot.slane %v1871_v45, 1  ;;  %v1873_v62 = vpop.f32.mrb[102].mxu1  ;;  %3037 = vmatprep.mubr.bf16.mxu0 %v11148_v18  ;;  %v9740_v34 = vadd.f32 %v2480_v14, %v9571_v61 }
 0x23f   : > { %v2214_v22 = vadd.f32 %v1873_v62, %v9552_v7  ;;  %v1875_v39 = vpop.f32.mrb[103].mxu1  ;;  %v2477_v7 = vsel %vm1336_vm1, %v2474_v6, %v2476_v11  ;;  %v11156_v11 = vld [vmem:[#allocation17_spill] sm:$0xff] }
 0x240   : > { %v2320_v53 = vsel %vm1143_vm0, %v2317_v26, %v2319_v17  ;;  %v9743_v56 = vadd.f32 %v2477_v7, %v11154_v30  ;;  %v7973_v2 = vpop.f32.mrb[104].mxu0  ;;  %v2321_v21 = vrot.slane %v1875_v39, 1 }
 0x241   : > { %v9735_v1 = vadd.f32 %v2320_v53, %v2213_v63  ;;  %v2037_v51 = vpop.f32.mrb[105].mxu0  ;;  %v2484_v41 = vrot.slane %v7973_v2, 2  ;;  %v8471_v53 = vld [vmem:[#allocation9 + $0xe0] ss:$12 sps:$4 sm:$0xff]  }
 0x242   : > { %v2481_v63 = vrot.slane %v2037_v51, 2  ;;  %v7974_v40 = vpop.f32.mrb[106].mxu0  ;;  %8141 = vmatprep.subr.bf16.mxu1 %v8471_v53 }
 0x243   : > { %v2486_v17 = vrot.slane %v7974_v40, 2  ;;  %v2040_v62 = vpop.f32.mrb[107].mxu0  ;;  %8142 = vmatpush3.bf16.msra.mxu1 %v8471_v53 }
 0x244   : > { %v1879_v26 = vpop.f32.mrb[104].mxu1  ;;  %v2483_v27 = vrot.slane %v2040_v62, 2  ;;  %v2482_v33 = vsel %vm1336_vm1, %v2479_v19, %v2481_v63 }
 0x245   : > { %v2215_v54 = vadd.f32 %v1879_v26, %v11155_v44  ;;  %v1881_v4 = vpop.f32.mrb[105].mxu1  ;;  %3038 = vmatmul.mubr.bf16.gmra.mrb[212].mxu0 %v9593_v58  ;;  %v9750_v46 = vadd.f32 %v2482_v33, %v11156_v11  ;;  %v2487_v39 = vsel %vm1336_vm1, %v2484_v41, %v2486_v17 }
 0x246   : > { %v2322_v36 = vrot.slane %v1881_v4, 1  ;;  %v1883_v45 = vpop.f32.mrb[106].mxu1  ;;  %3046 = vmatprep.mubr.bf16.mxu0 %v11148_v18  ;;  %v2485_v7 = vsel %vm1336_vm1, %v2483_v27, %v2484_v41  ;;  %v9758_v30 = vadd.f32 %v2487_v39, %v9610_v49  ;;  %v11158_v49 = vld [vmem:[#allocation18_spill] sm:$0xff] }
 0x247   : > { %v1884_v6 = vpop.f32.mrb[107].mxu1  ;;  %v9762_v26 = vadd.f32 %v2485_v7, %v9601_v57 }
 0x248   : > { %v2324_v61 = vrot.slane %v1884_v6, 1  ;;  %v2323_v15 = vsel %vm1143_vm0, %v2321_v21, %v2322_v36  ;;  %v7977_v44 = vpop.f32.mrb[108].mxu0 }
 0x249   : > { %v9753_v14 = vadd.f32 %v2323_v15, %v2214_v22  ;;  %v11157_v22 = vld [vmem:[#allocation16_spill] sm:$0xff]  ;;  %v2053_v21 = vpop.f32.mrb[109].mxu0  ;;  %v2491_v6 = vrot.slane %v7977_v44, 2 }
 0x24a   : > { %v2325_v19 = vsel %vm1143_vm0, %v2322_v36, %v2324_v61  ;;  %v7978_v40 = vpop.f32.mrb[110].mxu0  ;;  %v2488_v57 = vrot.slane %v2053_v21, 2 }
 0x24b   : > { %v9764_v58 = vadd.f32 %v2325_v19, %v2215_v54  ;;  %v2056_v36 = vpop.f32.mrb[111].mxu0 }
 0x24c   : > { %v1888_v2 = vpop.f32.mrb[108].mxu1  ;;  %v2489_v61 = vrot.slane %v2056_v36, 2 }
 0x24d   : > { %v2216_v4 = vadd.f32 %v1888_v2, %v11157_v22  ;;  %v1890_v51 = vpop.f32.mrb[109].mxu1  ;;  %3047 = vmatmul.mubr.bf16.gmra.mrb[216].mxu0 %v9595_v29  ;;  %v2493_v2 = vrot.slane %v7978_v40, 2 }
 0x24e   : > { %v2326_v63 = vrot.slane %v1890_v51, 1  ;;  %v1892_v45 = vpop.f32.mrb[110].mxu1  ;;  %3056 = vmatprep.mubr.bf16.mxu0 %v11148_v18  ;;  %v2490_v54 = vsel %vm1336_vm1, %v2488_v57, %v2489_v61  ;;  %v2492_v27 = vsel %vm1336_vm1, %v2489_v61, %v2491_v6 }
 0x24f   : > { %v2217_v41 = vadd.f32 %v1892_v45, %v11158_v49  ;;  %v1894_v17 = vpop.f32.mrb[111].mxu1  ;;  %v9774_v15 = vadd.f32 %v2490_v54, %v9627_v16  ;;  %v9777_v11 = vadd.f32 %v2492_v27, %v9642_v60 }
 0x250   : > { %v2327_v62 = vrot.slane %v1894_v17, 1  ;;  %v7981_v7 = vpop.f32.mrb[112].mxu0 }
 0x251   : > { %v2069_v29 = vpop.f32.mrb[113].mxu0  ;;  %v2498_v45 = vrot.slane %v7981_v7, 2 }
 0x252   : > { %v2328_v33 = vsel %vm1143_vm0, %v2326_v63, %v2327_v62  ;;  %v2494_v22 = vrot.slane %v2069_v29, 2  ;;  %v7982_v21 = vpop.f32.mrb[114].mxu0 }
 0x253   : > { %v9779_v39 = vadd.f32 %v2328_v33, %v2216_v4  ;;  %v2499_v49 = vrot.slane %v7982_v21, 2  ;;  %v2072_v17 = vpop.f32.mrb[115].mxu0 }
 0x254   : > { %v1898_v53 = vpop.f32.mrb[112].mxu1  ;;  %v2496_v36 = vrot.slane %v2072_v17, 2  ;;  %v2495_v60 = vsel %vm1336_vm1, %v2493_v2, %v2494_v22 }
 0x255   : > { %v1899_v19 = vpop.f32.mrb[113].mxu1  ;;  %3057 = vmatmul.mubr.bf16.gmra.mrb[220].mxu0 %v9613_v0  ;;  %v9786_v6 = vadd.f32 %v2495_v60, %v9656_v12  ;;  %v2500_v40 = vsel %vm1336_vm1, %v2498_v45, %v2499_v49 }
 0x256   : > { %v2329_v44 = vrot.slane %v1899_v19, 1  ;;  %v1901_v51 = vpop.f32.mrb[114].mxu1  ;;  %3065 = vmatprep.mubr.bf16.mxu0 %v11148_v18  ;;  %v9794_v61 = vadd.f32 %v2500_v40, %v9680_v25 }
 0x257   : > { %v2218_v63 = vadd.f32 %v1901_v51, %v9608_v8  ;;  %v1903_v16 = vpop.f32.mrb[115].mxu1  ;;  %v2497_v8 = vsel %vm1336_vm1, %v2494_v22, %v2496_v36 }
 0x258   : > { %v2330_v4 = vsel %vm1143_vm0, %v2327_v62, %v2329_v44  ;;  %v9797_v54 = vadd.f32 %v2497_v8, %v9665_v20  ;;  %v7985_v27 = vpop.f32.mrb[116].mxu0  ;;  %v2331_v53 = vrot.slane %v1903_v16, 1 }
 0x259   : > { %v9789_v57 = vadd.f32 %v2330_v4, %v2217_v41  ;;  %v2085_v33 = vpop.f32.mrb[117].mxu0  ;;  %v2504_v2 = vrot.slane %v7985_v27, 2 }
 0x25a   : > { %v2501_v41 = vrot.slane %v2085_v33, 2  ;;  %v7986_v29 = vpop.f32.mrb[118].mxu0 }
 0x25b   : > { %v2506_v44 = vrot.slane %v7986_v29, 2  ;;  %v2088_v51 = vpop.f32.mrb[119].mxu0 }
 0x25c   : > { %v1907_v62 = vpop.f32.mrb[116].mxu1  ;;  %v2503_v21 = vrot.slane %v2088_v51, 2  ;;  %v2502_v20 = vsel %vm1336_vm1, %v2499_v49, %v2501_v41 }
 0x25d   : > { %v2219_v0 = vadd.f32 %v1907_v62, %v9616_v10  ;;  %v1909_v12 = vpop.f32.mrb[117].mxu1  ;;  %3066 = vmatmul.mubr.bf16.gmra.mrb[224].mxu0 %v9618_v23  ;;  %v8472_v10 = vld [vmem:[#allocation9 + $0xf8] ss:$12 sps:$4 sm:$0xff]   ;;  %v9804_v17 = vadd.f32 %v2502_v20, %v9689_v42  ;;  %v2507_v16 = vsel %vm1336_vm1, %v2504_v2, %v2506_v44 }
 0x25e   : > { %v2332_v7 = vrot.slane %v1909_v12, 1  ;;  %v1911_v19 = vpop.f32.mrb[118].mxu1  ;;  %3074 = vmatprep.mubr.bf16.mxu0 %v11148_v18  ;;  %v2505_v60 = vsel %vm1336_vm1, %v2503_v21, %v2504_v2  ;;  %v9812_v4 = vadd.f32 %v2507_v16, %v9707_v32  ;;  %8143 = vmatprep.subr.bf16.mxu1 %v8472_v10 }
 0x25f   : > { %v1912_v22 = vpop.f32.mrb[119].mxu1  ;;  %v9816_v23 = vadd.f32 %v2505_v60, %v9699_v31  ;;  %8144 = vmatpush3.bf16.msra.mxu1 %v8472_v10 }
 0x260   : > { %v2334_v25 = vrot.slane %v1912_v22, 1  ;;  %v2333_v45 = vsel %vm1143_vm0, %v2331_v53, %v2332_v7  ;;  %v7989_v8 = vpop.f32.mrb[120].mxu0 }
 0x261   : > { %v9807_v36 = vadd.f32 %v2333_v45, %v2218_v63  ;;  %v2101_v27 = vpop.f32.mrb[121].mxu0  ;;  %v2511_v19 = vrot.slane %v7989_v8, 2 }
 0x262   : > { %v2335_v49 = vsel %vm1143_vm0, %v2332_v7, %v2334_v25  ;;  %v7990_v53 = vpop.f32.mrb[122].mxu0  ;;  %v2508_v29 = vrot.slane %v2101_v27, 2 }
 0x263   : > { %v9818_v40 = vadd.f32 %v2335_v49, %v2219_v0  ;;  %v2104_v7 = vpop.f32.mrb[123].mxu0  ;;  %v2513_v45 = vrot.slane %v7990_v53, 2 }
 0x264   : > { %v1916_v42 = vpop.f32.mrb[120].mxu1  ;;  %v2509_v2 = vrot.slane %v2104_v7, 2 }
 0x265   : > { %v2220_v63 = vadd.f32 %v1916_v42, %v9633_v47  ;;  %v1918_v62 = vpop.f32.mrb[121].mxu1  ;;  %3075 = vmatmul.mubr.bf16.gmra.mrb[228].mxu0 %v9630_v43 }
 0x266   : > { %v2336_v12 = vrot.slane %v1918_v62, 1  ;;  %v1920_v33 = vpop.f32.mrb[122].mxu1  ;;  %3084 = vmatprep.mubr.bf16.mxu0 %v11148_v18  ;;  %v2510_v0 = vsel %vm1336_vm1, %v2508_v29, %v2509_v2  ;;  %v2512_v47 = vsel %vm1336_vm1, %v2509_v2, %v2511_v19 }
 0x267   : > { %v2221_v32 = vadd.f32 %v1920_v33, %v9647_v48  ;;  %v1922_v41 = vpop.f32.mrb[123].mxu1  ;;  %v9828_v22 = vadd.f32 %v2510_v0, %v9725_v50  ;;  %v9831_v48 = vadd.f32 %v2512_v47, %v9735_v1 }
 0x268   : > { %v2337_v31 = vrot.slane %v1922_v41, 1  ;;  %v7993_v21 = vpop.f32.mrb[124].mxu0 }
 0x269   : > { %v2117_v43 = vpop.f32.mrb[125].mxu0  ;;  %v2518_v42 = vrot.slane %v7993_v21, 2 }
 0x26a   : > { %v2338_v44 = vsel %vm1143_vm0, %v2336_v12, %v2337_v31  ;;  %v2514_v16 = vrot.slane %v2117_v43, 2  ;;  %v7994_v49 = vpop.f32.mrb[126].mxu0 }
 0x26b   : > { %v9833_v51 = vadd.f32 %v2338_v44, %v2220_v63  ;;  %v2519_v62 = vrot.slane %v7994_v49, 2  ;;  %v2120_v27 = vpop.f32.mrb[127].mxu0 }
 0x26c   : > { %v1926_v25 = vpop.f32.mrb[124].mxu1  ;;  %v2516_v12 = vrot.slane %v2120_v27, 2  ;;  %v2515_v1 = vsel %vm1336_vm1, %v2513_v45, %v2514_v16 }
 0x26d   : > { %v1927_v20 = vpop.f32.mrb[125].mxu1  ;;  %3085 = vmatmul.mubr.bf16.gmra.mrb[232].mxu0 %v9635_v55  ;;  %v9840_v33 = vadd.f32 %v2515_v1, %v9753_v14  ;;  %v2520_v53 = vsel %vm1336_vm1, %v2518_v42, %v2519_v62 }
 0x26e   : > { %v2339_v10 = vrot.slane %v1927_v20, 1  ;;  %v1929_v60 = vpop.f32.mrb[126].mxu1  ;;  %3093 = vmatprep.mubr.bf16.mxu0 %v11148_v18  ;;  %v9846_v7 = vadd.f32 %v2520_v53, %v9779_v39 }
 0x26f   : > { %v2222_v8 = vadd.f32 %v1929_v60, %v9663_v9  ;;  %v1931_v50 = vpop.f32.mrb[127].mxu1  ;;  %v2517_v9 = vsel %vm1336_vm1, %v2514_v16, %v2516_v12 }
 0x270   : > { %v2340_v63 = vsel %vm1143_vm0, %v2337_v31, %v2339_v10  ;;  %v9849_v19 = vadd.f32 %v2517_v9, %v9764_v58  ;;  %v7997_v31 = vpop.f32.mrb[128].mxu0  ;;  %v2341_v0 = vrot.slane %v1931_v50, 1 }
 0x271   : > { %v2413_v41 = vadd.f32 %v2340_v63, %v2221_v32  ;;  %v2133_v14 = vpop.f32.mrb[129].mxu0  ;;  %v2524_v21 = vrot.slane %v7997_v31, 2 }
 0x272   : > { %v2521_v44 = vrot.slane %v2133_v14, 2  ;;  %v7998_v25 = vpop.f32.mrb[130].mxu0 }
 0x273   : > { %v2526_v20 = vrot.slane %v7998_v25, 2  ;;  %v2136_v45 = vpop.f32.mrb[131].mxu0 }
 0x274   : > { %v1935_v29 = vpop.f32.mrb[128].mxu1  ;;  %v2523_v10 = vrot.slane %v2136_v45, 2  ;;  %v2522_v58 = vsel %vm1336_vm1, %v2519_v62, %v2521_v44 }
 0x275   : > { %v2223_v55 = vadd.f32 %v1935_v29, %v9669_v3  ;;  %v1937_v2 = vpop.f32.mrb[129].mxu1  ;;  %3094 = vmatmul.mubr.bf16.gmra.mrb[236].mxu0 %v9650_v38  ;;  %v8473_v3 = vld [vmem:[#allocation9 + $0x110] ss:$12 sps:$4 sm:$0xff]   ;;  %v9856_v60 = vadd.f32 %v2522_v58, %v9789_v57  ;;  %v2527_v49 = vsel %vm1336_vm1, %v2524_v21, %v2526_v20 }
 0x276   : > { %v2342_v47 = vrot.slane %v1937_v2, 1  ;;  %v1939_v32 = vpop.f32.mrb[130].mxu1  ;;  %8091 = vmatprep.mubr.bf16.mxu0 %v9671_v5  ;;  %v2525_v50 = vsel %vm1336_vm1, %v2523_v10, %v2524_v21  ;;  %v9862_v27 = vadd.f32 %v2527_v49, %v9818_v40  ;;  %8145 = vmatprep.subr.bf16.mxu1 %v8473_v3 }
 0x277   : > { %v1940_v43 = vpop.f32.mrb[131].mxu1  ;;  %v9866_v12 = vadd.f32 %v2525_v50, %v9807_v36  ;;  %8146 = vmatpush3.bf16.msra.mxu1 %v8473_v3 }
 0x278   : > { %v2344_v39 = vrot.slane %v1940_v43, 1  ;;  %v2343_v16 = vsel %vm1143_vm0, %v2341_v0, %v2342_v47  ;;  %v8001_v57 = vpop.f32.mrb[132].mxu0 }
 0x279   : > { %v2414_v42 = vadd.f32 %v2343_v16, %v2222_v8  ;;  %v2149_v53 = vpop.f32.mrb[133].mxu0  ;;  %v2531_v14 = vrot.slane %v8001_v57, 2 }
 0x27a   : > { %v2345_v62 = vsel %vm1143_vm0, %v2342_v47, %v2344_v39  ;;  %v8002_v29 = vpop.f32.mrb[134].mxu0  ;;  %v2528_v0 = vrot.slane %v2149_v53, 2 }
 0x27b   : > { %v2415_v38 = vadd.f32 %v2345_v62, %v2223_v55  ;;  %v2152_v2 = vpop.f32.mrb[135].mxu0  ;;  %v2533_v39 = vrot.slane %v8002_v29, 2 }
 0x27c   : > { %v1944_v1 = vpop.f32.mrb[132].mxu1  ;;  %v2529_v36 = vrot.slane %v2152_v2, 2 }
 0x27d   : > { %v2224_v63 = vadd.f32 %v1944_v1, %v9683_v24  ;;  %v1946_v8 = vpop.f32.mrb[133].mxu1 }
 0x27e   : > { %v2346_v5 = vrot.slane %v1946_v8, 1  ;;  %v1948_v9 = vpop.f32.mrb[134].mxu1  ;;  %v2530_v55 = vsel %vm1336_vm1, %v2528_v0, %v2529_v36  ;;  %v2532_v44 = vsel %vm1336_vm1, %v2529_v36, %v2531_v14 }
 0x27f   : > { %v2225_v40 = vadd.f32 %v1948_v9, %v9693_v37  ;;  %v1950_v31 = vpop.f32.mrb[135].mxu1  ;;  %v9874_v24 = vadd.f32 %v2530_v55, %v9833_v51  ;;  %v9876_v25 = vadd.f32 %v2532_v44, %v2413_v41 }
 0x280   : > { %v2347_v47 = vrot.slane %v1950_v31, 1  ;;  %v8005_v37 = vpop.f32.mrb[136].mxu0 }
 0x281   : > { %v2165_v45 = vpop.f32.mrb[137].mxu0  ;;  %v2538_v49 = vrot.slane %v8005_v37, 2 }
 0x282   : > { %v2348_v32 = vsel %vm1143_vm0, %v2346_v5, %v2347_v47  ;;  %v2534_v58 = vrot.slane %v2165_v45, 2  ;;  %v8006_v3 = vpop.f32.mrb[138].mxu0 }
 0x283   : > { %v2416_v21 = vadd.f32 %v2348_v32, %v2224_v63  ;;  %v2539_v62 = vrot.slane %v8006_v3, 2  ;;  %v2168_v57 = vpop.f32.mrb[139].mxu0 }
 0x284   : > { %v1954_v20 = vpop.f32.mrb[136].mxu1  ;;  %v2536_v51 = vrot.slane %v2168_v57, 2  ;;  %v2535_v41 = vsel %vm1336_vm1, %v2533_v39, %v2534_v58 }
 0x285   : > { %v1955_v43 = vpop.f32.mrb[137].mxu1  ;;  %v9881_v8 = vadd.f32 %v2535_v41, %v2414_v42  ;;  %v2540_v53 = vsel %vm1336_vm1, %v2538_v49, %v2539_v62 }
 0x286   : > { %v2349_v10 = vrot.slane %v1955_v43, 1  ;;  %v1957_v16 = vpop.f32.mrb[138].mxu1  ;;  %v2537_v9 = vsel %vm1336_vm1, %v2534_v58, %v2536_v51  ;;  %v9885_v29 = vadd.f32 %v2540_v53, %v2416_v21 }
 0x287   : > { %v2226_v50 = vadd.f32 %v1957_v16, %v9705_v35  ;;  %v1959_v1 = vpop.f32.mrb[139].mxu1  ;;  %v9887_v31 = vadd.f32 %v2537_v9, %v2415_v38 }
 0x288   : > { %v2350_v63 = vsel %vm1143_vm0, %v2347_v47, %v2349_v10  ;;  %v8009_v2 = vpop.f32.mrb[140].mxu0  ;;  %v2351_v55 = vrot.slane %v1959_v1, 1  ;;  %v8474_v10 = vld [vmem:[#allocation9 + $0x128] ss:$12 sps:$4 sm:$0xff]   ;;  %v8477_v1 = vld [vmem:[#allocation9 + $0xc4] ss:$12 sps:$4 sm:$0xff]  }
 0x289   : > { %v2417_v5 = vadd.f32 %v2350_v63, %v2225_v40  ;;  %v2181_v36 = vpop.f32.mrb[141].mxu0  ;;  %v2544_v20 = vrot.slane %v8009_v2, 2  ;;  %8147 = vmatprep.subr.bf16.mxu1 %v8474_v10  ;;  %5222 = vmatprep.subr.bf16.mxu0 %v8477_v1 }
 0x28a   : > { %v2541_v47 = vrot.slane %v2181_v36, 2  ;;  %v8010_v32 = vpop.f32.mrb[142].mxu0  ;;  %8148 = vmatpush3.bf16.msra.mxu1 %v8474_v10 }
 0x28b   : > { %v2546_v37 = vrot.slane %v8010_v32, 2  ;;  %v2184_v43 = vpop.f32.mrb[143].mxu0 }
 0x28c   : > { %v1963_v35 = vpop.f32.mrb[140].mxu1  ;;  %v2543_v21 = vrot.slane %v2184_v43, 2  ;;  %v2542_v38 = vsel %vm1336_vm1, %v2539_v62, %v2541_v47 }
 0x28d   : > { %v2227_v14 = vadd.f32 %v1963_v35, %v9711_v59  ;;  %v1965_v0 = vpop.f32.mrb[141].mxu1  ;;  %v9892_v58 = vadd.f32 %v2542_v38, %v2417_v5  ;;  %v2547_v16 = vsel %vm1336_vm1, %v2544_v20, %v2546_v37 }
 0x28e   : > { %v2352_v44 = vrot.slane %v1965_v0, 1  ;;  %v1967_v42 = vpop.f32.mrb[142].mxu1  ;;  %v2545_v3 = vsel %vm1336_vm1, %v2543_v21, %v2544_v20 }
 0x28f   : > { %v1968_v40 = vpop.f32.mrb[143].mxu1 }
 0x290   : > { %v2354_v45 = vrot.slane %v1968_v40, 1  ;;  %v2353_v39 = vsel %vm1143_vm0, %v2351_v55, %v2352_v44  ;;  %v2880_v41 = vpop.f32.mrb[144].mxu0  ;;  %v9909_v40 = vld [vmem:[%s11118_s2] ss:$0 sm:$0xff] }
 0x291   : > { %v2418_v59 = vadd.f32 %v2353_v39, %v2226_v50  ;;  %v3328_v62 = vadd.f32 %v2880_v41, %v9720_v52  ;;  %v2882_v53 = vpop.f32.mrb[145].mxu0 }
 0x292   : > { %v2355_v49 = vsel %vm1143_vm0, %v2352_v44, %v2354_v45  ;;  %v2884_v2 = vpop.f32.mrb[146].mxu0  ;;  %v3408_v47 = vrot.slane %v2882_v53, 1 }
 0x293   : > { %v9897_v57 = vadd.f32 %v2545_v3, %v2418_v59  ;;  %v2419_v51 = vadd.f32 %v2355_v49, %v2227_v14  ;;  %v3329_v36 = vadd.f32 %v2884_v2, %v9723_v28  ;;  %v2886_v55 = vpop.f32.mrb[147].mxu0 }
 0x294   : > { %v8029_v63 = vpop.f32.mrb[144].mxu1  ;;  %v3409_v14 = vrot.slane %v2886_v55, 1 }
 0x295   : > { %v3137_v5 = vpop.f32.mrb[145].mxu1  ;;  %v9900_v50 = vadd.f32 %v2547_v16, %v2419_v51  ;;  %v3603_v9 = vrot.slane %v8029_v63, 2 }
 0x296   : > { %v3600_v35 = vrot.slane %v3137_v5, 2  ;;  %v8030_v0 = vpop.f32.mrb[146].mxu1  ;;  %v3410_v32 = vsel %vm1143_vm0, %v3408_v47, %v3409_v14 }
 0x297   : > { %v3140_v44 = vpop.f32.mrb[147].mxu1  ;;  %v3520_v37 = vadd.f32 %v3410_v32, %v3328_v62  ;;  %v3605_v10 = vrot.slane %v8030_v0, 2 }
 0x298   : > { %v3601_v42 = vrot.slane %v3140_v44, 2  ;;  %v2890_v43 = vpop.f32.mrb[148].mxu0 }
 0x299   : > { %v2891_v38 = vpop.f32.mrb[149].mxu0 }
 0x29a   : > { %v3602_v52 = vsel %vm1336_vm1, %v3600_v35, %v3601_v42  ;;  %v3604_v20 = vsel %vm1336_vm1, %v3601_v42, %v3603_v9  ;;  %v3411_v59 = vrot.slane %v2891_v38, 1  ;;  %v2893_v3 = vpop.f32.mrb[150].mxu0 }
 0x29b   : > { %v3712_v28 = vadd.f32 %v3602_v52, %v3520_v37  ;;  %v3330_v51 = vadd.f32 %v2893_v3, %v9732_v13  ;;  %v2895_v41 = vpop.f32.mrb[151].mxu0 }
 0x29c   : > { %v8033_v45 = vpop.f32.mrb[148].mxu1  ;;  %v3412_v53 = vsel %vm1143_vm0, %v3409_v14, %v3411_v59  ;;  %v3413_v43 = vrot.slane %v2895_v41, 1 }
 0x29d   : > { %v3610_v21 = vrot.slane %v8033_v45, 2  ;;  %v3153_v39 = vpop.f32.mrb[149].mxu1  ;;  %v3751_v1 = vadd.f32 %v9909_v40, %v3712_v28  ;;  %v3521_v2 = vadd.f32 %v3412_v53, %v3329_v36 }
 0x29e   : > { %v3606_v16 = vrot.slane %v3153_v39, 2  ;;  %v8034_v49 = vpop.f32.mrb[150].mxu1 }
 0x29f   : > { %v3611_v63 = vrot.slane %v8034_v49, 2  ;;  %v3156_v62 = vpop.f32.mrb[151].mxu1  ;;  %v3783_v35 = vmax.f32 %v3751_v1, 0.0  ;;  %v3713_v44 = vadd.f32 %v3604_v20, %v3521_v2  ;;  %v3893_v49 = vld [vmem:[#allocation3 + $0x10] sm:$0xff] }
 0x2a0   : > { %v3607_v5 = vsel %vm1336_vm1, %v3605_v10, %v3606_v16  ;;  %v3608_v9 = vrot.slane %v3156_v62, 2  ;;  %v2899_v47 = vpop.f32.mrb[152].mxu0  ;;  %v8481_v62 = vld [vmem:[#allocation9 + $0x140] ss:$12 sps:$4 sm:$0xff]  }
 0x2a1   : > { %v9916_v0 = vsel %vm1336_vm1, %v3610_v21, %v3611_v63  ;;  %3859 = vst [vmem:[#allocation3 + $0x19] sm:$0xff] %v3783_v35  ;;  %v3752_v13 = vadd.f32 %v9909_v40, %v3713_v44  ;;  %v3331_v32 = vadd.f32 %v2899_v47, %v9743_v56  ;;  %v2901_v52 = vpop.f32.mrb[153].mxu0  ;;  %v8475_v2 = vld [vmem:[#allocation9 + $0xc0] ss:$12 sps:$4 sm:$0xff]   ;;  %8149 = vmatprep.subr.bf16.mxu1 %v8481_v62 }
 0x2a2   : > { %v3609_v55 = vsel %vm1336_vm1, %v3606_v16, %v3608_v9  ;;  %v3414_v45 = vrot.slane %v2901_v52, 1  ;;  %v2903_v28 = vpop.f32.mrb[154].mxu0  ;;  %8150 = vmatpush3.bf16.msra.mxu1 %v8481_v62 }
 0x2a3   : > { %v3784_v21 = vmax.f32 %v3752_v13, 0.0  ;;  %v2904_v39 = vpop.f32.mrb[155].mxu0 }
 0x2a4   : > { %v8037_v42 = vpop.f32.mrb[152].mxu1  ;;  %v3415_v20 = vsel %vm1143_vm0, %v3413_v43, %v3414_v45  ;;  %v3416_v16 = vrot.slane %v2904_v39, 1 }
 0x2a5   : > { %v3616_v14 = vrot.slane %v8037_v42, 2  ;;  %v3169_v37 = vpop.f32.mrb[153].mxu1  ;;  %3860 = vst [vmem:[#allocation3 + $0x21] sm:$0xff] %v3784_v21  ;;  %v3522_v1 = vadd.f32 %v3415_v20, %v3330_v51 }
 0x2a6   : > { %v3613_v36 = vrot.slane %v3169_v37, 2  ;;  %v8038_v38 = vpop.f32.mrb[154].mxu1  ;;  %v3417_v53 = vsel %vm1143_vm0, %v3414_v45, %v3416_v16 }
 0x2a7   : > { %v3618_v10 = vrot.slane %v8038_v38, 2  ;;  %v3172_v59 = vpop.f32.mrb[155].mxu1  ;;  %v3714_v44 = vadd.f32 %v3607_v5, %v3522_v1  ;;  %v3523_v47 = vadd.f32 %v3417_v53, %v3331_v32  ;;  %v8478_v38 = vld [vmem:[#allocation9 + $0xd8] ss:$12 sps:$4 sm:$0xff]  }
 0x2a8   : > { %v9923_v3 = vsel %vm1336_vm1, %v3611_v63, %v3613_v36  ;;  %v3615_v56 = vrot.slane %v3172_v59, 2  ;;  %v3894_v9 = vld [vmem:[#allocation3 + $0x18] sm:$0xff]  ;;  %v2908_v13 = vpop.f32.mrb[156].mxu0 }
 0x2a9   : > { %v9926_v41 = vsel %vm1336_vm1, %v3616_v14, %v3618_v10  ;;  %v3940_v42 = vpack.c.bf16 %v3894_v9, %v3893_v49  ;;  %v8480_v63 = vld [vmem:[#allocation9 + $0xdc] ss:$12 sps:$4 sm:$0xff]   ;;  %v3753_v51 = vadd.f32 %v9909_v40, %v3714_v44  ;;  %v3715_v37 = vadd.f32 %v3609_v55, %v3523_v47  ;;  %v2910_v28 = vpop.f32.mrb[157].mxu0 }
 0x2aa   : > { %v9930_v35 = vsel %vm1336_vm1, %v3615_v56, %v3616_v14  ;;  %v3332_v43 = vadd.f32 %v2908_v13, %v9740_v34  ;;  %v2912_v14 = vpop.f32.mrb[158].mxu0  ;;  %v8484_v34 = vld [vmem:[#allocation9 + $0xf4] ss:$12 sps:$4 sm:$0xff]   ;;  %v3418_v20 = vrot.slane %v2910_v28, 1 }
 0x2ab   : > { %4166 = vmatmul.mubr.bf16.gmra.mrb[196].mxu1 %v3940_v42  ;;  %8092 = vmatmul.mubr.bf16.vlgmr.msra.gmra.mrb[240].mxu0 %v3940_v42  ;;  %v3785_v21 = vmax.f32 %v3753_v51, 0.0  ;;  %v3754_v39 = vadd.f32 %v9909_v40, %v3715_v37  ;;  %v3333_v10 = vadd.f32 %v2912_v14, %v9750_v46  ;;  %v2914_v55 = vpop.f32.mrb[159].mxu0  ;;  %v8482_v46 = vld [vmem:[#allocation9 + $0xf0] ss:$12 sps:$4 sm:$0xff]   ;;  %v8487_v42 = vld [vmem:[#allocation9 + $0x10c] ss:$12 sps:$4 sm:$0xff]  }
 0x2ac   : > { %v8041_v52 = vpop.f32.mrb[156].mxu1  ;;  %4174 = vmatprep.mubr.bf16.mxu1 %v11148_v18  ;;  %5223 = vmatpush1.bf16.msra.mxu0 %v8475_v2  ;;  %v3419_v16 = vrot.slane %v2914_v55, 1  ;;  %v3895_v49 = vld [vmem:[#allocation3 + $0x20] sm:$0xff]  ;;  %v3896_v56 = vld [vmem:[#allocation3 + $0x28] sm:$0xff] }
 0x2ad   : > { %v3185_v45 = vpop.f32.mrb[157].mxu1  ;;  %v3623_v5 = vrot.slane %v8041_v52, 2  ;;  %5224 = vmatprep.subr.bf16.mxu0 %v8480_v63  ;;  %3861 = vst [vmem:[#allocation3 + $0x31] sm:$0xff] %v3785_v21  ;;  %v3786_v62 = vmax.f32 %v3754_v39, 0.0  ;;  %v3941_v53 = vpack.c.bf16 %v3896_v56, %v3895_v49 }
 0x2ae   : > { %v3620_v32 = vrot.slane %v3185_v45, 2  ;;  %v8042_v36 = vpop.f32.mrb[158].mxu1  ;;  %v3420_v9 = vsel %vm1143_vm0, %v3418_v20, %v3419_v16 }
 0x2af   : > { %v3188_v59 = vpop.f32.mrb[159].mxu1  ;;  %3862 = vst [vmem:[#allocation3 + $0x39] sm:$0xff] %v3786_v62  ;;  %v3524_v47 = vadd.f32 %v3420_v9, %v3332_v43  ;;  %8095 = vmatprep.mubr.bf16.mxu0 %v3941_v53  ;;  %v3625_v13 = vrot.slane %v8042_v36, 2  ;;  %v8485_v43 = vld [vmem:[#allocation9 + $0x108] ss:$12 sps:$4 sm:$0xff]  }
 0x2b0   : > { %v3621_v1 = vrot.slane %v3188_v59, 2  ;;  %5225 = vmatpush1.bf16.msra.mxu0 %v8478_v38  ;;  %v2918_v63 = vpop.f32.mrb[160].mxu0 }
 0x2b1   : > { %5226 = vmatprep.subr.bf16.mxu0 %v8484_v34  ;;  %v3716_v51 = vadd.f32 %v9916_v0, %v3524_v47  ;;  %v2919_v37 = vpop.f32.mrb[161].mxu0 }
 0x2b2   : > { %v9939_v2 = vsel %vm1336_vm1, %v3620_v32, %v3621_v1  ;;  %v9942_v44 = vsel %vm1336_vm1, %v3621_v1, %v3623_v5  ;;  %v3421_v14 = vrot.slane %v2919_v37, 1  ;;  %v2921_v32 = vpop.f32.mrb[162].mxu0 }
 0x2b3   : > { %4175 = vmatmul.mubr.bf16.gmra.mrb[200].mxu1 %v3941_v53  ;;  %v3755_v21 = vadd.f32 %v9909_v40, %v3716_v51  ;;  %v3334_v39 = vadd.f32 %v2921_v32, %v9762_v26  ;;  %v2923_v36 = vpop.f32.mrb[163].mxu0 }
 0x2b4   : > { %v8045_v52 = vpop.f32.mrb[160].mxu1  ;;  %4183 = vmatprep.mubr.bf16.mxu1 %v11148_v18  ;;  %5227 = vmatpush1.bf16.msra.mxu0 %v8482_v46  ;;  %v3422_v0 = vsel %vm1143_vm0, %v3419_v16, %v3421_v14  ;;  %v3897_v1 = vld [vmem:[#allocation3 + $0x30] sm:$0xff] }
 0x2b5   : > { %v3630_v28 = vrot.slane %v8045_v52, 2  ;;  %v3201_v45 = vpop.f32.mrb[161].mxu1  ;;  %5228 = vmatprep.subr.bf16.mxu0 %v8487_v42  ;;  %v3787_v49 = vmax.f32 %v3755_v21, 0.0  ;;  %v3525_v56 = vadd.f32 %v3422_v0, %v3333_v10  ;;  %v4992_v26 = vld [vmem:[#allocation3 + $0x30] sm:$0xff] }
 0x2b6   : > { %v3626_v5 = vrot.slane %v3201_v45, 2  ;;  %v8046_v38 = vpop.f32.mrb[162].mxu1  ;;  %v3898_v53 = vld [vmem:[#allocation3 + $0x38] sm:$0xff]  ;;  %v3423_v45 = vrot.slane %v2923_v36, 1  ;;  %v3899_v36 = vld [vmem:[#allocation3 + $0x40] sm:$0xff] }
 0x2b7   : > { %v3631_v55 = vrot.slane %v8046_v38, 2  ;;  %v3204_v59 = vpop.f32.mrb[163].mxu1  ;;  %v4993_v46 = vld [vmem:[#allocation3 + $0x38] sm:$0xff]  ;;  %3863 = vst [vmem:[#allocation3 + $0x49] sm:$0xff] %v3787_v49  ;;  %v3717_v16 = vadd.f32 %v9923_v3, %v3525_v56  ;;  %v3942_v47 = vpack.c.bf16 %v3898_v53, %v3897_v1  ;;  %v8488_v53 = vld [vmem:[#allocation9 + $0x158] ss:$12 sps:$4 sm:$0xff]  }
 0x2b8   : > { %v9950_v34 = vsel %vm1336_vm1, %v3625_v13, %v3626_v5  ;;  %v3628_v20 = vrot.slane %v3204_v59, 2  ;;  %5229 = vmatpush1.bf16.msra.mxu0 %v8485_v43  ;;  %v9959_v42 = vpack.c.bf16 %v4993_v46, %v4992_v26  ;;  %v2927_v63 = vpop.f32.mrb[164].mxu0  ;;  %8151 = vmatprep.subr.bf16.mxu1 %v8488_v53 }
 0x2b9   : > { %v9953_v62 = vsel %vm1336_vm1, %v3630_v28, %v3631_v55  ;;  %v3756_v10 = vadd.f32 %v9909_v40, %v3717_v16  ;;  %v3335_v52 = vadd.f32 %v2927_v63, %v9758_v30  ;;  %v2929_v51 = vpop.f32.mrb[165].mxu0  ;;  %8096 = vmatmul.mubr.bf16.gmra.mrb[244].mxu0 %v3942_v47  ;;  %8152 = vmatpush3.bf16.msra.mxu1 %v8488_v53 }
 0x2ba   : > { %v9956_v9 = vsel %vm1336_vm1, %v3626_v5, %v3628_v20  ;;  %11159 = vst [vmem:[#allocation14_spill] sm:$0xff] %v9959_v42  ;;  %v3424_v14 = vrot.slane %v2929_v51, 1  ;;  %v2931_v32 = vpop.f32.mrb[166].mxu0  ;;  %v8489_v51 = vld [vmem:[#allocation9 + $0x120] ss:$12 sps:$4 sm:$0xff]  }
 0x2bb   : > { %4184 = vmatmul.mubr.bf16.gmra.mrb[204].mxu1 %v3942_v47  ;;  %v3788_v38 = vmax.f32 %v3756_v10, 0.0  ;;  %v2932_v43 = vpop.f32.mrb[167].mxu0  ;;  %v4994_v47 = vld [vmem:[#allocation3 + $0x40] sm:$0xff] }
 0x2bc   : > { %v8049_v13 = vpop.f32.mrb[164].mxu1  ;;  %4193 = vmatprep.mubr.bf16.mxu1 %v11148_v18  ;;  %v3425_v0 = vsel %vm1143_vm0, %v3423_v45, %v3424_v14  ;;  %v3426_v20 = vrot.slane %v2932_v43, 1 }
 0x2bd   : > { %v3636_v37 = vrot.slane %v8049_v13, 2  ;;  %v3217_v28 = vpop.f32.mrb[165].mxu1  ;;  %3864 = vst [vmem:[#allocation3 + $0x51] sm:$0xff] %v3788_v38  ;;  %v3526_v56 = vadd.f32 %v3425_v0, %v3334_v39  ;;  %v8491_v39 = vld [vmem:[#allocation9 + $0x124] ss:$12 sps:$4 sm:$0xff]  }
 0x2be   : > { %v3633_v3 = vrot.slane %v3217_v28, 2  ;;  %v8050_v5 = vpop.f32.mrb[166].mxu1  ;;  %v3427_v26 = vsel %vm1143_vm0, %v3424_v14, %v3426_v20  ;;  %v3900_v46 = vld [vmem:[#allocation3 + $0x48] sm:$0xff]  ;;  %5230 = vmatprep.subr.bf16.mxu0 %v8491_v39 }
 0x2bf   : > { %v3638_v21 = vrot.slane %v8050_v5, 2  ;;  %v3220_v59 = vpop.f32.mrb[167].mxu1  ;;  %v4995_v63 = vld [vmem:[#allocation3 + $0x48] sm:$0xff]  ;;  %v3718_v13 = vadd.f32 %v9930_v35, %v3526_v56  ;;  %v3943_v10 = vpack.c.bf16 %v3900_v46, %v3899_v36  ;;  %5231 = vmatpush1.bf16.msra.mxu0 %v8489_v51 }
 0x2c0   : > { %v9966_v30 = vsel %vm1336_vm1, %v3631_v55, %v3633_v3  ;;  %v3635_v49 = vrot.slane %v3220_v59, 2  ;;  %v3527_v55 = vadd.f32 %v3427_v26, %v3335_v52  ;;  %v9976_v28 = vpack.c.bf16 %v4995_v63, %v4994_v47  ;;  %v2936_v45 = vpop.f32.mrb[168].mxu0 }
 0x2c1   : > { %v9969_v1 = vsel %vm1336_vm1, %v3636_v37, %v3638_v21  ;;  %v3757_v14 = vadd.f32 %v9909_v40, %v3718_v13  ;;  %v2938_v5 = vpop.f32.mrb[169].mxu0  ;;  %8099 = vmatprep.mubr.bf16.mxu0 %v3943_v10 }
 0x2c2   : > { %v9973_v16 = vsel %vm1336_vm1, %v3635_v49, %v3636_v37  ;;  %11160 = vst [vmem:[#allocation15_spill] sm:$0xff] %v9976_v28  ;;  %v3719_v3 = vadd.f32 %v9926_v41, %v3527_v55  ;;  %v3336_v37 = vadd.f32 %v2936_v45, %v9774_v15  ;;  %v2940_v52 = vpop.f32.mrb[170].mxu0  ;;  %v3428_v15 = vrot.slane %v2938_v5, 1  ;;  %v8492_v45 = vld [vmem:[#allocation9 + $0x138] ss:$12 sps:$4 sm:$0xff]  }
 0x2c3   : > { %4194 = vmatmul.mubr.bf16.gmra.mrb[208].mxu1 %v3943_v10  ;;  %v3789_v59 = vmax.f32 %v3757_v14, 0.0  ;;  %v3337_v20 = vadd.f32 %v2940_v52, %v9777_v11  ;;  %v2942_v49 = vpop.f32.mrb[171].mxu0 }
 0x2c4   : > { %v8053_v32 = vpop.f32.mrb[168].mxu1  ;;  %4202 = vmatprep.mubr.bf16.mxu1 %v11148_v18  ;;  %v3758_v0 = vadd.f32 %v9909_v40, %v3719_v3  ;;  %v3429_v56 = vrot.slane %v2942_v49, 1  ;;  %v3901_v36 = vld [vmem:[#allocation3 + $0x50] sm:$0xff]  ;;  %v3902_v53 = vld [vmem:[#allocation3 + $0x58] sm:$0xff] }
 0x2c5   : > { %v3233_v35 = vpop.f32.mrb[169].mxu1  ;;  %v3643_v38 = vrot.slane %v8053_v32, 2  ;;  %v4996_v46 = vld [vmem:[#allocation3 + $0x50] sm:$0xff]  ;;  %3865 = vst [vmem:[#allocation3 + $0x61] sm:$0xff] %v3789_v59  ;;  %v3944_v63 = vpack.c.bf16 %v3902_v53, %v3901_v36  ;;  %v4997_v13 = vld [vmem:[#allocation3 + $0x58] sm:$0xff] }
 0x2c6   : > { %v3640_v43 = vrot.slane %v3233_v35, 2  ;;  %v8054_v21 = vpop.f32.mrb[170].mxu1  ;;  %v3790_v47 = vmax.f32 %v3758_v0, 0.0  ;;  %v3430_v55 = vsel %vm1143_vm0, %v3428_v15, %v3429_v56  ;;  %v9991_v39 = vpack.c.bf16 %v4997_v13, %v4996_v46  ;;  %v8494_v32 = vld [vmem:[#allocation9 + $0x13c] ss:$12 sps:$4 sm:$0xff]  }
 0x2c7   : > { %v3236_v41 = vpop.f32.mrb[171].mxu1  ;;  %v3528_v51 = vadd.f32 %v3430_v55, %v3336_v37  ;;  %8100 = vmatmul.mubr.bf16.gmra.mrb[248].mxu0 %v3944_v63  ;;  %v3645_v3 = vrot.slane %v8054_v21, 2  ;;  %5232 = vmatprep.subr.bf16.mxu0 %v8494_v32 }
 0x2c8   : > { %v3641_v26 = vrot.slane %v3236_v41, 2  ;;  %11161 = vst [vmem:[#allocation17_spill] sm:$0xff] %v9991_v39  ;;  %3866 = vst [vmem:[#allocation3 + $0x69] sm:$0xff] %v3790_v47  ;;  %v2946_v14 = vpop.f32.mrb[172].mxu0  ;;  %5233 = vmatpush1.bf16.msra.mxu0 %v8492_v45 }
 0x2c9   : > { %v3720_v35 = vadd.f32 %v9939_v2, %v3528_v51  ;;  %v2947_v52 = vpop.f32.mrb[173].mxu0 }
 0x2ca   : > { %v9986_v10 = vsel %vm1336_vm1, %v3640_v43, %v3641_v26  ;;  %v9989_v11 = vsel %vm1336_vm1, %v3641_v26, %v3643_v38  ;;  %v3431_v0 = vrot.slane %v2947_v52, 1  ;;  %v2949_v38 = vpop.f32.mrb[174].mxu0 }
 0x2cb   : > { %4203 = vmatmul.mubr.bf16.gmra.mrb[212].mxu1 %v3944_v63  ;;  %v3759_v37 = vadd.f32 %v9909_v40, %v3720_v35  ;;  %v3338_v15 = vadd.f32 %v2949_v38, %v9786_v6  ;;  %v2951_v21 = vpop.f32.mrb[175].mxu0 }
 0x2cc   : > { %v8057_v5 = vpop.f32.mrb[172].mxu1  ;;  %4211 = vmatprep.mubr.bf16.mxu1 %v11148_v18  ;;  %v3432_v2 = vsel %vm1143_vm0, %v3429_v56, %v3431_v0  ;;  %v3903_v13 = vld [vmem:[#allocation3 + $0x60] sm:$0xff]  ;;  %v3433_v38 = vrot.slane %v2951_v21, 1 }
 0x2cd   : > { %v3650_v59 = vrot.slane %v8057_v5, 2  ;;  %v3249_v43 = vpop.f32.mrb[173].mxu1  ;;  %v3791_v47 = vmax.f32 %v3759_v37, 0.0  ;;  %v3529_v63 = vadd.f32 %v3432_v2, %v3337_v20  ;;  %v10007_v6 = vld [vmem:[#allocation3 + $0x60] sm:$0xff] }
 0x2ce   : > { %v3646_v49 = vrot.slane %v3249_v43, 2  ;;  %v8058_v41 = vpop.f32.mrb[174].mxu1 }
 0x2cf   : > { %v3651_v36 = vrot.slane %v8058_v41, 2  ;;  %v3252_v53 = vpop.f32.mrb[175].mxu1  ;;  %v3904_v51 = vld [vmem:[#allocation3 + $0x68] sm:$0xff]  ;;  %3867 = vst [vmem:[#allocation3 + $0x79] sm:$0xff] %v3791_v47  ;;  %v3721_v56 = vadd.f32 %v9942_v44, %v3529_v63  ;;  %v3905_v21 = vld [vmem:[#allocation3 + $0x70] sm:$0xff] }
 0x2d0   : > { %v9999_v26 = vsel %vm1336_vm1, %v3645_v3, %v3646_v49  ;;  %v3648_v46 = vrot.slane %v3252_v53, 2  ;;  %v10009_v32 = vld [vmem:[#allocation3 + $0x68] sm:$0xff]  ;;  %v3945_v14 = vpack.c.bf16 %v3904_v51, %v3903_v13  ;;  %v2955_v20 = vpop.f32.mrb[176].mxu0 }
 0x2d1   : > { %v10002_v55 = vsel %vm1336_vm1, %v3650_v59, %v3651_v36  ;;  %v10014_v3 = vpack.c.bf16 %v10009_v32, %v10007_v6  ;;  %v3760_v35 = vadd.f32 %v9909_v40, %v3721_v56  ;;  %v3339_v52 = vadd.f32 %v2955_v20, %v9797_v54  ;;  %v2957_v59 = vpop.f32.mrb[177].mxu0  ;;  %v8495_v20 = vld [vmem:[#allocation9 + $0x170] ss:$12 sps:$4 sm:$0xff]  }
 0x2d2   : > { %v10005_v45 = vsel %vm1336_vm1, %v3646_v49, %v3648_v46  ;;  %8103 = vmatprep.mubr.bf16.mxu0 %v3945_v14  ;;  %v3434_v49 = vrot.slane %v2957_v59, 1  ;;  %v2959_v41 = vpop.f32.mrb[178].mxu0  ;;  %8153 = vmatprep.subr.bf16.mxu1 %v8495_v20 }
 0x2d3   : > { %11162 = vst [vmem:[#allocation16_spill] sm:$0xff] %v10014_v3  ;;  %4212 = vmatmul.mubr.bf16.gmra.mrb[216].mxu1 %v3945_v14  ;;  %v3792_v53 = vmax.f32 %v3760_v35, 0.0  ;;  %v2960_v2 = vpop.f32.mrb[179].mxu0 }
 0x2d4   : > { %v8061_v5 = vpop.f32.mrb[176].mxu1  ;;  %4221 = vmatprep.mubr.bf16.mxu1 %v11148_v18  ;;  %v3435_v63 = vsel %vm1143_vm0, %v3433_v38, %v3434_v49  ;;  %v3436_v13 = vrot.slane %v2960_v2, 1  ;;  %v8498_v38 = vld [vmem:[#allocation9 + $0x154] ss:$12 sps:$4 sm:$0xff]   ;;  %8154 = vmatpush3.bf16.msra.mxu1 %v8495_v20 }
 0x2d5   : > { %v3656_v43 = vrot.slane %v8061_v5, 2  ;;  %v3265_v0 = vpop.f32.mrb[177].mxu1  ;;  %3868 = vst [vmem:[#allocation3 + $0x81] sm:$0xff] %v3792_v53  ;;  %v3530_v56 = vadd.f32 %v3435_v63, %v3338_v15  ;;  %v10026_v5 = vld [vmem:[#allocation3 + $0x70] sm:$0xff]  ;;  %v8501_v53 = vld [vmem:[#allocation9 + $0x16c] ss:$12 sps:$4 sm:$0xff]   ;;  %5234 = vmatprep.subr.bf16.mxu0 %v8498_v38 }
 0x2d6   : > { %v3653_v44 = vrot.slane %v3265_v0, 2  ;;  %v8062_v37 = vpop.f32.mrb[178].mxu1  ;;  %v3437_v35 = vsel %vm1143_vm0, %v3434_v49, %v3436_v13  ;;  %v3906_v59 = vld [vmem:[#allocation3 + $0x78] sm:$0xff] }
 0x2d7   : > { %v3658_v46 = vrot.slane %v8062_v37, 2  ;;  %v3268_v47 = vpop.f32.mrb[179].mxu1  ;;  %v10032_v41 = vld [vmem:[#allocation3 + $0x78] sm:$0xff]  ;;  %v3946_v15 = vpack.c.bf16 %v3906_v59, %v3905_v21  ;;  %v8496_v37 = vld [vmem:[#allocation9 + $0x150] ss:$12 sps:$4 sm:$0xff]  }
 0x2d8   : > { %v10021_v54 = vsel %vm1336_vm1, %v3651_v36, %v3653_v44  ;;  %v3655_v51 = vrot.slane %v3268_v47, 2  ;;  %v3722_v36 = vadd.f32 %v9950_v34, %v3530_v56  ;;  %v3531_v44 = vadd.f32 %v3437_v35, %v3339_v52  ;;  %5235 = vmatpush1.bf16.msra.mxu0 %v8496_v37  ;;  %v8499_v35 = vld [vmem:[#allocation9 + $0x168] ss:$12 sps:$4 sm:$0xff]  }
 0x2d9   : > { %v10024_v14 = vsel %vm1336_vm1, %v3656_v43, %v3658_v46  ;;  %v10037_v2 = vpack.c.bf16 %v10032_v41, %v10026_v5  ;;  %v2964_v46 = vpop.f32.mrb[180].mxu0  ;;  %8104 = vmatmul.mubr.bf16.gmra.mrb[252].mxu0 %v3946_v15  ;;  %5236 = vmatprep.subr.bf16.mxu0 %v8501_v53 }
 0x2da   : > { %v10030_v0 = vsel %vm1336_vm1, %v3655_v51, %v3656_v43  ;;  %v3761_v43 = vadd.f32 %v9909_v40, %v3722_v36  ;;  %v3723_v47 = vadd.f32 %v9956_v9, %v3531_v44  ;;  %v3340_v63 = vadd.f32 %v2964_v46, %v9794_v61  ;;  %v2966_v34 = vpop.f32.mrb[181].mxu0 }
 0x2db   : > { %11163 = vst [vmem:[#allocation18_spill] sm:$0xff] %v10037_v2  ;;  %4222 = vmatmul.mubr.bf16.gmra.mrb[220].mxu1 %v3946_v15  ;;  %v2968_v13 = vpop.f32.mrb[182].mxu0  ;;  %v3438_v61 = vrot.slane %v2966_v34, 1 }
 0x2dc   : > { %v8065_v49 = vpop.f32.mrb[180].mxu1  ;;  %4230 = vmatprep.mubr.bf16.mxu1 %v11148_v18  ;;  %v3793_v20 = vmax.f32 %v3761_v43, 0.0  ;;  %v3762_v59 = vadd.f32 %v9909_v40, %v3723_v47  ;;  %v3341_v38 = vadd.f32 %v2968_v13, %v9804_v17  ;;  %v2970_v9 = vpop.f32.mrb[183].mxu0  ;;  %v3907_v15 = vld [vmem:[#allocation3 + $0x80] sm:$0xff]  ;;  %v3908_v46 = vld [vmem:[#allocation3 + $0x88] sm:$0xff]  ;;  %5237 = vmatpush1.bf16.msra.mxu0 %v8499_v35 }
 0x2dd   : > { %v3281_v52 = vpop.f32.mrb[181].mxu1  ;;  %v3663_v51 = vrot.slane %v8065_v49, 2  ;;  %v3439_v44 = vrot.slane %v2970_v9, 1  ;;  %v10045_v3 = vld [vmem:[#allocation3 + $0x80] sm:$0xff]  ;;  %v10047_v37 = vld [vmem:[#allocation3 + $0x88] sm:$0xff] }
 0x2de   : > { %v3660_v56 = vrot.slane %v3281_v52, 2  ;;  %v8066_v21 = vpop.f32.mrb[182].mxu1  ;;  %3869 = vst [vmem:[#allocation3 + $0x91] sm:$0xff] %v3793_v20  ;;  %v3794_v49 = vmax.f32 %v3762_v59, 0.0  ;;  %v3947_v52 = vpack.c.bf16 %v3908_v46, %v3907_v15  ;;  %v10058_v53 = vpack.c.bf16 %v10047_v37, %v10045_v3  ;;  %v8504_v46 = vld [vmem:[#allocation9 + $0x184] ss:$12 sps:$4 sm:$0xff]  }
 0x2df   : > { %v3284_v36 = vpop.f32.mrb[183].mxu1  ;;  %v3440_v43 = vsel %vm1143_vm0, %v3438_v61, %v3439_v44  ;;  %v3665_v20 = vrot.slane %v8066_v21, 2  ;;  %6354 = vmatprep.subr.bf16.mxu1 %v8504_v46 }
 0x2e0   : > { %v3661_v2 = vrot.slane %v3284_v36, 2  ;;  %11164 = vst [vmem:[#allocation19_spill] sm:$0xff] %v10058_v53  ;;  %3870 = vst [vmem:[#allocation3 + $0x99] sm:$0xff] %v3794_v49  ;;  %v3532_v34 = vadd.f32 %v3440_v43, %v3340_v63  ;;  %8107 = vmatprep.mubr.bf16.mxu0 %v3947_v52  ;;  %v2974_v13 = vpop.f32.mrb[184].mxu0  ;;  %v10064_v53 = vld [vmem:[#allocation9 + $0x188] ss:$12 sps:$4 sm:$0xff]  }
 0x2e1   : > { %v2975_v36 = vpop.f32.mrb[185].mxu0  ;;  %8203 = vmatprep.subr.bf16.mxu0 %v10064_v53 }
 0x2e2   : > { %v10051_v47 = vsel %vm1336_vm1, %v3660_v56, %v3661_v2  ;;  %v10054_v17 = vsel %vm1336_vm1, %v3661_v2, %v3663_v51  ;;  %v3724_v9 = vadd.f32 %v9953_v62, %v3532_v34  ;;  %v3441_v15 = vrot.slane %v2975_v36, 1  ;;  %v2977_v2 = vpop.f32.mrb[186].mxu0 }
 0x2e3   : > { %4231 = vmatmul.mubr.bf16.gmra.mrb[224].mxu1 %v3947_v52  ;;  %v3342_v63 = vadd.f32 %v2977_v2, %v9816_v23  ;;  %v2979_v43 = vpop.f32.mrb[187].mxu0 }
 0x2e4   : > { %v8069_v59 = vpop.f32.mrb[184].mxu1  ;;  %4239 = vmatprep.mubr.bf16.mxu1 %v11148_v18  ;;  %v3763_v49 = vadd.f32 %v9909_v40, %v3724_v9  ;;  %v3442_v62 = vsel %vm1143_vm0, %v3439_v44, %v3441_v15 }
 0x2e5   : > { %v3670_v56 = vrot.slane %v8069_v59, 2  ;;  %v3297_v61 = vpop.f32.mrb[185].mxu1  ;;  %v3533_v36 = vadd.f32 %v3442_v62, %v3341_v38  ;;  %v10077_v2 = vld [vmem:[#allocation3 + $0x90] sm:$0xff] }
 0x2e6   : > { %v3666_v51 = vrot.slane %v3297_v61, 2  ;;  %v8070_v35 = vpop.f32.mrb[186].mxu1  ;;  %v3795_v59 = vmax.f32 %v3763_v49, 0.0  ;;  %v3909_v61 = vld [vmem:[#allocation3 + $0x90] sm:$0xff] }
 0x2e7   : > { %v3671_v21 = vrot.slane %v8070_v35, 2  ;;  %v3300_v13 = vpop.f32.mrb[187].mxu1  ;;  %v3910_v23 = vld [vmem:[#allocation3 + $0x98] sm:$0xff] }
 0x2e8   : > { %v10068_v52 = vsel %vm1336_vm1, %v3665_v20, %v3666_v51  ;;  %v3668_v34 = vrot.slane %v3300_v13, 2  ;;  %v10079_v44 = vld [vmem:[#allocation3 + $0x98] sm:$0xff]  ;;  %3871 = vst [vmem:[#allocation3 + $0xa9] sm:$0xff] %v3795_v59  ;;  %v3725_v20 = vadd.f32 %v9966_v30, %v3533_v36  ;;  %v3948_v15 = vpack.c.bf16 %v3910_v23, %v3909_v61 }
 0x2e9   : > { %v10071_v39 = vsel %vm1336_vm1, %v3670_v56, %v3671_v21  ;;  %11165 = vst [vmem:[#allocation20_spill] sm:$0xff] %v10079_v44  ;;  %v10084_v38 = vpack.c.bf16 %v10079_v44, %v10077_v2  ;;  %v2983_v56 = vpop.f32.mrb[188].mxu0 }
 0x2ea   : > { %v10075_v9 = vsel %vm1336_vm1, %v3666_v51, %v3668_v34  ;;  %v3764_v46 = vadd.f32 %v9909_v40, %v3725_v20  ;;  %v3343_v49 = vadd.f32 %v2983_v56, %v9812_v4  ;;  %v2985_v51 = vpop.f32.mrb[189].mxu0  ;;  %8108 = vmatmul.mubr.bf16.gmra.mrb[0].mxu0 %v3948_v15  ;;  %v3443_v34 = vrot.slane %v2979_v43, 1  ;;  %v3911_v43 = vld [vmem:[#allocation3 + $0xa0] sm:$0xff] }
 0x2eb   : > { %11166 = vst [vmem:[#allocation21_spill] sm:$0xff] %v10084_v38  ;;  %4240 = vmatmul.mubr.bf16.gmra.mrb[228].mxu1 %v3948_v15  ;;  %v3444_v59 = vrot.slane %v2985_v51, 1  ;;  %v2987_v28 = vpop.f32.mrb[190].mxu0 }
 0x2ec   : > { %v8073_v35 = vpop.f32.mrb[188].mxu1  ;;  %4249 = vmatprep.mubr.bf16.mxu1 %v11148_v18  ;;  %v3796_v61 = vmax.f32 %v3764_v46, 0.0  ;;  %v2988_v23 = vpop.f32.mrb[191].mxu0 }
 0x2ed   : > { %v3676_v13 = vrot.slane %v8073_v35, 2  ;;  %v3313_v62 = vpop.f32.mrb[189].mxu1  ;;  %v3445_v20 = vsel %vm1143_vm0, %v3443_v34, %v3444_v59  ;;  %v3446_v44 = vrot.slane %v2988_v23, 1 }
 0x2ee   : > { %v3673_v30 = vrot.slane %v3313_v62, 2  ;;  %v8074_v36 = vpop.f32.mrb[190].mxu1  ;;  %3872 = vst [vmem:[#allocation3 + $0xb1] sm:$0xff] %v3796_v61  ;;  %v3534_v56 = vadd.f32 %v3445_v20, %v3342_v63  ;;  %v10100_v62 = vld [vmem:[#allocation3 + $0xa0] sm:$0xff] }
 0x2ef   : > { %v3678_v38 = vrot.slane %v8074_v36, 2  ;;  %v3316_v42 = vpop.f32.mrb[191].mxu1  ;;  %v3447_v35 = vsel %vm1143_vm0, %v3444_v59, %v3446_v44  ;;  %v3912_v51 = vld [vmem:[#allocation3 + $0xa8] sm:$0xff] }
 0x2f0   : > { %v10091_v4 = vsel %vm1336_vm1, %v3671_v21, %v3673_v30  ;;  %v3675_v15 = vrot.slane %v3316_v42, 2  ;;  %v10102_v34 = vld [vmem:[#allocation3 + $0xa8] sm:$0xff]  ;;  %v3726_v21 = vadd.f32 %v9973_v16, %v3534_v56  ;;  %v3535_v30 = vadd.f32 %v3447_v35, %v3343_v49 }
 0x2f1   : > { %v10094_v28 = vsel %vm1336_vm1, %v3676_v13, %v3678_v38  ;;  %v3949_v42 = vpack.c.bf16 %v3912_v51, %v3911_v43  ;;  %v10107_v63 = vpack.c.bf16 %v10102_v34, %v10100_v62  ;;  %v2992_v38 = vpop.f32.mrb[192].mxu0 }
 0x2f2   : > { %v10098_v46 = vsel %vm1336_vm1, %v3675_v15, %v3676_v13  ;;  %v3765_v44 = vadd.f32 %v9909_v40, %v3726_v21  ;;  %v3727_v59 = vadd.f32 %v9969_v1, %v3535_v30  ;;  %v3344_v13 = vadd.f32 %v2992_v38, %v9828_v22  ;;  %v2994_v61 = vpop.f32.mrb[193].mxu0 }
 0x2f3   : > { %11167 = vst [vmem:[#allocation22_spill] sm:$0xff] %v10107_v63  ;;  %4250 = vmatmul.mubr.bf16.gmra.mrb[232].mxu1 %v3949_v42  ;;  %8111 = vmatprep.mubr.bf16.mxu0 %v3949_v42  ;;  %v2996_v20 = vpop.f32.mrb[194].mxu0  ;;  %v3448_v1 = vrot.slane %v2994_v61, 1 }
 0x2f4   : > { %v4157_v36 = vpop.f32.mrb[192].mxu1  ;;  %4258 = vmatprep.mubr.bf16.mxu1 %v11148_v18  ;;  %v3797_v15 = vmax.f32 %v3765_v44, 0.0  ;;  %v3766_v56 = vadd.f32 %v9909_v40, %v3727_v59  ;;  %v3345_v43 = vadd.f32 %v2996_v20, %v9831_v48  ;;  %v2998_v35 = vpop.f32.mrb[195].mxu0 }
 0x2f5   : > { %v4159_v23 = vpop.f32.mrb[193].mxu1  ;;  %v3449_v22 = vrot.slane %v2998_v35, 1  ;;  %v3913_v21 = vld [vmem:[#allocation3 + $0xb0] sm:$0xff]  ;;  %v3914_v30 = vld [vmem:[#allocation3 + $0xb8] sm:$0xff] }
 0x2f6   : > { %v4653_v16 = vrot.slane %v4159_v23, 1  ;;  %v10113_v49 = vpop.f32.mrb[194].mxu1  ;;  %v10120_v38 = vld [vmem:[#allocation3 + $0xb0] sm:$0xff]  ;;  %3873 = vst [vmem:[#allocation3 + $0xc1] sm:$0xff] %v3797_v15  ;;  %v3798_v23 = vmax.f32 %v3766_v56, 0.0  ;;  %v3950_v63 = vpack.c.bf16 %v3914_v30, %v3913_v21 }
 0x2f7   : > { %11168 = vst [vmem:[#allocation23_spill] sm:$0xff] %v10113_v49  ;;  %v10117_v51 = vpop.f32.mrb[195].mxu1  ;;  %v10122_v49 = vld [vmem:[#allocation3 + $0xb8] sm:$0xff]  ;;  %v3450_v44 = vsel %vm1143_vm0, %v3448_v1, %v3449_v22 }
 0x2f8   : > { %v11136_v42 = vrot.slane %v10117_v51, 1  ;;  %v10130_v59 = vpack.c.bf16 %v10122_v49, %v10120_v38  ;;  %3874 = vst [vmem:[#allocation3 + $0xc9] sm:$0xff] %v3798_v23  ;;  %v3536_v61 = vadd.f32 %v3450_v44, %v3344_v13  ;;  %8112 = vmatmul.mubr.bf16.gmra.mrb[4].mxu0 %v3950_v63  ;;  %v3002_v15 = vpop.f32.mrb[196].mxu0 }
 0x2f9   : > { %v3003_v35 = vpop.f32.mrb[197].mxu0 }
 0x2fa   : > { %v4655_v48 = vsel %vm1143_vm0, %v4653_v16, %v11136_v42  ;;  %11169 = vst [vmem:[#allocation24_spill] sm:$0xff] %v10130_v59  ;;  %v3728_v56 = vadd.f32 %v9986_v10, %v3536_v61  ;;  %v3451_v21 = vrot.slane %v3003_v35, 1  ;;  %v3005_v1 = vpop.f32.mrb[198].mxu0 }
 0x2fb   : > { %v10132_v20 = vadd.f32 %v4655_v48, %v4157_v36  ;;  %4259 = vmatmul.mubr.bf16.gmra.mrb[236].mxu1 %v3950_v63  ;;  %v3346_v30 = vadd.f32 %v3005_v1, %v9840_v33  ;;  %v3007_v42 = vpop.f32.mrb[199].mxu0 }
 0x2fc   : > { %4267 = vmatprep.mubr.bf16.mxu1 %v11148_v18  ;;  %v3767_v16 = vadd.f32 %v9909_v40, %v3728_v56  ;;  %v3452_v23 = vsel %vm1143_vm0, %v3449_v22, %v3451_v21 }
 0x2fd   : > { %v3537_v44 = vadd.f32 %v3452_v23, %v3345_v43  ;;  %v10139_v36 = vld [vmem:[#allocation3 + $0xc0] sm:$0xff]  ;;  %v3453_v43 = vrot.slane %v3007_v42, 1 }
 0x2fe   : > { %v3799_v13 = vmax.f32 %v3767_v16, 0.0 }
 0x2ff   : > { %v3916_v48 = vld [vmem:[#allocation3 + $0xc8] sm:$0xff]  ;;  %v3917_v15 = vld [vmem:[#allocation3 + $0xd0] sm:$0xff]  ;;  %v3729_v10 = vadd.f32 %v9989_v11, %v3537_v44 }
 0x300   : > { %3875 = vst [vmem:[#allocation3 + $0xd9] sm:$0xff] %v3799_v13  ;;  %v3951_v63 = vpack.c.bf16 %v3916_v48, %v10139_v36  ;;  %v10143_v61 = vpack.c.bf16 %v3917_v15, %v3916_v48  ;;  %v3011_v35 = vpop.f32.mrb[200].mxu0 }
 0x301   : > { %v3768_v56 = vadd.f32 %v9909_v40, %v3729_v10  ;;  %v3347_v33 = vadd.f32 %v3011_v35, %v9849_v19  ;;  %v3013_v1 = vpop.f32.mrb[201].mxu0 }
 0x302   : > { %8115 = vmatprep.mubr.bf16.mxu0 %v3951_v63  ;;  %v3454_v22 = vrot.slane %v3013_v1, 1  ;;  %v3015_v21 = vpop.f32.mrb[202].mxu0 }
 0x303   : > { %4268 = vmatmul.mubr.bf16.gmra.mrb[240].mxu1 %v3951_v63  ;;  %v3800_v16 = vmax.f32 %v3768_v56, 0.0  ;;  %v3016_v23 = vpop.f32.mrb[203].mxu0 }
 0x304   : > { %4277 = vmatprep.mubr.bf16.mxu1 %v11148_v18  ;;  %v3455_v11 = vsel %vm1143_vm0, %v3453_v43, %v3454_v22  ;;  %v3456_v13 = vrot.slane %v3016_v23, 1 }
 0x305   : > { %3876 = vst [vmem:[#allocation3 + $0xe1] sm:$0xff] %v3800_v16  ;;  %v3538_v44 = vadd.f32 %v3455_v11, %v3346_v30 }
 0x306   : > { %v3457_v48 = vsel %vm1143_vm0, %v3454_v22, %v3456_v13 }
 0x307   : > { %v3918_v10 = vld [vmem:[#allocation3 + $0xd8] sm:$0xff]  ;;  %v3730_v19 = vadd.f32 %v9999_v26, %v3538_v44  ;;  %v3539_v35 = vadd.f32 %v3457_v48, %v3347_v33 }
 0x308   : > { %v3952_v59 = vpack.c.bf16 %v3918_v10, %v3917_v15  ;;  %v3020_v63 = vpop.f32.mrb[204].mxu0 }
 0x309   : > { %v3769_v42 = vadd.f32 %v9909_v40, %v3730_v19  ;;  %v3731_v1 = vadd.f32 %v10005_v45, %v3539_v35  ;;  %v3348_v56 = vadd.f32 %v3020_v63, %v9846_v7  ;;  %v3022_v21 = vpop.f32.mrb[205].mxu0  ;;  %v10165_v63 = vld [vmem:[%s11118_s2] ss:$0 sm:$0xff] }
 0x30a   : > { %8116 = vmatmul.mubr.bf16.gmra.mrb[8].mxu0 %v3952_v59  ;;  %v3024_v43 = vpop.f32.mrb[206].mxu0  ;;  %v3458_v15 = vrot.slane %v3022_v21, 1 }
 0x30b   : > { %4278 = vmatmul.mubr.bf16.gmra.mrb[244].mxu1 %v3952_v59  ;;  %v3801_v30 = vmax.f32 %v3769_v42, 0.0  ;;  %v3770_v22 = vadd.f32 %v9909_v40, %v3731_v1  ;;  %v3349_v26 = vadd.f32 %v3024_v43, %v9856_v60  ;;  %v3026_v33 = vpop.f32.mrb[207].mxu0 }
 0x30c   : > { %4286 = vmatprep.mubr.bf16.mxu1 %v11148_v18  ;;  %v3459_v16 = vrot.slane %v3026_v33, 1  ;;  %v3919_v23 = vld [vmem:[#allocation3 + $0xe0] sm:$0xff]  ;;  %v3920_v11 = vld [vmem:[#allocation3 + $0xe8] sm:$0xff] }
 0x30d   : > { %3877 = vst [vmem:[#allocation3 + $0xf1] sm:$0xff] %v3801_v30  ;;  %v3802_v45 = vmax.f32 %v3770_v22, 0.0  ;;  %v3953_v13 = vpack.c.bf16 %v3920_v11, %v3919_v23  ;;  %v10157_v7 = vpack.c.bf16 %v3919_v23, %v3918_v10 }
 0x30e   : > { %v3460_v59 = vsel %vm1143_vm0, %v3458_v15, %v3459_v16 }
 0x30f   : > { %3878 = vst [vmem:[#allocation3 + $0xf9] sm:$0xff] %v3802_v45  ;;  %v3540_v44 = vadd.f32 %v3460_v59, %v3348_v56  ;;  %8119 = vmatprep.mubr.bf16.mxu0 %v3953_v13 }
 0x310   : > { %v3030_v48 = vpop.f32.mrb[208].mxu0 }
 0x311   : > { %v3732_v40 = vadd.f32 %v10002_v55, %v3540_v44  ;;  %v3031_v19 = vpop.f32.mrb[209].mxu0 }
 0x312   : > { %v3461_v60 = vrot.slane %v3031_v19, 1  ;;  %v3033_v35 = vpop.f32.mrb[210].mxu0 }
 0x313   : > { %4287 = vmatmul.mubr.bf16.gmra.mrb[248].mxu1 %v3953_v13  ;;  %v3771_v10 = vadd.f32 %v10165_v63, %v3732_v40  ;;  %v3350_v42 = vadd.f32 %v3033_v35, %v9866_v12  ;;  %v3035_v1 = vpop.f32.mrb[211].mxu0 }
 0x314   : > { %4295 = vmatprep.mubr.bf16.mxu1 %v11148_v18  ;;  %v3462_v56 = vsel %vm1143_vm0, %v3459_v16, %v3461_v60  ;;  %v3921_v21 = vld [vmem:[#allocation3 + $0xf0] sm:$0xff]  ;;  %v3463_v16 = vrot.slane %v3035_v1, 1 }
 0x315   : > { %v3803_v55 = vmax.f32 %v3771_v10, 0.0  ;;  %v3541_v43 = vadd.f32 %v3462_v56, %v3349_v26  ;;  %v10170_v30 = vpack.c.bf16 %v3921_v21, %v3920_v11 }
 0x316   : > { %v3922_v22 = vld [vmem:[#allocation3 + $0xf8] sm:$0xff]  ;;  %v3923_v33 = vld [vmem:[#allocation3 + $0x100] sm:$0xff] }
 0x317   : > { %3879 = vst [vmem:[#allocation3 + $0x109] sm:$0xff] %v3803_v55  ;;  %v3733_v15 = vadd.f32 %v10021_v54, %v3541_v43  ;;  %v3954_v23 = vpack.c.bf16 %v3922_v22, %v3921_v21  ;;  %v10173_v45 = vpack.c.bf16 %v3923_v33, %v3922_v22 }
 0x318   : > { %v3039_v13 = vpop.f32.mrb[212].mxu0 }
 0x319   : > { %v3772_v59 = vadd.f32 %v10165_v63, %v3733_v15  ;;  %v3351_v12 = vadd.f32 %v3039_v13, %v9862_v27  ;;  %v3041_v44 = vpop.f32.mrb[213].mxu0  ;;  %8120 = vmatmul.mubr.bf16.gmra.mrb[12].mxu0 %v3954_v23 }
 0x31a   : > { %v3464_v26 = vrot.slane %v3041_v44, 1  ;;  %v3043_v11 = vpop.f32.mrb[214].mxu0 }
 0x31b   : > { %4296 = vmatmul.mubr.bf16.gmra.mrb[252].mxu1 %v3954_v23  ;;  %v3804_v48 = vmax.f32 %v3772_v59, 0.0  ;;  %v3044_v40 = vpop.f32.mrb[215].mxu0 }
 0x31c   : > { %4305 = vmatprep.mubr.bf16.mxu1 %v11148_v18  ;;  %v3465_v54 = vsel %vm1143_vm0, %v3463_v16, %v3464_v26  ;;  %v3466_v19 = vrot.slane %v3044_v40, 1 }
 0x31d   : > { %3880 = vst [vmem:[#allocation3 + $0x111] sm:$0xff] %v3804_v48  ;;  %v3542_v60 = vadd.f32 %v3465_v54, %v3350_v42 }
 0x31e   : > { %v3467_v35 = vsel %vm1143_vm0, %v3464_v26, %v3466_v19  ;;  %v3924_v10 = vld [vmem:[#allocation3 + $0x108] sm:$0xff] }
 0x31f   : > { %v3734_v27 = vadd.f32 %v10030_v0, %v3542_v60  ;;  %v3543_v56 = vadd.f32 %v3467_v35, %v3351_v12  ;;  %v3955_v21 = vpack.c.bf16 %v3924_v10, %v3923_v33 }
 0x320   : > { %v3048_v55 = vpop.f32.mrb[216].mxu0 }
 0x321   : > { %v3773_v1 = vadd.f32 %v10165_v63, %v3734_v27  ;;  %v3735_v43 = vadd.f32 %v10024_v14, %v3543_v56  ;;  %v3352_v22 = vadd.f32 %v3048_v55, %v9874_v24  ;;  %v3050_v15 = vpop.f32.mrb[217].mxu0  ;;  %8123 = vmatprep.mubr.bf16.mxu0 %v3955_v21 }
 0x322   : > { %v3052_v23 = vpop.f32.mrb[218].mxu0  ;;  %v3468_v33 = vrot.slane %v3050_v15, 1 }
 0x323   : > { %4306 = vmatmul.mubr.bf16.gmra.mrb[0].mxu1 %v3955_v21  ;;  %v3805_v42 = vmax.f32 %v3773_v1, 0.0  ;;  %v3774_v13 = vadd.f32 %v10165_v63, %v3735_v43  ;;  %v3353_v0 = vadd.f32 %v3052_v23, %v9876_v25  ;;  %v3054_v59 = vpop.f32.mrb[219].mxu0 }
 0x324   : > { %4314 = vmatprep.mubr.bf16.mxu1 %v11148_v18  ;;  %v3469_v12 = vrot.slane %v3054_v59, 1  ;;  %v3925_v44 = vld [vmem:[#allocation3 + $0x110] sm:$0xff]  ;;  %v3926_v16 = vld [vmem:[#allocation3 + $0x118] sm:$0xff] }
 0x325   : > { %3881 = vst [vmem:[#allocation3 + $0x121] sm:$0xff] %v3805_v42  ;;  %v3806_v14 = vmax.f32 %v3774_v13, 0.0  ;;  %v3956_v26 = vpack.c.bf16 %v3926_v16, %v3925_v44  ;;  %v10187_v24 = vpack.c.bf16 %v3925_v44, %v3924_v10 }
 0x326   : > { %v3470_v11 = vsel %vm1143_vm0, %v3468_v33, %v3469_v12 }
 0x327   : > { %3882 = vst [vmem:[#allocation3 + $0x129] sm:$0xff] %v3806_v14  ;;  %v3544_v48 = vadd.f32 %v3470_v11, %v3352_v22  ;;  %8124 = vmatmul.mubr.bf16.gmra.mrb[16].mxu0 %v3956_v26 }
 0x328   : > { %v3058_v40 = vpop.f32.mrb[220].mxu0 }
 0x329   : > { %v3736_v54 = vadd.f32 %v10051_v47, %v3544_v48  ;;  %v3059_v19 = vpop.f32.mrb[221].mxu0 }
 0x32a   : > { %v3471_v25 = vrot.slane %v3059_v19, 1  ;;  %v3061_v60 = vpop.f32.mrb[222].mxu0 }
 0x32b   : > { %4315 = vmatmul.mubr.bf16.gmra.mrb[4].mxu1 %v3956_v26  ;;  %v3775_v35 = vadd.f32 %v10165_v63, %v3736_v54  ;;  %v3354_v27 = vadd.f32 %v3061_v60, %v9881_v8  ;;  %v3063_v10 = vpop.f32.mrb[223].mxu0 }
 0x32c   : > { %4323 = vmatprep.mubr.bf16.mxu1 %v11148_v18  ;;  %v3472_v56 = vsel %vm1143_vm0, %v3469_v12, %v3471_v25  ;;  %v3927_v21 = vld [vmem:[#allocation3 + $0x120] sm:$0xff]  ;;  %v3473_v12 = vrot.slane %v3063_v10, 1 }
 0x32d   : > { %v3807_v55 = vmax.f32 %v3775_v35, 0.0  ;;  %v3545_v1 = vadd.f32 %v3472_v56, %v3353_v0  ;;  %v10195_v43 = vpack.c.bf16 %v3927_v21, %v3926_v16 }
 0x32e   : > { %v3928_v22 = vld [vmem:[#allocation3 + $0x128] sm:$0xff]  ;;  %v3929_v47 = vld [vmem:[#allocation3 + $0x130] sm:$0xff] }
 0x32f   : > { %3883 = vst [vmem:[#allocation3 + $0x139] sm:$0xff] %v3807_v55  ;;  %v3737_v15 = vadd.f32 %v10054_v17, %v3545_v1  ;;  %v3957_v23 = vpack.c.bf16 %v3928_v22, %v3927_v21  ;;  %v10198_v42 = vpack.c.bf16 %v3929_v47, %v3928_v22 }
 0x330   : > { %v3067_v13 = vpop.f32.mrb[224].mxu0 }
 0x331   : > { %v3776_v59 = vadd.f32 %v10165_v63, %v3737_v15  ;;  %v3355_v8 = vadd.f32 %v3067_v13, %v9887_v31  ;;  %v3069_v33 = vpop.f32.mrb[225].mxu0  ;;  %8127 = vmatprep.mubr.bf16.mxu0 %v3957_v23 }
 0x332   : > { %v3474_v0 = vrot.slane %v3069_v33, 1  ;;  %v3071_v44 = vpop.f32.mrb[226].mxu0 }
 0x333   : > { %4324 = vmatmul.mubr.bf16.gmra.mrb[8].mxu1 %v3957_v23  ;;  %v3808_v16 = vmax.f32 %v3776_v59, 0.0  ;;  %v3072_v14 = vpop.f32.mrb[227].mxu0 }
 0x334   : > { %4333 = vmatprep.mubr.bf16.mxu1 %v11148_v18  ;;  %v3475_v17 = vsel %vm1143_vm0, %v3473_v12, %v3474_v0  ;;  %v3476_v26 = vrot.slane %v3072_v14, 1 }
 0x335   : > { %3884 = vst [vmem:[#allocation3 + $0x141] sm:$0xff] %v3808_v16  ;;  %v3546_v11 = vadd.f32 %v3475_v17, %v3354_v27 }
 0x336   : > { %v3477_v48 = vsel %vm1143_vm0, %v3474_v0, %v3476_v26  ;;  %v3930_v40 = vld [vmem:[#allocation3 + $0x138] sm:$0xff] }
 0x337   : > { %v3738_v31 = vadd.f32 %v10068_v52, %v3546_v11  ;;  %v3547_v54 = vadd.f32 %v3477_v48, %v3355_v8  ;;  %v3958_v19 = vpack.c.bf16 %v3930_v40, %v3929_v47 }
 0x338   : > { %v3076_v25 = vpop.f32.mrb[228].mxu0 }
 0x339   : > { %v3777_v60 = vadd.f32 %v10165_v63, %v3738_v31  ;;  %v3739_v35 = vadd.f32 %v10075_v9, %v3547_v54  ;;  %v3356_v10 = vadd.f32 %v3076_v25, %v9885_v29  ;;  %v3078_v56 = vpop.f32.mrb[229].mxu0  ;;  %8128 = vmatmul.mubr.bf16.gmra.mrb[20].mxu0 %v3958_v19 }
 0x33a   : > { %v3080_v21 = vpop.f32.mrb[230].mxu0  ;;  %v3478_v22 = vrot.slane %v3078_v56, 1 }
 0x33b   : > { %4334 = vmatmul.mubr.bf16.gmra.mrb[12].mxu1 %v3958_v19  ;;  %v3809_v27 = vmax.f32 %v3777_v60, 0.0  ;;  %v3778_v55 = vadd.f32 %v10165_v63, %v3739_v35  ;;  %v3357_v52 = vadd.f32 %v3080_v21, %v9892_v58  ;;  %v3082_v1 = vpop.f32.mrb[231].mxu0 }
 0x33c   : > { %4342 = vmatprep.mubr.bf16.mxu1 %v11148_v18  ;;  %v3479_v47 = vrot.slane %v3082_v1, 1  ;;  %v3931_v15 = vld [vmem:[#allocation3 + $0x140] sm:$0xff]  ;;  %v3932_v23 = vld [vmem:[#allocation3 + $0x148] sm:$0xff] }
 0x33d   : > { %3885 = vst [vmem:[#allocation3 + $0x151] sm:$0xff] %v3809_v27  ;;  %v3810_v9 = vmax.f32 %v3778_v55, 0.0  ;;  %v3959_v13 = vpack.c.bf16 %v3932_v23, %v3931_v15  ;;  %v10212_v29 = vpack.c.bf16 %v3931_v15, %v3930_v40 }
 0x33e   : > { %v3480_v59 = vsel %vm1143_vm0, %v3478_v22, %v3479_v47 }
 0x33f   : > { %3886 = vst [vmem:[#allocation3 + $0x159] sm:$0xff] %v3810_v9  ;;  %v3548_v8 = vadd.f32 %v3480_v59, %v3356_v10  ;;  %8131 = vmatprep.mubr.bf16.mxu0 %v3959_v13 }
 0x340   : > { %v3086_v33 = vpop.f32.mrb[232].mxu0 }
 0x341   : > { %v3740_v12 = vadd.f32 %v10071_v39, %v3548_v8  ;;  %v3087_v0 = vpop.f32.mrb[233].mxu0 }
 0x342   : > { %v3481_v58 = vrot.slane %v3087_v0, 1  ;;  %v3089_v44 = vpop.f32.mrb[234].mxu0 }
 0x343   : > { %4343 = vmatmul.mubr.bf16.gmra.mrb[16].mxu1 %v3959_v13  ;;  %v3779_v16 = vadd.f32 %v10165_v63, %v3740_v12  ;;  %v3358_v14 = vadd.f32 %v3089_v44, %v9897_v57  ;;  %v3091_v17 = vpop.f32.mrb[235].mxu0 }
 0x344   : > { %4351 = vmatprep.mubr.bf16.mxu1 %v11148_v18  ;;  %v3482_v26 = vsel %vm1143_vm0, %v3479_v47, %v3481_v58  ;;  %v3933_v11 = vld [vmem:[#allocation3 + $0x150] sm:$0xff]  ;;  %v3483_v21 = vrot.slane %v3091_v17, 1 }
 0x345   : > { %v3811_v48 = vmax.f32 %v3779_v16, 0.0  ;;  %v3549_v40 = vadd.f32 %v3482_v26, %v3357_v52  ;;  %v10220_v31 = vpack.c.bf16 %v3933_v11, %v3932_v23  ;;  %v4990_v16 = vld [vmem:[#allocation3 + $0x20] sm:$0xff]  ;;  %v8512_v26 = vld [vmem:[#allocation9 + $0x1a0] ss:$12 sps:$4 sm:$0xff]  }
 0x346   : > { %v3934_v54 = vld [vmem:[#allocation3 + $0x158] sm:$0xff]  ;;  %v3935_v39 = vld [vmem:[#allocation3 + $0x160] sm:$0xff] }
 0x347   : > { %3887 = vst [vmem:[#allocation3 + $0x169] sm:$0xff] %v3811_v48  ;;  %v3741_v19 = vadd.f32 %v10091_v4, %v3549_v40  ;;  %v3960_v25 = vpack.c.bf16 %v3934_v54, %v3933_v11  ;;  %v10223_v60 = vpack.c.bf16 %v3935_v39, %v3934_v54  ;;  %v8502_v11 = vld [vmem:[#allocation9 + $0x180] ss:$12 sps:$4 sm:$0xff]   ;;  %v8508_v54 = vld [vmem:[#allocation9 + $0x19c] ss:$12 sps:$4 sm:$0xff]  }
 0x348   : > { %v3095_v35 = vpop.f32.mrb[236].mxu0  ;;  %v8536_v48 = vld [vmem:[#allocation3 + $0x30] sm:$0xff] }
 0x349   : > { %v3780_v10 = vadd.f32 %v10165_v63, %v3741_v19  ;;  %v3359_v57 = vadd.f32 %v3095_v35, %v9900_v50  ;;  %v3097_v56 = vpop.f32.mrb[237].mxu0  ;;  %8132 = vmatmul.mubr.bf16.gmra.mrb[24].mxu0 %v3960_v25  ;;  %v8538_v19 = vld [vmem:[#allocation3 + $0x40] sm:$0xff]  ;;  %v8519_v35 = vld [vmem:[#allocation9 + $0x1b8] ss:$12 sps:$4 sm:$0xff]  }
 0x34a   : > { %v3484_v27 = vrot.slane %v3097_v56, 1  ;;  %v3099_v55 = vpop.f32.mrb[238].mxu0  ;;  %v8526_v56 = vld [vmem:[#allocation9 + $0x1d0] ss:$12 sps:$4 sm:$0xff]  }
 0x34b   : > { %4352 = vmatmul.mubr.bf16.gmra.mrb[20].mxu1 %v3960_v25  ;;  %v3812_v52 = vmax.f32 %v3780_v10, 0.0  ;;  %v3100_v1 = vpop.f32.mrb[239].mxu0  ;;  %v8506_v10 = vld [vmem:[#allocation9 + $0x198] ss:$12 sps:$4 sm:$0xff]  }
 0x34c   : > { %4361 = vmatprep.mubr.bf16.mxu1 %v11148_v18  ;;  %v3485_v4 = vsel %vm1143_vm0, %v3483_v21, %v3484_v27  ;;  %v3486_v22 = vrot.slane %v3100_v1, 1  ;;  %v8509_v21 = vld [vmem:[#allocation9 + $0x1b0] ss:$12 sps:$4 sm:$0xff]   ;;  %v8540_v55 = vld [vmem:[#allocation3 + $0x50] sm:$0xff]  ;;  %v8541_v1 = vld [vmem:[#allocation3 + $0x58] sm:$0xff] }
 0x34d   : > { %3888 = vst [vmem:[#allocation3 + $0x171] sm:$0xff] %v3812_v52  ;;  %v3550_v47 = vadd.f32 %v3485_v4, %v3358_v14  ;;  %v5041_v4 = vpack.c.bf16 %v10007_v6, %v8541_v1  ;;  %v5042_v6 = vpack.c.bf16 %v10026_v5, %v10009_v32  ;;  %v8523_v32 = vld [vmem:[#allocation9 + $0x210] ss:$12 sps:$4 sm:$0xff]   ;;  %v8529_v5 = vld [vmem:[#allocation9 + $0x22c] ss:$12 sps:$4 sm:$0xff]  }
 0x34e   : > { %v3487_v15 = vsel %vm1143_vm0, %v3484_v27, %v3486_v22  ;;  %v3936_v23 = vld [vmem:[#allocation3 + $0x168] sm:$0xff]  ;;  %v8530_v22 = vld [vmem:[#allocation9 + $0x1e8] ss:$12 sps:$4 sm:$0xff]  }
 0x34f   : > { %v3742_v50 = vadd.f32 %v10098_v46, %v3550_v47  ;;  %v3551_v9 = vadd.f32 %v3487_v15, %v3359_v57  ;;  %v3961_v13 = vpack.c.bf16 %v3936_v23, %v3935_v39  ;;  %v8537_v39 = vld [vmem:[#allocation3 + $0x38] sm:$0xff]  ;;  %v8511_v57 = vld [vmem:[#allocation9 + $0x1b4] ss:$12 sps:$4 sm:$0xff]   ;;  %v8539_v27 = vld [vmem:[#allocation3 + $0x48] sm:$0xff] }
 0x350   : > { %v5039_v25 = vpack.c.bf16 %v8538_v19, %v8537_v39  ;;  %v5040_v52 = vpack.c.bf16 %v8540_v55, %v8539_v27  ;;  %v8513_v47 = vld [vmem:[#allocation9 + $0x1c8] ss:$12 sps:$4 sm:$0xff]   ;;  %v8518_v15 = vld [vmem:[#allocation9 + $0x1e4] ss:$12 sps:$4 sm:$0xff]  }
 0x351   : > { %v3781_v59 = vadd.f32 %v10165_v63, %v3742_v50  ;;  %v3743_v8 = vadd.f32 %v10094_v28, %v3551_v9  ;;  %8135 = vmatprep.mubr.bf16.mxu0 %v3961_v13  ;;  %v4989_v28 = vld [vmem:[#allocation3 + $0x18] sm:$0xff]  ;;  %v8533_v1 = vld [vmem:[#allocation9 + $0x230] ss:$12 sps:$4 sm:$0xff]  }
 0x352   : > { %v5037_v17 = vpack.c.bf16 %v4990_v16, %v4989_v28  ;;  %v8516_v50 = vld [vmem:[#allocation9 + $0x1e0] ss:$12 sps:$4 sm:$0xff]   ;;  %v8522_v9 = vld [vmem:[#allocation9 + $0x1fc] ss:$12 sps:$4 sm:$0xff]  }
 0x353   : > { %4362 = vmatmul.mubr.bf16.gmra.mrb[24].mxu1 %v3961_v13  ;;  %v3813_v33 = vmax.f32 %v3781_v59, 0.0  ;;  %v3782_v12 = vadd.f32 %v10165_v63, %v3743_v8  ;;  %v4991_v63 = vld [vmem:[#allocation3 + $0x28] sm:$0xff]  ;;  %v10249_v13 = vpack.c.bf16 %v10045_v3, %v10032_v41  ;;  %v10255_v3 = vpack.c.bf16 %v10077_v2, %v10047_v37  ;;  %v11170_v41 = vld [vmem:[#allocation20_spill] sm:$0xff] }
 0x354   : > { %4370 = vmatprep.mubr.bf16.mxu1 %v11148_v18  ;;  %v3937_v0 = vld [vmem:[#allocation3 + $0x170] sm:$0xff]  ;;  %v10235_v58 = vld [vmem:[#allocation3 + $0x178] sm:$0xff]  ;;  %v5038_v40 = vpack.c.bf16 %v8536_v48, %v4991_v63  ;;  %v10266_v63 = vpack.c.bf16 %v10120_v38, %v10102_v34 }
 0x355   : > { %3889 = vst [vmem:[#allocation3 + $0x181] sm:$0xff] %v3813_v33  ;;  %v3814_v44 = vmax.f32 %v3782_v12, 0.0  ;;  %v3962_v46 = vpack.c.bf16 %v10235_v58, %v3937_v0  ;;  %v10238_v14 = vpack.c.bf16 %v3937_v0, %v3936_v23  ;;  %v8531_v23 = vld [vmem:[#allocation9 + $0x200] ss:$12 sps:$4 sm:$0xff]   ;;  %v8520_v59 = vld [vmem:[#allocation9 + $0x1f8] ss:$12 sps:$4 sm:$0xff]   ;;  %v10259_v12 = vpack.c.bf16 %v10100_v62, %v11170_v41 }
 0x356   : > { %v8532_v8 = vld [vmem:[#allocation9 + $0x218] ss:$12 sps:$4 sm:$0xff]   ;;  %v8525_v33 = vld [vmem:[#allocation9 + $0x214] ss:$12 sps:$4 sm:$0xff]  }
 0x357   : > { %3890 = vst [vmem:[#allocation3 + $0x189] sm:$0xff] %v3814_v44  ;;  %8136 = vmatmul.mubr.bf16.gmra.mrb[28].mxu0 %v3962_v46  ;;  %v8527_v0 = vld [vmem:[#allocation9 + $0x228] ss:$12 sps:$4 sm:$0xff]  }
 0x358   : > { %5254 = vmatprep.mubr.bf16.mxu0 %v11148_v18 }
 0x35b   : > { %4371 = vmatmul.mubr.bf16.gmra.mrb[28].mxu1 %v3962_v46 }
 0x35c   : > { %8155 = vmatprep.mubr.bf16.mxu1 %v5037_v17 }
 0x35f   : > { %5255 = vmatmul.mubr.bf16.vlgmr.msra.gmra.mrb[32].mxu0 %v5037_v17 }
 0x360   : > { %8204 = vmatpush3.bf16.msra.mxu0 %v10064_v53  ;;  %5264 = vmatprep.mubr.bf16.mxu0 %v11148_v18  ;;  %v8515_v53 = vld [vmem:[#allocation9 + $0x1cc] ss:$12 sps:$4 sm:$0xff]  }
 0x361   : > { %8205 = vmatprep.subr.bf16.mxu0 %v8512_v26 }
 0x363   : > { %8156 = vmatmul.mubr.bf16.vlgmr.msra.gmra.mrb[32].mxu1 %v5038_v40 }
 0x364   : > { %8159 = vmatprep.mubr.bf16.mxu1 %v5039_v25  ;;  %6355 = vmatpush1.bf16.msra.mxu1 %v8502_v11  ;;  %v10270_v11 = vpack.c.bf16 %v10139_v36, %v10122_v49 }
 0x365   : > { %6356 = vmatprep.subr.bf16.mxu1 %v8508_v54  ;;  %8206 = vmatpush3.bf16.msra.mxu0 %v8512_v26 }
 0x366   : > { %8207 = vmatprep.subr.bf16.mxu0 %v8519_v35 }
 0x367   : > { %5265 = vmatmul.mubr.bf16.gmra.mrb[36].mxu0 %v5038_v40  ;;  %v11171_v40 = vrot.slane %v10117_v51, 1 }
 0x368   : > { %6357 = vmatpush1.bf16.msra.mxu1 %v8506_v10  ;;  %5273 = vmatprep.mubr.bf16.mxu0 %v11148_v18 }
 0x369   : > { %6358 = vmatprep.subr.bf16.mxu1 %v8511_v57  ;;  %8208 = vmatpush3.bf16.msra.mxu0 %v8519_v35 }
 0x36a   : > { %8209 = vmatprep.subr.bf16.mxu0 %v8526_v56 }
 0x36b   : > { %8160 = vmatmul.mubr.bf16.gmra.mrb[36].mxu1 %v5040_v52 }
 0x36c   : > { %8163 = vmatprep.mubr.bf16.mxu1 %v5041_v4  ;;  %6359 = vmatpush1.bf16.msra.mxu1 %v8509_v21 }
 0x36d   : > { %6360 = vmatprep.subr.bf16.mxu1 %v8515_v53  ;;  %8210 = vmatpush3.bf16.msra.mxu0 %v8526_v56 }
 0x36e   : > { %8211 = vmatprep.subr.bf16.mxu0 %v8530_v22 }
 0x36f   : > { %5274 = vmatmul.mubr.bf16.gmra.mrb[40].mxu0 %v5039_v25  ;;  %v11172_v25 = vld [vmem:[#allocation23_spill] sm:$0xff] }
 0x370   : > { %6361 = vmatpush1.bf16.msra.mxu1 %v8513_v47  ;;  %5282 = vmatprep.mubr.bf16.mxu0 %v11148_v18 }
 0x371   : > { %6362 = vmatprep.subr.bf16.mxu1 %v8518_v15  ;;  %8212 = vmatpush3.bf16.msra.mxu0 %v8530_v22 }
 0x372   : > { %8213 = vmatprep.subr.bf16.mxu0 %v8531_v23 }
 0x373   : > { %8164 = vmatmul.mubr.bf16.gmra.mrb[40].mxu1 %v5042_v6 }
 0x374   : > { %8167 = vmatprep.mubr.bf16.mxu1 %v10249_v13  ;;  %6363 = vmatpush1.bf16.msra.mxu1 %v8516_v50 }
 0x375   : > { %6364 = vmatprep.subr.bf16.mxu1 %v8522_v9  ;;  %8214 = vmatpush3.bf16.msra.mxu0 %v8531_v23 }
 0x376   : > { %8215 = vmatprep.subr.bf16.mxu0 %v8532_v8 }
 0x377   : > { %5283 = vmatmul.mubr.bf16.gmra.mrb[44].mxu0 %v5040_v52 }
 0x378   : > { %6365 = vmatpush1.bf16.msra.mxu1 %v8520_v59  ;;  %5292 = vmatprep.mubr.bf16.mxu0 %v11148_v18 }
 0x379   : > { %6366 = vmatprep.subr.bf16.mxu1 %v8525_v33  ;;  %8216 = vmatpush3.bf16.msra.mxu0 %v8532_v8 }
 0x37a   : > { %8217 = vmatprep.subr.bf16.mxu0 %v8533_v1 }
 0x37b   : > { %8168 = vmatmul.mubr.bf16.gmra.mrb[44].mxu1 %v10255_v3 }
 0x37c   : > { %8171 = vmatprep.mubr.bf16.mxu1 %v10259_v12  ;;  %6367 = vmatpush1.bf16.msra.mxu1 %v8523_v32 }
 0x37d   : > { %6368 = vmatprep.subr.bf16.mxu1 %v8529_v5  ;;  %8218 = vmatpush3.bf16.msra.mxu0 %v8533_v1 }
 0x37e   : > { %v4167_v44 = vpop.f32.mrb[196].mxu1  ;;  %v8093_v46 = vpop.f32.mrb[240].mxu0 }
 0x37f   : > { %v4168_v37 = vpop.f32.mrb[197].mxu1  ;;  %v4414_v2 = vpop.f32.mrb[241].mxu0  ;;  %5293 = vmatmul.mubr.bf16.gmra.mrb[48].mxu0 %v5041_v4  ;;  %v4848_v48 = vrot.slane %v8093_v46, 2 }
 0x380   : > { %v4656_v16 = vrot.slane %v4168_v37, 1  ;;  %v4170_v28 = vpop.f32.mrb[198].mxu1  ;;  %v8094_v17 = vpop.f32.mrb[242].mxu0  ;;  %6369 = vmatpush1.bf16.msra.mxu1 %v8527_v0  ;;  %v4845_v39 = vrot.slane %v4414_v2, 2  ;;  %5301 = vmatprep.mubr.bf16.mxu0 %v11148_v18 }
 0x381   : > { %v4172_v62 = vpop.f32.mrb[199].mxu1  ;;  %v4417_v26 = vpop.f32.mrb[243].mxu0  ;;  %v4850_v50 = vrot.slane %v8094_v17, 2 }
 0x382   : > { %v4657_v54 = vsel %vm1143_vm0, %v11171_v40, %v4656_v16  ;;  %v4846_v19 = vrot.slane %v4417_v26, 2  ;;  %v4658_v57 = vrot.slane %v4172_v62, 1 }
 0x383   : > { %8172 = vmatmul.mubr.bf16.gmra.mrb[48].mxu1 %v10266_v63  ;;  %v4766_v35 = vadd.f32 %v4657_v54, %v11172_v25 }
 0x384   : > { %8175 = vmatprep.mubr.bf16.mxu1 %v10270_v11  ;;  %v4847_v34 = vsel %vm1336_vm1, %v4845_v39, %v4846_v19  ;;  %v4849_v49 = vsel %vm1336_vm1, %v4846_v19, %v4848_v48 }
 0x385   : > { %v10282_v38 = vadd.f32 %v4847_v34, %v10132_v20  ;;  %v10284_v51 = vadd.f32 %v4849_v49, %v4766_v35 }
 0x386   : > { %v4176_v36 = vpop.f32.mrb[200].mxu1 }
 0x387   : > { %v4178_v10 = vpop.f32.mrb[201].mxu1  ;;  %5302 = vmatmul.mubr.bf16.gmra.mrb[52].mxu0 %v5042_v6 }
 0x388   : > { %v4659_v56 = vrot.slane %v4178_v10, 1  ;;  %v4180_v21 = vpop.f32.mrb[202].mxu1  ;;  %5310 = vmatprep.mubr.bf16.mxu0 %v11148_v18 }
 0x389   : > { %v4181_v27 = vpop.f32.mrb[203].mxu1 }
 0x38a   : > { %v4660_v55 = vsel %vm1143_vm0, %v4658_v57, %v4659_v56  ;;  %v4661_v52 = vrot.slane %v4181_v27, 1 }
 0x38b   : > { %8176 = vmatmul.mubr.bf16.gmra.mrb[52].mxu1 %v10143_v61  ;;  %v4767_v53 = vadd.f32 %v4660_v55, %v4170_v28 }
 0x38c   : > { %v4662_v20 = vsel %vm1143_vm0, %v4659_v56, %v4661_v52  ;;  %8179 = vmatprep.mubr.bf16.mxu1 %v10157_v7  ;;  %v8097_v47 = vpop.f32.mrb[244].mxu0 }
 0x38d   : > { %v4768_v4 = vadd.f32 %v4662_v20, %v4176_v36  ;;  %v4430_v23 = vpop.f32.mrb[245].mxu0  ;;  %v4855_v8 = vrot.slane %v8097_v47, 2 }
 0x38e   : > { %v4185_v22 = vpop.f32.mrb[204].mxu1  ;;  %v4851_v6 = vrot.slane %v4430_v23, 2  ;;  %v8098_v59 = vpop.f32.mrb[246].mxu0 }
 0x38f   : > { %v4187_v15 = vpop.f32.mrb[205].mxu1  ;;  %v4856_v33 = vrot.slane %v8098_v59, 2  ;;  %v4433_v5 = vpop.f32.mrb[247].mxu0  ;;  %5311 = vmatmul.mubr.bf16.gmra.mrb[56].mxu0 %v10249_v13 }
 0x390   : > { %v4189_v9 = vpop.f32.mrb[206].mxu1  ;;  %v4663_v41 = vrot.slane %v4187_v15, 1  ;;  %v4853_v44 = vrot.slane %v4433_v5, 2  ;;  %5320 = vmatprep.mubr.bf16.mxu0 %v11148_v18  ;;  %v4852_v46 = vsel %vm1336_vm1, %v4850_v50, %v4851_v6 }
 0x391   : > { %v4191_v32 = vpop.f32.mrb[207].mxu1  ;;  %v10295_v37 = vadd.f32 %v4852_v46, %v4767_v53  ;;  %v4857_v2 = vsel %vm1336_vm1, %v4855_v8, %v4856_v33 }
 0x392   : > { %v4664_v0 = vrot.slane %v4191_v32, 1  ;;  %v4854_v28 = vsel %vm1336_vm1, %v4851_v6, %v4853_v44 }
 0x393   : > { %8180 = vmatmul.mubr.bf16.gmra.mrb[56].mxu1 %v10170_v30  ;;  %v10301_v13 = vadd.f32 %v4854_v28, %v4768_v4  ;;  %v5034_v28 = vld [vmem:[#allocation3 + $0x180] sm:$0xff] }
 0x394   : > { %v4665_v16 = vsel %vm1143_vm0, %v4663_v41, %v4664_v0  ;;  %8183 = vmatprep.mubr.bf16.mxu1 %v10173_v45 }
 0x395   : > { %v4769_v17 = vadd.f32 %v4665_v16, %v4185_v22 }
 0x396   : > { %v4195_v62 = vpop.f32.mrb[208].mxu1 }
 0x397   : > { %v4196_v26 = vpop.f32.mrb[209].mxu1  ;;  %v10303_v48 = vadd.f32 %v4857_v2, %v4769_v17  ;;  %5321 = vmatmul.mubr.bf16.gmra.mrb[60].mxu0 %v10255_v3 }
 0x398   : > { %v4666_v40 = vrot.slane %v4196_v26, 1  ;;  %v4198_v54 = vpop.f32.mrb[210].mxu1  ;;  %5329 = vmatprep.mubr.bf16.mxu0 %v11148_v18 }
 0x399   : > { %v4200_v39 = vpop.f32.mrb[211].mxu1 }
 0x39a   : > { %v4667_v19 = vsel %vm1143_vm0, %v4664_v0, %v4666_v40  ;;  %v8101_v35 = vpop.f32.mrb[248].mxu0  ;;  %v4668_v55 = vrot.slane %v4200_v39, 1 }
 0x39b   : > { %8184 = vmatmul.mubr.bf16.gmra.mrb[60].mxu1 %v10187_v24  ;;  %v4770_v25 = vadd.f32 %v4667_v19, %v4189_v9  ;;  %v4446_v34 = vpop.f32.mrb[249].mxu0  ;;  %v4861_v57 = vrot.slane %v8101_v35, 2  ;;  %v10332_v19 = vpack.c.bf16 %v5034_v28, %v10235_v58 }
 0x39c   : > { %8187 = vmatprep.mubr.bf16.mxu1 %v10195_v43  ;;  %v4858_v49 = vrot.slane %v4446_v34, 2  ;;  %v8102_v10 = vpop.f32.mrb[250].mxu0 }
 0x39d   : > { %v4863_v56 = vrot.slane %v8102_v10, 2  ;;  %v4449_v27 = vpop.f32.mrb[251].mxu0 }
 0x39e   : > { %v4204_v36 = vpop.f32.mrb[212].mxu1  ;;  %v4860_v52 = vrot.slane %v4449_v27, 2  ;;  %v4859_v20 = vsel %vm1336_vm1, %v4856_v33, %v4858_v49  ;;  %v5036_v27 = vld [vmem:[#allocation3 + $0x190] sm:$0xff] }
 0x39f   : > { %v4206_v21 = vpop.f32.mrb[213].mxu1  ;;  %5330 = vmatmul.mubr.bf16.gmra.mrb[64].mxu0 %v10259_v12  ;;  %v10312_v4 = vadd.f32 %v4859_v20, %v4770_v25  ;;  %v4864_v22 = vsel %vm1336_vm1, %v4861_v57, %v4863_v56 }
 0x3a0   : > { %v4669_v3 = vrot.slane %v4206_v21, 1  ;;  %v4208_v53 = vpop.f32.mrb[214].mxu1  ;;  %5338 = vmatprep.mubr.bf16.mxu0 %v11148_v18  ;;  %v4862_v23 = vsel %vm1336_vm1, %v4860_v52, %v4861_v57  ;;  %v5035_v21 = vld [vmem:[#allocation3 + $0x188] sm:$0xff] }
 0x3a1   : > { %v4209_v1 = vpop.f32.mrb[215].mxu1 }
 0x3a2   : > { %v4670_v47 = vsel %vm1143_vm0, %v4668_v55, %v4669_v3  ;;  %v4671_v15 = vrot.slane %v4209_v1, 1  ;;  %v10345_v1 = vpack.c.bf16 %v5036_v27, %v5035_v21  ;;  %v11174_v21 = vld [vmem:[#allocation15_spill] sm:$0xff] }
 0x3a3   : > { %8188 = vmatmul.mubr.bf16.gmra.mrb[64].mxu1 %v10198_v42  ;;  %v4771_v50 = vadd.f32 %v4670_v47, %v4198_v54 }
 0x3a4   : > { %v4672_v6 = vsel %vm1143_vm0, %v4669_v3, %v4671_v15  ;;  %8191 = vmatprep.mubr.bf16.mxu1 %v10212_v29 }
 0x3a5   : > { %v10321_v9 = vadd.f32 %v4862_v23, %v4771_v50  ;;  %v4772_v12 = vadd.f32 %v4672_v6, %v4204_v36 }
 0x3a6   : > { %v4213_v59 = vpop.f32.mrb[216].mxu1 }
 0x3a7   : > { %v4215_v8 = vpop.f32.mrb[217].mxu1  ;;  %v10323_v33 = vadd.f32 %v4864_v22, %v4772_v12  ;;  %5339 = vmatmul.mubr.bf16.gmra.mrb[68].mxu0 %v10266_v63 }
 0x3a8   : > { %v4217_v32 = vpop.f32.mrb[218].mxu1  ;;  %v4673_v41 = vrot.slane %v4215_v8, 1  ;;  %5348 = vmatprep.mubr.bf16.mxu0 %v11148_v18 }
 0x3a9   : > { %v4219_v5 = vpop.f32.mrb[219].mxu1 }
 0x3aa   : > { %v4674_v0 = vrot.slane %v4219_v5, 1 }
 0x3ab   : > { %8192 = vmatmul.mubr.bf16.gmra.mrb[68].mxu1 %v10220_v31 }
 0x3ac   : > { %v4675_v44 = vsel %vm1143_vm0, %v4673_v41, %v4674_v0  ;;  %8195 = vmatprep.mubr.bf16.mxu1 %v10223_v60  ;;  %v8105_v16 = vpop.f32.mrb[252].mxu0 }
 0x3ad   : > { %v4773_v46 = vadd.f32 %v4675_v44, %v4213_v59  ;;  %v4462_v62 = vpop.f32.mrb[253].mxu0  ;;  %v4868_v25 = vrot.slane %v8105_v16, 2 }
 0x3ae   : > { %v4223_v2 = vpop.f32.mrb[220].mxu1  ;;  %v8106_v54 = vpop.f32.mrb[254].mxu0  ;;  %v4865_v34 = vrot.slane %v4462_v62, 2 }
 0x3af   : > { %v4224_v17 = vpop.f32.mrb[221].mxu1  ;;  %v4465_v39 = vpop.f32.mrb[255].mxu0  ;;  %5349 = vmatmul.mubr.bf16.gmra.mrb[72].mxu0 %v10270_v11 }
 0x3b0   : > { %v4676_v26 = vrot.slane %v4224_v17, 1  ;;  %v4226_v40 = vpop.f32.mrb[222].mxu1  ;;  %v4866_v49 = vrot.slane %v4465_v39, 2  ;;  %5357 = vmatprep.mubr.bf16.mxu0 %v11148_v18 }
 0x3b1   : > { %v4228_v63 = vpop.f32.mrb[223].mxu1 }
 0x3b2   : > { %v4677_v35 = vsel %vm1143_vm0, %v4674_v0, %v4676_v26  ;;  %v4867_v10 = vsel %vm1336_vm1, %v4865_v34, %v4866_v49  ;;  %v4869_v57 = vsel %vm1336_vm1, %v4866_v49, %v4868_v25  ;;  %v4678_v3 = vrot.slane %v4228_v63, 1  ;;  %v11173_v26 = vld [vmem:[#allocation14_spill] sm:$0xff] }
 0x3b3   : > { %8196 = vmatmul.mubr.bf16.gmra.mrb[72].mxu1 %v10238_v14  ;;  %v4774_v36 = vadd.f32 %v4677_v35, %v4217_v32  ;;  %v10340_v11 = vadd.f32 %v4867_v10, %v4773_v46 }
 0x3b4   : > { %8199 = vmatprep.mubr.bf16.mxu1 %v10332_v19 }
 0x3b5   : > { %v10342_v58 = vadd.f32 %v4869_v57, %v4774_v36 }
 0x3b6   : > { %v4232_v56 = vpop.f32.mrb[224].mxu1 }
 0x3b7   : > { %v4234_v55 = vpop.f32.mrb[225].mxu1  ;;  %5358 = vmatmul.mubr.bf16.gmra.mrb[76].mxu0 %v10143_v61  ;;  %v4870_v61 = vrot.slane %v8106_v54, 2 }
 0x3b8   : > { %v4679_v52 = vrot.slane %v4234_v55, 1  ;;  %v4236_v53 = vpop.f32.mrb[226].mxu1  ;;  %5366 = vmatprep.mubr.bf16.mxu0 %v11148_v18 }
 0x3b9   : > { %v4237_v20 = vpop.f32.mrb[227].mxu1 }
 0x3ba   : > { %v4680_v22 = vsel %vm1143_vm0, %v4678_v3, %v4679_v52  ;;  %v4681_v47 = vrot.slane %v4237_v20, 1 }
 0x3bb   : > { %8200 = vmatmul.mubr.bf16.gmra.mrb[76].mxu1 %v10345_v1  ;;  %v4775_v15 = vadd.f32 %v4680_v22, %v4226_v40 }
 0x3bc   : > { %v4682_v23 = vsel %vm1143_vm0, %v4679_v52, %v4681_v47  ;;  %6386 = vmatprep.mubr.bf16.mxu1 %v11148_v18 }
 0x3bd   : > { %v4776_v50 = vadd.f32 %v4682_v23, %v4232_v56  ;;  %v8109_v12 = vpop.f32.mrb[0].mxu0 }
 0x3be   : > { %v4241_v6 = vpop.f32.mrb[228].mxu1  ;;  %v4478_v8 = vpop.f32.mrb[1].mxu0  ;;  %v4875_v0 = vrot.slane %v8109_v12, 2 }
 0x3bf   : > { %v4243_v59 = vpop.f32.mrb[229].mxu1  ;;  %v4871_v32 = vrot.slane %v4478_v8, 2  ;;  %v8110_v41 = vpop.f32.mrb[2].mxu0  ;;  %5367 = vmatmul.mubr.bf16.gmra.mrb[80].mxu0 %v10157_v7 }
 0x3c0   : > { %v4245_v5 = vpop.f32.mrb[230].mxu1  ;;  %v4876_v44 = vrot.slane %v8110_v41, 2  ;;  %v4481_v2 = vpop.f32.mrb[3].mxu0  ;;  %v4683_v16 = vrot.slane %v4243_v59, 1  ;;  %5376 = vmatprep.mubr.bf16.mxu0 %v11148_v18 }
 0x3c1   : > { %v4247_v46 = vpop.f32.mrb[231].mxu1  ;;  %v4873_v17 = vrot.slane %v4481_v2, 2  ;;  %v4872_v62 = vsel %vm1336_vm1, %v4870_v61, %v4871_v32 }
 0x3c2   : > { %v4684_v28 = vrot.slane %v4247_v46, 1  ;;  %v10356_v40 = vadd.f32 %v4872_v62, %v4775_v15  ;;  %v4877_v54 = vsel %vm1336_vm1, %v4875_v0, %v4876_v44  ;;  %v11175_v46 = vld [vmem:[#allocation17_spill] sm:$0xff] }
 0x3c3   : > { %6387 = vmatmul.mubr.bf16.vlgmr.msra.gmra.mrb[80].mxu1 %v11173_v26  ;;  %v4874_v39 = vsel %vm1336_vm1, %v4871_v32, %v4873_v17 }
 0x3c4   : > { %v4685_v63 = vsel %vm1143_vm0, %v4683_v16, %v4684_v28  ;;  %6396 = vmatprep.mubr.bf16.mxu1 %v11148_v18  ;;  %v10362_v7 = vadd.f32 %v4874_v39, %v4776_v50 }
 0x3c5   : > { %v4777_v25 = vadd.f32 %v4685_v63, %v4241_v6 }
 0x3c6   : > { %v4251_v35 = vpop.f32.mrb[232].mxu1 }
 0x3c7   : > { %v4252_v34 = vpop.f32.mrb[233].mxu1  ;;  %v10364_v49 = vadd.f32 %v4877_v54, %v4777_v25  ;;  %5377 = vmatmul.mubr.bf16.gmra.mrb[84].mxu0 %v10170_v30  ;;  %v11176_v35 = vld [vmem:[#allocation16_spill] sm:$0xff] }
 0x3c8   : > { %v4686_v36 = vrot.slane %v4252_v34, 1  ;;  %v4254_v10 = vpop.f32.mrb[234].mxu1  ;;  %5385 = vmatprep.mubr.bf16.mxu0 %v11148_v18 }
 0x3c9   : > { %v4256_v57 = vpop.f32.mrb[235].mxu1 }
 0x3ca   : > { %v4687_v56 = vsel %vm1143_vm0, %v4684_v28, %v4686_v36  ;;  %v4688_v50 = vrot.slane %v4256_v57, 1 }
 0x3cb   : > { %6397 = vmatmul.mubr.bf16.gmra.mrb[84].mxu1 %v11174_v21  ;;  %v4778_v27 = vadd.f32 %v4687_v56, %v4245_v5  ;;  %v8113_v55 = vpop.f32.mrb[4].mxu0 }
 0x3cc   : > { %6405 = vmatprep.mubr.bf16.mxu1 %v11148_v18  ;;  %v4494_v3 = vpop.f32.mrb[5].mxu0  ;;  %v4881_v22 = vrot.slane %v8113_v55, 2 }
 0x3cd   : > { %v4878_v52 = vrot.slane %v4494_v3, 2  ;;  %v8114_v20 = vpop.f32.mrb[6].mxu0 }
 0x3ce   : > { %v4260_v53 = vpop.f32.mrb[236].mxu1  ;;  %v4883_v47 = vrot.slane %v8114_v20, 2  ;;  %v4497_v23 = vpop.f32.mrb[7].mxu0 }
 0x3cf   : > { %v4262_v15 = vpop.f32.mrb[237].mxu1  ;;  %v4880_v6 = vrot.slane %v4497_v23, 2  ;;  %v4879_v59 = vsel %vm1336_vm1, %v4876_v44, %v4878_v52  ;;  %5386 = vmatmul.mubr.bf16.gmra.mrb[88].mxu0 %v10173_v45  ;;  %v11177_v23 = vld [vmem:[#allocation18_spill] sm:$0xff] }
 0x3d0   : > { %v4689_v30 = vrot.slane %v4262_v15, 1  ;;  %v4264_v12 = vpop.f32.mrb[238].mxu1  ;;  %v10373_v61 = vadd.f32 %v4879_v59, %v4778_v27  ;;  %v4884_v32 = vsel %vm1336_vm1, %v4881_v22, %v4883_v47  ;;  %5394 = vmatprep.mubr.bf16.mxu0 %v11148_v18 }
 0x3d1   : > { %v4265_v8 = vpop.f32.mrb[239].mxu1  ;;  %v4882_v0 = vsel %vm1336_vm1, %v4880_v6, %v4881_v22 }
 0x3d2   : > { %v4690_v5 = vsel %vm1143_vm0, %v4688_v50, %v4689_v30  ;;  %v4691_v41 = vrot.slane %v4265_v8, 1 }
 0x3d3   : > { %6406 = vmatmul.mubr.bf16.gmra.mrb[88].mxu1 %v11175_v46  ;;  %v4779_v2 = vadd.f32 %v4690_v5, %v4254_v10 }
 0x3d4   : > { %v4692_v16 = vsel %vm1143_vm0, %v4689_v30, %v4691_v41  ;;  %6414 = vmatprep.mubr.bf16.mxu1 %v11148_v18 }
 0x3d5   : > { %v10382_v44 = vadd.f32 %v4882_v0, %v4779_v2  ;;  %v4780_v45 = vadd.f32 %v4692_v16, %v4260_v53 }
 0x3d6   : > { %v4269_v28 = vpop.f32.mrb[240].mxu1 }
 0x3d7   : > { %v4271_v17 = vpop.f32.mrb[241].mxu1  ;;  %v10384_v62 = vadd.f32 %v4884_v32, %v4780_v45  ;;  %5395 = vmatmul.mubr.bf16.gmra.mrb[92].mxu0 %v10187_v24  ;;  %v11178_v45 = vld [vmem:[#allocation19_spill] sm:$0xff] }
 0x3d8   : > { %v4273_v54 = vpop.f32.mrb[242].mxu1  ;;  %v4693_v39 = vrot.slane %v4271_v17, 1  ;;  %5404 = vmatprep.mubr.bf16.mxu0 %v11148_v18 }
 0x3d9   : > { %v4275_v63 = vpop.f32.mrb[243].mxu1 }
 0x3da   : > { %v4694_v25 = vrot.slane %v4275_v63, 1 }
 0x3db   : > { %6415 = vmatmul.mubr.bf16.gmra.mrb[92].mxu1 %v11176_v35 }
 0x3dc   : > { %v4695_v34 = vsel %vm1143_vm0, %v4693_v39, %v4694_v25  ;;  %6424 = vmatprep.mubr.bf16.mxu1 %v11148_v18 }
 0x3dd   : > { %v4781_v36 = vadd.f32 %v4695_v34, %v4269_v28  ;;  %v8117_v57 = vpop.f32.mrb[8].mxu0 }
 0x3de   : > { %v4279_v10 = vpop.f32.mrb[244].mxu1  ;;  %v4510_v27 = vpop.f32.mrb[9].mxu0  ;;  %v4888_v20 = vrot.slane %v8117_v57, 2 }
 0x3df   : > { %v4280_v56 = vpop.f32.mrb[245].mxu1  ;;  %v8118_v52 = vpop.f32.mrb[10].mxu0  ;;  %5405 = vmatmul.mubr.bf16.gmra.mrb[96].mxu0 %v10195_v43  ;;  %v4885_v47 = vrot.slane %v4510_v27, 2 }
 0x3e0   : > { %v4696_v55 = vrot.slane %v4280_v56, 1  ;;  %v4282_v3 = vpop.f32.mrb[246].mxu1  ;;  %v4513_v24 = vpop.f32.mrb[11].mxu0  ;;  %5413 = vmatprep.mubr.bf16.mxu0 %v11148_v18 }
 0x3e1   : > { %v4284_v53 = vpop.f32.mrb[247].mxu1  ;;  %v4886_v15 = vrot.slane %v4513_v24, 2 }
 0x3e2   : > { %v4697_v22 = vsel %vm1143_vm0, %v4694_v25, %v4696_v55  ;;  %v4698_v32 = vrot.slane %v4284_v53, 1 }
 0x3e3   : > { %6425 = vmatmul.mubr.bf16.gmra.mrb[96].mxu1 %v11177_v23  ;;  %v4782_v50 = vadd.f32 %v4697_v22, %v4273_v54  ;;  %v4887_v30 = vsel %vm1336_vm1, %v4885_v47, %v4886_v15  ;;  %v4889_v6 = vsel %vm1336_vm1, %v4886_v15, %v4888_v20  ;;  %v11179_v47 = vld [vmem:[#allocation21_spill] sm:$0xff] }
 0x3e4   : > { %6433 = vmatprep.mubr.bf16.mxu1 %v11148_v18  ;;  %v10398_v12 = vadd.f32 %v4887_v30, %v4781_v36  ;;  %v4890_v36 = vrot.slane %v8118_v52, 2 }
 0x3e5   : > { %v10400_v59 = vadd.f32 %v4889_v6, %v4782_v50 }
 0x3e6   : > { %v4288_v43 = vpop.f32.mrb[248].mxu1 }
 0x3e7   : > { %v4290_v8 = vpop.f32.mrb[249].mxu1  ;;  %5414 = vmatmul.mubr.bf16.gmra.mrb[100].mxu0 %v10198_v42 }
 0x3e8   : > { %v4699_v5 = vrot.slane %v4290_v8, 1  ;;  %v4292_v41 = vpop.f32.mrb[250].mxu1  ;;  %5422 = vmatprep.mubr.bf16.mxu0 %v11148_v18 }
 0x3e9   : > { %v4293_v0 = vpop.f32.mrb[251].mxu1 }
 0x3ea   : > { %v4700_v2 = vsel %vm1143_vm0, %v4698_v32, %v4699_v5  ;;  %v4701_v16 = vrot.slane %v4293_v0, 1 }
 0x3eb   : > { %6434 = vmatmul.mubr.bf16.gmra.mrb[100].mxu1 %v11178_v45  ;;  %v4783_v28 = vadd.f32 %v4700_v2, %v4282_v3 }
 0x3ec   : > { %v4702_v17 = vsel %vm1143_vm0, %v4699_v5, %v4701_v16  ;;  %6442 = vmatprep.mubr.bf16.mxu1 %v11148_v18  ;;  %v8121_v39 = vpop.f32.mrb[12].mxu0  ;;  %v11180_v16 = vld [vmem:[#allocation22_spill] sm:$0xff] }
 0x3ed   : > { %v4784_v54 = vadd.f32 %v4702_v17, %v4288_v43  ;;  %v4526_v34 = vpop.f32.mrb[13].mxu0  ;;  %v4895_v56 = vrot.slane %v8121_v39, 2 }
 0x3ee   : > { %v4297_v63 = vpop.f32.mrb[252].mxu1  ;;  %v4891_v10 = vrot.slane %v4526_v34, 2  ;;  %v8122_v57 = vpop.f32.mrb[14].mxu0 }
 0x3ef   : > { %v4299_v25 = vpop.f32.mrb[253].mxu1  ;;  %v4896_v27 = vrot.slane %v8122_v57, 2  ;;  %v4529_v53 = vpop.f32.mrb[15].mxu0  ;;  %5423 = vmatmul.mubr.bf16.gmra.mrb[104].mxu0 %v10212_v29 }
 0x3f0   : > { %v4301_v42 = vpop.f32.mrb[254].mxu1  ;;  %v4703_v3 = vrot.slane %v4299_v25, 1  ;;  %v4893_v20 = vrot.slane %v4529_v53, 2  ;;  %5432 = vmatprep.mubr.bf16.mxu0 %v11148_v18  ;;  %v4892_v22 = vsel %vm1336_vm1, %v4890_v36, %v4891_v10 }
 0x3f1   : > { %v4303_v55 = vpop.f32.mrb[255].mxu1  ;;  %v10412_v15 = vadd.f32 %v4892_v22, %v4783_v28  ;;  %v4897_v52 = vsel %vm1336_vm1, %v4895_v56, %v4896_v27 }
 0x3f2   : > { %v4704_v24 = vrot.slane %v4303_v55, 1  ;;  %v4894_v30 = vsel %vm1336_vm1, %v4891_v10, %v4893_v20 }
 0x3f3   : > { %6443 = vmatmul.mubr.bf16.gmra.mrb[104].mxu1 %v11179_v47  ;;  %v10418_v29 = vadd.f32 %v4894_v30, %v4784_v54  ;;  %v11181_v30 = vld [vmem:[#allocation24_spill] sm:$0xff] }
 0x3f4   : > { %v4705_v50 = vsel %vm1143_vm0, %v4703_v3, %v4704_v24  ;;  %6452 = vmatprep.mubr.bf16.mxu1 %v11148_v18 }
 0x3f5   : > { %v4785_v6 = vadd.f32 %v4705_v50, %v4297_v63 }
 0x3f6   : > { %v4307_v43 = vpop.f32.mrb[0].mxu1 }
 0x3f7   : > { %v4308_v8 = vpop.f32.mrb[1].mxu1  ;;  %v10420_v32 = vadd.f32 %v4897_v52, %v4785_v6  ;;  %5433 = vmatmul.mubr.bf16.gmra.mrb[108].mxu0 %v10220_v31 }
 0x3f8   : > { %v4706_v5 = vrot.slane %v4308_v8, 1  ;;  %v4310_v41 = vpop.f32.mrb[2].mxu1  ;;  %5441 = vmatprep.mubr.bf16.mxu0 %v11148_v18 }
 0x3f9   : > { %v4312_v0 = vpop.f32.mrb[3].mxu1 }
 0x3fa   : > { %v4707_v2 = vsel %vm1143_vm0, %v4704_v24, %v4706_v5  ;;  %v8125_v17 = vpop.f32.mrb[16].mxu0  ;;  %v4708_v56 = vrot.slane %v4312_v0, 1  ;;  %v6140_v5 = vld [vmem:[#allocation3 + $0xc8] sm:$0xff] }
 0x3fb   : > { %6453 = vmatmul.mubr.bf16.gmra.mrb[108].mxu1 %v11180_v16  ;;  %v4786_v28 = vadd.f32 %v4707_v2, %v4301_v42  ;;  %v4542_v54 = vpop.f32.mrb[17].mxu0  ;;  %v4901_v34 = vrot.slane %v8125_v17, 2  ;;  %v6139_v17 = vld [vmem:[#allocation3 + $0xc0] sm:$0xff] }
 0x3fc   : > { %6461 = vmatprep.mubr.bf16.mxu1 %v11148_v18  ;;  %v4898_v63 = vrot.slane %v4542_v54, 2  ;;  %v8126_v25 = vpop.f32.mrb[18].mxu0 }
 0x3fd   : > { %v4903_v36 = vrot.slane %v8126_v25, 2  ;;  %v4545_v57 = vpop.f32.mrb[19].mxu0 }
 0x3fe   : > { %v4316_v39 = vpop.f32.mrb[4].mxu1  ;;  %v4900_v55 = vrot.slane %v4545_v57, 2  ;;  %v4899_v3 = vsel %vm1336_vm1, %v4896_v27, %v4898_v63  ;;  %v10443_v63 = vpack.c.bf16 %v6140_v5, %v6139_v17  ;;  %v6142_v57 = vld [vmem:[#allocation3 + $0xd8] sm:$0xff] }
 0x3ff   : > { %v4318_v10 = vpop.f32.mrb[5].mxu1  ;;  %5442 = vmatmul.mubr.bf16.gmra.mrb[112].mxu0 %v10223_v60  ;;  %v10429_v42 = vadd.f32 %v4899_v3, %v4786_v28  ;;  %v4904_v20 = vsel %vm1336_vm1, %v4901_v34, %v4903_v36  ;;  %v6141_v3 = vld [vmem:[#allocation3 + $0xd0] sm:$0xff] }
 0x400   : > { %v4709_v31 = vrot.slane %v4318_v10, 1  ;;  %v4320_v53 = vpop.f32.mrb[6].mxu1  ;;  %5450 = vmatprep.mubr.bf16.mxu0 %v11148_v18  ;;  %v4902_v50 = vsel %vm1336_vm1, %v4900_v55, %v4901_v34 }
 0x401   : > { %v4321_v24 = vpop.f32.mrb[7].mxu1 }
 0x402   : > { %v4710_v22 = vsel %vm1143_vm0, %v4708_v56, %v4709_v31  ;;  %v4711_v52 = vrot.slane %v4321_v24, 1 }
 0x403   : > { %6462 = vmatmul.mubr.bf16.gmra.mrb[112].mxu1 %v11181_v30  ;;  %v4787_v6 = vadd.f32 %v4710_v22, %v4310_v41  ;;  %v10450_v22 = vpack.c.bf16 %v6142_v57, %v6141_v3 }
 0x404   : > { %v4712_v43 = vsel %vm1143_vm0, %v4709_v31, %v4711_v52  ;;  %6470 = vmatprep.mubr.bf16.mxu1 %v11148_v18 }
 0x405   : > { %v10438_v27 = vadd.f32 %v4902_v50, %v4787_v6  ;;  %v4788_v60 = vadd.f32 %v4712_v43, %v4316_v39 }
 0x406   : > { %v4325_v8 = vpop.f32.mrb[8].mxu1 }
 0x407   : > { %v4327_v0 = vpop.f32.mrb[9].mxu1  ;;  %v10440_v2 = vadd.f32 %v4904_v20, %v4788_v60  ;;  %5451 = vmatmul.mubr.bf16.gmra.mrb[116].mxu0 %v10238_v14 }
 0x408   : > { %v4329_v28 = vpop.f32.mrb[10].mxu1  ;;  %v4713_v41 = vrot.slane %v4327_v0, 1  ;;  %5460 = vmatprep.mubr.bf16.mxu0 %v11148_v18 }
 0x409   : > { %v4331_v54 = vpop.f32.mrb[11].mxu1 }
 0x40a   : > { %v4714_v25 = vrot.slane %v4331_v54, 1  ;;  %v6143_v54 = vld [vmem:[#allocation3 + $0xe0] sm:$0xff] }
 0x40b   : > { %6471 = vmatmul.mubr.bf16.gmra.mrb[116].mxu1 %v10443_v63 }
 0x40c   : > { %v4715_v39 = vsel %vm1143_vm0, %v4713_v41, %v4714_v25  ;;  %6480 = vmatprep.mubr.bf16.mxu1 %v11148_v18  ;;  %v8129_v10 = vpop.f32.mrb[20].mxu0  ;;  %v6144_v41 = vld [vmem:[#allocation3 + $0xe8] sm:$0xff] }
 0x40d   : > { %v4789_v34 = vadd.f32 %v4715_v39, %v4325_v8  ;;  %v4558_v31 = vpop.f32.mrb[21].mxu0  ;;  %v4908_v52 = vrot.slane %v8129_v10, 2 }
 0x40e   : > { %v4335_v36 = vpop.f32.mrb[12].mxu1  ;;  %v8130_v53 = vpop.f32.mrb[22].mxu0  ;;  %v4905_v6 = vrot.slane %v4558_v31, 2 }
 0x40f   : > { %v4336_v56 = vpop.f32.mrb[13].mxu1  ;;  %v4561_v20 = vpop.f32.mrb[23].mxu0  ;;  %5461 = vmatmul.mubr.bf16.gmra.mrb[120].mxu0 %v10332_v19 }
 0x410   : > { %v4716_v55 = vrot.slane %v4336_v56, 1  ;;  %v4338_v14 = vpop.f32.mrb[14].mxu1  ;;  %v4906_v43 = vrot.slane %v4561_v20, 2  ;;  %5469 = vmatprep.mubr.bf16.mxu0 %v11148_v18 }
 0x411   : > { %v4340_v24 = vpop.f32.mrb[15].mxu1 }
 0x412   : > { %v4717_v50 = vsel %vm1143_vm0, %v4714_v25, %v4716_v55  ;;  %v4907_v8 = vsel %vm1336_vm1, %v4905_v6, %v4906_v43  ;;  %v4909_v5 = vsel %vm1336_vm1, %v4906_v43, %v4908_v52  ;;  %v4718_v39 = vrot.slane %v4340_v24, 1  ;;  %v6146_v52 = vld [vmem:[#allocation3 + $0xf8] sm:$0xff] }
 0x413   : > { %6481 = vmatmul.mubr.bf16.gmra.mrb[120].mxu1 %v10450_v22  ;;  %v4790_v60 = vadd.f32 %v4717_v50, %v4329_v28  ;;  %v10458_v0 = vadd.f32 %v4907_v8, %v4789_v34  ;;  %v10463_v28 = vpack.c.bf16 %v6144_v41, %v6143_v54  ;;  %v4910_v6 = vrot.slane %v8130_v53, 2 }
 0x414   : > { %6489 = vmatprep.mubr.bf16.mxu1 %v11148_v18 }
 0x415   : > { %v10460_v19 = vadd.f32 %v4909_v5, %v4790_v60  ;;  %v6145_v5 = vld [vmem:[#allocation3 + $0xf0] sm:$0xff] }
 0x416   : > { %v4344_v17 = vpop.f32.mrb[16].mxu1 }
 0x417   : > { %v4346_v25 = vpop.f32.mrb[17].mxu1  ;;  %5470 = vmatmul.mubr.bf16.gmra.mrb[124].mxu0 %v10345_v1 }
 0x418   : > { %v4719_v36 = vrot.slane %v4346_v25, 1  ;;  %v4348_v10 = vpop.f32.mrb[18].mxu1  ;;  %8219 = vmatprep.mubr.bf16.mxu0 %v11173_v26 }
 0x419   : > { %v4349_v57 = vpop.f32.mrb[19].mxu1 }
 0x41a   : > { %v4720_v56 = vsel %vm1143_vm0, %v4718_v39, %v4719_v36  ;;  %v4721_v31 = vrot.slane %v4349_v57, 1 }
 0x41b   : > { %6490 = vmatmul.mubr.bf16.gmra.mrb[124].mxu1 %v10463_v28  ;;  %v4791_v34 = vadd.f32 %v4720_v56, %v4338_v14  ;;  %v10471_v14 = vpack.c.bf16 %v6146_v52, %v6145_v5  ;;  %v6148_v52 = vld [vmem:[#allocation3 + $0x108] sm:$0xff] }
 0x41c   : > { %v4722_v55 = vsel %vm1143_vm0, %v4719_v36, %v4721_v31  ;;  %6498 = vmatprep.mubr.bf16.mxu1 %v11148_v18  ;;  %v8133_v20 = vpop.f32.mrb[24].mxu0 }
 0x41d   : > { %v4792_v3 = vadd.f32 %v4722_v55, %v4344_v17  ;;  %v4574_v1 = vpop.f32.mrb[25].mxu0  ;;  %v4915_v54 = vrot.slane %v8133_v20, 2 }
 0x41e   : > { %v4353_v24 = vpop.f32.mrb[20].mxu1  ;;  %v4911_v43 = vrot.slane %v4574_v1, 2  ;;  %v8134_v8 = vpop.f32.mrb[26].mxu0 }
 0x41f   : > { %v4355_v50 = vpop.f32.mrb[21].mxu1  ;;  %v4916_v26 = vrot.slane %v8134_v8, 2  ;;  %v4577_v25 = vpop.f32.mrb[27].mxu0  ;;  %8220 = vmatmul.mubr.bf16.vlgmr.msra.gmra.mrb[128].mxu0 %v11174_v21 }
 0x420   : > { %v4357_v60 = vpop.f32.mrb[22].mxu1  ;;  %v4723_v39 = vrot.slane %v4355_v50, 1  ;;  %v4913_v36 = vrot.slane %v4577_v25, 2  ;;  %8223 = vmatprep.mubr.bf16.mxu0 %v11175_v46  ;;  %v4912_v10 = vsel %vm1336_vm1, %v4910_v6, %v4911_v43 }
 0x421   : > { %v4359_v41 = vpop.f32.mrb[23].mxu1  ;;  %v10476_v53 = vadd.f32 %v4912_v10, %v4791_v34  ;;  %v4917_v57 = vsel %vm1336_vm1, %v4915_v54, %v4916_v26  ;;  %v6147_v34 = vld [vmem:[#allocation3 + $0x100] sm:$0xff]  ;;  %v6150_v10 = vld [vmem:[#allocation3 + $0x118] sm:$0xff] }
 0x422   : > { %v4724_v17 = vrot.slane %v4359_v41, 1  ;;  %v4914_v21 = vsel %vm1336_vm1, %v4911_v43, %v4913_v36  ;;  %v10487_v5 = vpack.c.bf16 %v6148_v52, %v6147_v34  ;;  %v6149_v36 = vld [vmem:[#allocation3 + $0x110] sm:$0xff] }
 0x423   : > { %6499 = vmatmul.mubr.bf16.gmra.mrb[128].mxu1 %v10471_v14  ;;  %v10482_v31 = vadd.f32 %v4914_v21, %v4792_v3 }
 0x424   : > { %v4725_v56 = vsel %vm1143_vm0, %v4723_v39, %v4724_v17  ;;  %6508 = vmatprep.mubr.bf16.mxu1 %v11148_v18 }
 0x425   : > { %v4793_v55 = vadd.f32 %v4725_v56, %v4353_v24 }
 0x426   : > { %v4363_v20 = vpop.f32.mrb[24].mxu1 }
 0x427   : > { %v4364_v46 = vpop.f32.mrb[25].mxu1  ;;  %v10484_v50 = vadd.f32 %v4917_v57, %v4793_v55  ;;  %8224 = vmatmul.mubr.bf16.gmra.mrb[132].mxu0 %v11176_v35 }
 0x428   : > { %v4726_v1 = vrot.slane %v4364_v46, 1  ;;  %v4366_v6 = vpop.f32.mrb[26].mxu1  ;;  %8227 = vmatprep.mubr.bf16.mxu0 %v11177_v23  ;;  %v10495_v46 = vpack.c.bf16 %v6150_v10, %v6149_v36 }
 0x429   : > { %v4368_v8 = vpop.f32.mrb[27].mxu1 }
 0x42a   : > { %v4727_v54 = vsel %vm1143_vm0, %v4724_v17, %v4726_v1  ;;  %v8137_v24 = vpop.f32.mrb[28].mxu0  ;;  %v4728_v55 = vrot.slane %v4368_v8, 1 }
 0x42b   : > { %6509 = vmatmul.mubr.bf16.gmra.mrb[132].mxu1 %v10487_v5  ;;  %v4794_v3 = vadd.f32 %v4727_v54, %v4357_v60  ;;  %v4590_v43 = vpop.f32.mrb[29].mxu0  ;;  %v4921_v57 = vrot.slane %v8137_v24, 2 }
 0x42c   : > { %6517 = vmatprep.mubr.bf16.mxu1 %v11148_v18  ;;  %v4918_v41 = vrot.slane %v4590_v43, 2  ;;  %v8138_v39 = vpop.f32.mrb[30].mxu0 }
 0x42d   : > { %v4923_v35 = vrot.slane %v8138_v39, 2  ;;  %v4593_v21 = vpop.f32.mrb[31].mxu0 }
 0x42e   : > { %v4372_v25 = vpop.f32.mrb[28].mxu1  ;;  %v4920_v20 = vrot.slane %v4593_v21, 2  ;;  %v4919_v52 = vsel %vm1336_vm1, %v4916_v26, %v4918_v41 }
 0x42f   : > { %v4374_v56 = vpop.f32.mrb[29].mxu1  ;;  %8228 = vmatmul.mubr.bf16.gmra.mrb[136].mxu0 %v11178_v45  ;;  %v10497_v1 = vadd.f32 %v4919_v52, %v4794_v3  ;;  %v4924_v34 = vsel %vm1336_vm1, %v4921_v57, %v4923_v35 }
 0x430   : > { %v4729_v17 = vrot.slane %v4374_v56, 1  ;;  %v4376_v23 = vpop.f32.mrb[30].mxu1  ;;  %8231 = vmatprep.mubr.bf16.mxu0 %v11179_v47  ;;  %v4922_v8 = vsel %vm1336_vm1, %v4920_v20, %v4921_v57  ;;  %v6152_v56 = vld [vmem:[#allocation3 + $0x128] sm:$0xff] }
 0x431   : > { %v4377_v60 = vpop.f32.mrb[31].mxu1  ;;  %v6151_v23 = vld [vmem:[#allocation3 + $0x120] sm:$0xff] }
 0x432   : > { %v4730_v54 = vsel %vm1143_vm0, %v4728_v55, %v4729_v17  ;;  %v4731_v24 = vrot.slane %v4377_v60, 1  ;;  %v5256_v41 = vpop.f32.mrb[32].mxu0 }
 0x433   : > { %6518 = vmatmul.mubr.bf16.gmra.mrb[136].mxu1 %v10495_v46  ;;  %v4795_v43 = vadd.f32 %v4730_v54, %v4366_v6  ;;  %v5704_v45 = vadd.f32 %v5256_v41, %v10282_v38  ;;  %v5258_v3 = vpop.f32.mrb[33].mxu0  ;;  %v10513_v38 = vpack.c.bf16 %v6152_v56, %v6151_v23  ;;  %v6153_v23 = vld [vmem:[#allocation3 + $0x130] sm:$0xff] }
 0x434   : > { %v4732_v26 = vsel %vm1143_vm0, %v4729_v17, %v4731_v24  ;;  %6526 = vmatprep.mubr.bf16.mxu1 %v11148_v18  ;;  %v5260_v10 = vpop.f32.mrb[34].mxu0  ;;  %v5784_v6 = vrot.slane %v5258_v3, 1 }
 0x435   : > { %v10507_v39 = vadd.f32 %v4922_v8, %v4795_v43  ;;  %v4796_v36 = vadd.f32 %v4732_v26, %v4372_v25  ;;  %v5705_v47 = vadd.f32 %v5260_v10, %v10284_v51  ;;  %v5262_v57 = vpop.f32.mrb[35].mxu0  ;;  %v6154_v10 = vld [vmem:[#allocation3 + $0x138] sm:$0xff] }
 0x436   : > { %v8157_v35 = vpop.f32.mrb[32].mxu1  ;;  %v5785_v17 = vrot.slane %v5262_v57, 1 }
 0x437   : > { %11182 = vst [vmem:[#allocation20_spill] sm:$0xff] %v10507_v39  ;;  %v5513_v21 = vpop.f32.mrb[33].mxu1  ;;  %v10510_v55 = vadd.f32 %v4924_v34, %v4796_v36  ;;  %8232 = vmatmul.mubr.bf16.gmra.mrb[140].mxu0 %v11180_v16  ;;  %v5979_v60 = vrot.slane %v8157_v35, 2 }
 0x438   : > { %v8158_v20 = vpop.f32.mrb[34].mxu1  ;;  %v5786_v25 = vsel %vm1143_vm0, %v5784_v6, %v5785_v17  ;;  %v5976_v54 = vrot.slane %v5513_v21, 2  ;;  %8235 = vmatprep.mubr.bf16.mxu0 %v11181_v30 }
 0x439   : > { %11183 = vst [vmem:[#allocation23_spill] sm:$0xff] %v10510_v55  ;;  %v5516_v52 = vpop.f32.mrb[35].mxu1  ;;  %v5896_v51 = vadd.f32 %v5786_v25, %v5704_v45  ;;  %v5981_v57 = vrot.slane %v8158_v20, 2 }
 0x43a   : > { %v5977_v24 = vrot.slane %v5516_v52, 2  ;;  %v5266_v34 = vpop.f32.mrb[36].mxu0 }
 0x43b   : > { %6527 = vmatmul.mubr.bf16.gmra.mrb[140].mxu1 %v10513_v38  ;;  %v5267_v16 = vpop.f32.mrb[37].mxu0 }
 0x43c   : > { %6536 = vmatprep.mubr.bf16.mxu1 %v11148_v18  ;;  %v5978_v8 = vsel %vm1336_vm1, %v5976_v54, %v5977_v24  ;;  %v5980_v43 = vsel %vm1336_vm1, %v5977_v24, %v5979_v60  ;;  %v5787_v41 = vrot.slane %v5267_v16, 1  ;;  %v5269_v3 = vpop.f32.mrb[38].mxu0  ;;  %v10526_v54 = vpack.c.bf16 %v6154_v10, %v6153_v23  ;;  %v6156_v10 = vld [vmem:[#allocation3 + $0x148] sm:$0xff] }
 0x43d   : > { %v10521_v26 = vadd.f32 %v5978_v8, %v5896_v51  ;;  %v5706_v35 = vadd.f32 %v5269_v3, %v10295_v37  ;;  %v5271_v30 = vpop.f32.mrb[39].mxu0 }
 0x43e   : > { %v8161_v36 = vpop.f32.mrb[36].mxu1  ;;  %v5788_v45 = vsel %vm1143_vm0, %v5785_v17, %v5787_v41  ;;  %v5789_v16 = vrot.slane %v5271_v30, 1 }
 0x43f   : > { %v5529_v56 = vpop.f32.mrb[37].mxu1  ;;  %v5986_v52 = vrot.slane %v8161_v36, 2  ;;  %8236 = vmatmul.mubr.bf16.gmra.mrb[144].mxu0 %v10443_v63  ;;  %v5897_v24 = vadd.f32 %v5788_v45, %v5705_v47  ;;  %v6155_v36 = vld [vmem:[#allocation3 + $0x140] sm:$0xff] }
 0x440   : > { %v5982_v21 = vrot.slane %v5529_v56, 2  ;;  %v8162_v6 = vpop.f32.mrb[38].mxu1  ;;  %8239 = vmatprep.mubr.bf16.mxu0 %v10450_v22 }
 0x441   : > { %v5987_v25 = vrot.slane %v8162_v6, 2  ;;  %v5532_v60 = vpop.f32.mrb[39].mxu1  ;;  %v10531_v20 = vadd.f32 %v5980_v43, %v5897_v24 }
 0x442   : > { %v5984_v51 = vrot.slane %v5532_v60, 2  ;;  %v5983_v37 = vsel %vm1336_vm1, %v5981_v57, %v5982_v21  ;;  %v5275_v34 = vpop.f32.mrb[40].mxu0 }
 0x443   : > { %6537 = vmatmul.mubr.bf16.gmra.mrb[144].mxu1 %v10526_v54  ;;  %v10534_v17 = vsel %vm1336_vm1, %v5986_v52, %v5987_v25  ;;  %v5707_v8 = vadd.f32 %v5275_v34, %v10301_v13  ;;  %v5277_v47 = vpop.f32.mrb[41].mxu0  ;;  %v10541_v13 = vpack.c.bf16 %v6156_v10, %v6155_v36  ;;  %v6158_v10 = vld [vmem:[#allocation3 + $0x158] sm:$0xff] }
 0x444   : > { %6545 = vmatprep.mubr.bf16.mxu1 %v11148_v18  ;;  %v5985_v63 = vsel %vm1336_vm1, %v5982_v21, %v5984_v51  ;;  %v5790_v41 = vrot.slane %v5277_v47, 1  ;;  %v5279_v22 = vpop.f32.mrb[42].mxu0 }
 0x445   : > { %v5280_v56 = vpop.f32.mrb[43].mxu0 }
 0x446   : > { %v8165_v3 = vpop.f32.mrb[40].mxu1  ;;  %v5791_v57 = vsel %vm1143_vm0, %v5789_v16, %v5790_v41  ;;  %v5792_v45 = vrot.slane %v5280_v56, 1 }
 0x447   : > { %v5545_v43 = vpop.f32.mrb[41].mxu1  ;;  %v5992_v52 = vrot.slane %v8165_v3, 2  ;;  %8240 = vmatmul.mubr.bf16.gmra.mrb[148].mxu0 %v10463_v28  ;;  %v5898_v30 = vadd.f32 %v5791_v57, %v5706_v35 }
 0x448   : > { %v5989_v6 = vrot.slane %v5545_v43, 2  ;;  %v8166_v23 = vpop.f32.mrb[42].mxu1  ;;  %v5793_v21 = vsel %vm1143_vm0, %v5790_v41, %v5792_v45  ;;  %8243 = vmatprep.mubr.bf16.mxu0 %v10471_v14 }
 0x449   : > { %v5994_v60 = vrot.slane %v8166_v23, 2  ;;  %v5548_v24 = vpop.f32.mrb[43].mxu1  ;;  %v10547_v47 = vadd.f32 %v5983_v37, %v5898_v30  ;;  %v5899_v16 = vadd.f32 %v5793_v21, %v5707_v8 }
 0x44a   : > { %v5991_v51 = vrot.slane %v5548_v24, 2  ;;  %v5990_v34 = vsel %vm1336_vm1, %v5987_v25, %v5989_v6  ;;  %v5284_v3 = vpop.f32.mrb[44].mxu0  ;;  %v6157_v6 = vld [vmem:[#allocation3 + $0x150] sm:$0xff] }
 0x44b   : > { %6546 = vmatmul.mubr.bf16.gmra.mrb[148].mxu1 %v10541_v13  ;;  %v10550_v22 = vsel %vm1336_vm1, %v5992_v52, %v5994_v60  ;;  %v5708_v35 = vadd.f32 %v5284_v3, %v10303_v48  ;;  %v5286_v41 = vpop.f32.mrb[45].mxu0  ;;  %v10557_v14 = vadd.f32 %v5985_v63, %v5899_v16 }
 0x44c   : > { %6554 = vmatprep.mubr.bf16.mxu1 %v11148_v18  ;;  %v10554_v28 = vsel %vm1336_vm1, %v5991_v51, %v5992_v52  ;;  %v5288_v25 = vpop.f32.mrb[46].mxu0  ;;  %v5794_v43 = vrot.slane %v5286_v41, 1  ;;  %v10561_v52 = vpack.c.bf16 %v6158_v10, %v6157_v6 }
 0x44d   : > { %v5709_v37 = vadd.f32 %v5288_v25, %v10312_v4  ;;  %v5290_v8 = vpop.f32.mrb[47].mxu0 }
 0x44e   : > { %v8169_v36 = vpop.f32.mrb[44].mxu1  ;;  %v5795_v57 = vrot.slane %v5290_v8, 1 }
 0x44f   : > { %v5561_v56 = vpop.f32.mrb[45].mxu1  ;;  %8244 = vmatmul.mubr.bf16.gmra.mrb[152].mxu0 %v10487_v5  ;;  %v5999_v48 = vrot.slane %v8169_v36, 2 }
 0x450   : > { %v8170_v45 = vpop.f32.mrb[46].mxu1  ;;  %v5796_v63 = vsel %vm1143_vm0, %v5794_v43, %v5795_v57  ;;  %v5996_v60 = vrot.slane %v5561_v56, 2  ;;  %8247 = vmatprep.mubr.bf16.mxu0 %v10495_v46  ;;  %v6160_v46 = vld [vmem:[#allocation3 + $0x168] sm:$0xff] }
 0x451   : > { %v5564_v23 = vpop.f32.mrb[47].mxu1  ;;  %v5900_v4 = vadd.f32 %v5796_v63, %v5708_v35  ;;  %v6001_v8 = vrot.slane %v8170_v45, 2 }
 0x452   : > { %v5997_v24 = vrot.slane %v5564_v23, 2  ;;  %v5294_v30 = vpop.f32.mrb[48].mxu0  ;;  %v6159_v23 = vld [vmem:[#allocation3 + $0x160] sm:$0xff] }
 0x453   : > { %6555 = vmatmul.mubr.bf16.gmra.mrb[152].mxu1 %v10561_v52  ;;  %v5295_v51 = vpop.f32.mrb[49].mxu0  ;;  %v10574_v16 = vadd.f32 %v10534_v17, %v5900_v4  ;;  %v6188_v17 = vpack.c.bf16 %v6160_v46, %v6159_v23  ;;  %v6161_v46 = vld [vmem:[#allocation3 + $0x170] sm:$0xff] }
 0x454   : > { %6564 = vmatprep.mubr.bf16.mxu1 %v11148_v18  ;;  %v10568_v21 = vsel %vm1336_vm1, %v5996_v60, %v5997_v24  ;;  %v10571_v5 = vsel %vm1336_vm1, %v5997_v24, %v5999_v48  ;;  %v5797_v3 = vrot.slane %v5295_v51, 1  ;;  %v5297_v41 = vpop.f32.mrb[50].mxu0 }
 0x455   : > { %v5710_v36 = vadd.f32 %v5297_v41, %v10321_v9  ;;  %v5299_v35 = vpop.f32.mrb[51].mxu0 }
 0x456   : > { %v8173_v25 = vpop.f32.mrb[48].mxu1  ;;  %v5798_v56 = vsel %vm1143_vm0, %v5795_v57, %v5797_v3  ;;  %v5799_v3 = vrot.slane %v5299_v35, 1 }
 0x457   : > { %v5577_v10 = vpop.f32.mrb[49].mxu1  ;;  %v6006_v48 = vrot.slane %v8173_v25, 2  ;;  %8248 = vmatmul.mubr.bf16.gmra.mrb[156].mxu0 %v10513_v38  ;;  %v5901_v24 = vadd.f32 %v5798_v56, %v5709_v37 }
 0x458   : > { %v6002_v43 = vrot.slane %v5577_v10, 2  ;;  %v8174_v6 = vpop.f32.mrb[50].mxu1  ;;  %8251 = vmatprep.mubr.bf16.mxu0 %v10526_v54  ;;  %v6162_v10 = vld [vmem:[#allocation3 + $0x178] sm:$0xff] }
 0x459   : > { %v6007_v63 = vrot.slane %v8174_v6, 2  ;;  %v5580_v60 = vpop.f32.mrb[51].mxu1  ;;  %v10583_v45 = vadd.f32 %v5990_v34, %v5901_v24 }
 0x45a   : > { %v6004_v4 = vrot.slane %v5580_v60, 2  ;;  %v10581_v9 = vsel %vm1336_vm1, %v6001_v8, %v6002_v43  ;;  %v5303_v30 = vpop.f32.mrb[52].mxu0 }
 0x45b   : > { %6565 = vmatmul.mubr.bf16.gmra.mrb[156].mxu1 %v6188_v17  ;;  %v10586_v57 = vsel %vm1336_vm1, %v6006_v48, %v6007_v63  ;;  %v5711_v38 = vadd.f32 %v5303_v30, %v10323_v33  ;;  %v5305_v37 = vpop.f32.mrb[53].mxu0  ;;  %v6189_v33 = vpack.c.bf16 %v6162_v10, %v6161_v46 }
 0x45c   : > { %6573 = vmatprep.mubr.bf16.mxu1 %v11148_v18  ;;  %v10590_v51 = vsel %vm1336_vm1, %v6002_v43, %v6004_v4  ;;  %v5800_v54 = vrot.slane %v5305_v37, 1  ;;  %v5307_v41 = vpop.f32.mrb[54].mxu0 }
 0x45d   : > { %v5308_v34 = vpop.f32.mrb[55].mxu0 }
 0x45e   : > { %v8177_v25 = vpop.f32.mrb[52].mxu1  ;;  %v5801_v56 = vsel %vm1143_vm0, %v5799_v3, %v5800_v54  ;;  %v5802_v6 = vrot.slane %v5308_v34, 1 }
 0x45f   : > { %v5593_v8 = vpop.f32.mrb[53].mxu1  ;;  %v6012_v60 = vrot.slane %v8177_v25, 2  ;;  %8252 = vmatmul.mubr.bf16.gmra.mrb[160].mxu0 %v10541_v13  ;;  %v5902_v4 = vadd.f32 %v5801_v56, %v5710_v36 }
 0x460   : > { %v6009_v23 = vrot.slane %v5593_v8, 2  ;;  %v8178_v48 = vpop.f32.mrb[54].mxu1  ;;  %v5803_v35 = vsel %vm1143_vm0, %v5800_v54, %v5802_v6  ;;  %8255 = vmatprep.mubr.bf16.mxu0 %v10561_v52 }
 0x461   : > { %v6014_v24 = vrot.slane %v8178_v48, 2  ;;  %v5596_v43 = vpop.f32.mrb[55].mxu1  ;;  %v10601_v3 = vadd.f32 %v10554_v28, %v5902_v4  ;;  %v5903_v41 = vadd.f32 %v5803_v35, %v5711_v38 }
 0x462   : > { %v6011_v30 = vrot.slane %v5596_v43, 2  ;;  %v10598_v37 = vsel %vm1336_vm1, %v6007_v63, %v6009_v23  ;;  %v5312_v34 = vpop.f32.mrb[56].mxu0  ;;  %v6163_v23 = vld [vmem:[#allocation3 + $0x180] sm:$0xff] }
 0x463   : > { %6574 = vmatmul.mubr.bf16.gmra.mrb[160].mxu1 %v6189_v33  ;;  %v10604_v25 = vsel %vm1336_vm1, %v6012_v60, %v6014_v24  ;;  %v5712_v36 = vadd.f32 %v5312_v34, %v10340_v11  ;;  %v5314_v52 = vpop.f32.mrb[57].mxu0  ;;  %v10612_v63 = vadd.f32 %v10550_v22, %v5903_v41  ;;  %v6165_v34 = vld [vmem:[#allocation3 + $0x190] sm:$0xff] }
 0x464   : > { %6582 = vmatprep.mubr.bf16.mxu1 %v11148_v18  ;;  %v10608_v13 = vsel %vm1336_vm1, %v6011_v30, %v6012_v60  ;;  %v5316_v54 = vpop.f32.mrb[58].mxu0  ;;  %v5804_v8 = vrot.slane %v5314_v52, 1  ;;  %v8542_v60 = vld [vmem:[#allocation3 + $0x188] sm:$0xff]  ;;  %v6166_v52 = vld [vmem:[#allocation3 + $0x198] sm:$0xff] }
 0x465   : > { %v5713_v28 = vadd.f32 %v5316_v54, %v10342_v58  ;;  %v5318_v38 = vpop.f32.mrb[59].mxu0  ;;  %v6190_v24 = vpack.c.bf16 %v8542_v60, %v6163_v23 }
 0x466   : > { %v8181_v46 = vpop.f32.mrb[56].mxu1  ;;  %v5805_v56 = vrot.slane %v5318_v38, 1 }
 0x467   : > { %v5609_v10 = vpop.f32.mrb[57].mxu1  ;;  %8256 = vmatmul.mubr.bf16.gmra.mrb[164].mxu0 %v6188_v17  ;;  %v6019_v43 = vrot.slane %v8181_v46, 2 }
 0x468   : > { %v8182_v6 = vpop.f32.mrb[58].mxu1  ;;  %v5806_v11 = vsel %vm1143_vm0, %v5804_v8, %v5805_v56  ;;  %v6016_v4 = vrot.slane %v5609_v10, 2  ;;  %8259 = vmatprep.mubr.bf16.mxu0 %v6189_v33 }
 0x469   : > { %v5612_v48 = vpop.f32.mrb[59].mxu1  ;;  %v5904_v35 = vadd.f32 %v5806_v11, %v5712_v36  ;;  %v6021_v23 = vrot.slane %v8182_v6, 2 }
 0x46a   : > { %v6017_v22 = vrot.slane %v5612_v48, 2  ;;  %v5322_v30 = vpop.f32.mrb[60].mxu0 }
 0x46b   : > { %6583 = vmatmul.mubr.bf16.gmra.mrb[164].mxu1 %v6190_v24  ;;  %v5323_v17 = vpop.f32.mrb[61].mxu0  ;;  %v10624_v54 = vadd.f32 %v10568_v21, %v5904_v35  ;;  %v6168_v35 = vld [vmem:[#allocation3 + $0x1a8] sm:$0xff] }
 0x46c   : > { %6592 = vmatprep.mubr.bf16.mxu1 %v11148_v18  ;;  %v10618_v58 = vsel %vm1336_vm1, %v6016_v4, %v6017_v22  ;;  %v10621_v41 = vsel %vm1336_vm1, %v6017_v22, %v6019_v43  ;;  %v5807_v46 = vrot.slane %v5323_v17, 1  ;;  %v5325_v38 = vpop.f32.mrb[62].mxu0  ;;  %v6191_v43 = vpack.c.bf16 %v6166_v52, %v6165_v34  ;;  %v8543_v52 = vld [vmem:[#allocation2 + $0x8] sm:$0xff] }
 0x46d   : > { %v5714_v36 = vadd.f32 %v5325_v38, %v10356_v40  ;;  %v5327_v10 = vpop.f32.mrb[63].mxu0 }
 0x46e   : > { %v8185_v33 = vpop.f32.mrb[60].mxu1  ;;  %v5808_v48 = vsel %vm1143_vm0, %v5805_v56, %v5807_v46  ;;  %v6192_v46 = vpack.c.bf16 %v6168_v35, %v8543_v52  ;;  %v5809_v38 = vrot.slane %v5327_v10, 1 }
 0x46f   : > { %v5625_v8 = vpop.f32.mrb[61].mxu1  ;;  %v6026_v4 = vrot.slane %v8185_v33, 2  ;;  %8260 = vmatmul.mubr.bf16.gmra.mrb[168].mxu0 %v6190_v24  ;;  %v5905_v55 = vadd.f32 %v5808_v48, %v5713_v28 }
 0x470   : > { %v6022_v60 = vrot.slane %v5625_v8, 2  ;;  %v8186_v11 = vpop.f32.mrb[62].mxu1  ;;  %8263 = vmatprep.mubr.bf16.mxu0 %v6191_v43 }
 0x471   : > { %v6027_v22 = vrot.slane %v8186_v11, 2  ;;  %v5628_v30 = vpop.f32.mrb[63].mxu1  ;;  %v10632_v40 = vadd.f32 %v10571_v5, %v5905_v55 }
 0x472   : > { %v6024_v21 = vrot.slane %v5628_v30, 2  ;;  %v10629_v17 = vsel %vm1336_vm1, %v6021_v23, %v6022_v60  ;;  %v5331_v6 = vpop.f32.mrb[64].mxu0 }
 0x473   : > { %6593 = vmatmul.mubr.bf16.gmra.mrb[168].mxu1 %v6191_v43  ;;  %v10635_v56 = vsel %vm1336_vm1, %v6026_v4, %v6027_v22  ;;  %v5715_v28 = vadd.f32 %v5331_v6, %v10362_v7  ;;  %v5333_v24 = vpop.f32.mrb[65].mxu0 }
 0x474   : > { %6601 = vmatprep.mubr.bf16.mxu1 %v11148_v18  ;;  %v10639_v34 = vsel %vm1336_vm1, %v6022_v60, %v6024_v21  ;;  %v5810_v33 = vrot.slane %v5333_v24, 1  ;;  %v5335_v8 = vpop.f32.mrb[66].mxu0 }
 0x475   : > { %v5336_v55 = vpop.f32.mrb[67].mxu0 }
 0x476   : > { %v8189_v23 = vpop.f32.mrb[64].mxu1  ;;  %v5811_v48 = vsel %vm1143_vm0, %v5809_v38, %v5810_v33  ;;  %v5812_v11 = vrot.slane %v5336_v55, 1 }
 0x477   : > { %v5641_v5 = vpop.f32.mrb[65].mxu1  ;;  %v6032_v18 = vrot.slane %v8189_v23, 2  ;;  %8264 = vmatmul.mubr.bf16.gmra.mrb[172].mxu0 %v6192_v46  ;;  %v5906_v21 = vadd.f32 %v5811_v48, %v5714_v36 }
 0x478   : > { %v6029_v43 = vrot.slane %v5641_v5, 2  ;;  %v8190_v4 = vpop.f32.mrb[66].mxu1  ;;  %v5813_v7 = vsel %vm1143_vm0, %v5810_v33, %v5812_v11 }
 0x479   : > { %v6034_v30 = vrot.slane %v8190_v4, 2  ;;  %v5644_v60 = vpop.f32.mrb[67].mxu1  ;;  %v10648_v35 = vadd.f32 %v10581_v9, %v5906_v21  ;;  %v5907_v24 = vadd.f32 %v5813_v7, %v5715_v28 }
 0x47a   : > { %v6031_v6 = vrot.slane %v5644_v60, 2  ;;  %v10645_v10 = vsel %vm1336_vm1, %v6027_v22, %v6029_v43  ;;  %v5340_v38 = vpop.f32.mrb[68].mxu0 }
 0x47b   : > { %6602 = vmatmul.mubr.bf16.gmra.mrb[172].mxu1 %v6192_v46  ;;  %v10651_v52 = vsel %vm1336_vm1, %v6032_v18, %v6034_v30  ;;  %v5716_v36 = vadd.f32 %v5340_v38, %v10364_v49  ;;  %v5342_v23 = vpop.f32.mrb[69].mxu0  ;;  %v10658_v33 = vadd.f32 %v10590_v51, %v5907_v24 }
 0x47c   : > { %v10654_v8 = vsel %vm1336_vm1, %v6031_v6, %v6032_v18  ;;  %v5344_v22 = vpop.f32.mrb[70].mxu0  ;;  %v5814_v28 = vrot.slane %v5342_v23, 1 }
 0x47d   : > { %v5717_v46 = vadd.f32 %v5344_v22, %v10373_v61  ;;  %v5346_v9 = vpop.f32.mrb[71].mxu0 }
 0x47e   : > { %v8193_v55 = vpop.f32.mrb[68].mxu1  ;;  %v5815_v48 = vrot.slane %v5346_v9, 1 }
 0x47f   : > { %v5657_v5 = vpop.f32.mrb[69].mxu1  ;;  %v6039_v4 = vrot.slane %v8193_v55, 2 }
 0x480   : > { %v8194_v11 = vpop.f32.mrb[70].mxu1  ;;  %v5816_v18 = vsel %vm1143_vm0, %v5814_v28, %v5815_v48  ;;  %v6036_v30 = vrot.slane %v5657_v5, 2 }
 0x481   : > { %v5660_v43 = vpop.f32.mrb[71].mxu1  ;;  %v5908_v49 = vadd.f32 %v5816_v18, %v5716_v36  ;;  %v6041_v5 = vrot.slane %v8194_v11, 2 }
 0x482   : > { %v6037_v60 = vrot.slane %v5660_v43, 2  ;;  %v5350_v21 = vpop.f32.mrb[72].mxu0 }
 0x483   : > { %v5351_v61 = vpop.f32.mrb[73].mxu0  ;;  %v10669_v6 = vadd.f32 %v10586_v57, %v5908_v49 }
 0x484   : > { %v10663_v51 = vsel %vm1336_vm1, %v6036_v30, %v6037_v60  ;;  %v10666_v7 = vsel %vm1336_vm1, %v6037_v60, %v6039_v4  ;;  %v5817_v24 = vrot.slane %v5351_v61, 1  ;;  %v5353_v38 = vpop.f32.mrb[74].mxu0 }
 0x485   : > { %v5718_v22 = vadd.f32 %v5353_v38, %v10382_v44  ;;  %v5355_v55 = vpop.f32.mrb[75].mxu0 }
 0x486   : > { %v8197_v23 = vpop.f32.mrb[72].mxu1  ;;  %v5818_v36 = vsel %vm1143_vm0, %v5815_v48, %v5817_v24  ;;  %v5819_v38 = vrot.slane %v5355_v55, 1 }
 0x487   : > { %v5673_v9 = vpop.f32.mrb[73].mxu1  ;;  %v6046_v18 = vrot.slane %v8197_v23, 2  ;;  %v5909_v60 = vadd.f32 %v5818_v36, %v5717_v46 }
 0x488   : > { %v6042_v28 = vrot.slane %v5673_v9, 2  ;;  %v8198_v43 = vpop.f32.mrb[74].mxu1 }
 0x489   : > { %v6047_v30 = vrot.slane %v8198_v43, 2  ;;  %v5676_v4 = vpop.f32.mrb[75].mxu1  ;;  %v10677_v49 = vadd.f32 %v10598_v37, %v5909_v60 }
 0x48a   : > { %v6044_v21 = vrot.slane %v5676_v4, 2  ;;  %v10674_v57 = vsel %vm1336_vm1, %v6041_v5, %v6042_v28  ;;  %v5359_v61 = vpop.f32.mrb[76].mxu0 }
 0x48b   : > { %11184 = vst [vmem:[#allocation14_spill] sm:$0xff] %v10677_v49  ;;  %v10680_v44 = vsel %vm1336_vm1, %v6046_v18, %v6047_v30  ;;  %v5719_v48 = vadd.f32 %v5359_v61, %v10384_v62  ;;  %v5361_v24 = vpop.f32.mrb[77].mxu0 }
 0x48c   : > { %11185 = vst [vmem:[#allocation15_spill] sm:$0xff] %v10680_v44  ;;  %v10683_v11 = vsel %vm1336_vm1, %v6042_v28, %v6044_v21  ;;  %v5820_v23 = vrot.slane %v5361_v24, 1  ;;  %v5363_v46 = vpop.f32.mrb[78].mxu0 }
 0x48d   : > { %v5364_v36 = vpop.f32.mrb[79].mxu0 }
 0x48e   : > { %v8201_v9 = vpop.f32.mrb[76].mxu1  ;;  %v5821_v43 = vsel %vm1143_vm0, %v5819_v38, %v5820_v23  ;;  %v5822_v37 = vrot.slane %v5364_v36, 1 }
 0x48f   : > { %v5689_v5 = vpop.f32.mrb[77].mxu1  ;;  %v6052_v18 = vrot.slane %v8201_v9, 2  ;;  %v5910_v49 = vadd.f32 %v5821_v43, %v5718_v22 }
 0x490   : > { %v6049_v4 = vrot.slane %v5689_v5, 2  ;;  %v8202_v60 = vpop.f32.mrb[78].mxu1  ;;  %v5823_v28 = vsel %vm1143_vm0, %v5820_v23, %v5822_v37 }
 0x491   : > { %v6054_v39 = vrot.slane %v8202_v60, 2  ;;  %v5692_v44 = vpop.f32.mrb[79].mxu1  ;;  %v10692_v55 = vadd.f32 %v10608_v13, %v5910_v49  ;;  %v5911_v61 = vadd.f32 %v5823_v28, %v5719_v48 }
 0x492   : > { %v6051_v21 = vrot.slane %v5692_v44, 2  ;;  %v10689_v62 = vsel %vm1336_vm1, %v6047_v30, %v6049_v4  ;;  %v5368_v38 = vpop.f32.mrb[80].mxu0 }
 0x493   : > { %v10695_v24 = vsel %vm1336_vm1, %v6052_v18, %v6054_v39  ;;  %v5720_v9 = vadd.f32 %v5368_v38, %v10398_v12  ;;  %v5370_v22 = vpop.f32.mrb[81].mxu0  ;;  %v10702_v23 = vadd.f32 %v10604_v25, %v5911_v61 }
 0x494   : > { %v10698_v46 = vsel %vm1336_vm1, %v6051_v21, %v6052_v18  ;;  %v5372_v44 = vpop.f32.mrb[82].mxu0  ;;  %v5824_v39 = vrot.slane %v5370_v22, 1 }
 0x495   : > { %v5721_v36 = vadd.f32 %v5372_v44, %v10400_v59  ;;  %v5374_v49 = vpop.f32.mrb[83].mxu0 }
 0x496   : > { %v6388_v30 = vpop.f32.mrb[80].mxu1  ;;  %v5825_v5 = vrot.slane %v5374_v49, 1 }
 0x497   : > { %v6836_v13 = vadd.f32 %v6388_v30, %v10521_v26  ;;  %v6390_v48 = vpop.f32.mrb[81].mxu1 }
 0x498   : > { %v6392_v43 = vpop.f32.mrb[82].mxu1  ;;  %v5826_v12 = vsel %vm1143_vm0, %v5824_v39, %v5825_v5  ;;  %v6916_v60 = vrot.slane %v6390_v48, 1 }
 0x499   : > { %v6837_v37 = vadd.f32 %v6392_v43, %v10531_v20  ;;  %v6394_v4 = vpop.f32.mrb[83].mxu1  ;;  %v5912_v25 = vadd.f32 %v5826_v12, %v5720_v9 }
 0x49a   : > { %v6917_v18 = vrot.slane %v6394_v4, 1  ;;  %v5378_v21 = vpop.f32.mrb[84].mxu0 }
 0x49b   : > { %v5379_v59 = vpop.f32.mrb[85].mxu0  ;;  %v10712_v26 = vadd.f32 %v10618_v58, %v5912_v25 }
 0x49c   : > { %v6918_v28 = vsel %vm1143_vm0, %v6916_v60, %v6917_v18  ;;  %v5827_v38 = vrot.slane %v5379_v59, 1  ;;  %v5381_v22 = vpop.f32.mrb[86].mxu0 }
 0x49d   : > { %v10709_v61 = vadd.f32 %v6918_v28, %v6836_v13  ;;  %v5722_v20 = vadd.f32 %v5381_v22, %v10412_v15  ;;  %v5383_v30 = vpop.f32.mrb[87].mxu0 }
 0x49e   : > { %v6398_v44 = vpop.f32.mrb[84].mxu1  ;;  %v5828_v48 = vsel %vm1143_vm0, %v5825_v5, %v5827_v38  ;;  %v5829_v21 = vrot.slane %v5383_v30, 1 }
 0x49f   : > { %v6399_v49 = vpop.f32.mrb[85].mxu1  ;;  %v5913_v13 = vadd.f32 %v5828_v48, %v5721_v36 }
 0x4a0   : > { %v6919_v39 = vrot.slane %v6399_v49, 1  ;;  %v6401_v9 = vpop.f32.mrb[86].mxu1 }
 0x4a1   : > { %v6838_v43 = vadd.f32 %v6401_v9, %v10547_v47  ;;  %v6403_v4 = vpop.f32.mrb[87].mxu1  ;;  %v10721_v58 = vadd.f32 %v10621_v41, %v5913_v13 }
 0x4a2   : > { %v6920_v12 = vsel %vm1143_vm0, %v6917_v18, %v6919_v39  ;;  %v5387_v25 = vpop.f32.mrb[88].mxu0  ;;  %v6921_v36 = vrot.slane %v6403_v4, 1 }
 0x4a3   : > { %v10718_v60 = vadd.f32 %v6920_v12, %v6837_v37  ;;  %v5723_v15 = vadd.f32 %v5387_v25, %v10418_v29  ;;  %v5389_v28 = vpop.f32.mrb[89].mxu0 }
 0x4a4   : > { %v5830_v59 = vrot.slane %v5389_v28, 1  ;;  %v5391_v5 = vpop.f32.mrb[90].mxu0 }
 0x4a5   : > { %v5392_v47 = vpop.f32.mrb[91].mxu0 }
 0x4a6   : > { %v6407_v38 = vpop.f32.mrb[88].mxu1  ;;  %v5831_v18 = vsel %vm1143_vm0, %v5829_v21, %v5830_v59  ;;  %v5832_v37 = vrot.slane %v5392_v47, 1 }
 0x4a7   : > { %v6839_v22 = vadd.f32 %v6407_v38, %v10557_v14  ;;  %v6409_v44 = vpop.f32.mrb[89].mxu1  ;;  %v5914_v39 = vadd.f32 %v5831_v18, %v5722_v20 }
 0x4a8   : > { %v6922_v49 = vrot.slane %v6409_v44, 1  ;;  %v6411_v48 = vpop.f32.mrb[90].mxu1  ;;  %v5833_v9 = vsel %vm1143_vm0, %v5830_v59, %v5832_v37 }
 0x4a9   : > { %v6412_v41 = vpop.f32.mrb[91].mxu1  ;;  %v10731_v12 = vadd.f32 %v10629_v17, %v5914_v39  ;;  %v5915_v14 = vadd.f32 %v5833_v9, %v5723_v15 }
 0x4aa   : > { %v6923_v29 = vsel %vm1143_vm0, %v6921_v36, %v6922_v49  ;;  %v6924_v30 = vrot.slane %v6412_v41, 1  ;;  %v5396_v25 = vpop.f32.mrb[92].mxu0 }
 0x4ab   : > { %v10728_v13 = vadd.f32 %v6923_v29, %v6838_v43  ;;  %v5724_v21 = vadd.f32 %v5396_v25, %v10420_v32  ;;  %v5398_v5 = vpop.f32.mrb[93].mxu0  ;;  %v10738_v20 = vadd.f32 %v10639_v34, %v5915_v14 }
 0x4ac   : > { %v6925_v4 = vsel %vm1143_vm0, %v6922_v49, %v6924_v30  ;;  %v5400_v59 = vpop.f32.mrb[94].mxu0  ;;  %v5834_v15 = vrot.slane %v5398_v5, 1 }
 0x4ad   : > { %v10734_v28 = vadd.f32 %v6925_v4, %v6839_v22  ;;  %v5725_v43 = vadd.f32 %v5400_v59, %v10429_v42  ;;  %v5402_v17 = vpop.f32.mrb[95].mxu0 }
 0x4ae   : > { %v6416_v38 = vpop.f32.mrb[92].mxu1  ;;  %v5835_v36 = vrot.slane %v5402_v17, 1 }
 0x4af   : > { %v6840_v47 = vadd.f32 %v6416_v38, %v10574_v16  ;;  %v6418_v44 = vpop.f32.mrb[93].mxu1 }
 0x4b0   : > { %v6420_v18 = vpop.f32.mrb[94].mxu1  ;;  %v5836_v32 = vsel %vm1143_vm0, %v5834_v15, %v5835_v36  ;;  %v6926_v49 = vrot.slane %v6418_v44, 1 }
 0x4b1   : > { %v6841_v22 = vadd.f32 %v6420_v18, %v10583_v45  ;;  %v6422_v37 = vpop.f32.mrb[95].mxu1  ;;  %v5916_v34 = vadd.f32 %v5836_v32, %v5724_v21 }
 0x4b2   : > { %v6927_v48 = vrot.slane %v6422_v37, 1  ;;  %v5406_v39 = vpop.f32.mrb[96].mxu0 }
 0x4b3   : > { %v5407_v42 = vpop.f32.mrb[97].mxu0  ;;  %v10748_v16 = vadd.f32 %v10635_v56, %v5916_v34 }
 0x4b4   : > { %v6928_v41 = vsel %vm1143_vm0, %v6926_v49, %v6927_v48  ;;  %v5837_v29 = vrot.slane %v5407_v42, 1  ;;  %v5409_v30 = vpop.f32.mrb[98].mxu0 }
 0x4b5   : > { %v10745_v9 = vadd.f32 %v6928_v41, %v6840_v47  ;;  %v5726_v45 = vadd.f32 %v5409_v30, %v10438_v27  ;;  %v5411_v4 = vpop.f32.mrb[99].mxu0 }
 0x4b6   : > { %v6426_v14 = vpop.f32.mrb[96].mxu1  ;;  %v5838_v5 = vsel %vm1143_vm0, %v5835_v36, %v5837_v29  ;;  %v5839_v32 = vrot.slane %v5411_v4, 1 }
 0x4b7   : > { %v6427_v25 = vpop.f32.mrb[97].mxu1  ;;  %v5917_v47 = vadd.f32 %v5838_v5, %v5725_v43 }
 0x4b8   : > { %v6929_v59 = vrot.slane %v6427_v25, 1  ;;  %v6429_v21 = vpop.f32.mrb[98].mxu1 }
 0x4b9   : > { %v6842_v38 = vadd.f32 %v6429_v21, %v10601_v3  ;;  %v6431_v17 = vpop.f32.mrb[99].mxu1  ;;  %v10757_v56 = vadd.f32 %v10645_v10, %v5917_v47 }
 0x4ba   : > { %v6930_v44 = vsel %vm1143_vm0, %v6927_v48, %v6929_v59  ;;  %v5415_v18 = vpop.f32.mrb[100].mxu0  ;;  %v6931_v43 = vrot.slane %v6431_v17, 1 }
 0x4bb   : > { %v10754_v15 = vadd.f32 %v6930_v44, %v6841_v22  ;;  %v5727_v27 = vadd.f32 %v5415_v18, %v10440_v2  ;;  %v5417_v37 = vpop.f32.mrb[101].mxu0 }
 0x4bc   : > { %v5840_v49 = vrot.slane %v5417_v37, 1  ;;  %v5419_v36 = vpop.f32.mrb[102].mxu0 }
 0x4bd   : > { %v5420_v3 = vpop.f32.mrb[103].mxu0 }
 0x4be   : > { %v6435_v34 = vpop.f32.mrb[100].mxu1  ;;  %v5841_v48 = vsel %vm1143_vm0, %v5839_v32, %v5840_v49  ;;  %v5842_v22 = vrot.slane %v5420_v3, 1 }
 0x4bf   : > { %v6843_v41 = vadd.f32 %v6435_v34, %v10612_v63  ;;  %v6437_v39 = vpop.f32.mrb[101].mxu1  ;;  %v5918_v30 = vadd.f32 %v5841_v48, %v5726_v45 }
 0x4c0   : > { %v6932_v42 = vrot.slane %v6437_v39, 1  ;;  %v6439_v29 = vpop.f32.mrb[102].mxu1  ;;  %v5843_v14 = vsel %vm1143_vm0, %v5840_v49, %v5842_v22 }
 0x4c1   : > { %v6440_v10 = vpop.f32.mrb[103].mxu1  ;;  %v10767_v5 = vadd.f32 %v10654_v8, %v5918_v30  ;;  %v5919_v63 = vadd.f32 %v5843_v14, %v5727_v27 }
 0x4c2   : > { %v6933_v2 = vsel %vm1143_vm0, %v6931_v43, %v6932_v42  ;;  %v6934_v4 = vrot.slane %v6440_v10, 1  ;;  %v5424_v21 = vpop.f32.mrb[104].mxu0 }
 0x4c3   : > { %v10764_v25 = vadd.f32 %v6933_v2, %v6842_v38  ;;  %v5728_v47 = vadd.f32 %v5424_v21, %v10458_v0  ;;  %v5426_v44 = vpop.f32.mrb[105].mxu0  ;;  %v10774_v45 = vadd.f32 %v10651_v52, %v5919_v63 }
 0x4c4   : > { %v6935_v59 = vsel %vm1143_vm0, %v6932_v42, %v6934_v4  ;;  %v5428_v18 = vpop.f32.mrb[106].mxu0  ;;  %v5844_v27 = vrot.slane %v5426_v44, 1 }
 0x4c5   : > { %v10770_v17 = vadd.f32 %v6935_v59, %v6843_v41  ;;  %v5729_v38 = vadd.f32 %v5428_v18, %v10460_v19  ;;  %v5430_v8 = vpop.f32.mrb[107].mxu0 }
 0x4c6   : > { %v6444_v37 = vpop.f32.mrb[104].mxu1  ;;  %v5845_v36 = vrot.slane %v5430_v8, 1 }
 0x4c7   : > { %v6844_v32 = vadd.f32 %v6444_v37, %v10624_v54  ;;  %v6446_v49 = vpop.f32.mrb[105].mxu1 }
 0x4c8   : > { %v6448_v34 = vpop.f32.mrb[106].mxu1  ;;  %v5846_v0 = vsel %vm1143_vm0, %v5844_v27, %v5845_v36  ;;  %v6936_v39 = vrot.slane %v6446_v49, 1 }
 0x4c9   : > { %v6845_v41 = vadd.f32 %v6448_v34, %v10632_v40  ;;  %v6450_v3 = vpop.f32.mrb[107].mxu1  ;;  %v5920_v52 = vadd.f32 %v5846_v0, %v5728_v47 }
 0x4ca   : > { %v6937_v43 = vrot.slane %v6450_v3, 1  ;;  %v5434_v22 = vpop.f32.mrb[108].mxu0 }
 0x4cb   : > { %v5435_v19 = vpop.f32.mrb[109].mxu0  ;;  %v10784_v54 = vadd.f32 %v10663_v51, %v5920_v52 }
 0x4cc   : > { %v6938_v48 = vsel %vm1143_vm0, %v6936_v39, %v6937_v43  ;;  %v5847_v29 = vrot.slane %v5435_v19, 1  ;;  %v5437_v10 = vpop.f32.mrb[110].mxu0 }
 0x4cd   : > { %v10781_v42 = vadd.f32 %v6938_v48, %v6844_v32  ;;  %v5730_v40 = vadd.f32 %v5437_v10, %v10476_v53  ;;  %v5439_v14 = vpop.f32.mrb[111].mxu0 }
 0x4ce   : > { %v6454_v30 = vpop.f32.mrb[108].mxu1  ;;  %v5848_v4 = vsel %vm1143_vm0, %v5845_v36, %v5847_v29  ;;  %v5849_v49 = vrot.slane %v5439_v14, 1 }
 0x4cf   : > { %v6455_v2 = vpop.f32.mrb[109].mxu1  ;;  %v5921_v44 = vadd.f32 %v5848_v4, %v5729_v38 }
 0x4d0   : > { %v6939_v63 = vrot.slane %v6455_v2, 1  ;;  %v6457_v59 = vpop.f32.mrb[110].mxu1 }
 0x4d1   : > { %v6846_v21 = vadd.f32 %v6457_v59, %v10648_v35  ;;  %v6459_v47 = vpop.f32.mrb[111].mxu1  ;;  %v10793_v51 = vadd.f32 %v10666_v7, %v5921_v44 }
 0x4d2   : > { %v6940_v18 = vsel %vm1143_vm0, %v6937_v43, %v6939_v63  ;;  %v5443_v32 = vpop.f32.mrb[112].mxu0  ;;  %v6941_v38 = vrot.slane %v6459_v47, 1 }
 0x4d3   : > { %v10790_v37 = vadd.f32 %v6940_v18, %v6845_v41  ;;  %v5731_v53 = vadd.f32 %v5443_v32, %v10482_v31  ;;  %v5445_v8 = vpop.f32.mrb[113].mxu0 }
 0x4d4   : > { %v5850_v27 = vrot.slane %v5445_v8, 1  ;;  %v5447_v36 = vpop.f32.mrb[114].mxu0 }
 0x4d5   : > { %v5448_v35 = vpop.f32.mrb[115].mxu0 }
 0x4d6   : > { %v6463_v34 = vpop.f32.mrb[112].mxu1  ;;  %v5851_v39 = vsel %vm1143_vm0, %v5849_v49, %v5850_v27  ;;  %v5852_v41 = vrot.slane %v5448_v35, 1  ;;  %v11186_v49 = vld [vmem:[#allocation14_spill] sm:$0xff] }
 0x4d7   : > { %v6847_v3 = vadd.f32 %v6463_v34, %v10658_v33  ;;  %v6465_v0 = vpop.f32.mrb[113].mxu1  ;;  %v5922_v48 = vadd.f32 %v5851_v39, %v5730_v40 }
 0x4d8   : > { %v6942_v43 = vrot.slane %v6465_v0, 1  ;;  %v6467_v52 = vpop.f32.mrb[114].mxu1  ;;  %v5853_v22 = vsel %vm1143_vm0, %v5850_v27, %v5852_v41 }
 0x4d9   : > { %v6468_v7 = vpop.f32.mrb[115].mxu1  ;;  %v10803_v10 = vadd.f32 %v10674_v57, %v5922_v48  ;;  %v5923_v33 = vadd.f32 %v5853_v22, %v5731_v53 }
 0x4da   : > { %v6943_v31 = vsel %vm1143_vm0, %v6941_v38, %v6942_v43  ;;  %v6944_v19 = vrot.slane %v6468_v7, 1  ;;  %v5452_v14 = vpop.f32.mrb[116].mxu0  ;;  %v11188_v7 = vld [vmem:[#allocation20_spill] sm:$0xff] }
 0x4db   : > { %v10800_v29 = vadd.f32 %v6943_v31, %v6846_v21  ;;  %v5732_v4 = vadd.f32 %v5452_v14, %v10484_v50  ;;  %v5454_v63 = vpop.f32.mrb[117].mxu0  ;;  %v10810_v40 = vadd.f32 %v10683_v11, %v5923_v33 }
 0x4dc   : > { %v6945_v30 = vsel %vm1143_vm0, %v6942_v43, %v6944_v19  ;;  %v5456_v59 = vpop.f32.mrb[118].mxu0  ;;  %v5854_v32 = vrot.slane %v5454_v63, 1 }
 0x4dd   : > { %v10806_v2 = vadd.f32 %v6945_v30, %v6847_v3  ;;  %v5733_v21 = vadd.f32 %v5456_v59, %v10497_v1  ;;  %v5458_v57 = vpop.f32.mrb[119].mxu0 }
 0x4de   : > { %v6472_v47 = vpop.f32.mrb[116].mxu1  ;;  %v5855_v53 = vrot.slane %v5458_v57, 1 }
 0x4df   : > { %v6848_v44 = vadd.f32 %v6472_v47, %v10669_v6  ;;  %v6474_v18 = vpop.f32.mrb[117].mxu1  ;;  %v11187_v6 = vld [vmem:[#allocation15_spill] sm:$0xff] }
 0x4e0   : > { %v6476_v8 = vpop.f32.mrb[118].mxu1  ;;  %v5856_v50 = vsel %vm1143_vm0, %v5854_v32, %v5855_v53  ;;  %v6946_v34 = vrot.slane %v6474_v18, 1  ;;  %v11189_v18 = vld [vmem:[#allocation23_spill] sm:$0xff] }
 0x4e1   : > { %v6849_v27 = vadd.f32 %v6476_v8, %v11186_v49  ;;  %v6478_v36 = vpop.f32.mrb[119].mxu1  ;;  %v5924_v11 = vadd.f32 %v5856_v50, %v5732_v4 }
 0x4e2   : > { %v6947_v3 = vrot.slane %v6478_v36, 1  ;;  %v5462_v0 = vpop.f32.mrb[120].mxu0 }
 0x4e3   : > { %v5463_v1 = vpop.f32.mrb[121].mxu0  ;;  %v10820_v39 = vadd.f32 %v11187_v6, %v5924_v11 }
 0x4e4   : > { %v6948_v35 = vsel %vm1143_vm0, %v6946_v34, %v6947_v3  ;;  %v5857_v41 = vrot.slane %v5463_v1, 1  ;;  %v5465_v43 = vpop.f32.mrb[122].mxu0 }
 0x4e5   : > { %v10817_v38 = vadd.f32 %v6948_v35, %v6848_v44  ;;  %v5734_v48 = vadd.f32 %v5465_v43, %v11188_v7  ;;  %v5467_v22 = vpop.f32.mrb[123].mxu0 }
 0x4e6   : > { %v6482_v52 = vpop.f32.mrb[120].mxu1  ;;  %v5858_v19 = vsel %vm1143_vm0, %v5855_v53, %v5857_v41  ;;  %v5859_v49 = vrot.slane %v5467_v22, 1 }
 0x4e7   : > { %v6483_v31 = vpop.f32.mrb[121].mxu1  ;;  %v5925_v63 = vadd.f32 %v5858_v19, %v5733_v21 }
 0x4e8   : > { %v6949_v33 = vrot.slane %v6483_v31, 1  ;;  %v6485_v30 = vpop.f32.mrb[122].mxu1 }
 0x4e9   : > { %v6850_v14 = vadd.f32 %v6485_v30, %v10692_v55  ;;  %v6487_v4 = vpop.f32.mrb[123].mxu1  ;;  %v10829_v44 = vadd.f32 %v10689_v62, %v5925_v63 }
 0x4ea   : > { %v6950_v59 = vsel %vm1143_vm0, %v6947_v3, %v6949_v33  ;;  %v5471_v57 = vpop.f32.mrb[124].mxu0  ;;  %v6951_v21 = vrot.slane %v6487_v4, 1 }
 0x4eb   : > { %v10826_v47 = vadd.f32 %v6950_v59, %v6849_v27  ;;  %v5735_v32 = vadd.f32 %v5471_v57, %v11189_v18  ;;  %v5473_v8 = vpop.f32.mrb[125].mxu0 }
 0x4ec   : > { %v5860_v36 = vrot.slane %v5473_v8, 1  ;;  %v5475_v53 = vpop.f32.mrb[126].mxu0 }
 0x4ed   : > { %v5476_v55 = vpop.f32.mrb[127].mxu0 }
 0x4ee   : > { %v6491_v50 = vpop.f32.mrb[124].mxu1  ;;  %v5861_v3 = vsel %vm1143_vm0, %v5859_v49, %v5860_v36  ;;  %v5862_v27 = vrot.slane %v5476_v55, 1 }
 0x4ef   : > { %v6851_v34 = vadd.f32 %v6491_v50, %v10702_v23  ;;  %v6493_v11 = vpop.f32.mrb[125].mxu1  ;;  %v5926_v1 = vadd.f32 %v5861_v3, %v5734_v48 }
 0x4f0   : > { %v6952_v35 = vrot.slane %v6493_v11, 1  ;;  %v6495_v0 = vpop.f32.mrb[126].mxu1  ;;  %v5863_v6 = vsel %vm1143_vm0, %v5860_v36, %v5862_v27  ;;  %v7291_v11 = vld [vmem:[%s8922_s6] sm:$0xff] }
 0x4f1   : > { %v6496_v62 = vpop.f32.mrb[127].mxu1  ;;  %v10839_v7 = vadd.f32 %v10698_v46, %v5926_v1  ;;  %v5927_v23 = vadd.f32 %v5863_v6, %v5735_v32 }
 0x4f2   : > { %v6953_v41 = vsel %vm1143_vm0, %v6951_v21, %v6952_v35  ;;  %v6954_v43 = vrot.slane %v6496_v62, 1  ;;  %v8221_v31 = vpop.f32.mrb[128].mxu0  ;;  %v7292_v21 = vld [vmem:[%s8922_s6 + $0x8] sm:$0xff] }
 0x4f3   : > { %v10836_v52 = vadd.f32 %v6953_v41, %v6850_v14  ;;  %v6645_v33 = vpop.f32.mrb[129].mxu0  ;;  %v10845_v30 = vadd.f32 %v10695_v24, %v5927_v23  ;;  %v7111_v46 = vrot.slane %v8221_v31, 2 }
 0x4f4   : > { %v6955_v22 = vsel %vm1143_vm0, %v6952_v35, %v6954_v43  ;;  %v8222_v4 = vpop.f32.mrb[130].mxu0  ;;  %v7108_v57 = vrot.slane %v6645_v33, 2 }
 0x4f5   : > { %v10842_v19 = vadd.f32 %v6955_v22, %v6851_v34  ;;  %v6648_v59 = vpop.f32.mrb[131].mxu0  ;;  %v7113_v1 = vrot.slane %v8222_v4, 2 }
 0x4f6   : > { %v6500_v48 = vpop.f32.mrb[128].mxu1  ;;  %v7109_v18 = vrot.slane %v6648_v59, 2 }
 0x4f7   : > { %v6852_v63 = vadd.f32 %v6500_v48, %v10712_v26  ;;  %v6502_v14 = vpop.f32.mrb[129].mxu1  ;;  %v10854_v26 = vld [vmem:[%s11120_s4] ss:$0 sm:$0xff] }
 0x4f8   : > { %v6504_v32 = vpop.f32.mrb[130].mxu1  ;;  %v6956_v36 = vrot.slane %v6502_v14, 1  ;;  %v7110_v53 = vsel %vm1336_vm1, %v7108_v57, %v7109_v18  ;;  %v7112_v24 = vsel %vm1336_vm1, %v7109_v18, %v7111_v46 }
 0x4f9   : > { %v6853_v8 = vadd.f32 %v6504_v32, %v10721_v58  ;;  %v6506_v49 = vpop.f32.mrb[131].mxu1  ;;  %v7220_v34 = vadd.f32 %v7110_v53, %v10709_v61  ;;  %v7221_v55 = vadd.f32 %v7112_v24, %v10718_v60 }
 0x4fa   : > { %v6957_v50 = vrot.slane %v6506_v49, 1  ;;  %v8225_v3 = vpop.f32.mrb[132].mxu0  ;;  %v7293_v49 = vld [vmem:[%s8922_s6 + $0x10] sm:$0xff] }
 0x4fb   : > { %v7259_v27 = vadd.f32 %v10854_v26, %v7220_v34  ;;  %v7260_v35 = vadd.f32 %v10854_v26, %v7221_v55  ;;  %v6661_v62 = vpop.f32.mrb[133].mxu0  ;;  %v7118_v60 = vrot.slane %v8225_v3, 2  ;;  %v7295_v55 = vld [vmem:[%s8922_s6 + $0x20] sm:$0xff] }
 0x4fc   : > { %v6958_v58 = vsel %vm1143_vm0, %v6956_v36, %v6957_v50  ;;  %v7114_v6 = vrot.slane %v6661_v62, 2  ;;  %v8226_v43 = vpop.f32.mrb[134].mxu0 }
 0x4fd   : > { %v10863_v0 = vadd.f32 %v6958_v58, %v6852_v63  ;;  %v7323_v61 = vadd.f32 %v7291_v11, %v7259_v27  ;;  %v7324_v23 = vadd.f32 %v7292_v21, %v7260_v35  ;;  %v7119_v22 = vrot.slane %v8226_v43, 2  ;;  %v6664_v33 = vpop.f32.mrb[135].mxu0  ;;  %v7294_v21 = vld [vmem:[%s8922_s6 + $0x18] sm:$0xff] }
 0x4fe   : > { %v6510_v41 = vpop.f32.mrb[132].mxu1  ;;  %v7115_v48 = vsel %vm1336_vm1, %v7113_v1, %v7114_v6  ;;  %v7116_v59 = vrot.slane %v6664_v33, 2 }
 0x4ff   : > { %v6511_v31 = vpop.f32.mrb[133].mxu1  ;;  %v7355_v46 = vmax.f32 %v7323_v61, 0.0  ;;  %v7356_v57 = vmax.f32 %v7324_v23, 0.0  ;;  %v7222_v4 = vadd.f32 %v7115_v48, %v10728_v13  ;;  %v7120_v18 = vsel %vm1336_vm1, %v7118_v60, %v7119_v22 }
 0x500   : > { %v6959_v14 = vrot.slane %v6511_v31, 1  ;;  %v6513_v63 = vpop.f32.mrb[134].mxu1  ;;  %v7224_v36 = vadd.f32 %v7120_v18, %v10745_v9  ;;  %v7117_v24 = vsel %vm1336_vm1, %v7114_v6, %v7116_v59 }
 0x501   : > { %v6515_v32 = vpop.f32.mrb[135].mxu1  ;;  %v6854_v34 = vadd.f32 %v6513_v63, %v10731_v12  ;;  %7387 = vst [vmem:[%s10875_s30] sm:$0xff] %v7355_v46  ;;  %7388 = vst [vmem:[%s10875_s30 + $0x8] sm:$0xff] %v7356_v57  ;;  %v7261_v13 = vadd.f32 %v10854_v26, %v7222_v4  ;;  %v7223_v9 = vadd.f32 %v7117_v24, %v10734_v28  ;;  %v7298_v24 = vld [vmem:[%s8922_s6 + $0x38] sm:$0xff] }
 0x502   : > { %v6960_v53 = vsel %vm1143_vm0, %v6957_v50, %v6959_v14  ;;  %v7263_v50 = vadd.f32 %v10854_v26, %v7224_v36  ;;  %v8229_v58 = vpop.f32.mrb[136].mxu0  ;;  %v6961_v62 = vrot.slane %v6515_v32, 1 }
 0x503   : > { %v10881_v11 = vadd.f32 %v6960_v53, %v6853_v8  ;;  %v7325_v3 = vadd.f32 %v7293_v49, %v7261_v13  ;;  %v7262_v12 = vadd.f32 %v10854_v26, %v7223_v9  ;;  %v6677_v27 = vpop.f32.mrb[137].mxu0  ;;  %v7124_v1 = vrot.slane %v8229_v58, 2  ;;  %v7297_v9 = vld [vmem:[%s8922_s6 + $0x30] sm:$0xff] }
 0x504   : > { %v7327_v35 = vadd.f32 %v7295_v55, %v7263_v50  ;;  %v7121_v6 = vrot.slane %v6677_v27, 2  ;;  %v8230_v43 = vpop.f32.mrb[138].mxu0 }
 0x505   : > { %v7357_v61 = vmax.f32 %v7325_v3, 0.0  ;;  %v7326_v8 = vadd.f32 %v7294_v21, %v7262_v12  ;;  %v7126_v23 = vrot.slane %v8230_v43, 2  ;;  %v6680_v31 = vpop.f32.mrb[139].mxu0 }
 0x506   : > { %v6519_v41 = vpop.f32.mrb[136].mxu1  ;;  %v7359_v33 = vmax.f32 %v7327_v35, 0.0  ;;  %v7122_v48 = vsel %vm1336_vm1, %v7119_v22, %v7121_v6  ;;  %v7123_v59 = vrot.slane %v6680_v31, 2 }
 0x507   : > { %v6855_v28 = vadd.f32 %v6519_v41, %v10738_v20  ;;  %v6521_v60 = vpop.f32.mrb[137].mxu1  ;;  %7389 = vst [vmem:[%s10875_s30 + $0x10] sm:$0xff] %v7357_v61  ;;  %v7358_v46 = vmax.f32 %v7326_v8, 0.0  ;;  %v7225_v57 = vadd.f32 %v7122_v48, %v10754_v15  ;;  %v7127_v4 = vsel %vm1336_vm1, %v7124_v1, %v7126_v23  ;;  %v7296_v20 = vld [vmem:[%s8922_s6 + $0x28] sm:$0xff] }
 0x508   : > { %v6962_v14 = vrot.slane %v6521_v60, 1  ;;  %v6523_v63 = vpop.f32.mrb[138].mxu1  ;;  %7391 = vst [vmem:[%s10875_s30 + $0x20] sm:$0xff] %v7359_v33  ;;  %v7227_v32 = vadd.f32 %v7127_v4, %v10770_v17  ;;  %v7125_v22 = vsel %vm1336_vm1, %v7123_v59, %v7124_v1  ;;  %v7300_v4 = vld [vmem:[%s8922_s6 + $0x48] sm:$0xff] }
 0x509   : > { %v6524_v18 = vpop.f32.mrb[139].mxu1  ;;  %7390 = vst [vmem:[%s10875_s30 + $0x18] sm:$0xff] %v7358_v46  ;;  %v7264_v53 = vadd.f32 %v10854_v26, %v7225_v57  ;;  %v7226_v15 = vadd.f32 %v7125_v22, %v10764_v25  ;;  %v7299_v57 = vld [vmem:[%s8922_s6 + $0x40] sm:$0xff] }
 0x50a   : > { %v6963_v49 = vsel %vm1143_vm0, %v6961_v62, %v6962_v14  ;;  %v6964_v36 = vrot.slane %v6524_v18, 1  ;;  %v7266_v55 = vadd.f32 %v10854_v26, %v7227_v32  ;;  %v8233_v21 = vpop.f32.mrb[140].mxu0 }
 0x50b   : > { %v10900_v13 = vadd.f32 %v6963_v49, %v6854_v34  ;;  %v7328_v17 = vadd.f32 %v7296_v20, %v7264_v53  ;;  %v7265_v58 = vadd.f32 %v10854_v26, %v7226_v15  ;;  %v6693_v12 = vpop.f32.mrb[141].mxu0  ;;  %v7131_v61 = vrot.slane %v8233_v21, 2 }
 0x50c   : > { %v6965_v50 = vsel %vm1143_vm0, %v6962_v14, %v6964_v36  ;;  %v7330_v27 = vadd.f32 %v7298_v24, %v7266_v55  ;;  %v8234_v34 = vpop.f32.mrb[142].mxu0  ;;  %v7128_v8 = vrot.slane %v6693_v12, 2 }
 0x50d   : > { %v10907_v3 = vadd.f32 %v6965_v50, %v6855_v28  ;;  %v7360_v62 = vmax.f32 %v7328_v17, 0.0  ;;  %v7329_v1 = vadd.f32 %v7297_v9, %v7265_v58  ;;  %v6696_v41 = vpop.f32.mrb[143].mxu0  ;;  %v7133_v36 = vrot.slane %v8234_v34, 2 }
 0x50e   : > { %v6528_v35 = vpop.f32.mrb[140].mxu1  ;;  %v7362_v43 = vmax.f32 %v7330_v27, 0.0  ;;  %v7129_v23 = vrot.slane %v6696_v41, 2 }
 0x50f   : > { %v6856_v25 = vadd.f32 %v6528_v35, %v10748_v16  ;;  %v6530_v6 = vpop.f32.mrb[141].mxu1  ;;  %7392 = vst [vmem:[%s10875_s30 + $0x28] sm:$0xff] %v7360_v62  ;;  %v7361_v60 = vmax.f32 %v7329_v1, 0.0 }
 0x510   : > { %v6532_v28 = vpop.f32.mrb[142].mxu1  ;;  %7394 = vst [vmem:[%s10875_s30 + $0x38] sm:$0xff] %v7362_v43  ;;  %v6966_v48 = vrot.slane %v6530_v6, 1  ;;  %v7130_v14 = vsel %vm1336_vm1, %v7128_v8, %v7129_v23  ;;  %v7132_v16 = vsel %vm1336_vm1, %v7129_v23, %v7131_v61  ;;  %v7301_v6 = vld [vmem:[%s8922_s6 + $0x50] sm:$0xff] }
 0x511   : > { %v6857_v31 = vadd.f32 %v6532_v28, %v10757_v56  ;;  %v6534_v33 = vpop.f32.mrb[143].mxu1  ;;  %7393 = vst [vmem:[%s10875_s30 + $0x30] sm:$0xff] %v7361_v60  ;;  %v7228_v63 = vadd.f32 %v7130_v14, %v10781_v42  ;;  %v7229_v46 = vadd.f32 %v7132_v16, %v10790_v37  ;;  %v7303_v28 = vld [vmem:[%s8922_s6 + $0x60] sm:$0xff] }
 0x512   : > { %v6967_v59 = vrot.slane %v6534_v33, 1  ;;  %v8237_v20 = vpop.f32.mrb[144].mxu0 }
 0x513   : > { %v7267_v56 = vadd.f32 %v10854_v26, %v7228_v63  ;;  %v7268_v32 = vadd.f32 %v10854_v26, %v7229_v46  ;;  %v6709_v22 = vpop.f32.mrb[145].mxu0  ;;  %v7138_v37 = vrot.slane %v8237_v20, 2 }
 0x514   : > { %v6968_v18 = vsel %vm1143_vm0, %v6966_v48, %v6967_v59  ;;  %v7134_v53 = vrot.slane %v6709_v22, 2  ;;  %v8238_v15 = vpop.f32.mrb[146].mxu0  ;;  %v7302_v48 = vld [vmem:[%s8922_s6 + $0x58] sm:$0xff] }
 0x515   : > { %v10923_v49 = vadd.f32 %v6968_v18, %v6856_v25  ;;  %v7331_v42 = vadd.f32 %v7299_v57, %v7267_v56  ;;  %v7332_v55 = vadd.f32 %v7300_v4, %v7268_v32  ;;  %v7139_v9 = vrot.slane %v8238_v15, 2  ;;  %v6712_v21 = vpop.f32.mrb[147].mxu0 }
 0x516   : > { %v6538_v24 = vpop.f32.mrb[144].mxu1  ;;  %v7135_v17 = vsel %vm1336_vm1, %v7133_v36, %v7134_v53  ;;  %v7136_v12 = vrot.slane %v6712_v21, 2 }
 0x517   : > { %v6539_v50 = vpop.f32.mrb[145].mxu1  ;;  %v7363_v35 = vmax.f32 %v7331_v42, 0.0  ;;  %v7364_v34 = vmax.f32 %v7332_v55, 0.0  ;;  %v7230_v62 = vadd.f32 %v7135_v17, %v10800_v29  ;;  %v7140_v1 = vsel %vm1336_vm1, %v7138_v37, %v7139_v9 }
 0x518   : > { %v6969_v58 = vrot.slane %v6539_v50, 1  ;;  %v6541_v27 = vpop.f32.mrb[146].mxu1  ;;  %v7232_v41 = vadd.f32 %v7140_v1, %v10817_v38  ;;  %v7137_v61 = vsel %vm1336_vm1, %v7134_v53, %v7136_v12  ;;  %v7305_v1 = vld [vmem:[%s8922_s6 + $0x70] sm:$0xff] }
 0x519   : > { %v6543_v25 = vpop.f32.mrb[147].mxu1  ;;  %v6858_v8 = vadd.f32 %v6541_v27, %v10767_v5  ;;  %7395 = vst [vmem:[%s10875_s30 + $0x40] sm:$0xff] %v7363_v35  ;;  %7396 = vst [vmem:[%s10875_s30 + $0x48] sm:$0xff] %v7364_v34  ;;  %v7269_v23 = vadd.f32 %v10854_v26, %v7230_v62  ;;  %v7231_v29 = vadd.f32 %v7137_v61, %v10806_v2  ;;  %v7306_v35 = vld [vmem:[%s8922_s6 + $0x78] sm:$0xff] }
 0x51a   : > { %v6970_v43 = vsel %vm1143_vm0, %v6967_v59, %v6969_v58  ;;  %v7271_v33 = vadd.f32 %v10854_v26, %v7232_v41  ;;  %v8241_v14 = vpop.f32.mrb[148].mxu0  ;;  %v6971_v46 = vrot.slane %v6543_v25, 1 }
 0x51b   : > { %v10937_v60 = vadd.f32 %v6970_v43, %v6857_v31  ;;  %v7333_v38 = vadd.f32 %v7301_v6, %v7269_v23  ;;  %v7270_v16 = vadd.f32 %v10854_v26, %v7231_v29  ;;  %v6725_v59 = vpop.f32.mrb[149].mxu0  ;;  %v7144_v5 = vrot.slane %v8241_v14, 2 }
 0x51c   : > { %v7335_v63 = vadd.f32 %v7303_v28, %v7271_v33  ;;  %v7141_v57 = vrot.slane %v6725_v59, 2  ;;  %v8242_v18 = vpop.f32.mrb[150].mxu0 }
 0x51d   : > { %v7365_v20 = vmax.f32 %v7333_v38, 0.0  ;;  %v7334_v31 = vadd.f32 %v7302_v48, %v7270_v16  ;;  %v7146_v56 = vrot.slane %v8242_v18, 2  ;;  %v6728_v22 = vpop.f32.mrb[151].mxu0 }
 0x51e   : > { %v6547_v4 = vpop.f32.mrb[148].mxu1  ;;  %v7367_v36 = vmax.f32 %v7335_v63, 0.0  ;;  %v7142_v53 = vsel %vm1336_vm1, %v7139_v9, %v7141_v57  ;;  %v7143_v15 = vrot.slane %v6728_v22, 2  ;;  %v7308_v22 = vld [vmem:[%s8922_s6 + $0x88] sm:$0xff] }
 0x51f   : > { %v6859_v2 = vadd.f32 %v6547_v4, %v10774_v45  ;;  %v6549_v32 = vpop.f32.mrb[149].mxu1  ;;  %7397 = vst [vmem:[%s10875_s30 + $0x50] sm:$0xff] %v7365_v20  ;;  %v7366_v55 = vmax.f32 %v7334_v31, 0.0  ;;  %v7233_v37 = vadd.f32 %v7142_v53, %v10826_v47  ;;  %v7147_v50 = vsel %vm1336_vm1, %v7144_v5, %v7146_v56  ;;  %v7304_v45 = vld [vmem:[%s8922_s6 + $0x68] sm:$0xff] }
 0x520   : > { %v6972_v24 = vrot.slane %v6549_v32, 1  ;;  %v6551_v42 = vpop.f32.mrb[150].mxu1  ;;  %7399 = vst [vmem:[%s10875_s30 + $0x60] sm:$0xff] %v7367_v36  ;;  %v7235_v17 = vadd.f32 %v7147_v50, %v10842_v19  ;;  %v7145_v9 = vsel %vm1336_vm1, %v7143_v15, %v7144_v5  ;;  %v7307_v32 = vld [vmem:[%s8922_s6 + $0x80] sm:$0xff] }
 0x521   : > { %v6552_v21 = vpop.f32.mrb[151].mxu1  ;;  %7398 = vst [vmem:[%s10875_s30 + $0x58] sm:$0xff] %v7366_v55  ;;  %v7272_v27 = vadd.f32 %v10854_v26, %v7233_v37  ;;  %v7234_v47 = vadd.f32 %v7145_v9, %v10836_v52 }
 0x522   : > { %v6973_v58 = vsel %vm1143_vm0, %v6971_v46, %v6972_v24  ;;  %v6974_v12 = vrot.slane %v6552_v21, 1  ;;  %v7274_v62 = vadd.f32 %v10854_v26, %v7235_v17  ;;  %v8245_v6 = vpop.f32.mrb[152].mxu0 }
 0x523   : > { %v10956_v34 = vadd.f32 %v6973_v58, %v6858_v8  ;;  %v7336_v19 = vadd.f32 %v7304_v45, %v7272_v27  ;;  %v7273_v41 = vadd.f32 %v10854_v26, %v7234_v47  ;;  %v6741_v61 = vpop.f32.mrb[153].mxu0  ;;  %v7151_v16 = vrot.slane %v8245_v6, 2 }
 0x524   : > { %v6975_v25 = vsel %vm1143_vm0, %v6972_v24, %v6974_v12  ;;  %v7338_v23 = vadd.f32 %v7306_v35, %v7274_v62  ;;  %v8246_v8 = vpop.f32.mrb[154].mxu0  ;;  %v7148_v59 = vrot.slane %v6741_v61, 2 }
 0x525   : > { %v10963_v43 = vadd.f32 %v6975_v25, %v6859_v2  ;;  %v7368_v29 = vmax.f32 %v7336_v19, 0.0  ;;  %v7337_v33 = vadd.f32 %v7305_v1, %v7273_v41  ;;  %v6744_v14 = vpop.f32.mrb[155].mxu0  ;;  %v7153_v55 = vrot.slane %v8246_v8, 2  ;;  %v7309_v41 = vld [vmem:[%s8922_s6 + $0x90] sm:$0xff] }
 0x526   : > { %v6556_v28 = vpop.f32.mrb[152].mxu1  ;;  %v7370_v38 = vmax.f32 %v7338_v23, 0.0  ;;  %v7149_v63 = vrot.slane %v6744_v14, 2  ;;  %v7310_v14 = vld [vmem:[%s8922_s6 + $0x98] sm:$0xff] }
 0x527   : > { %v6860_v52 = vadd.f32 %v6556_v28, %v10784_v54  ;;  %v6558_v48 = vpop.f32.mrb[153].mxu1  ;;  %7400 = vst [vmem:[%s10875_s30 + $0x68] sm:$0xff] %v7368_v29  ;;  %v7369_v5 = vmax.f32 %v7337_v33, 0.0  ;;  %v7311_v33 = vld [vmem:[%s8922_s6 + $0xa0] sm:$0xff] }
 0x528   : > { %v6560_v46 = vpop.f32.mrb[154].mxu1  ;;  %7402 = vst [vmem:[%s10875_s30 + $0x78] sm:$0xff] %v7370_v38  ;;  %v6976_v18 = vrot.slane %v6558_v48, 1  ;;  %v7150_v20 = vsel %vm1336_vm1, %v7148_v59, %v7149_v63  ;;  %v7152_v54 = vsel %vm1336_vm1, %v7149_v63, %v7151_v16 }
 0x529   : > { %v6861_v57 = vadd.f32 %v6560_v46, %v10793_v51  ;;  %v6562_v4 = vpop.f32.mrb[155].mxu1  ;;  %7401 = vst [vmem:[%s10875_s30 + $0x70] sm:$0xff] %v7369_v5  ;;  %v7236_v2 = vadd.f32 %v7150_v20, %v10863_v0  ;;  %v7237_v56 = vadd.f32 %v7152_v54, %v10881_v11 }
 0x52a   : > { %v6977_v31 = vrot.slane %v6562_v4, 1  ;;  %v8249_v53 = vpop.f32.mrb[156].mxu0 }
 0x52b   : > { %v7275_v51 = vadd.f32 %v10854_v26, %v7236_v2  ;;  %v7276_v24 = vadd.f32 %v10854_v26, %v7237_v56  ;;  %v6757_v42 = vpop.f32.mrb[157].mxu0  ;;  %v7158_v11 = vrot.slane %v8249_v53, 2 }
 0x52c   : > { %v6978_v36 = vsel %vm1143_vm0, %v6976_v18, %v6977_v31  ;;  %v7154_v37 = vrot.slane %v6757_v42, 2  ;;  %v8250_v21 = vpop.f32.mrb[158].mxu0 }
 0x52d   : > { %v10979_v15 = vadd.f32 %v6978_v36, %v6860_v52  ;;  %v7339_v0 = vadd.f32 %v7307_v32, %v7275_v51  ;;  %v7340_v45 = vadd.f32 %v7308_v22, %v7276_v24  ;;  %v7159_v17 = vrot.slane %v8250_v21, 2  ;;  %v6760_v9 = vpop.f32.mrb[159].mxu0 }
 0x52e   : > { %v6566_v50 = vpop.f32.mrb[156].mxu1  ;;  %v7155_v12 = vsel %vm1336_vm1, %v7153_v55, %v7154_v37  ;;  %v7156_v35 = vrot.slane %v6760_v9, 2  ;;  %v7313_v9 = vld [vmem:[%s8922_s6 + $0xb0] sm:$0xff] }
 0x52f   : > { %v6567_v58 = vpop.f32.mrb[157].mxu1  ;;  %v7371_v62 = vmax.f32 %v7339_v0, 0.0  ;;  %v7372_v1 = vmax.f32 %v7340_v45, 0.0  ;;  %v7238_v25 = vadd.f32 %v7155_v12, %v10900_v13  ;;  %v7160_v6 = vsel %vm1336_vm1, %v7158_v11, %v7159_v17  ;;  %v7314_v11 = vld [vmem:[%s8922_s6 + $0xb8] sm:$0xff] }
 0x530   : > { %v6979_v27 = vrot.slane %v6567_v58, 1  ;;  %v6569_v47 = vpop.f32.mrb[158].mxu1  ;;  %v7240_v61 = vadd.f32 %v7160_v6, %v10923_v49  ;;  %v7157_v28 = vsel %vm1336_vm1, %v7154_v37, %v7156_v35 }
 0x531   : > { %v6571_v19 = vpop.f32.mrb[159].mxu1  ;;  %v6862_v8 = vadd.f32 %v6569_v47, %v10803_v10  ;;  %7403 = vst [vmem:[%s10875_s30 + $0x80] sm:$0xff] %v7371_v62  ;;  %7404 = vst [vmem:[%s10875_s30 + $0x88] sm:$0xff] %v7372_v1  ;;  %v7277_v29 = vadd.f32 %v10854_v26, %v7238_v25  ;;  %v7239_v13 = vadd.f32 %v7157_v28, %v10907_v3 }
 0x532   : > { %v6980_v23 = vsel %vm1143_vm0, %v6977_v31, %v6979_v27  ;;  %v7279_v48 = vadd.f32 %v10854_v26, %v7240_v61  ;;  %v8253_v38 = vpop.f32.mrb[160].mxu0  ;;  %v6981_v46 = vrot.slane %v6571_v19, 1 }
 0x533   : > { %v10993_v52 = vadd.f32 %v6980_v23, %v6861_v57  ;;  %v7341_v49 = vadd.f32 %v7309_v41, %v7277_v29  ;;  %v7278_v16 = vadd.f32 %v10854_v26, %v7239_v13  ;;  %v6773_v59 = vpop.f32.mrb[161].mxu0  ;;  %v7164_v10 = vrot.slane %v8253_v38, 2 }
 0x534   : > { %v7343_v63 = vadd.f32 %v7311_v33, %v7279_v48  ;;  %v7161_v5 = vrot.slane %v6773_v59, 2  ;;  %v8254_v18 = vpop.f32.mrb[162].mxu0 }
 0x535   : > { %v7373_v20 = vmax.f32 %v7341_v49, 0.0  ;;  %v7342_v57 = vadd.f32 %v7310_v14, %v7278_v16  ;;  %v7166_v54 = vrot.slane %v8254_v18, 2  ;;  %v6776_v2 = vpop.f32.mrb[163].mxu0 }
 0x536   : > { %v6575_v4 = vpop.f32.mrb[160].mxu1  ;;  %v7375_v56 = vmax.f32 %v7343_v63, 0.0  ;;  %v7162_v32 = vsel %vm1336_vm1, %v7159_v17, %v7161_v5  ;;  %v7163_v36 = vrot.slane %v6776_v2, 2  ;;  %v7316_v5 = vld [vmem:[%s8922_s6 + $0xc8] sm:$0xff] }
 0x537   : > { %v6863_v3 = vadd.f32 %v6575_v4, %v10810_v40  ;;  %v6577_v31 = vpop.f32.mrb[161].mxu1  ;;  %7405 = vst [vmem:[%s10875_s30 + $0x90] sm:$0xff] %v7373_v20  ;;  %v7374_v51 = vmax.f32 %v7342_v57, 0.0  ;;  %v7241_v24 = vadd.f32 %v7162_v32, %v10937_v60  ;;  %v7167_v42 = vsel %vm1336_vm1, %v7164_v10, %v7166_v54  ;;  %v7312_v40 = vld [vmem:[%s8922_s6 + $0xa8] sm:$0xff] }
 0x538   : > { %v6982_v22 = vrot.slane %v6577_v31, 1  ;;  %v6579_v53 = vpop.f32.mrb[162].mxu1  ;;  %7407 = vst [vmem:[%s10875_s30 + $0xa0] sm:$0xff] %v7375_v56  ;;  %v7243_v37 = vadd.f32 %v7167_v42, %v10963_v43  ;;  %v7165_v21 = vsel %vm1336_vm1, %v7163_v36, %v7164_v10  ;;  %v7315_v10 = vld [vmem:[%s8922_s6 + $0xc0] sm:$0xff] }
 0x539   : > { %v6580_v55 = vpop.f32.mrb[163].mxu1  ;;  %7406 = vst [vmem:[%s10875_s30 + $0x98] sm:$0xff] %v7374_v51  ;;  %v7280_v45 = vadd.f32 %v10854_v26, %v7241_v24  ;;  %v7242_v58 = vadd.f32 %v7165_v21, %v10956_v34 }
 0x53a   : > { %v6983_v50 = vsel %vm1143_vm0, %v6981_v46, %v6982_v22  ;;  %v6984_v0 = vrot.slane %v6580_v55, 1  ;;  %v7282_v60 = vadd.f32 %v10854_v26, %v7243_v37  ;;  %v8257_v27 = vpop.f32.mrb[164].mxu0 }
 0x53b   : > { %v7054_v17 = vadd.f32 %v6983_v50, %v6862_v8  ;;  %v7344_v35 = vadd.f32 %v7312_v40, %v7280_v45  ;;  %v7281_v43 = vadd.f32 %v10854_v26, %v7242_v58  ;;  %v6789_v62 = vpop.f32.mrb[165].mxu0  ;;  %v7171_v8 = vrot.slane %v8257_v27, 2  ;;  %v7317_v45 = vld [vmem:[%s8922_s6 + $0xd0] sm:$0xff]  ;;  %v7319_v27 = vld [vmem:[%s8922_s6 + $0xe0] sm:$0xff] }
 0x53c   : > { %v6985_v12 = vsel %vm1143_vm0, %v6982_v22, %v6984_v0  ;;  %v7346_v1 = vadd.f32 %v7314_v11, %v7282_v60  ;;  %v8258_v6 = vpop.f32.mrb[166].mxu0  ;;  %v7168_v29 = vrot.slane %v6789_v62, 2  ;;  %v7318_v62 = vld [vmem:[%s8922_s6 + $0xd8] sm:$0xff] }
 0x53d   : > { %v11017_v47 = vadd.f32 %v6985_v12, %v6863_v3  ;;  %v7376_v19 = vmax.f32 %v7344_v35, 0.0  ;;  %v7345_v41 = vadd.f32 %v7313_v9, %v7281_v43  ;;  %v6792_v23 = vpop.f32.mrb[167].mxu0  ;;  %v7173_v54 = vrot.slane %v8258_v6, 2 }
 0x53e   : > { %v6584_v25 = vpop.f32.mrb[164].mxu1  ;;  %v7378_v28 = vmax.f32 %v7346_v1, 0.0  ;;  %v7169_v33 = vrot.slane %v6792_v23, 2 }
 0x53f   : > { %v6864_v34 = vadd.f32 %v6584_v25, %v10820_v39  ;;  %v6586_v61 = vpop.f32.mrb[165].mxu1  ;;  %7408 = vst [vmem:[%s10875_s30 + $0xa8] sm:$0xff] %v7376_v19  ;;  %v7377_v48 = vmax.f32 %v7345_v41, 0.0 }
 0x540   : > { %v6588_v13 = vpop.f32.mrb[166].mxu1  ;;  %7410 = vst [vmem:[%s10875_s30 + $0xb8] sm:$0xff] %v7378_v28  ;;  %v6986_v49 = vrot.slane %v6586_v61, 1  ;;  %v7170_v16 = vsel %vm1336_vm1, %v7168_v29, %v7169_v33  ;;  %v7172_v39 = vsel %vm1336_vm1, %v7169_v33, %v7171_v8 }
 0x541   : > { %v6865_v14 = vadd.f32 %v6588_v13, %v10829_v44  ;;  %v6590_v38 = vpop.f32.mrb[167].mxu1  ;;  %7409 = vst [vmem:[%s10875_s30 + $0xb0] sm:$0xff] %v7377_v48  ;;  %v7244_v63 = vadd.f32 %v7170_v16, %v10979_v15  ;;  %v7245_v46 = vadd.f32 %v7172_v39, %v10993_v52 }
 0x542   : > { %v6987_v59 = vrot.slane %v6590_v38, 1  ;;  %v8261_v18 = vpop.f32.mrb[168].mxu0 }
 0x543   : > { %v7283_v44 = vadd.f32 %v10854_v26, %v7244_v63  ;;  %v7284_v20 = vadd.f32 %v10854_v26, %v7245_v46  ;;  %v6805_v3 = vpop.f32.mrb[169].mxu0  ;;  %v7178_v22 = vrot.slane %v8261_v18, 2 }
 0x544   : > { %v6988_v4 = vsel %vm1143_vm0, %v6986_v49, %v6987_v59  ;;  %v7174_v31 = vrot.slane %v6805_v3, 2  ;;  %v8262_v56 = vpop.f32.mrb[170].mxu0 }
 0x545   : > { %v7056_v57 = vadd.f32 %v6988_v4, %v6864_v34  ;;  %v7347_v32 = vadd.f32 %v7315_v10, %v7283_v44  ;;  %v7348_v15 = vadd.f32 %v7316_v5, %v7284_v20  ;;  %v7179_v52 = vrot.slane %v8262_v56, 2  ;;  %v6808_v53 = vpop.f32.mrb[171].mxu0 }
 0x546   : > { %v6594_v2 = vpop.f32.mrb[168].mxu1  ;;  %v7175_v51 = vsel %vm1336_vm1, %v7173_v54, %v7174_v31  ;;  %v7176_v42 = vrot.slane %v6808_v53, 2 }
 0x547   : > { %v6595_v36 = vpop.f32.mrb[169].mxu1  ;;  %v7379_v40 = vmax.f32 %v7347_v32, 0.0  ;;  %v7380_v37 = vmax.f32 %v7348_v15, 0.0  ;;  %v7246_v50 = vadd.f32 %v7175_v51, %v7054_v17  ;;  %v7180_v21 = vsel %vm1336_vm1, %v7178_v22, %v7179_v52  ;;  %v7321_v2 = vld [vmem:[%s8922_s6 + $0xf0] sm:$0xff]  ;;  %v7322_v22 = vld [vmem:[%s8922_s6 + $0xf8] sm:$0xff] }
 0x548   : > { %v6989_v24 = vrot.slane %v6595_v36, 1  ;;  %v6597_v55 = vpop.f32.mrb[170].mxu1  ;;  %v7248_v11 = vadd.f32 %v7180_v21, %v7056_v57  ;;  %v7177_v60 = vsel %vm1336_vm1, %v7174_v31, %v7176_v42 }
 0x549   : > { %v6599_v0 = vpop.f32.mrb[171].mxu1  ;;  %v6866_v9 = vadd.f32 %v6597_v55, %v10839_v7  ;;  %7411 = vst [vmem:[%s10875_s30 + $0xc0] sm:$0xff] %v7379_v40  ;;  %7412 = vst [vmem:[%s10875_s30 + $0xc8] sm:$0xff] %v7380_v37  ;;  %v7285_v12 = vadd.f32 %v10854_v26, %v7246_v50  ;;  %v7247_v43 = vadd.f32 %v7177_v60, %v11017_v47 }
 0x54a   : > { %v6990_v58 = vsel %vm1143_vm0, %v6987_v59, %v6989_v24  ;;  %v7287_v17 = vadd.f32 %v10854_v26, %v7248_v11  ;;  %v8265_v1 = vpop.f32.mrb[172].mxu0  ;;  %v6991_v7 = vrot.slane %v6599_v0, 1 }
 0x54b   : > { %v7057_v35 = vadd.f32 %v6990_v58, %v6865_v14  ;;  %v7349_v25 = vadd.f32 %v7317_v45, %v7285_v12  ;;  %v7286_v6 = vadd.f32 %v10854_v26, %v7247_v43  ;;  %v7184_v19 = vrot.slane %v8265_v1, 2  ;;  %v6821_v41 = vpop.f32.mrb[173].mxu0 }
 0x54c   : > { %v7351_v34 = vadd.f32 %v7319_v27, %v7287_v17  ;;  %v7181_v61 = vrot.slane %v6821_v41, 2  ;;  %v8266_v28 = vpop.f32.mrb[174].mxu0 }
 0x54d   : > { %v7381_v8 = vmax.f32 %v7349_v25, 0.0  ;;  %v7350_v29 = vadd.f32 %v7318_v62, %v7286_v6  ;;  %v7186_v13 = vrot.slane %v8266_v28, 2  ;;  %v6824_v48 = vpop.f32.mrb[175].mxu0 }
 0x54e   : > { %v6603_v23 = vpop.f32.mrb[172].mxu1  ;;  %v7383_v14 = vmax.f32 %v7351_v34, 0.0  ;;  %v7182_v38 = vsel %vm1336_vm1, %v7179_v52, %v7181_v61  ;;  %v7183_v39 = vrot.slane %v6824_v48, 2 }
 0x54f   : > { %v6867_v47 = vadd.f32 %v6603_v23, %v10845_v30  ;;  %v6605_v33 = vpop.f32.mrb[173].mxu1  ;;  %7413 = vst [vmem:[%s10875_s30 + $0xd0] sm:$0xff] %v7381_v8  ;;  %v7382_v59 = vmax.f32 %v7350_v29, 0.0  ;;  %v7249_v63 = vadd.f32 %v7182_v38, %v7057_v35  ;;  %v7187_v46 = vsel %vm1336_vm1, %v7184_v19, %v7186_v13  ;;  %v7320_v30 = vld [vmem:[%s8922_s6 + $0xe8] sm:$0xff]  ;;  %s8634_s6 = sshll.u32 %s8711_s22, 4  ;;  %s8635_s6 = int_to_ptr.vmem [resolvable:$false] %s8634_s6 }
 0x550   : > { %v6992_v49 = vrot.slane %v6605_v33, 1  ;;  %v6607_v16 = vpop.f32.mrb[174].mxu1  ;;  %7415 = vst [vmem:[%s10875_s30 + $0xe0] sm:$0xff] %v7383_v14  ;;  %v7185_v18 = vsel %vm1336_vm1, %v7183_v39, %v7184_v19  ;;  %s8636_s24 = scalar_lea.vmem %s8635_s6, 8192  ;;  %p8637_p7 = scmp.lt.s32.totalorder %s11070_s16, %s8635_s6 }
 0x551   : > { %v6608_v10 = vpop.f32.mrb[175].mxu1  ;;  %7414 = vst [vmem:[%s10875_s30 + $0xd8] sm:$0xff] %v7382_v59  ;;  %v7288_v44 = vadd.f32 %v10854_v26, %v7249_v63  ;;  %p8638_p9 = scmp.lt.s32.totalorder %s8636_s24, %s8630_s7 }
 0x552   : > { %v6993_v5 = vsel %vm1143_vm0, %v6991_v7, %v6992_v49  ;;  %v6994_v4 = vrot.slane %v6608_v10, 1 }
 0x553   : > { %v7058_v20 = vadd.f32 %v6993_v5, %v6866_v9  ;;  %v7352_v3 = vadd.f32 %v7320_v30, %v7288_v44  ;;  %p8639_p12 = por %p8638_p9, %p8637_p7 }
 0x554   : > { %v6995_v57 = vsel %vm1143_vm0, %v6992_v49, %v6994_v4 }
 0x555   : > { %v7059_v54 = vadd.f32 %v6995_v57, %v6867_v47  ;;  %v7250_v31 = vadd.f32 %v7185_v18, %v7058_v20  ;;  %v7384_v56 = vmax.f32 %v7352_v3, 0.0  ;;  %p8640_p2 = pnand %p8639_p12, %p8633_p3 }
 0x557   : > { %v7251_v32 = vadd.f32 %v7187_v46, %v7059_v54  ;;  %v7289_v15 = vadd.f32 %v10854_v26, %v7250_v31  ;;  %7416 = vst [vmem:[%s10875_s30 + $0xe8] sm:$0xff] %v7384_v56 }
 0x559   : > { %v7290_v52 = vadd.f32 %v10854_v26, %v7251_v32  ;;  %v7353_v36 = vadd.f32 %v7321_v2, %v7289_v15 }
 0x55b   : > { %v7354_v53 = vadd.f32 %v7322_v22, %v7290_v52  ;;  %v7385_v51 = vmax.f32 %v7353_v36, 0.0 }
 0x55d   : > { %v7386_v24 = vmax.f32 %v7354_v53, 0.0  ;;  %7417 = vst [vmem:[%s10875_s30 + $0xf0] sm:$0xff] %v7385_v51 }
 0x55f   : > { %7418 = vst [vmem:[%s10875_s30 + $0xf8] sm:$0xff] %v7386_v24 }
 0x560   : > { %8643 = shalt.err (!%p8640_p2)
}
 0x561   : > { %s8644_s26 = scalar_lea.hbm %s11068_s13, 4096  ;;  %s8648_s11 = scalar_lea.hbm %s11121_s5, 8192 }
 0x562   : > { %p8645_p13 = scmp.ne.s32.totalorder %s11068_s13, %s8644_s26  ;;  %p8649_p4 = scmp.lt.u32.totalorder %s11068_s13, %s11121_s5 }
 0x563   : > { %p8650_p5 = scmp.lt.u32.totalorder %s8648_s11, %s8644_s26  ;;  %p8652_p11 = scmp.lt.u32.totalorder %s8644_s26, %s11068_s13 }
 0x564   : > { %p8646_p6 = pnand %p8645_p13, %p11190_p0 }
 0x565   : > { %p8651_p8 = por %p8650_p5, %p8649_p4 }
 0x566   : > { %p8647_p10 = pneg %p8646_p6 }
 0x567   : > { %p8653_p1 = por %p8652_p11, %p8651_p8 }
 0x569   : > { %p8654_p3 = pnand %p8653_p1, %p8647_p10 }
 0x56b   : > { %8657 = shalt.err (!%p8654_p3)
}
 0x56c   : > { %s8712_s15 = smov 128   ;;  %s8713_s9 = smov 8  }
 0x56d   : > { %8277 = dma.vmem_to_hbm [thread:$0]  (%p11190_p0), %s11070_s16, 4096, %s11068_s13, %s7420_s17, %s8712_s15, %s8712_s15, %s8713_s9  }
 0x56e PF: > { %s7448_s12 = sand.u32 1, %s8688_s18   ;;  %p11191_p7 = scmp.ne.s32.totalorder %s11139_s25, 0 }
 0x56f   : > { %p11192_p9 = scmp.ge.s32.totalorder %s8700_s21, 2  ;;  %s7449_s7 = scalar_lea.sflag [#allocation6], %s7448_s12 }
 0x571   : > { %p8291_p12 = pnand %p11192_p9, %p11191_p7 }
 0x573   : > { %8683 = dma.done.wait (!%p8291_p12), %s7449_s7, 4096  }
 0x574   : > { %8685 = vsyncadd (!%p8291_p12), %s7449_s7, 4294963200  ;;  %p19_p2 = scmp.ge.s32.totalorder %s8854_s14, 4   ;;  %s11193_s18 = smov %s8692_s19 }
 0x575   : > { %s11194_s19 = smov %s8696_s20  ;;  %s11195_s20 = smov %s8870_s27 }
 0x576   : > { %s11196_s21 = smov %s8854_s14  ;;  %21 = sbr.rel (!%p19_p2) target bundleno = 6 (0x6), region = 103 }
 0x57d   :  { %7454 = vsyncpa [#allocation5], 1 }
 0x57e   :  { %7456 = vsyncpa [#allocation5 + $0x1], 1 }
 0x57f   :  { %7457 = vsyncpa [#allocation8], 1 }
 0x580   :  { %7458 = vsyncpa [#allocation6], 1 }
 0x581   :  { %7460 = vsyncpa [#allocation6 + $0x1], 1 }

</bundles_post_ra>
